<compile_context>
chip_gen: v6e
topology: v6e:2x2x1
jax: 0.10.0
libtpu: 0.0.40
codegen_flags: <defaults>
</compile_context>

<pallas_src>
import numpy as np

import jax
import jax.numpy as jnp
from jax import lax
from jax.experimental import pallas as pl
from jax.experimental.pallas import tpu as pltpu


# ---------------------------------------------------------------------------
# Fused Pallas kernel: the whole LeNet forward pass in one launch.
# ---------------------------------------------------------------------------
def _lenet_kernel(x_ref, l1_ref, s1_ref, b1_ref, l2_ref, s2_ref, b2_ref,
                  w1_ref, bf1_ref, w2_ref, bf2_ref, w3_ref, bf3_ref, out_ref):
    f32 = jnp.float32

    def mm(a, b):  # plain (M,K)@(K,N) MXU matmul, f32 accumulation
        return lax.dot_general(a, b, (((1,), (0,)), ((), ())),
                               preferred_element_type=f32)

    def conv_relu_pool(x, l_ref, s_ref, bias_ref):
        # x: (Cin*H, bb*W), rows=(c,h), lanes=(b,w).  For pool parities (p,q):
        #   A[p,q] = L_cat[p] @ concat_kw(x @ S[kw,q])
        # equals conv(x) sampled at (2t+p, 2u+q); bias + ReLU + max over the
        # four parities == MaxPool2d(2,2)(relu(conv(x) + bias)).
        kk = s_ref.shape[0]                      # kernel width (5)
        bias = bias_ref[...]                     # (Cout*Hp_rows, 1)
        pooled = None
        for q in range(2):
            # X@S first (small K), then stack the kk shifted copies on the
            # sublane axis (all pieces 8-row aligned) so L_cat runs as a
            # single wide-K (K = 5*Cin*H = 480) matmul per parity.
            r_cat = jnp.concatenate(
                [mm(x, s_ref[kw, q].astype(f32)) for kw in range(kk)], axis=0)
            for p in range(2):
                act = jnp.maximum(mm(l_ref[p].astype(f32), r_cat) + bias, 0.0)
                pooled = act if pooled is None else jnp.maximum(pooled, act)
        return pooled                            # (Cout*Hp_rows, bb*Wp)

    x = x_ref[0]                                         # (3*32, bb*32)
    x2 = conv_relu_pool(x, l1_ref, s1_ref, b1_ref)       # (6*16, bb*14)
    p2 = conv_relu_pool(x2, l2_ref, s2_ref, b2_ref)      # (16*5, bb*5)

    bb = out_ref.shape[1]
    wp2 = p2.shape[1] // bb
    # p2 lanes are ordered (u, b); stacking the wp2 contiguous lane groups on
    # the sublane axis gives (400, bb) with rows ordered (u, o, t).  fc1's
    # weight columns were permuted (and pre-transposed) on the host to the same
    # order, so fc1 is a single K=400 matmul with a lane-dense (bb,120) output.
    q_cat = jnp.concatenate(
        [p2[:, u * bb:(u + 1) * bb] for u in range(wp2)], axis=0)
    h1 = lax.dot_general(q_cat, w1_ref[...].astype(f32),
                         (((0,), (0,)), ((), ())),       # contract the 400 axis
                         preferred_element_type=f32)
    h1 = jnp.maximum(h1 + bf1_ref[...], 0.0)                               # (bb, 120)
    h2 = jnp.maximum(mm(h1, w2_ref[...].astype(f32)) + bf2_ref[...], 0.0)  # (bb, 84)
    out_ref[0] = mm(h2, w3_ref[...].astype(f32)) + bf3_ref[...]            # (bb, 10)


def _const_index_map(ndim):
    def index_map(i):
        return (0,) * ndim
    return index_map


def net_forward(x, prep):
    """Fused forward pass.  x: (B, 3, 32, 32) NCHW, prep: prepare_params(...)."""
    B, C, H, W = x.shape
    assert (C, H, W) == (3, 32, 32)
    bb = prep["s1"].shape[2] // W           # images per batch block (static)
    assert B % bb == 0
    nb = B // bb
    # Per batch block: rows = (channel, row), lanes = (local batch, col).
    xp = (x.reshape(nb, bb, C, H, W)
           .transpose(0, 2, 3, 1, 4)
           .reshape(nb, C * H, bb * W))

    w_names = ["l1", "s1", "b1", "l2", "s2", "b2",
               "w1", "bf1", "w2", "bf2", "w3", "bf3"]
    weights = [prep[k] for k in w_names]

    out = pl.pallas_call(
        _lenet_kernel,
        out_shape=jax.ShapeDtypeStruct((nb, bb, 10), jnp.float32),
        grid=(nb,),
        in_specs=([pl.BlockSpec((1, C * H, bb * W), lambda i: (i, 0, 0))] +
                  [pl.BlockSpec(w.shape, _const_index_map(w.ndim))
                   for w in weights]),
        out_specs=pl.BlockSpec((1, bb, 10), lambda i: (i, 0, 0)),
        compiler_params=pltpu.CompilerParams(
            dimension_semantics=("parallel",)),
    )(xp, *weights)
    return out.reshape(B, 10)


# ---------------------------------------------------------------------------
# One-time host-side lowering of the PyTorch-layout weights.
# ---------------------------------------------------------------------------
def _lower_conv_pool(w, b, *, h_valid, h_rows, w_in, hp_rows, bb, out_col_order):
    """Lower Conv2d(k, stride=1, pad=0) + ReLU + MaxPool2d(2,2) to matmuls.

    Activation layout: rows = (channel, row) with h_rows rows/channel (rows
    >= h_valid are zero padding), lanes = (local batch, column).

    Returns:
      L:    (2, cout*hp_rows, k*cin*h_rows)  wide-K left factors (per parity p)
      S:    (k, 2, bb*w_in, bb*wp)           0/1 right selection factors
                                             (block-diagonal over local batch)
      bias: (cout*hp_rows, 1)                per-row bias (0 on padding rows)
    """
    cout, cin, k, _ = w.shape
    ho, wo = h_valid - k + 1, w_in - k + 1
    assert ho % 2 == 0 and wo % 2 == 0
    hp, wp = ho // 2, wo // 2
    assert hp <= hp_rows

    L = np.zeros((2, cout * hp_rows, k * cin * h_rows), np.float32)
    for p in range(2):
        for o in range(cout):
            for t in range(hp):
                row = o * hp_rows + t
                for kw in range(k):
                    for c in range(cin):
                        for kh in range(k):
                            col = kw * cin * h_rows + c * h_rows + 2 * t + p + kh
                            L[p, row, col] = w[o, c, kh, kw]

    S = np.zeros((k, 2, bb * w_in, bb * wp), np.float32)
    for kw in range(k):
        for q in range(2):
            for bl in range(bb):
                for u in range(wp):
                    r = bl * w_in + 2 * u + q + kw
                    c = bl * wp + u if out_col_order == "bu" else u * bb + bl
                    S[kw, q, r, c] = 1.0

    bias = np.zeros((cout * hp_rows, 1), np.float32)
    for o in range(cout):
        bias[o * hp_rows:o * hp_rows + hp, 0] = b[o]
    return L, S, bias, hp, wp


def prepare_params(params, batch_block, weight_dtype=jnp.bfloat16):
    """One-time host-side weight preparation for the fused kernel.

    batch_block : images packed together on the lane axis per grid step
                  (batch_block*32 <= 128 keeps conv1 within one vreg row).
    weight_dtype: HBM storage dtype of the prepared matrices (bf16 halves the
                  dominant weight-DMA cost; matmuls still accumulate in f32).
    """
    w1 = np.asarray(params["conv1_w"], np.float32)
    b1 = np.asarray(params["conv1_b"], np.float32)
    w2 = np.asarray(params["conv2_w"], np.float32)
    b2 = np.asarray(params["conv2_b"], np.float32)
    f1w = np.asarray(params["fc1_w"], np.float32)
    f1b = np.asarray(params["fc1_b"], np.float32)
    f2w = np.asarray(params["fc2_w"], np.float32)
    f2b = np.asarray(params["fc2_b"], np.float32)
    f3w = np.asarray(params["fc3_w"], np.float32)
    f3b = np.asarray(params["fc3_b"], np.float32)
    bb = batch_block

    # conv1: 32x32 -> 28x28 -> pool 14x14.  The 14 pooled rows/channel are
    # stored in 16 rows (rows 14,15 exact zeros) so conv2's per-(kw,c) row
    # blocks stay 8-sublane aligned for the in-kernel concatenate.
    # Output lane order (b, u) == conv2's (b, w) input layout.
    l1, s1, bias1, hp1, wp1 = _lower_conv_pool(
        w1, b1, h_valid=32, h_rows=32, w_in=32, hp_rows=16, bb=bb,
        out_col_order="bu")
    # conv2: 14x14 (stored as 16 rows/channel) -> 10x10 -> pool 5x5.
    # Output lane order (u, b): per-u lane groups are contiguous for fc1.
    l2, s2, bias2, hp2, wp2 = _lower_conv_pool(
        w2, b2, h_valid=hp1, h_rows=16, w_in=wp1, hp_rows=5, bb=bb,
        out_col_order="ub")

    # fc1: PyTorch flatten order is f = o*25 + t*5 + u; the kernel stacks the
    # conv2 output as rows (u, o, t), so permute fc1's columns on the host and
    # store it pre-transposed as (400, 120).
    cout2 = w2.shape[0]
    w1p = (f1w.reshape(-1, cout2, hp2, wp2)
              .transpose(3, 1, 2, 0)
              .reshape(cout2 * hp2 * wp2, -1))

    wd = weight_dtype
    prep = dict(
        l1=jnp.asarray(l1, wd), s1=jnp.asarray(s1, wd), b1=jnp.asarray(bias1),
        l2=jnp.asarray(l2, wd), s2=jnp.asarray(s2, wd), b2=jnp.asarray(bias2),
        w1=jnp.asarray(w1p, wd), bf1=jnp.asarray(f1b[None, :]),
        w2=jnp.asarray(f2w.T, wd), bf2=jnp.asarray(f2b[None, :]),
        w3=jnp.asarray(f3w.T, wd), bf3=jnp.asarray(f3b[None, :]),
    )
    return prep


# ---------------------------------------------------------------------------
# Reference (plain JAX) and parameter init (PyTorch-style).
# ---------------------------------------------------------------------------
def reference_forward(x, p):
    hi = lax.Precision.HIGHEST

    def conv(z, w, b):
        y = lax.conv_general_dilated(
            z, w, window_strides=(1, 1), padding="VALID",
            dimension_numbers=("NCHW", "OIHW", "NCHW"), precision=hi)
        return y + b[None, :, None, None]

    def pool(z):
        n, c, h, w = z.shape
        return z.reshape(n, c, h // 2, 2, w // 2, 2).max(axis=(3, 5))

    y = pool(jnp.maximum(conv(x, p["conv1_w"], p["conv1_b"]), 0.0))
    y = pool(jnp.maximum(conv(y, p["conv2_w"], p["conv2_b"]), 0.0))
    y = y.reshape(y.shape[0], -1)
    y = jnp.maximum(jnp.dot(y, p["fc1_w"].T, precision=hi) + p["fc1_b"], 0.0)
    y = jnp.maximum(jnp.dot(y, p["fc2_w"].T, precision=hi) + p["fc2_b"], 0.0)
    return jnp.dot(y, p["fc3_w"].T, precision=hi) + p["fc3_b"]


def init_params(key):
    """Deterministic init, PyTorch-style U(-1/sqrt(fan_in), +1/sqrt(fan_in))."""
    def u(k, shape, fan_in):
        bound = 1.0 / jnp.sqrt(jnp.asarray(fan_in, jnp.float32))
        return jax.random.uniform(k, shape, jnp.float32, -bound, bound)

    ks = jax.random.split(key, 10)
    return {
        "conv1_w": u(ks[0], (6, 3, 5, 5), 3 * 5 * 5),
        "conv1_b": u(ks[1], (6,), 3 * 5 * 5),
        "conv2_w": u(ks[2], (16, 6, 5, 5), 6 * 5 * 5),
        "conv2_b": u(ks[3], (16,), 6 * 5 * 5),
        "fc1_w": u(ks[4], (120, 400), 400),
        "fc1_b": u(ks[5], (120,), 400),
        "fc2_w": u(ks[6], (84, 120), 120),
        "fc2_b": u(ks[7], (84,), 120),
        "fc3_w": u(ks[8], (10, 84), 84),
        "fc3_b": u(ks[9], (10,), 84),
    }


if __name__ == "__main__":
    key = jax.random.PRNGKey(0)
    k_x, k_p = jax.random.split(key)
    B = 2
    # The forward pass implies 3x32x32 inputs (CIFAR-10); small batch of 2.
    x = jax.random.normal(k_x, (B, 3, 32, 32), dtype=jnp.float32)
    params = init_params(k_p)
    # batch_block=B: both images share one grid step with lanes=(b,w);
    # at larger batches use batch_block=4 (4*32=128 lanes) and the
    # ("parallel",) batch-block grid shards across v7x's two TensorCores
    # while the constant-index weight blocks stay VMEM-resident.
    prep = prepare_params(params, batch_block=B)

    out = jax.block_until_ready(jax.jit(net_forward)(x, prep))
    assert out.shape == (B, 10) and out.dtype == jnp.float32

    # Numerical check against a plain-JAX implementation of the PyTorch module.
    ref = jax.block_until_ready(jax.jit(reference_forward)(x, params))
    err = float(jnp.max(jnp.abs(out - ref)))
    assert err < 2e-2, f"mismatch vs reference: max abs err {err}"
    print("KERNEL_OK")
</pallas_src>

<mosaic_0001>
module attributes {stable_mosaic.version = 11 : i64} {
  func.func @_lenet_kernel(%arg0: i32, %arg1: memref<1x96x64xf32, #tpu.memory_space<vmem>>, %arg2: memref<2x96x480xbf16, #tpu.memory_space<vmem>>, %arg3: memref<5x2x64x28xbf16, #tpu.memory_space<vmem>>, %arg4: memref<96x1xf32, #tpu.memory_space<vmem>>, %arg5: memref<2x80x480xbf16, #tpu.memory_space<vmem>>, %arg6: memref<5x2x28x10xbf16, #tpu.memory_space<vmem>>, %arg7: memref<80x1xf32, #tpu.memory_space<vmem>>, %arg8: memref<400x120xbf16, #tpu.memory_space<vmem>>, %arg9: memref<1x120xf32, #tpu.memory_space<vmem>>, %arg10: memref<120x84xbf16, #tpu.memory_space<vmem>>, %arg11: memref<1x84xf32, #tpu.memory_space<vmem>>, %arg12: memref<84x10xbf16, #tpu.memory_space<vmem>>, %arg13: memref<1x10xf32, #tpu.memory_space<vmem>>, %arg14: memref<1x2x10xf32, #tpu.memory_space<vmem>>) attributes {dimension_semantics = [#tpu.dimension_semantics<parallel>], iteration_bounds = array<i64: 1>, scalar_prefetch = 0 : i64, scratch_operands = 0 : i64, tpu.core_type = #tpu.core_type<tc>, window_params = [{transform_indices = @transform_0, window_bounds = array<i64: 1, 96, 64>}, {pipeline_mode = #tpu.pipeline_mode<synchronous>, transform_indices = @transform_1, window_bounds = array<i64: 2, 96, 480>}, {pipeline_mode = #tpu.pipeline_mode<synchronous>, transform_indices = @transform_2, window_bounds = array<i64: 5, 2, 64, 28>}, {pipeline_mode = #tpu.pipeline_mode<synchronous>, transform_indices = @transform_3, window_bounds = array<i64: 96, 1>}, {pipeline_mode = #tpu.pipeline_mode<synchronous>, transform_indices = @transform_4, window_bounds = array<i64: 2, 80, 480>}, {pipeline_mode = #tpu.pipeline_mode<synchronous>, transform_indices = @transform_5, window_bounds = array<i64: 5, 2, 28, 10>}, {pipeline_mode = #tpu.pipeline_mode<synchronous>, transform_indices = @transform_6, window_bounds = array<i64: 80, 1>}, {pipeline_mode = #tpu.pipeline_mode<synchronous>, transform_indices = @transform_7, window_bounds = array<i64: 400, 120>}, {pipeline_mode = #tpu.pipeline_mode<synchronous>, transform_indices = @transform_8, window_bounds = array<i64: 1, 120>}, {pipeline_mode = #tpu.pipeline_mode<synchronous>, transform_indices = @transform_9, window_bounds = array<i64: 120, 84>}, {pipeline_mode = #tpu.pipeline_mode<synchronous>, transform_indices = @transform_10, window_bounds = array<i64: 1, 84>}, {pipeline_mode = #tpu.pipeline_mode<synchronous>, transform_indices = @transform_11, window_bounds = array<i64: 84, 10>}, {pipeline_mode = #tpu.pipeline_mode<synchronous>, transform_indices = @transform_12, window_bounds = array<i64: 1, 10>}, {transform_indices = @transform_13, window_bounds = array<i64: 1, 2, 10>}]} {
    %c0 = arith.constant 0 : index
    %c0_0 = arith.constant 0 : index
    %c0_1 = arith.constant 0 : index
    %0 = vector.load %arg1[%c0, %c0_0, %c0_1] : memref<1x96x64xf32, #tpu.memory_space<vmem>>, vector<1x96x64xf32>
    %1 = vector.shape_cast %0 : vector<1x96x64xf32> to vector<96x64xf32>
    %c0_2 = arith.constant 0 : index
    %c0_3 = arith.constant 0 : index
    %2 = vector.load %arg4[%c0_2, %c0_3] : memref<96x1xf32, #tpu.memory_space<vmem>>, vector<96x1xf32>
    %c0_4 = arith.constant 0 : index
    %c0_5 = arith.constant 0 : index
    %c0_6 = arith.constant 0 : index
    %c0_7 = arith.constant 0 : index
    %3 = vector.load %arg3[%c0_4, %c0_5, %c0_6, %c0_7] : memref<5x2x64x28xbf16, #tpu.memory_space<vmem>>, vector<1x1x64x28xbf16>
    %4 = vector.shape_cast %3 : vector<1x1x64x28xbf16> to vector<64x28xbf16>
    %5 = arith.extf %4 : vector<64x28xbf16> to vector<64x28xf32>
    %cst = arith.constant dense<0.000000e+00> : vector<96x28xf32>
    %6 = tpu.matmul %1, %5, %cst {dimension_numbers = #tpu.dot_dimension_numbers<[1], [0], [0], [1], [0, 0, 1, 1], [], []>} : vector<96x64xf32>, vector<64x28xf32>, vector<96x28xf32> -> vector<96x28xf32>
    %c1 = arith.constant 1 : index
    %c0_8 = arith.constant 0 : index
    %c0_9 = arith.constant 0 : index
    %c0_10 = arith.constant 0 : index
    %7 = vector.load %arg3[%c1, %c0_8, %c0_9, %c0_10] : memref<5x2x64x28xbf16, #tpu.memory_space<vmem>>, vector<1x1x64x28xbf16>
    %8 = vector.shape_cast %7 : vector<1x1x64x28xbf16> to vector<64x28xbf16>
    %9 = arith.extf %8 : vector<64x28xbf16> to vector<64x28xf32>
    %cst_11 = arith.constant dense<0.000000e+00> : vector<96x28xf32>
    %10 = tpu.matmul %1, %9, %cst_11 {dimension_numbers = #tpu.dot_dimension_numbers<[1], [0], [0], [1], [0, 0, 1, 1], [], []>} : vector<96x64xf32>, vector<64x28xf32>, vector<96x28xf32> -> vector<96x28xf32>
    %c2 = arith.constant 2 : index
    %c0_12 = arith.constant 0 : index
    %c0_13 = arith.constant 0 : index
    %c0_14 = arith.constant 0 : index
    %11 = vector.load %arg3[%c2, %c0_12, %c0_13, %c0_14] : memref<5x2x64x28xbf16, #tpu.memory_space<vmem>>, vector<1x1x64x28xbf16>
    %12 = vector.shape_cast %11 : vector<1x1x64x28xbf16> to vector<64x28xbf16>
    %13 = arith.extf %12 : vector<64x28xbf16> to vector<64x28xf32>
    %cst_15 = arith.constant dense<0.000000e+00> : vector<96x28xf32>
    %14 = tpu.matmul %1, %13, %cst_15 {dimension_numbers = #tpu.dot_dimension_numbers<[1], [0], [0], [1], [0, 0, 1, 1], [], []>} : vector<96x64xf32>, vector<64x28xf32>, vector<96x28xf32> -> vector<96x28xf32>
    %c3 = arith.constant 3 : index
    %c0_16 = arith.constant 0 : index
    %c0_17 = arith.constant 0 : index
    %c0_18 = arith.constant 0 : index
    %15 = vector.load %arg3[%c3, %c0_16, %c0_17, %c0_18] : memref<5x2x64x28xbf16, #tpu.memory_space<vmem>>, vector<1x1x64x28xbf16>
    %16 = vector.shape_cast %15 : vector<1x1x64x28xbf16> to vector<64x28xbf16>
    %17 = arith.extf %16 : vector<64x28xbf16> to vector<64x28xf32>
    %cst_19 = arith.constant dense<0.000000e+00> : vector<96x28xf32>
    %18 = tpu.matmul %1, %17, %cst_19 {dimension_numbers = #tpu.dot_dimension_numbers<[1], [0], [0], [1], [0, 0, 1, 1], [], []>} : vector<96x64xf32>, vector<64x28xf32>, vector<96x28xf32> -> vector<96x28xf32>
    %c4 = arith.constant 4 : index
    %c0_20 = arith.constant 0 : index
    %c0_21 = arith.constant 0 : index
    %c0_22 = arith.constant 0 : index
    %19 = vector.load %arg3[%c4, %c0_20, %c0_21, %c0_22] : memref<5x2x64x28xbf16, #tpu.memory_space<vmem>>, vector<1x1x64x28xbf16>
    %20 = vector.shape_cast %19 : vector<1x1x64x28xbf16> to vector<64x28xbf16>
    %21 = arith.extf %20 : vector<64x28xbf16> to vector<64x28xf32>
    %cst_23 = arith.constant dense<0.000000e+00> : vector<96x28xf32>
    %22 = tpu.matmul %1, %21, %cst_23 {dimension_numbers = #tpu.dot_dimension_numbers<[1], [0], [0], [1], [0, 0, 1, 1], [], []>} : vector<96x64xf32>, vector<64x28xf32>, vector<96x28xf32> -> vector<96x28xf32>
    %23 = tpu.concatenate %6, %10, %14, %18, %22 in 0 : vector<96x28xf32>, vector<96x28xf32>, vector<96x28xf32>, vector<96x28xf32>, vector<96x28xf32> -> vector<480x28xf32>
    %c0_24 = arith.constant 0 : index
    %c0_25 = arith.constant 0 : index
    %c0_26 = arith.constant 0 : index
    %24 = vector.load %arg2[%c0_24, %c0_25, %c0_26] : memref<2x96x480xbf16, #tpu.memory_space<vmem>>, vector<1x96x480xbf16>
    %25 = vector.shape_cast %24 : vector<1x96x480xbf16> to vector<96x480xbf16>
    %26 = arith.extf %25 : vector<96x480xbf16> to vector<96x480xf32>
    %cst_27 = arith.constant dense<0.000000e+00> : vector<96x28xf32>
    %27 = tpu.matmul %26, %23, %cst_27 {dimension_numbers = #tpu.dot_dimension_numbers<[1], [0], [0], [1], [0, 0, 1, 1], [], []>} : vector<96x480xf32>, vector<480x28xf32>, vector<96x28xf32> -> vector<96x28xf32>
    %28 = vector.broadcast %2 : vector<96x1xf32> to vector<96x28xf32>
    %29 = arith.addf %27, %28 : vector<96x28xf32>
    %cst_28 = arith.constant 0.000000e+00 : f32
    %30 = vector.broadcast %cst_28 : f32 to vector<96x28xf32>
    %31 = arith.maximumf %29, %30 : vector<96x28xf32>
    %c1_29 = arith.constant 1 : index
    %c0_30 = arith.constant 0 : index
    %c0_31 = arith.constant 0 : index
    %32 = vector.load %arg2[%c1_29, %c0_30, %c0_31] : memref<2x96x480xbf16, #tpu.memory_space<vmem>>, vector<1x96x480xbf16>
    %33 = vector.shape_cast %32 : vector<1x96x480xbf16> to vector<96x480xbf16>
    %34 = arith.extf %33 : vector<96x480xbf16> to vector<96x480xf32>
    %cst_32 = arith.constant dense<0.000000e+00> : vector<96x28xf32>
    %35 = tpu.matmul %34, %23, %cst_32 {dimension_numbers = #tpu.dot_dimension_numbers<[1], [0], [0], [1], [0, 0, 1, 1], [], []>} : vector<96x480xf32>, vector<480x28xf32>, vector<96x28xf32> -> vector<96x28xf32>
    %36 = vector.broadcast %2 : vector<96x1xf32> to vector<96x28xf32>
    %37 = arith.addf %35, %36 : vector<96x28xf32>
    %cst_33 = arith.constant 0.000000e+00 : f32
    %38 = vector.broadcast %cst_33 : f32 to vector<96x28xf32>
    %39 = arith.maximumf %37, %38 : vector<96x28xf32>
    %40 = arith.maximumf %31, %39 : vector<96x28xf32>
    %c0_34 = arith.constant 0 : index
    %c1_35 = arith.constant 1 : index
    %c0_36 = arith.constant 0 : index
    %c0_37 = arith.constant 0 : index
    %41 = vector.load %arg3[%c0_34, %c1_35, %c0_36, %c0_37] : memref<5x2x64x28xbf16, #tpu.memory_space<vmem>>, vector<1x1x64x28xbf16>
    %42 = vector.shape_cast %41 : vector<1x1x64x28xbf16> to vector<64x28xbf16>
    %43 = arith.extf %42 : vector<64x28xbf16> to vector<64x28xf32>
    %cst_38 = arith.constant dense<0.000000e+00> : vector<96x28xf32>
    %44 = tpu.matmul %1, %43, %cst_38 {dimension_numbers = #tpu.dot_dimension_numbers<[1], [0], [0], [1], [0, 0, 1, 1], [], []>} : vector<96x64xf32>, vector<64x28xf32>, vector<96x28xf32> -> vector<96x28xf32>
    %c1_39 = arith.constant 1 : index
    %c1_40 = arith.constant 1 : index
    %c0_41 = arith.constant 0 : index
    %c0_42 = arith.constant 0 : index
    %45 = vector.load %arg3[%c1_39, %c1_40, %c0_41, %c0_42] : memref<5x2x64x28xbf16, #tpu.memory_space<vmem>>, vector<1x1x64x28xbf16>
    %46 = vector.shape_cast %45 : vector<1x1x64x28xbf16> to vector<64x28xbf16>
    %47 = arith.extf %46 : vector<64x28xbf16> to vector<64x28xf32>
    %cst_43 = arith.constant dense<0.000000e+00> : vector<96x28xf32>
    %48 = tpu.matmul %1, %47, %cst_43 {dimension_numbers = #tpu.dot_dimension_numbers<[1], [0], [0], [1], [0, 0, 1, 1], [], []>} : vector<96x64xf32>, vector<64x28xf32>, vector<96x28xf32> -> vector<96x28xf32>
    %c2_44 = arith.constant 2 : index
    %c1_45 = arith.constant 1 : index
    %c0_46 = arith.constant 0 : index
    %c0_47 = arith.constant 0 : index
    %49 = vector.load %arg3[%c2_44, %c1_45, %c0_46, %c0_47] : memref<5x2x64x28xbf16, #tpu.memory_space<vmem>>, vector<1x1x64x28xbf16>
    %50 = vector.shape_cast %49 : vector<1x1x64x28xbf16> to vector<64x28xbf16>
    %51 = arith.extf %50 : vector<64x28xbf16> to vector<64x28xf32>
    %cst_48 = arith.constant dense<0.000000e+00> : vector<96x28xf32>
    %52 = tpu.matmul %1, %51, %cst_48 {dimension_numbers = #tpu.dot_dimension_numbers<[1], [0], [0], [1], [0, 0, 1, 1], [], []>} : vector<96x64xf32>, vector<64x28xf32>, vector<96x28xf32> -> vector<96x28xf32>
    %c3_49 = arith.constant 3 : index
    %c1_50 = arith.constant 1 : index
    %c0_51 = arith.constant 0 : index
    %c0_52 = arith.constant 0 : index
    %53 = vector.load %arg3[%c3_49, %c1_50, %c0_51, %c0_52] : memref<5x2x64x28xbf16, #tpu.memory_space<vmem>>, vector<1x1x64x28xbf16>
    %54 = vector.shape_cast %53 : vector<1x1x64x28xbf16> to vector<64x28xbf16>
    %55 = arith.extf %54 : vector<64x28xbf16> to vector<64x28xf32>
    %cst_53 = arith.constant dense<0.000000e+00> : vector<96x28xf32>
    %56 = tpu.matmul %1, %55, %cst_53 {dimension_numbers = #tpu.dot_dimension_numbers<[1], [0], [0], [1], [0, 0, 1, 1], [], []>} : vector<96x64xf32>, vector<64x28xf32>, vector<96x28xf32> -> vector<96x28xf32>
    %c4_54 = arith.constant 4 : index
    %c1_55 = arith.constant 1 : index
    %c0_56 = arith.constant 0 : index
    %c0_57 = arith.constant 0 : index
    %57 = vector.load %arg3[%c4_54, %c1_55, %c0_56, %c0_57] : memref<5x2x64x28xbf16, #tpu.memory_space<vmem>>, vector<1x1x64x28xbf16>
    %58 = vector.shape_cast %57 : vector<1x1x64x28xbf16> to vector<64x28xbf16>
    %59 = arith.extf %58 : vector<64x28xbf16> to vector<64x28xf32>
    %cst_58 = arith.constant dense<0.000000e+00> : vector<96x28xf32>
    %60 = tpu.matmul %1, %59, %cst_58 {dimension_numbers = #tpu.dot_dimension_numbers<[1], [0], [0], [1], [0, 0, 1, 1], [], []>} : vector<96x64xf32>, vector<64x28xf32>, vector<96x28xf32> -> vector<96x28xf32>
    %61 = tpu.concatenate %44, %48, %52, %56, %60 in 0 : vector<96x28xf32>, vector<96x28xf32>, vector<96x28xf32>, vector<96x28xf32>, vector<96x28xf32> -> vector<480x28xf32>
    %c0_59 = arith.constant 0 : index
    %c0_60 = arith.constant 0 : index
    %c0_61 = arith.constant 0 : index
    %62 = vector.load %arg2[%c0_59, %c0_60, %c0_61] : memref<2x96x480xbf16, #tpu.memory_space<vmem>>, vector<1x96x480xbf16>
    %63 = vector.shape_cast %62 : vector<1x96x480xbf16> to vector<96x480xbf16>
    %64 = arith.extf %63 : vector<96x480xbf16> to vector<96x480xf32>
    %cst_62 = arith.constant dense<0.000000e+00> : vector<96x28xf32>
    %65 = tpu.matmul %64, %61, %cst_62 {dimension_numbers = #tpu.dot_dimension_numbers<[1], [0], [0], [1], [0, 0, 1, 1], [], []>} : vector<96x480xf32>, vector<480x28xf32>, vector<96x28xf32> -> vector<96x28xf32>
    %66 = vector.broadcast %2 : vector<96x1xf32> to vector<96x28xf32>
    %67 = arith.addf %65, %66 : vector<96x28xf32>
    %cst_63 = arith.constant 0.000000e+00 : f32
    %68 = vector.broadcast %cst_63 : f32 to vector<96x28xf32>
    %69 = arith.maximumf %67, %68 : vector<96x28xf32>
    %70 = arith.maximumf %40, %69 : vector<96x28xf32>
    %c1_64 = arith.constant 1 : index
    %c0_65 = arith.constant 0 : index
    %c0_66 = arith.constant 0 : index
    %71 = vector.load %arg2[%c1_64, %c0_65, %c0_66] : memref<2x96x480xbf16, #tpu.memory_space<vmem>>, vector<1x96x480xbf16>
    %72 = vector.shape_cast %71 : vector<1x96x480xbf16> to vector<96x480xbf16>
    %73 = arith.extf %72 : vector<96x480xbf16> to vector<96x480xf32>
    %cst_67 = arith.constant dense<0.000000e+00> : vector<96x28xf32>
    %74 = tpu.matmul %73, %61, %cst_67 {dimension_numbers = #tpu.dot_dimension_numbers<[1], [0], [0], [1], [0, 0, 1, 1], [], []>} : vector<96x480xf32>, vector<480x28xf32>, vector<96x28xf32> -> vector<96x28xf32>
    %75 = vector.broadcast %2 : vector<96x1xf32> to vector<96x28xf32>
    %76 = arith.addf %74, %75 : vector<96x28xf32>
    %cst_68 = arith.constant 0.000000e+00 : f32
    %77 = vector.broadcast %cst_68 : f32 to vector<96x28xf32>
    %78 = arith.maximumf %76, %77 : vector<96x28xf32>
    %79 = arith.maximumf %70, %78 : vector<96x28xf32>
    %c0_69 = arith.constant 0 : index
    %c0_70 = arith.constant 0 : index
    %80 = vector.load %arg7[%c0_69, %c0_70] : memref<80x1xf32, #tpu.memory_space<vmem>>, vector<80x1xf32>
    %c0_71 = arith.constant 0 : index
    %c0_72 = arith.constant 0 : index
    %c0_73 = arith.constant 0 : index
    %c0_74 = arith.constant 0 : index
    %81 = vector.load %arg6[%c0_71, %c0_72, %c0_73, %c0_74] : memref<5x2x28x10xbf16, #tpu.memory_space<vmem>>, vector<1x1x28x10xbf16>
    %82 = vector.shape_cast %81 : vector<1x1x28x10xbf16> to vector<28x10xbf16>
    %83 = arith.extf %82 : vector<28x10xbf16> to vector<28x10xf32>
    %cst_75 = arith.constant dense<0.000000e+00> : vector<96x10xf32>
    %84 = tpu.matmul %79, %83, %cst_75 {dimension_numbers = #tpu.dot_dimension_numbers<[1], [0], [0], [1], [0, 0, 1, 1], [], []>} : vector<96x28xf32>, vector<28x10xf32>, vector<96x10xf32> -> vector<96x10xf32>
    %c1_76 = arith.constant 1 : index
    %c0_77 = arith.constant 0 : index
    %c0_78 = arith.constant 0 : index
    %c0_79 = arith.constant 0 : index
    %85 = vector.load %arg6[%c1_76, %c0_77, %c0_78, %c0_79] : memref<5x2x28x10xbf16, #tpu.memory_space<vmem>>, vector<1x1x28x10xbf16>
    %86 = vector.shape_cast %85 : vector<1x1x28x10xbf16> to vector<28x10xbf16>
    %87 = arith.extf %86 : vector<28x10xbf16> to vector<28x10xf32>
    %cst_80 = arith.constant dense<0.000000e+00> : vector<96x10xf32>
    %88 = tpu.matmul %79, %87, %cst_80 {dimension_numbers = #tpu.dot_dimension_numbers<[1], [0], [0], [1], [0, 0, 1, 1], [], []>} : vector<96x28xf32>, vector<28x10xf32>, vector<96x10xf32> -> vector<96x10xf32>
    %c2_81 = arith.constant 2 : index
    %c0_82 = arith.constant 0 : index
    %c0_83 = arith.constant 0 : index
    %c0_84 = arith.constant 0 : index
    %89 = vector.load %arg6[%c2_81, %c0_82, %c0_83, %c0_84] : memref<5x2x28x10xbf16, #tpu.memory_space<vmem>>, vector<1x1x28x10xbf16>
    %90 = vector.shape_cast %89 : vector<1x1x28x10xbf16> to vector<28x10xbf16>
    %91 = arith.extf %90 : vector<28x10xbf16> to vector<28x10xf32>
    %cst_85 = arith.constant dense<0.000000e+00> : vector<96x10xf32>
    %92 = tpu.matmul %79, %91, %cst_85 {dimension_numbers = #tpu.dot_dimension_numbers<[1], [0], [0], [1], [0, 0, 1, 1], [], []>} : vector<96x28xf32>, vector<28x10xf32>, vector<96x10xf32> -> vector<96x10xf32>
    %c3_86 = arith.constant 3 : index
    %c0_87 = arith.constant 0 : index
    %c0_88 = arith.constant 0 : index
    %c0_89 = arith.constant 0 : index
    %93 = vector.load %arg6[%c3_86, %c0_87, %c0_88, %c0_89] : memref<5x2x28x10xbf16, #tpu.memory_space<vmem>>, vector<1x1x28x10xbf16>
    %94 = vector.shape_cast %93 : vector<1x1x28x10xbf16> to vector<28x10xbf16>
    %95 = arith.extf %94 : vector<28x10xbf16> to vector<28x10xf32>
    %cst_90 = arith.constant dense<0.000000e+00> : vector<96x10xf32>
    %96 = tpu.matmul %79, %95, %cst_90 {dimension_numbers = #tpu.dot_dimension_numbers<[1], [0], [0], [1], [0, 0, 1, 1], [], []>} : vector<96x28xf32>, vector<28x10xf32>, vector<96x10xf32> -> vector<96x10xf32>
    %c4_91 = arith.constant 4 : index
    %c0_92 = arith.constant 0 : index
    %c0_93 = arith.constant 0 : index
    %c0_94 = arith.constant 0 : index
    %97 = vector.load %arg6[%c4_91, %c0_92, %c0_93, %c0_94] : memref<5x2x28x10xbf16, #tpu.memory_space<vmem>>, vector<1x1x28x10xbf16>
    %98 = vector.shape_cast %97 : vector<1x1x28x10xbf16> to vector<28x10xbf16>
    %99 = arith.extf %98 : vector<28x10xbf16> to vector<28x10xf32>
    %cst_95 = arith.constant dense<0.000000e+00> : vector<96x10xf32>
    %100 = tpu.matmul %79, %99, %cst_95 {dimension_numbers = #tpu.dot_dimension_numbers<[1], [0], [0], [1], [0, 0, 1, 1], [], []>} : vector<96x28xf32>, vector<28x10xf32>, vector<96x10xf32> -> vector<96x10xf32>
    %101 = tpu.concatenate %84, %88, %92, %96, %100 in 0 : vector<96x10xf32>, vector<96x10xf32>, vector<96x10xf32>, vector<96x10xf32>, vector<96x10xf32> -> vector<480x10xf32>
    %c0_96 = arith.constant 0 : index
    %c0_97 = arith.constant 0 : index
    %c0_98 = arith.constant 0 : index
    %102 = vector.load %arg5[%c0_96, %c0_97, %c0_98] : memref<2x80x480xbf16, #tpu.memory_space<vmem>>, vector<1x80x480xbf16>
    %103 = vector.shape_cast %102 : vector<1x80x480xbf16> to vector<80x480xbf16>
    %104 = arith.extf %103 : vector<80x480xbf16> to vector<80x480xf32>
    %cst_99 = arith.constant dense<0.000000e+00> : vector<80x10xf32>
    %105 = tpu.matmul %104, %101, %cst_99 {dimension_numbers = #tpu.dot_dimension_numbers<[1], [0], [0], [1], [0, 0, 1, 1], [], []>} : vector<80x480xf32>, vector<480x10xf32>, vector<80x10xf32> -> vector<80x10xf32>
    %106 = vector.broadcast %80 : vector<80x1xf32> to vector<80x10xf32>
    %107 = arith.addf %105, %106 : vector<80x10xf32>
    %cst_100 = arith.constant 0.000000e+00 : f32
    %108 = vector.broadcast %cst_100 : f32 to vector<80x10xf32>
    %109 = arith.maximumf %107, %108 : vector<80x10xf32>
    %c1_101 = arith.constant 1 : index
    %c0_102 = arith.constant 0 : index
    %c0_103 = arith.constant 0 : index
    %110 = vector.load %arg5[%c1_101, %c0_102, %c0_103] : memref<2x80x480xbf16, #tpu.memory_space<vmem>>, vector<1x80x480xbf16>
    %111 = vector.shape_cast %110 : vector<1x80x480xbf16> to vector<80x480xbf16>
    %112 = arith.extf %111 : vector<80x480xbf16> to vector<80x480xf32>
    %cst_104 = arith.constant dense<0.000000e+00> : vector<80x10xf32>
    %113 = tpu.matmul %112, %101, %cst_104 {dimension_numbers = #tpu.dot_dimension_numbers<[1], [0], [0], [1], [0, 0, 1, 1], [], []>} : vector<80x480xf32>, vector<480x10xf32>, vector<80x10xf32> -> vector<80x10xf32>
    %114 = vector.broadcast %80 : vector<80x1xf32> to vector<80x10xf32>
    %115 = arith.addf %113, %114 : vector<80x10xf32>
    %cst_105 = arith.constant 0.000000e+00 : f32
    %116 = vector.broadcast %cst_105 : f32 to vector<80x10xf32>
    %117 = arith.maximumf %115, %116 : vector<80x10xf32>
    %118 = arith.maximumf %109, %117 : vector<80x10xf32>
    %c0_106 = arith.constant 0 : index
    %c1_107 = arith.constant 1 : index
    %c0_108 = arith.constant 0 : index
    %c0_109 = arith.constant 0 : index
    %119 = vector.load %arg6[%c0_106, %c1_107, %c0_108, %c0_109] : memref<5x2x28x10xbf16, #tpu.memory_space<vmem>>, vector<1x1x28x10xbf16>
    %120 = vector.shape_cast %119 : vector<1x1x28x10xbf16> to vector<28x10xbf16>
    %121 = arith.extf %120 : vector<28x10xbf16> to vector<28x10xf32>
    %cst_110 = arith.constant dense<0.000000e+00> : vector<96x10xf32>
    %122 = tpu.matmul %79, %121, %cst_110 {dimension_numbers = #tpu.dot_dimension_numbers<[1], [0], [0], [1], [0, 0, 1, 1], [], []>} : vector<96x28xf32>, vector<28x10xf32>, vector<96x10xf32> -> vector<96x10xf32>
    %c1_111 = arith.constant 1 : index
    %c1_112 = arith.constant 1 : index
    %c0_113 = arith.constant 0 : index
    %c0_114 = arith.constant 0 : index
    %123 = vector.load %arg6[%c1_111, %c1_112, %c0_113, %c0_114] : memref<5x2x28x10xbf16, #tpu.memory_space<vmem>>, vector<1x1x28x10xbf16>
    %124 = vector.shape_cast %123 : vector<1x1x28x10xbf16> to vector<28x10xbf16>
    %125 = arith.extf %124 : vector<28x10xbf16> to vector<28x10xf32>
    %cst_115 = arith.constant dense<0.000000e+00> : vector<96x10xf32>
    %126 = tpu.matmul %79, %125, %cst_115 {dimension_numbers = #tpu.dot_dimension_numbers<[1], [0], [0], [1], [0, 0, 1, 1], [], []>} : vector<96x28xf32>, vector<28x10xf32>, vector<96x10xf32> -> vector<96x10xf32>
    %c2_116 = arith.constant 2 : index
    %c1_117 = arith.constant 1 : index
    %c0_118 = arith.constant 0 : index
    %c0_119 = arith.constant 0 : index
    %127 = vector.load %arg6[%c2_116, %c1_117, %c0_118, %c0_119] : memref<5x2x28x10xbf16, #tpu.memory_space<vmem>>, vector<1x1x28x10xbf16>
    %128 = vector.shape_cast %127 : vector<1x1x28x10xbf16> to vector<28x10xbf16>
    %129 = arith.extf %128 : vector<28x10xbf16> to vector<28x10xf32>
    %cst_120 = arith.constant dense<0.000000e+00> : vector<96x10xf32>
    %130 = tpu.matmul %79, %129, %cst_120 {dimension_numbers = #tpu.dot_dimension_numbers<[1], [0], [0], [1], [0, 0, 1, 1], [], []>} : vector<96x28xf32>, vector<28x10xf32>, vector<96x10xf32> -> vector<96x10xf32>
    %c3_121 = arith.constant 3 : index
    %c1_122 = arith.constant 1 : index
    %c0_123 = arith.constant 0 : index
    %c0_124 = arith.constant 0 : index
    %131 = vector.load %arg6[%c3_121, %c1_122, %c0_123, %c0_124] : memref<5x2x28x10xbf16, #tpu.memory_space<vmem>>, vector<1x1x28x10xbf16>
    %132 = vector.shape_cast %131 : vector<1x1x28x10xbf16> to vector<28x10xbf16>
    %133 = arith.extf %132 : vector<28x10xbf16> to vector<28x10xf32>
    %cst_125 = arith.constant dense<0.000000e+00> : vector<96x10xf32>
    %134 = tpu.matmul %79, %133, %cst_125 {dimension_numbers = #tpu.dot_dimension_numbers<[1], [0], [0], [1], [0, 0, 1, 1], [], []>} : vector<96x28xf32>, vector<28x10xf32>, vector<96x10xf32> -> vector<96x10xf32>
    %c4_126 = arith.constant 4 : index
    %c1_127 = arith.constant 1 : index
    %c0_128 = arith.constant 0 : index
    %c0_129 = arith.constant 0 : index
    %135 = vector.load %arg6[%c4_126, %c1_127, %c0_128, %c0_129] : memref<5x2x28x10xbf16, #tpu.memory_space<vmem>>, vector<1x1x28x10xbf16>
    %136 = vector.shape_cast %135 : vector<1x1x28x10xbf16> to vector<28x10xbf16>
    %137 = arith.extf %136 : vector<28x10xbf16> to vector<28x10xf32>
    %cst_130 = arith.constant dense<0.000000e+00> : vector<96x10xf32>
    %138 = tpu.matmul %79, %137, %cst_130 {dimension_numbers = #tpu.dot_dimension_numbers<[1], [0], [0], [1], [0, 0, 1, 1], [], []>} : vector<96x28xf32>, vector<28x10xf32>, vector<96x10xf32> -> vector<96x10xf32>
    %139 = tpu.concatenate %122, %126, %130, %134, %138 in 0 : vector<96x10xf32>, vector<96x10xf32>, vector<96x10xf32>, vector<96x10xf32>, vector<96x10xf32> -> vector<480x10xf32>
    %c0_131 = arith.constant 0 : index
    %c0_132 = arith.constant 0 : index
    %c0_133 = arith.constant 0 : index
    %140 = vector.load %arg5[%c0_131, %c0_132, %c0_133] : memref<2x80x480xbf16, #tpu.memory_space<vmem>>, vector<1x80x480xbf16>
    %141 = vector.shape_cast %140 : vector<1x80x480xbf16> to vector<80x480xbf16>
    %142 = arith.extf %141 : vector<80x480xbf16> to vector<80x480xf32>
    %cst_134 = arith.constant dense<0.000000e+00> : vector<80x10xf32>
    %143 = tpu.matmul %142, %139, %cst_134 {dimension_numbers = #tpu.dot_dimension_numbers<[1], [0], [0], [1], [0, 0, 1, 1], [], []>} : vector<80x480xf32>, vector<480x10xf32>, vector<80x10xf32> -> vector<80x10xf32>
    %144 = vector.broadcast %80 : vector<80x1xf32> to vector<80x10xf32>
    %145 = arith.addf %143, %144 : vector<80x10xf32>
    %cst_135 = arith.constant 0.000000e+00 : f32
    %146 = vector.broadcast %cst_135 : f32 to vector<80x10xf32>
    %147 = arith.maximumf %145, %146 : vector<80x10xf32>
    %148 = arith.maximumf %118, %147 : vector<80x10xf32>
    %c1_136 = arith.constant 1 : index
    %c0_137 = arith.constant 0 : index
    %c0_138 = arith.constant 0 : index
    %149 = vector.load %arg5[%c1_136, %c0_137, %c0_138] : memref<2x80x480xbf16, #tpu.memory_space<vmem>>, vector<1x80x480xbf16>
    %150 = vector.shape_cast %149 : vector<1x80x480xbf16> to vector<80x480xbf16>
    %151 = arith.extf %150 : vector<80x480xbf16> to vector<80x480xf32>
    %cst_139 = arith.constant dense<0.000000e+00> : vector<80x10xf32>
    %152 = tpu.matmul %151, %139, %cst_139 {dimension_numbers = #tpu.dot_dimension_numbers<[1], [0], [0], [1], [0, 0, 1, 1], [], []>} : vector<80x480xf32>, vector<480x10xf32>, vector<80x10xf32> -> vector<80x10xf32>
    %153 = vector.broadcast %80 : vector<80x1xf32> to vector<80x10xf32>
    %154 = arith.addf %152, %153 : vector<80x10xf32>
    %cst_140 = arith.constant 0.000000e+00 : f32
    %155 = vector.broadcast %cst_140 : f32 to vector<80x10xf32>
    %156 = arith.maximumf %154, %155 : vector<80x10xf32>
    %157 = arith.maximumf %148, %156 : vector<80x10xf32>
    %158 = vector.extract_strided_slice %157 {offsets = [0, 0], sizes = [80, 2], strides = [1, 1]} : vector<80x10xf32> to vector<80x2xf32>
    %159 = vector.extract_strided_slice %157 {offsets = [0, 2], sizes = [80, 2], strides = [1, 1]} : vector<80x10xf32> to vector<80x2xf32>
    %160 = vector.extract_strided_slice %157 {offsets = [0, 4], sizes = [80, 2], strides = [1, 1]} : vector<80x10xf32> to vector<80x2xf32>
    %161 = vector.extract_strided_slice %157 {offsets = [0, 6], sizes = [80, 2], strides = [1, 1]} : vector<80x10xf32> to vector<80x2xf32>
    %162 = vector.extract_strided_slice %157 {offsets = [0, 8], sizes = [80, 2], strides = [1, 1]} : vector<80x10xf32> to vector<80x2xf32>
    %163 = tpu.concatenate %158, %159, %160, %161, %162 in 0 : vector<80x2xf32>, vector<80x2xf32>, vector<80x2xf32>, vector<80x2xf32>, vector<80x2xf32> -> vector<400x2xf32>
    %c0_141 = arith.constant 0 : index
    %c0_142 = arith.constant 0 : index
    %164 = vector.load %arg8[%c0_141, %c0_142] : memref<400x120xbf16, #tpu.memory_space<vmem>>, vector<400x120xbf16>
    %165 = arith.extf %164 : vector<400x120xbf16> to vector<400x120xf32>
    %cst_143 = arith.constant dense<0.000000e+00> : vector<2x120xf32>
    %166 = tpu.matmul %163, %165, %cst_143 {dimension_numbers = #tpu.dot_dimension_numbers<[0], [0], [1], [1], [0, 1, 1, 1], [], []>} : vector<400x2xf32>, vector<400x120xf32>, vector<2x120xf32> -> vector<2x120xf32>
    %c0_144 = arith.constant 0 : index
    %c0_145 = arith.constant 0 : index
    %167 = vector.load %arg9[%c0_144, %c0_145] : memref<1x120xf32, #tpu.memory_space<vmem>>, vector<1x120xf32>
    %168 = vector.broadcast %167 : vector<1x120xf32> to vector<2x120xf32>
    %169 = arith.addf %166, %168 : vector<2x120xf32>
    %cst_146 = arith.constant 0.000000e+00 : f32
    %170 = vector.broadcast %cst_146 : f32 to vector<2x120xf32>
    %171 = arith.maximumf %169, %170 : vector<2x120xf32>
    %c0_147 = arith.constant 0 : index
    %c0_148 = arith.constant 0 : index
    %172 = vector.load %arg10[%c0_147, %c0_148] : memref<120x84xbf16, #tpu.memory_space<vmem>>, vector<120x84xbf16>
    %173 = arith.extf %172 : vector<120x84xbf16> to vector<120x84xf32>
    %cst_149 = arith.constant dense<0.000000e+00> : vector<2x84xf32>
    %174 = tpu.matmul %171, %173, %cst_149 {dimension_numbers = #tpu.dot_dimension_numbers<[1], [0], [0], [1], [0, 0, 1, 1], [], []>} : vector<2x120xf32>, vector<120x84xf32>, vector<2x84xf32> -> vector<2x84xf32>
    %c0_150 = arith.constant 0 : index
    %c0_151 = arith.constant 0 : index
    %175 = vector.load %arg11[%c0_150, %c0_151] : memref<1x84xf32, #tpu.memory_space<vmem>>, vector<1x84xf32>
    %176 = vector.broadcast %175 : vector<1x84xf32> to vector<2x84xf32>
    %177 = arith.addf %174, %176 : vector<2x84xf32>
    %cst_152 = arith.constant 0.000000e+00 : f32
    %178 = vector.broadcast %cst_152 : f32 to vector<2x84xf32>
    %179 = arith.maximumf %177, %178 : vector<2x84xf32>
    %c0_153 = arith.constant 0 : index
    %c0_154 = arith.constant 0 : index
    %180 = vector.load %arg12[%c0_153, %c0_154] : memref<84x10xbf16, #tpu.memory_space<vmem>>, vector<84x10xbf16>
    %181 = arith.extf %180 : vector<84x10xbf16> to vector<84x10xf32>
    %cst_155 = arith.constant dense<0.000000e+00> : vector<2x10xf32>
    %182 = tpu.matmul %179, %181, %cst_155 {dimension_numbers = #tpu.dot_dimension_numbers<[1], [0], [0], [1], [0, 0, 1, 1], [], []>} : vector<2x84xf32>, vector<84x10xf32>, vector<2x10xf32> -> vector<2x10xf32>
    %c0_156 = arith.constant 0 : index
    %c0_157 = arith.constant 0 : index
    %183 = vector.load %arg13[%c0_156, %c0_157] : memref<1x10xf32, #tpu.memory_space<vmem>>, vector<1x10xf32>
    %184 = vector.broadcast %183 : vector<1x10xf32> to vector<2x10xf32>
    %185 = arith.addf %182, %184 : vector<2x10xf32>
    %c0_158 = arith.constant 0 : index
    %c0_159 = arith.constant 0 : index
    %c0_160 = arith.constant 0 : index
    %186 = vector.load %arg14[%c0_158, %c0_159, %c0_160] : memref<1x2x10xf32, #tpu.memory_space<vmem>>, vector<1x2x10xf32>
    %187 = vector.shape_cast %186 : vector<1x2x10xf32> to vector<2x10xf32>
    %188 = vector.shape_cast %185 : vector<2x10xf32> to vector<1x2x10xf32>
    tpu.vector_store %arg14[%c0_158, %c0_159, %c0_160], %188 {strides = array<i32>} : memref<1x2x10xf32, #tpu.memory_space<vmem>>, vector<1x2x10xf32>,
    return
  }
  func.func @transform_0(%arg0: i32) -> (i32, i32, i32) {
    %c0_i32 = arith.constant 0 : i32
    %c0_i32_0 = arith.constant 0 : i32
    %c0_i32_1 = arith.constant 0 : i32
    return %arg0, %c0_i32, %c0_i32_0 : i32, i32, i32
  }
  func.func @transform_1(%arg0: i32) -> (i32, i32, i32) {
    %c0_i32 = arith.constant 0 : i32
    %c0_i32_0 = arith.constant 0 : i32
    %c0_i32_1 = arith.constant 0 : i32
    %c0_i32_2 = arith.constant 0 : i32
    return %c0_i32, %c0_i32_0, %c0_i32_1 : i32, i32, i32
  }
  func.func @transform_2(%arg0: i32) -> (i32, i32, i32, i32) {
    %c0_i32 = arith.constant 0 : i32
    %c0_i32_0 = arith.constant 0 : i32
    %c0_i32_1 = arith.constant 0 : i32
    %c0_i32_2 = arith.constant 0 : i32
    %c0_i32_3 = arith.constant 0 : i32
    return %c0_i32, %c0_i32_0, %c0_i32_1, %c0_i32_2 : i32, i32, i32, i32
  }
  func.func @transform_3(%arg0: i32) -> (i32, i32) {
    %c0_i32 = arith.constant 0 : i32
    %c0_i32_0 = arith.constant 0 : i32
    %c0_i32_1 = arith.constant 0 : i32
    return %c0_i32, %c0_i32_0 : i32, i32
  }
  func.func @transform_4(%arg0: i32) -> (i32, i32, i32) {
    %c0_i32 = arith.constant 0 : i32
    %c0_i32_0 = arith.constant 0 : i32
    %c0_i32_1 = arith.constant 0 : i32
    %c0_i32_2 = arith.constant 0 : i32
    return %c0_i32, %c0_i32_0, %c0_i32_1 : i32, i32, i32
  }
  func.func @transform_5(%arg0: i32) -> (i32, i32, i32, i32) {
    %c0_i32 = arith.constant 0 : i32
    %c0_i32_0 = arith.constant 0 : i32
    %c0_i32_1 = arith.constant 0 : i32
    %c0_i32_2 = arith.constant 0 : i32
    %c0_i32_3 = arith.constant 0 : i32
    return %c0_i32, %c0_i32_0, %c0_i32_1, %c0_i32_2 : i32, i32, i32, i32
  }
  func.func @transform_6(%arg0: i32) -> (i32, i32) {
    %c0_i32 = arith.constant 0 : i32
    %c0_i32_0 = arith.constant 0 : i32
    %c0_i32_1 = arith.constant 0 : i32
    return %c0_i32, %c0_i32_0 : i32, i32
  }
  func.func @transform_7(%arg0: i32) -> (i32, i32) {
    %c0_i32 = arith.constant 0 : i32
    %c0_i32_0 = arith.constant 0 : i32
    %c0_i32_1 = arith.constant 0 : i32
    return %c0_i32, %c0_i32_0 : i32, i32
  }
  func.func @transform_8(%arg0: i32) -> (i32, i32) {
    %c0_i32 = arith.constant 0 : i32
    %c0_i32_0 = arith.constant 0 : i32
    %c0_i32_1 = arith.constant 0 : i32
    return %c0_i32, %c0_i32_0 : i32, i32
  }
  func.func @transform_9(%arg0: i32) -> (i32, i32) {
    %c0_i32 = arith.constant 0 : i32
    %c0_i32_0 = arith.constant 0 : i32
    %c0_i32_1 = arith.constant 0 : i32
    return %c0_i32, %c0_i32_0 : i32, i32
  }
  func.func @transform_10(%arg0: i32) -> (i32, i32) {
    %c0_i32 = arith.constant 0 : i32
    %c0_i32_0 = arith.constant 0 : i32
    %c0_i32_1 = arith.constant 0 : i32
    return %c0_i32, %c0_i32_0 : i32, i32
  }
  func.func @transform_11(%arg0: i32) -> (i32, i32) {
    %c0_i32 = arith.constant 0 : i32
    %c0_i32_0 = arith.constant 0 : i32
    %c0_i32_1 = arith.constant 0 : i32
    return %c0_i32, %c0_i32_0 : i32, i32
  }
  func.func @transform_12(%arg0: i32) -> (i32, i32) {
    %c0_i32 = arith.constant 0 : i32
    %c0_i32_0 = arith.constant 0 : i32
    %c0_i32_1 = arith.constant 0 : i32
    return %c0_i32, %c0_i32_0 : i32, i32
  }
  func.func @transform_13(%arg0: i32) -> (i32, i32, i32) {
    %c0_i32 = arith.constant 0 : i32
    %c0_i32_0 = arith.constant 0 : i32
    %c0_i32_1 = arith.constant 0 : i32
    return %arg0, %c0_i32, %c0_i32_0 : i32, i32, i32
  }
}

</mosaic_0001>

<bundles_post_ra>
// kernel: net_forward.1
= control target key start
LH: loop header
LB: loop body
LE: loop exit
PB: predicated region body
PF: predicated region fallthrough
CT: control target
= control target key end

     0   :  { %s13397_s0 = inlined_call_operand.vmem [shape: f32[1,96,64], index: 0, kind: input, shape index: {}]   ;;  %s13398_s1 = inlined_call_operand.vmem [shape: bf16[2,96,480], index: 1, kind: input, shape index: {}]   ;;  %s13399_s2 = inlined_call_operand.vmem [shape: bf16[5,2,64,28], index: 2, kind: input, shape index: {}]   ;;  %s13400_s3 = inlined_call_operand.vmem [shape: f32[96,1], index: 3, kind: input, shape index: {}]   ;;  %s13401_s4 = inlined_call_operand.vmem [shape: bf16[2,80,480], index: 4, kind: input, shape index: {}]   ;;  %s13402_s5 = inlined_call_operand.vmem [shape: bf16[5,2,28,10], index: 5, kind: input, shape index: {}]   ;;  %s13403_s6 = inlined_call_operand.vmem [shape: f32[80,1], index: 6, kind: input, shape index: {}]   ;;  %s13404_s7 = inlined_call_operand.vmem [shape: bf16[400,120], index: 7, kind: input, shape index: {}]   ;;  %s13405_s8 = inlined_call_operand.vmem [shape: f32[1,120], index: 8, kind: input, shape index: {}]   ;;  %s13406_s9 = inlined_call_operand.vmem [shape: bf16[120,84], index: 9, kind: input, shape index: {}]   ;;  %s13407_s10 = inlined_call_operand.vmem [shape: f32[1,84], index: 10, kind: input, shape index: {}]   ;;  %s13408_s11 = inlined_call_operand.vmem [shape: bf16[84,10], index: 11, kind: input, shape index: {}]   ;;  %s13409_s12 = inlined_call_operand.vmem [shape: f32[1,10], index: 12, kind: input, shape index: {}]   ;;  %s13410_s13 = inlined_call_operand.hbm [shape: f32[1,2,10], index: 13, kind: output, shape index: {}]  }
   0x1   :  { %v7116_v0 = vld [vmem:[%s13399_s2 + $0x18] sm:$0xff]   ;;  %v7115_v2 = vld [vmem:[%s13399_s2 + $0x10] sm:$0xff]   ;;  %v7114_v10 = vld [vmem:[%s13399_s2 + $0x8] sm:$0xff]  }
   0x2   :  { %v7120_v1 = vld [vmem:[%s13399_s2 + $0x58] sm:$0xff]   ;;  %v6780_v3 = vunpack.c.l.bf16 %v7116_v0  ;;  %v6781_v4 = vunpack.c.h.bf16 %v7116_v0  ;;  %v7119_v7 = vld [vmem:[%s13399_s2 + $0x50] sm:$0xff]   ;;  %v6777_v8 = vunpack.c.h.bf16 %v7115_v2  ;;  %v7118_v11 = vld [vmem:[%s13399_s2 + $0x48] sm:$0xff]   ;;  %v6776_v12 = vunpack.c.l.bf16 %v7115_v2 }
   0x3   :  { %v6796_v5 = vunpack.c.l.bf16 %v7120_v1  ;;  %v6797_v6 = vunpack.c.h.bf16 %v7120_v1  ;;  %v6793_v9 = vunpack.c.h.bf16 %v7119_v7  ;;  %v6792_v13 = vunpack.c.l.bf16 %v7119_v7  ;;  %v6767_v16 = vld [vmem:[%s13399_s2] sm:$0xff]  }
   0x4   :  { %8139 = vmatprep.subr.mxu0 %v6781_v4  ;;  %v6773_v14 = vunpack.c.h.bf16 %v7114_v10  ;;  %v6789_v15 = vunpack.c.h.bf16 %v7118_v11  ;;  %v7117_v17 = vld [vmem:[%s13399_s2 + $0x40] sm:$0xff]   ;;  %v6772_v18 = vunpack.c.l.bf16 %v7114_v10  ;;  %v6788_v19 = vunpack.c.l.bf16 %v7118_v11 }
   0x5   :  { %8173 = vmatprep.subr.mxu1 %v6797_v6  ;;  %8140 = vmatpush3.msra.mxu0 %v6781_v4 }
   0x6   :  { %8174 = vmatpush3.msra.mxu1 %v6797_v6  ;;  %8141 = vmatprep.subr.mxu0 %v6780_v3 }
   0x7   :  { %8175 = vmatprep.subr.mxu1 %v6796_v5  ;;  %8142 = vmatpush3.msra.mxu0 %v6780_v3 }
   0x8   :  { %8176 = vmatpush3.msra.mxu1 %v6796_v5  ;;  %8143 = vmatprep.subr.mxu0 %v6777_v8 }
   0x9   :  { %8177 = vmatprep.subr.mxu1 %v6793_v9  ;;  %8144 = vmatpush3.msra.mxu0 %v6777_v8 }
   0xa   :  { %8178 = vmatpush3.msra.mxu1 %v6793_v9  ;;  %8145 = vmatprep.subr.mxu0 %v6776_v12 }
   0xb   :  { %8179 = vmatprep.subr.mxu1 %v6792_v13  ;;  %8146 = vmatpush3.msra.mxu0 %v6776_v12 }
   0xc   :  { %8180 = vmatpush3.msra.mxu1 %v6792_v13 }
   0xd   :  { %18 = vsyncpa [#allocation3], 0  ;;  %8147 = vmatprep.subr.mxu0 %v6773_v14  ;;  %8181 = vmatprep.subr.mxu1 %v6789_v15  ;;  %v6769_v20 = vunpack.c.h.bf16 %v6767_v16  ;;  %v6785_v21 = vunpack.c.h.bf16 %v7117_v17  ;;  %v6768_v22 = vunpack.c.l.bf16 %v6767_v16  ;;  %v6784_v23 = vunpack.c.l.bf16 %v7117_v17  ;;  %v7124_v24 = vld [vmem:[%s13399_s2 + $0x98] sm:$0xff]   ;;  %v9084_v26 = vld [vmem:[%s13397_s0] sm:$0xff]  ;;  %s8976_s17 = smov 126   ;;  %s8977_s18 = smov 122  }
   0xe   :  { %8148 = vmatpush3.msra.mxu0 %v6773_v14  ;;  %8182 = vmatpush3.msra.mxu1 %v6789_v15  ;;  %v7128_v25 = vld [vmem:[%s13399_s2 + $0xd8] sm:$0xff]   ;;  %vm85_vm0 = vcmask 523264   ;;  %v9089_v27 = vld [vmem:[%s13397_s0 + $0x8] sm:$0xff]  ;;  %v6813_v28 = vunpack.c.h.bf16 %v7124_v24  ;;  %v7123_v30 = vld [vmem:[%s13399_s2 + $0x90] sm:$0xff]   ;;  %v6812_v32 = vunpack.c.l.bf16 %v7124_v24  ;;  %v13498_v8 = vmov 0.0   ;;  %s8978_s19 = smov 120  }
   0xf   :  { %8149 = vmatprep.subr.mxu0 %v6772_v18  ;;  %8183 = vmatprep.subr.mxu1 %v6788_v19  ;;  %v6829_v29 = vunpack.c.h.bf16 %v7128_v25  ;;  %v9105_v31 = vld [vmem:[%s13397_s0 + $0x10] sm:$0xff]  ;;  %v9110_v33 = vld [vmem:[%s13397_s0 + $0x18] sm:$0xff]  ;;  %v6828_v34 = vunpack.c.l.bf16 %v7128_v25  ;;  %v6809_v35 = vunpack.c.h.bf16 %v7123_v30  ;;  %v9124_v37 = vld [vmem:[%s13397_s0 + $0x20] sm:$0xff]  ;;  %v6808_v40 = vunpack.c.l.bf16 %v7123_v30  ;;  %s8980_s26 = smov [#allocation2]  }
  0x10   :  { %8150 = vmatpush3.msra.mxu0 %v6772_v18  ;;  %8184 = vmatpush3.msra.mxu1 %v6788_v19  ;;  %v7127_v36 = vld [vmem:[%s13399_s2 + $0xd0] sm:$0xff]   ;;  %v9131_v39 = vld [vmem:[%s13397_s0 + $0x28] sm:$0xff]  ;;  %v9155_v45 = vld [vmem:[%s13397_s0 + $0x38] sm:$0xff]  ;;  %vm947_vm1 = vcmask 785408   ;;  %vm2942_vm2 = vcmask 1043456   ;;  %vm2905_vm3 = vcmask 228352  }
  0x11   :  { %8151 = vmatprep.subr.mxu0 %v6769_v20  ;;  %8185 = vmatprep.subr.mxu1 %v6785_v21  ;;  %v6825_v38 = vunpack.c.h.bf16 %v7127_v36  ;;  %v6824_v41 = vunpack.c.l.bf16 %v7127_v36  ;;  %v7122_v42 = vld [vmem:[%s13399_s2 + $0x88] sm:$0xff]   ;;  %v9148_v44 = vld [vmem:[%s13397_s0 + $0x30] sm:$0xff]  ;;  %v7121_v48 = vld [vmem:[%s13399_s2 + $0x80] sm:$0xff]   ;;  %vm5890_vm4 = vcmask 130048   ;;  %vm8979_vm5 = vmmov 0   ;;  %s6261_s27 = sshll.u32 %s8980_s26, 4  ;;  %s6262_s27 = int_to_ptr.vmem [resolvable:$true] %s6261_s27 }
  0x12   :  { %8152 = vmatpush3.msra.mxu0 %v6769_v20  ;;  %8186 = vmatpush3.msra.mxu1 %v6785_v21  ;;  %v7126_v43 = vld [vmem:[%s13399_s2 + $0xc8] sm:$0xff]   ;;  %v6805_v46 = vunpack.c.h.bf16 %v7122_v42  ;;  %v9171_v49 = vld [vmem:[%s13397_s0 + $0x40] sm:$0xff]  ;;  %v6804_v50 = vunpack.c.l.bf16 %v7122_v42  ;;  %v6801_v53 = vunpack.c.h.bf16 %v7121_v48  ;;  %v9190_v55 = vld [vmem:[%s13397_s0 + $0x50] sm:$0xff]  ;;  %v6800_v58 = vunpack.c.l.bf16 %v7121_v48  ;;  %s8951_s28 = scalar_lea.vmem %s6262_s27, 32  ;;  %p8956_p1 = scmp.lt.s32.totalorder %s6262_s27, %s6262_s27 }
  0x13   :  { %8153 = vmatprep.subr.mxu0 %v6768_v22  ;;  %8187 = vmatprep.subr.mxu1 %v6784_v23  ;;  %v6821_v47 = vunpack.c.h.bf16 %v7126_v43  ;;  %v9176_v51 = vld [vmem:[%s13397_s0 + $0x48] sm:$0xff]  ;;  %v6820_v52 = vunpack.c.l.bf16 %v7126_v43  ;;  %v7125_v54 = vld [vmem:[%s13399_s2 + $0xc0] sm:$0xff]   ;;  %v9197_v57 = vld [vmem:[%s13397_s0 + $0x58] sm:$0xff]  ;;  %vm6072_vm6 = vcmask 982016   ;;  %vm6176_vm7 = vcmask 687104   ;;  %p8952_p0 = scmp.ne.s32.totalorder %s6262_s27, %s8951_s28  ;;  %p8957_p2 = scmp.lt.s32.totalorder %s8951_s28, %s8951_s28 }
  0x14   :  { %8154 = vmatpush3.msra.mxu0 %v6768_v22  ;;  %8155 = vmatprep.mubr.msk.f32.mxu0 %vm85_vm0, %v9084_v26  ;;  %v6817_v56 = vunpack.c.h.bf16 %v7125_v54  ;;  %v6816_v59 = vunpack.c.l.bf16 %v7125_v54  ;;  %v7132_v60 = vld [vmem:[%s13399_s2 + $0x118] sm:$0xff]   ;;  %v7131_v63 = vld [vmem:[%s13399_s2 + $0x110] sm:$0xff]   ;;  %v7130_v1 = vld [vmem:[%s13399_s2 + $0x108] sm:$0xff]   ;;  %vm6253_vm8 = vcmask 74752  }
  0x15   :  { %8188 = vmatpush3.msra.mxu1 %v6784_v23  ;;  %8189 = vmatprep.mubr.msk.f32.mxu1 %vm85_vm0, %v9084_v26  ;;  %v6845_v61 = vunpack.c.h.bf16 %v7132_v60  ;;  %v6844_v62 = vunpack.c.l.bf16 %v7132_v60  ;;  %v6841_v0 = vunpack.c.h.bf16 %v7131_v63  ;;  %v6840_v2 = vunpack.c.l.bf16 %v7131_v63  ;;  %v7129_v4 = vld [vmem:[%s13399_s2 + $0x100] sm:$0xff]   ;;  %v9303_v11 = vld [vmem:[%s13398_s1 + $0x8] sm:$0xff]  ;;  %p8958_p3 = por %p8957_p2, %p8956_p1 }
  0x16   :  { %8156 = vmatmul.mubr.msk.f32.vlgmr.msra.gmra.mxu0 %vm85_vm0, %v9089_v27  ;;  %8190 = vmatmul.mubr.msk.f32.vlgmr.msra.gmra.mxu1 %vm85_vm0, %v9089_v27  ;;  %v6837_v3 = vunpack.c.h.bf16 %v7130_v1  ;;  %v6836_v5 = vunpack.c.l.bf16 %v7130_v1  ;;  %v6833_v6 = vunpack.c.h.bf16 %v7129_v4  ;;  %v6832_v7 = vunpack.c.l.bf16 %v7129_v4  ;;  %v9295_v9 = vld [vmem:[%s13398_s1] sm:$0xff]  ;;  %13817 = vst [vmem:[#allocation5_spill] sm:$0xff] %v9303_v11 }
  0x17   :  { %8207 = vmatprep.subr.mxu0 %v6813_v28  ;;  %8241 = vmatprep.subr.mxu1 %v6829_v29  ;;  %v13412_v10 = vunpack.c.h.bf16 %v9295_v9  ;;  %v13411_v12 = vunpack.c.h.bf16 %v9303_v11  ;;  %v57_v42 = vld [vmem:[%s13400_s3] sm:$0xff]  ;;  %p8959_p4 = pnand %p8958_p3, %p8952_p0 }
  0x18   :  { %8208 = vmatpush3.msra.mxu0 %v6813_v28  ;;  %8242 = vmatpush3.msra.mxu1 %v6829_v29 }
  0x19   :  { %8158 = vmatprep.mubr.msk.f32.mxu0 %vm85_vm0, %v9105_v31  ;;  %8192 = vmatprep.mubr.msk.f32.mxu1 %vm85_vm0, %v9105_v31 }
  0x1a   :  { %8209 = vmatprep.subr.mxu0 %v6812_v32  ;;  %8159 = vmatmul.mubr.msk.f32.gmra.mxu0 %vm85_vm0, %v9110_v33 }
  0x1b   :  { %8193 = vmatmul.mubr.msk.f32.gmra.mxu1 %vm85_vm0, %v9110_v33  ;;  %8210 = vmatpush3.msra.mxu0 %v6812_v32 }
  0x1c   :  { %8243 = vmatprep.subr.mxu1 %v6828_v34  ;;  %8211 = vmatprep.subr.mxu0 %v6809_v35 }
  0x1d   :  { %8244 = vmatpush3.msra.mxu1 %v6828_v34  ;;  %8161 = vmatprep.mubr.msk.f32.mxu0 %vm85_vm0, %v9124_v37 }
  0x1e   :  { %8195 = vmatprep.mubr.msk.f32.mxu1 %vm85_vm0, %v9124_v37  ;;  %8212 = vmatpush3.msra.mxu0 %v6809_v35 }
  0x1f   :  { %8245 = vmatprep.subr.mxu1 %v6825_v38  ;;  %8162 = vmatmul.mubr.msk.f32.gmra.mxu0 %vm85_vm0, %v9131_v39 }
  0x20   :  { %8196 = vmatmul.mubr.msk.f32.gmra.mxu1 %vm85_vm0, %v9131_v39  ;;  %8213 = vmatprep.subr.mxu0 %v6808_v40 }
  0x21   :  { %8246 = vmatpush3.msra.mxu1 %v6825_v38  ;;  %8214 = vmatpush3.msra.mxu0 %v6808_v40 }
  0x22   :  { %8247 = vmatprep.subr.mxu1 %v6824_v41  ;;  %8164 = vmatprep.mubr.msk.f32.mxu0 %vm85_vm0, %v9148_v44 }
  0x23   :  { %8198 = vmatprep.mubr.msk.f32.mxu1 %vm85_vm0, %v9148_v44  ;;  %8248 = vmatpush3.msra.mxu1 %v6824_v41  ;;  %v8974_v41 = vmov 0  }
  0x24   :  { %8165 = vmatmul.mubr.msk.f32.gmra.mxu0 %vm85_vm0, %v9155_v45  ;;  %8199 = vmatmul.mubr.msk.f32.gmra.mxu1 %vm85_vm0, %v9155_v45 }
  0x25   :  { %8215 = vmatprep.subr.mxu0 %v6805_v46  ;;  %8249 = vmatprep.subr.mxu1 %v6821_v47 }
  0x26   :  { %8216 = vmatpush3.msra.mxu0 %v6805_v46  ;;  %8250 = vmatpush3.msra.mxu1 %v6821_v47  ;;  %v58_v47 = vld [vmem:[%s13400_s3 + $0x8] sm:$0xff] }
  0x27   :  { %8167 = vmatprep.mubr.msk.f32.mxu0 %vm85_vm0, %v9171_v49  ;;  %8201 = vmatprep.mubr.msk.f32.mxu1 %vm85_vm0, %v9171_v49 }
  0x28   :  { %8217 = vmatprep.subr.mxu0 %v6804_v50  ;;  %8168 = vmatmul.mubr.msk.f32.gmra.mxu0 %vm85_vm0, %v9176_v51 }
  0x29   :  { %8202 = vmatmul.mubr.msk.f32.gmra.mxu1 %vm85_vm0, %v9176_v51  ;;  %8218 = vmatpush3.msra.mxu0 %v6804_v50 }
  0x2a   :  { %8251 = vmatprep.subr.mxu1 %v6820_v52  ;;  %8219 = vmatprep.subr.mxu0 %v6801_v53 }
  0x2b   :  { %8252 = vmatpush3.msra.mxu1 %v6820_v52  ;;  %8170 = vmatprep.mubr.msk.f32.mxu0 %vm85_vm0, %v9190_v55  ;;  %v59_v52 = vld [vmem:[%s13400_s3 + $0x10] sm:$0xff] }
  0x2c   :  { %8204 = vmatprep.mubr.msk.f32.mxu1 %vm85_vm0, %v9190_v55  ;;  %8220 = vmatpush3.msra.mxu0 %v6801_v53 }
  0x2d   :  { %8253 = vmatprep.subr.mxu1 %v6817_v56  ;;  %8171 = vmatmul.mubr.msk.f32.gmra.mxu0 %vm85_vm0, %v9197_v57 }
  0x2e   :  { %8205 = vmatmul.mubr.msk.f32.gmra.mxu1 %vm85_vm0, %v9197_v57  ;;  %8221 = vmatprep.subr.mxu0 %v6800_v58 }
  0x2f   :  { %8254 = vmatpush3.msra.mxu1 %v6817_v56  ;;  %8222 = vmatpush3.msra.mxu0 %v6800_v58 }
  0x30   :  { %8255 = vmatprep.subr.mxu1 %v6816_v59  ;;  %8223 = vmatprep.mubr.msk.f32.mxu0 %vm85_vm0, %v9084_v26 }
  0x31   :  { %8256 = vmatpush3.msra.mxu1 %v6816_v59  ;;  %8257 = vmatprep.mubr.msk.f32.mxu1 %vm85_vm0, %v9084_v26 }
  0x32   :  { %8224 = vmatmul.mubr.msk.f32.vlgmr.msra.gmra.mxu0 %vm85_vm0, %v9089_v27  ;;  %8258 = vmatmul.mubr.msk.f32.vlgmr.msra.gmra.mxu1 %vm85_vm0, %v9089_v27 }
  0x33   :  { %8226 = vmatprep.mubr.msk.f32.mxu0 %vm85_vm0, %v9105_v31  ;;  %8260 = vmatprep.mubr.msk.f32.mxu1 %vm85_vm0, %v9105_v31 }
  0x34   :  { %8275 = vmatprep.subr.mxu0 %v6845_v61  ;;  %8805 = vset.pattern.permute.xlu0 %v8974_v41 }
  0x35   :  { %8276 = vmatpush3.msra.mxu0 %v6845_v61  ;;  %8806 = vset.pattern.permute.xlu1 %v8974_v41 }
  0x36   :  { %8227 = vmatmul.mubr.msk.f32.gmra.mxu0 %vm85_vm0, %v9110_v33  ;;  %8261 = vmatmul.mubr.msk.f32.gmra.mxu1 %vm85_vm0, %v9110_v33 }
  0x37   :  { %8229 = vmatprep.mubr.msk.f32.mxu0 %vm85_vm0, %v9124_v37  ;;  %8263 = vmatprep.mubr.msk.f32.mxu1 %vm85_vm0, %v9124_v37 }
  0x38   :  { %8277 = vmatprep.subr.mxu0 %v6844_v62  ;;  %889 = vperm.xlu0 %8805, %v57_v42  }
  0x39   :  { %8278 = vmatpush3.msra.mxu0 %v6844_v62  ;;  %899 = vperm.xlu1 %8806, %v59_v52   ;;  %v61_v62 = vld [vmem:[%s13400_s3 + $0x20] sm:$0xff]  ;;  %v13415_v52 = vunpack.c.l.bf16 %v9295_v9 }
  0x3a   :  { %8230 = vmatmul.mubr.msk.f32.gmra.mxu0 %vm85_vm0, %v9131_v39  ;;  %8264 = vmatmul.mubr.msk.f32.gmra.mxu1 %vm85_vm0, %v9131_v39 }
  0x3b   :  { %8232 = vmatprep.mubr.msk.f32.mxu0 %vm85_vm0, %v9148_v44  ;;  %8266 = vmatprep.mubr.msk.f32.mxu1 %vm85_vm0, %v9148_v44 }
  0x3c   :  { %8279 = vmatprep.subr.mxu0 %v6841_v0  ;;  %894 = vperm.xlu0 %8805, %v58_v47  }
  0x3d   :  { %8280 = vmatpush3.msra.mxu0 %v6841_v0 }
  0x3e   :  { %8233 = vmatmul.mubr.msk.f32.gmra.mxu0 %vm85_vm0, %v9155_v45  ;;  %8267 = vmatmul.mubr.msk.f32.gmra.mxu1 %vm85_vm0, %v9155_v45 }
  0x3f   :  { %8269 = vmatprep.mubr.msk.f32.mxu1 %vm85_vm0, %v9171_v49  ;;  %8281 = vmatprep.subr.mxu0 %v6840_v2 }
  0x40   :  { %8282 = vmatpush3.msra.mxu0 %v6840_v2  ;;  %8235 = vmatprep.mubr.msk.f32.mxu0 %vm85_vm0, %v9171_v49 }
  0x41   :  { %8283 = vmatprep.subr.mxu0 %v6837_v3  ;;  %909 = vperm.xlu0 %8805, %v61_v62  }
  0x42   :  { %8270 = vmatmul.mubr.msk.f32.gmra.mxu1 %vm85_vm0, %v9176_v51  ;;  %8284 = vmatpush3.msra.mxu0 %v6837_v3 }
  0x43   :  { %8272 = vmatprep.mubr.msk.f32.mxu1 %vm85_vm0, %v9190_v55  ;;  %8236 = vmatmul.mubr.msk.f32.gmra.mxu0 %vm85_vm0, %v9176_v51 }
  0x44   :  { %8285 = vmatprep.subr.mxu0 %v6836_v5  ;;  %8238 = vmatprep.mubr.msk.f32.mxu0 %vm85_vm0, %v9190_v55 }
  0x45   :  { %8286 = vmatpush3.msra.mxu0 %v6836_v5 }
  0x46   :  { %8273 = vmatmul.mubr.msk.f32.gmra.mxu1 %vm85_vm0, %v9197_v57  ;;  %8287 = vmatprep.subr.mxu0 %v6833_v6 }
  0x47   :  { %8239 = vmatmul.mubr.msk.f32.gmra.mxu0 %vm85_vm0, %v9197_v57  ;;  %1048 = vmatprep.mubr.f32.mxu1 %v13412_v10 }
  0x48   :  { %8288 = vmatpush3.msra.mxu0 %v6833_v6  ;;  %8291 = vmatprep.mubr.msk.f32.mxu0 %vm85_vm0, %v9084_v26 }
  0x49   :  { %8289 = vmatprep.subr.mxu0 %v6832_v7 }
  0x4a   :  { %8290 = vmatpush3.msra.mxu0 %v6832_v7 }
  0x4b   :  { %8292 = vmatmul.mubr.msk.f32.vlgmr.msra.gmra.mxu0 %vm85_vm0, %v9089_v27  ;;  %1109 = vmatprep.subr.mxu0 %v13498_v8 }
  0x4c   :  { %8294 = vmatprep.mubr.msk.f32.mxu0 %vm85_vm0, %v9105_v31 }
  0x4f   :  { %8295 = vmatmul.mubr.msk.f32.gmra.mxu0 %vm85_vm0, %v9110_v33 }
  0x50   :  { %8297 = vmatprep.mubr.msk.f32.mxu0 %vm85_vm0, %v9124_v37 }
  0x53   :  { %8298 = vmatmul.mubr.msk.f32.gmra.mxu0 %vm85_vm0, %v9131_v39 }
  0x54   :  { %8300 = vmatprep.mubr.msk.f32.mxu0 %vm85_vm0, %v9148_v44 }
  0x57   :  { %8301 = vmatmul.mubr.msk.f32.gmra.mxu0 %vm85_vm0, %v9155_v45 }
  0x58   :  { %8303 = vmatprep.mubr.msk.f32.mxu0 %vm85_vm0, %v9171_v49 }
  0x5b   :  { %8304 = vmatmul.mubr.msk.f32.gmra.mxu0 %vm85_vm0, %v9176_v51 }
  0x5c   :  { %8306 = vmatprep.mubr.msk.f32.mxu0 %vm85_vm0, %v9190_v55 }
  0x5f   :  { %8307 = vmatmul.mubr.msk.f32.gmra.mxu0 %vm85_vm0, %v9197_v57  ;;  %v60_v57 = vld [vmem:[%s13400_s3 + $0x18] sm:$0xff] }
  0x60   :  { %6361 = vmatprep.mubr.msk.f32.mxu0 %vm947_vm1, %v13411_v12  ;;  %904 = vperm.xlu1 %8806, %v60_v57   ;;  %v9490_v57 = vld [vmem:[%s13398_s1 + $0x10] sm:$0xff] }
  0x61   :  { %v13496_v12 = vunpack.c.h.bf16 %v9490_v57 }
  0xd6   :  { %v9309_v13 = vpop.f32.mrf.mxu0  ;;  %v9311_v14 = vpop.f32.mrf.mxu1 }
  0xd8   :  { %v9313_v15 = vpop.f32.mrf.mxu0  ;;  %v9315_v16 = vpop.f32.mrf.mxu1 }
  0xda   :  { %v9317_v17 = vpop.f32.mrf.mxu0 }
  0xdb   :  { %v9319_v18 = vpop.f32.mrf.mxu1 }
  0xdc   :  { %v9321_v19 = vpop.f32.mrf.mxu0 }
  0xdd   :  { %v9323_v20 = vpop.f32.mrf.mxu1 }
  0xdf   :  { %v9325_v21 = vpop.f32.mrf.mxu0 }
  0xe0   :  { %v9327_v22 = vpop.f32.mrf.mxu1 }
  0xe1   :  { %v9329_v23 = vpop.f32.mrf.mxu0 }
  0xe2   :  { %v9331_v24 = vpop.f32.mrf.mxu1 }
  0xe4   :  { %v9333_v25 = vpop.f32.mrf.mxu0  ;;  %v9335_v26 = vpop.f32.mrf.mxu1 }
  0xe6   :  { %v9337_v27 = vpop.f32.mrf.mxu0  ;;  %v9339_v28 = vpop.f32.mrf.mxu1 }
  0xe8   :  { %v9341_v29 = vpop.f32.mrf.mxu0 }
  0xe9   :  { %v9343_v30 = vpop.f32.mrf.mxu1 }
  0xea   :  { %v9345_v31 = vpop.f32.mrf.mxu0 }
  0xeb   :  { %v9347_v32 = vpop.f32.mrf.mxu1 }
  0xed   :  { %v9349_v33 = vpop.f32.mrf.mxu0 }
  0xee   :  { %v9351_v34 = vpop.f32.mrf.mxu1 }
  0xef   :  { %v9353_v35 = vpop.f32.mrf.mxu0 }
  0xf0   :  { %v9355_v36 = vpop.f32.mrf.mxu1 }
  0xf2   :  { %v9357_v37 = vpop.f32.mrf.mxu0  ;;  %v9359_v38 = vpop.f32.mrf.mxu1 }
  0xf3   :  { %13818 = vst [vmem:[#allocation6_spill] sm:$0xff] %v9359_v38 }
  0xf4   :  { %v9361_v39 = vpop.f32.mrf.mxu0  ;;  %v9363_v40 = vpop.f32.mrf.mxu1 }
  0xf5   :  { %13819 = vst [vmem:[#allocation7_spill] sm:$0xff] %v9363_v40 }
  0xf6   :  { %v9368_v43 = vpop.f32.mrf.mxu0  ;;  %v9370_v44 = vpop.f32.mrf.mxu1 }
  0xf8   :  { %v9372_v45 = vpop.f32.mrf.mxu0  ;;  %v9374_v46 = vpop.f32.mrf.mxu1 }
  0xfa   :  { %v9379_v48 = vpop.f32.mrf.mxu0  ;;  %v9381_v49 = vpop.f32.mrf.mxu1 }
  0xfc   :  { %v9383_v50 = vpop.f32.mrf.mxu0  ;;  %v9385_v51 = vpop.f32.mrf.mxu1 }
  0xfe   :  { %v9390_v53 = vpop.f32.mrf.mxu0  ;;  %v9392_v54 = vpop.f32.mrf.mxu1 }
  0xff   :  { %7296 = vmatprep.subr.mxu1 %v9390_v53 }
 0x100   :  { %v9395_v55 = vpop.f32.mrf.mxu0  ;;  %v9397_v56 = vpop.f32.mrf.mxu1  ;;  %7297 = vmatpush3.msra.mxu1 %v9319_v18 }
 0x101   :  { %7298 = vmatprep.subr.mxu1 %v9395_v55 }
 0x102   :  { %v9404_v58 = vpop.f32.mrf.mxu1  ;;  %7299 = vmatpush3.msra.mxu1 %v9323_v20 }
 0x103   :  { %7300 = vmatprep.subr.mxu1 %v9379_v48  ;;  %v9408_v59 = vpop.f32.mrf.mxu0 }
 0x104   :  { %v9410_v60 = vpop.f32.mrf.mxu1  ;;  %7301 = vmatpush3.msra.mxu1 %v9311_v14 }
 0x105   :  { %7302 = vmatprep.subr.mxu1 %v9383_v50  ;;  %v9414_v61 = vpop.f32.mrf.mxu0 }
 0x106   :  { %v9419_v63 = vpop.f32.mrf.mxu1  ;;  %7303 = vmatpush3.msra.mxu1 %v9315_v16 }
 0x107   :  { %7304 = vmatprep.subr.mxu1 %v9368_v43  ;;  %1110 = vmatpush1.msra.mxu0 %v9419_v63  ;;  %v9424_v0 = vpop.f32.mrf.mxu0 }
 0x108   :  { %v9426_v1 = vpop.f32.mrf.mxu1  ;;  %7305 = vmatpush3.msra.mxu1 %v9349_v33  ;;  %1111 = vmatprep.subr.mxu0 %v13498_v8 }
 0x109   :  { %7306 = vmatprep.subr.mxu1 %v9372_v45  ;;  %1112 = vmatpush1.msra.mxu0 %v9426_v1  ;;  %v9432_v2 = vpop.f32.mrf.mxu0 }
 0x10a   :  { %7307 = vmatpush3.msra.mxu1 %v9353_v35  ;;  %1113 = vmatprep.subr.mxu0 %v13498_v8 }
 0x10b   :  { %7308 = vmatprep.subr.mxu1 %v9357_v37  ;;  %1114 = vmatpush1.msra.mxu0 %v9404_v58  ;;  %v9438_v3 = vpop.f32.mrf.mxu0 }
 0x10c   :  { %7309 = vmatpush3.msra.mxu1 %v9341_v29  ;;  %1115 = vmatprep.subr.mxu0 %v13498_v8 }
 0x10d   :  { %7310 = vmatprep.subr.mxu1 %v9361_v39  ;;  %1116 = vmatpush1.msra.mxu0 %v9410_v60  ;;  %v9444_v4 = vpop.f32.mrf.mxu0 }
 0x10e   :  { %7311 = vmatpush3.msra.mxu1 %v9345_v31  ;;  %1117 = vmatprep.subr.mxu0 %v13498_v8 }
 0x10f   :  { %7312 = vmatprep.subr.mxu1 %v9351_v34  ;;  %1118 = vmatpush1.msra.mxu0 %v9392_v54  ;;  %v9450_v5 = vpop.f32.mrf.mxu0 }
 0x110   :  { %7313 = vmatpush3.msra.mxu1 %v9333_v25  ;;  %1119 = vmatprep.subr.mxu0 %v13498_v8 }
 0x111   :  { %7314 = vmatprep.subr.mxu1 %v9355_v36  ;;  %1120 = vmatpush1.msra.mxu0 %v9397_v56  ;;  %v9456_v6 = vpop.f32.mrf.mxu0 }
 0x112   :  { %7315 = vmatpush3.msra.mxu1 %v9337_v27  ;;  %1121 = vmatprep.subr.mxu0 %v13498_v8 }
 0x113   :  { %7316 = vmatprep.subr.mxu1 %v9343_v30  ;;  %1122 = vmatpush1.msra.mxu0 %v9381_v49  ;;  %v9462_v7 = vpop.f32.mrf.mxu0 }
 0x114   :  { %7317 = vmatpush3.msra.mxu1 %v9325_v21  ;;  %1123 = vmatprep.subr.mxu0 %v13498_v8 }
 0x115   :  { %7318 = vmatprep.subr.mxu1 %v9347_v32  ;;  %1124 = vmatpush1.msra.mxu0 %v9385_v51  ;;  %v9468_v41 = vpop.f32.mrf.mxu0 }
 0x116   :  { %7319 = vmatpush3.msra.mxu1 %v9329_v23  ;;  %1125 = vmatprep.subr.mxu0 %v13498_v8 }
 0x117   :  { %7320 = vmatprep.subr.mxu1 %v9335_v26  ;;  %1126 = vmatpush1.msra.mxu0 %v9370_v44  ;;  %v9474_v42 = vpop.f32.mrf.mxu0 }
 0x118   :  { %7321 = vmatpush3.msra.mxu1 %v9317_v17  ;;  %1127 = vmatprep.subr.mxu0 %v13498_v8 }
 0x119   :  { %7322 = vmatprep.subr.mxu1 %v9339_v28  ;;  %1128 = vmatpush1.msra.mxu0 %v9374_v46  ;;  %v9480_v47 = vpop.f32.mrf.mxu0 }
 0x11a   :  { %7323 = vmatpush3.msra.mxu1 %v9321_v19  ;;  %1129 = vmatprep.subr.mxu0 %v13498_v8 }
 0x11b   :  { %7324 = vmatprep.subr.mxu1 %v9327_v22  ;;  %1130 = vmatpush1.msra.mxu0 %v9359_v38  ;;  %v9494_v62 = vpop.f32.mrf.mxu0  ;;  %v13495_v38 = vunpack.c.l.bf16 %v9490_v57 }
 0x11c   :  { %7325 = vmatpush3.msra.mxu1 %v9309_v13  ;;  %1131 = vmatprep.subr.mxu0 %v13498_v8 }
 0x11d   :  { %7326 = vmatprep.subr.mxu1 %v9331_v24  ;;  %1132 = vmatpush1.msra.mxu0 %v9363_v40  ;;  %v9506_v10 = vpop.f32.mrf.mxu0  ;;  %v9512_v40 = vld [vmem:[%s13398_s1 + $0x20] sm:$0xff] }
 0x11e   :  { %7327 = vmatpush3.msra.mxu1 %v9313_v15  ;;  %1133 = vmatprep.subr.mxu0 %v13498_v8 }
 0x11f   :  { %1049 = vmatmul.mubr.f32.vlgmr.msra.gmra.mxu1 %v13415_v52  ;;  %1134 = vmatpush1.msra.mxu0 %v9424_v0  ;;  %v9525_v52 = vpop.f32.mrf.mxu0 }
 0x120   :  { %7364 = vmatprep.subr.mxu1 %v9390_v53  ;;  %1135 = vmatprep.subr.mxu0 %v13498_v8  ;;  %v13493_v53 = vunpack.c.h.bf16 %v9512_v40 }
 0x121   :  { %7365 = vmatpush3.msra.mxu1 %v9319_v18  ;;  %1136 = vmatpush1.msra.mxu0 %v9432_v2  ;;  %v13492_v18 = vunpack.c.l.bf16 %v9512_v40 }
 0x122   :  { %7366 = vmatprep.subr.mxu1 %v9395_v55  ;;  %1053 = vmatprep.mubr.f32.mxu1 %v13496_v12  ;;  %v9533_v55 = vld [vmem:[%s13398_s1 + $0x30] sm:$0xff] }
 0x123   :  { %1137 = vmatprep.subr.mxu0 %v13498_v8  ;;  %7367 = vmatpush3.msra.mxu1 %v9323_v20  ;;  %v9542_v20 = vpop.f32.mrf.mxu0 }
 0x124   :  { %1054 = vmatmul.mubr.f32.gmra.mxu1 %v13495_v38  ;;  %1138 = vmatpush1.msra.mxu0 %v9408_v59  ;;  %v7137_v38 = vld [vmem:[%s13399_s2 + $0x60] sm:$0xff]  }
 0x125   :  { %7368 = vmatprep.subr.mxu1 %v9379_v48  ;;  %1139 = vmatprep.subr.mxu0 %v13498_v8  ;;  %v13491_v48 = vunpack.c.h.bf16 %v9533_v55 }
 0x126   :  { %7369 = vmatpush3.msra.mxu1 %v9311_v14  ;;  %1140 = vmatpush1.msra.mxu0 %v9414_v61  ;;  %v13488_v14 = vunpack.c.l.bf16 %v9533_v55 }
 0x127   :  { %7370 = vmatprep.subr.mxu1 %v9383_v50  ;;  %1058 = vmatprep.mubr.f32.mxu1 %v13493_v53  ;;  %v9554_v50 = vld [vmem:[%s13398_s1 + $0x40] sm:$0xff]  ;;  %v10207_v53 = vld [vmem:[%s13398_s1 + $0x138] sm:$0xff] }
 0x128   :  { %1149 = vmatprep.subr.mxu0 %v13498_v8  ;;  %7371 = vmatpush3.msra.mxu1 %v9315_v16  ;;  %v13486_v16 = vunpack.c.h.bf16 %v9554_v50  ;;  %13858 = vst [vmem:[#allocation42_spill] sm:$0xff] %v10207_v53  ;;  %v13507_v12 = vunpack.c.h.bf16 %v10207_v53 }
 0x129   :  { %1059 = vmatmul.mubr.f32.gmra.mxu1 %v13492_v18  ;;  %1150 = vmatpush2.msra.mxu0 %v9525_v52 }
 0x12a   :  { %7372 = vmatprep.subr.mxu1 %v9368_v43  ;;  %1151 = vmatprep.subr.mxu0 %v13498_v8  ;;  %v9573_v43 = vld [vmem:[%s13398_s1 + $0x50] sm:$0xff] }
 0x12b   :  { %7373 = vmatpush3.msra.mxu1 %v9349_v33  ;;  %1152 = vmatpush2.msra.mxu0 %v9542_v20  ;;  %v13485_v33 = vunpack.c.l.bf16 %v9554_v50 }
 0x12c   :  { %7374 = vmatprep.subr.mxu1 %v9372_v45  ;;  %1063 = vmatprep.mubr.f32.mxu1 %v13491_v48  ;;  %v9685_v45 = vld [vmem:[%s13398_s1 + $0xa0] sm:$0xff] }
 0x12d   :  { %1153 = vmatprep.subr.mxu0 %v13498_v8  ;;  %7375 = vmatpush3.msra.mxu1 %v9353_v35  ;;  %v13483_v35 = vunpack.c.h.bf16 %v9573_v43  ;;  %13826 = vst [vmem:[#allocation14_spill] sm:$0xff] %v9685_v45 }
 0x12e   :  { %1064 = vmatmul.mubr.f32.gmra.mxu1 %v13488_v14  ;;  %1154 = vmatpush2.msra.mxu0 %v9494_v62  ;;  %v10173_v14 = vld [vmem:[%s13398_s1 + $0x128] sm:$0xff] }
 0x12f   :  { %7376 = vmatprep.subr.mxu1 %v9357_v37  ;;  %1155 = vmatprep.subr.mxu0 %v13498_v8  ;;  %v9592_v37 = vld [vmem:[%s13398_s1 + $0x60] sm:$0xff]  ;;  %13857 = vst [vmem:[#allocation41_spill] sm:$0xff] %v10173_v14  ;;  %v13500_v48 = vunpack.c.l.bf16 %v10173_v14 }
 0x130   :  { %7377 = vmatpush3.msra.mxu1 %v9341_v29  ;;  %1156 = vmatpush2.msra.mxu0 %v9506_v10  ;;  %v13482_v29 = vunpack.c.l.bf16 %v9573_v43  ;;  %13820 = vst [vmem:[#allocation8_spill] sm:$0xff] %v9592_v37 }
 0x131   :  { %7378 = vmatprep.subr.mxu1 %v9361_v39  ;;  %1068 = vmatprep.mubr.f32.mxu1 %v13486_v16  ;;  %v7138_v16 = vld [vmem:[%s13399_s2 + $0x68] sm:$0xff]  }
 0x132   :  { %1157 = vmatprep.subr.mxu0 %v13498_v8  ;;  %7379 = vmatpush3.msra.mxu1 %v9345_v31  ;;  %v13473_v31 = vunpack.c.h.bf16 %v9592_v37  ;;  %v6868_v18 = vunpack.c.l.bf16 %v7138_v16 }
 0x133   :  { %1069 = vmatmul.mubr.f32.gmra.mxu1 %v13485_v33  ;;  %1158 = vmatpush2.msra.mxu0 %v9474_v42 }
 0x134   :  { %7380 = vmatprep.subr.mxu1 %v9351_v34  ;;  %1159 = vmatprep.subr.mxu0 %v13498_v8  ;;  %v9611_v34 = vld [vmem:[%s13398_s1 + $0x70] sm:$0xff] }
 0x135   :  { %7381 = vmatpush3.msra.mxu1 %v9333_v25  ;;  %1160 = vmatpush2.msra.mxu0 %v9480_v47  ;;  %v13470_v25 = vunpack.c.l.bf16 %v9592_v37  ;;  %13821 = vst [vmem:[#allocation9_spill] sm:$0xff] %v9611_v34 }
 0x136   :  { %7382 = vmatprep.subr.mxu1 %v9355_v36  ;;  %1073 = vmatprep.mubr.f32.mxu1 %v13483_v35 }
 0x137   :  { %1161 = vmatprep.subr.mxu0 %v13498_v8  ;;  %7383 = vmatpush3.msra.mxu1 %v9337_v27  ;;  %v13420_v27 = vunpack.c.h.bf16 %v9611_v34 }
 0x138   :  { %1074 = vmatmul.mubr.f32.gmra.mxu1 %v13482_v29  ;;  %1162 = vmatpush2.msra.mxu0 %v9462_v7  ;;  %v10137_v29 = vld [vmem:[%s13397_s0 + $0x18] sm:$0xff] }
 0x139   :  { %7384 = vmatprep.subr.mxu1 %v9343_v30  ;;  %1163 = vmatprep.subr.mxu0 %v13498_v8  ;;  %v9630_v30 = vld [vmem:[%s13398_s1 + $0x80] sm:$0xff] }
 0x13a   :  { %7385 = vmatpush3.msra.mxu1 %v9325_v21  ;;  %1164 = vmatpush2.msra.mxu0 %v9468_v41  ;;  %v13419_v21 = vunpack.c.l.bf16 %v9611_v34  ;;  %13822 = vst [vmem:[#allocation10_spill] sm:$0xff] %v9630_v30 }
 0x13b   :  { %7386 = vmatprep.subr.mxu1 %v9347_v32  ;;  %1078 = vmatprep.mubr.f32.mxu1 %v13473_v31  ;;  %v9660_v32 = vld [vmem:[%s13399_s2 + $0x38] sm:$0xff]  }
 0x13c   :  { %1165 = vmatprep.subr.mxu0 %v13498_v8  ;;  %7387 = vmatpush3.msra.mxu1 %v9329_v23  ;;  %v13417_v23 = vunpack.c.h.bf16 %v9630_v30  ;;  %v6861_v39 = vunpack.c.h.bf16 %v9660_v32 }
 0x13d   :  { %1079 = vmatmul.mubr.f32.gmra.mxu1 %v13470_v25  ;;  %1166 = vmatpush2.msra.mxu0 %v9450_v5  ;;  %v7140_v25 = vld [vmem:[%s13399_s2 + $0x78] sm:$0xff]  }
 0x13e   :  { %7388 = vmatprep.subr.mxu1 %v9335_v26  ;;  %1167 = vmatprep.subr.mxu0 %v13498_v8  ;;  %v9643_v26 = vld [vmem:[%s13398_s1 + $0x18] sm:$0xff]  ;;  %v6877_v31 = vunpack.c.h.bf16 %v7140_v25 }
 0x13f   :  { %7389 = vmatpush3.msra.mxu1 %v9317_v17  ;;  %1168 = vmatpush2.msra.mxu0 %v9456_v6  ;;  %13823 = vst [vmem:[#allocation11_spill] sm:$0xff] %v9643_v26  ;;  %v13480_v17 = vunpack.c.l.bf16 %v9303_v11  ;;  %v13440_v36 = vunpack.c.h.bf16 %v9643_v26 }
 0x140   :  { %7390 = vmatprep.subr.mxu1 %v9339_v28  ;;  %1083 = vmatprep.mubr.f32.mxu1 %v13420_v27  ;;  %v9652_v28 = vld [vmem:[%s13398_s1 + $0x90] sm:$0xff] }
 0x141   :  { %1169 = vmatprep.subr.mxu0 %v13498_v8  ;;  %7391 = vmatpush3.msra.mxu1 %v9321_v19  ;;  %13824 = vst [vmem:[#allocation12_spill] sm:$0xff] %v9652_v28  ;;  %v13416_v19 = vunpack.c.l.bf16 %v9630_v30 }
 0x142   :  { %1084 = vmatmul.mubr.f32.gmra.mxu1 %v13419_v21  ;;  %1170 = vmatpush2.msra.mxu0 %v9438_v3  ;;  %v13426_v21 = vunpack.c.l.bf16 %v9685_v45 }
 0x143   :  { %7392 = vmatprep.subr.mxu1 %v9327_v22  ;;  %1171 = vmatprep.subr.mxu0 %v13498_v8  ;;  %v13418_v22 = vunpack.c.h.bf16 %v9652_v28 }
 0x144   :  { %7393 = vmatpush3.msra.mxu1 %v9309_v13  ;;  %1172 = vmatpush2.msra.mxu0 %v9444_v4  ;;  %v9675_v13 = vld [vmem:[%s13398_s1 + $0x28] sm:$0xff] }
 0x145   :  { %7394 = vmatprep.subr.mxu1 %v9331_v24  ;;  %1088 = vmatprep.mubr.f32.mxu1 %v13417_v23  ;;  %13825 = vst [vmem:[#allocation13_spill] sm:$0xff] %v9675_v13  ;;  %v13421_v24 = vunpack.c.l.bf16 %v9643_v26  ;;  %v13423_v23 = vunpack.c.h.bf16 %v9685_v45 }
 0x146   :  { %1174 = vmatmul.mubr.f32.vlgmr.msra.gmra.mxu0 %v13480_v17  ;;  %7395 = vmatpush3.msra.mxu1 %v9313_v15  ;;  %v13422_v15 = vunpack.c.l.bf16 %v9652_v28 }
 0x147   :  { %1480 = vmatprep.subr.mxu0 %v13498_v8  ;;  %1089 = vmatmul.mubr.f32.gmra.mxu1 %v13416_v19  ;;  %v13425_v19 = vunpack.c.h.bf16 %v9675_v13 }
 0x148   :  { %1481 = vmatpush1.msra.mxu0 %v9419_v63  ;;  %6362 = vmatprep.mubr.msk.f32.mxu0 %vm947_vm1, %v13440_v36  ;;  %v9701_v63 = vld [vmem:[%s13398_s1 + $0x38] sm:$0xff] }
 0x149   :  { %1482 = vmatprep.subr.mxu0 %v13498_v8  ;;  %1093 = vmatprep.mubr.f32.mxu1 %v13418_v22  ;;  %13827 = vst [vmem:[#allocation15_spill] sm:$0xff] %v9701_v63  ;;  %v13424_v22 = vunpack.c.l.bf16 %v9675_v13  ;;  %v13439_v27 = vunpack.c.h.bf16 %v9701_v63 }
 0x14a   :  { %1483 = vmatpush1.msra.mxu0 %v9426_v1  ;;  %8309 = vmatprep.subr.mxu1 %v6861_v39  ;;  %v9712_v1 = vld [vmem:[%s13398_s1 + $0xb0] sm:$0xff] }
 0x14b   :  { %1179 = vmatmul.mubr.f32.gmra.mxu0 %v13421_v24  ;;  %1484 = vmatprep.subr.mxu0 %v13498_v8  ;;  %13828 = vst [vmem:[#allocation16_spill] sm:$0xff] %v9712_v1  ;;  %v13427_v24 = vunpack.c.h.bf16 %v9712_v1 }
 0x14c   :  { %1094 = vmatmul.mubr.f32.gmra.mxu1 %v13422_v15  ;;  %1485 = vmatpush1.msra.mxu0 %v9404_v58  ;;  %v9730_v58 = vld [vmem:[%s13398_s1 + $0x48] sm:$0xff]  ;;  %v13429_v15 = vunpack.c.l.bf16 %v9701_v63 }
 0x14d   :  { %1486 = vmatprep.subr.mxu0 %v13498_v8  ;;  %6363 = vmatprep.mubr.msk.f32.mxu0 %vm947_vm1, %v13425_v19  ;;  %13829 = vst [vmem:[#allocation17_spill] sm:$0xff] %v9730_v58 }
 0x14e   :  { %1487 = vmatpush1.msra.mxu0 %v9410_v60  ;;  %1098 = vmatprep.mubr.f32.mxu1 %v13423_v23  ;;  %v9739_v60 = vld [vmem:[%s13398_s1 + $0xc0] sm:$0xff]  ;;  %v13428_v23 = vunpack.c.l.bf16 %v9712_v1 }
 0x14f   :  { %1184 = vmatmul.mubr.f32.gmra.mxu0 %v13424_v22  ;;  %1488 = vmatprep.subr.mxu0 %v13498_v8  ;;  %13830 = vst [vmem:[#allocation18_spill] sm:$0xff] %v9739_v60  ;;  %v13430_v22 = vunpack.c.h.bf16 %v9730_v58  ;;  %v13431_v19 = vunpack.c.h.bf16 %v9739_v60 }
 0x150   :  { %1099 = vmatmul.mubr.f32.gmra.mxu1 %v13426_v21  ;;  %1489 = vmatpush1.msra.mxu0 %v9392_v54  ;;  %v13432_v54 = vunpack.c.l.bf16 %v9730_v58  ;;  %v9761_v21 = vld [vmem:[%s13398_s1 + $0x58] sm:$0xff] }
 0x151   :  { %1490 = vmatprep.subr.mxu0 %v13498_v8  ;;  %6364 = vmatprep.mubr.msk.f32.mxu0 %vm947_vm1, %v13439_v27  ;;  %13831 = vst [vmem:[#allocation19_spill] sm:$0xff] %v9761_v21 }
 0x152   :  { %1491 = vmatpush1.msra.mxu0 %v9397_v56  ;;  %1103 = vmatprep.mubr.f32.mxu1 %v13427_v24  ;;  %v13433_v56 = vunpack.c.l.bf16 %v9739_v60  ;;  %v9770_v24 = vld [vmem:[%s13398_s1 + $0xd0] sm:$0xff] }
 0x153   :  { %1189 = vmatmul.mubr.f32.gmra.mxu0 %v13429_v15  ;;  %1492 = vmatprep.subr.mxu0 %v13498_v8  ;;  %13832 = vst [vmem:[#allocation20_spill] sm:$0xff] %v9770_v24  ;;  %v13436_v15 = vunpack.c.l.bf16 %v9761_v21 }
 0x154   :  { %1104 = vmatmul.mubr.f32.gmra.mxu1 %v13428_v23  ;;  %1493 = vmatpush1.msra.mxu0 %v9381_v49  ;;  %v13437_v49 = vunpack.c.h.bf16 %v9761_v21  ;;  %v9783_v23 = vld [vmem:[%s13398_s1 + $0x68] sm:$0xff] }
 0x155   :  { %1494 = vmatprep.subr.mxu0 %v13498_v8  ;;  %6365 = vmatprep.mubr.msk.f32.mxu0 %vm947_vm1, %v13430_v22  ;;  %13833 = vst [vmem:[#allocation21_spill] sm:$0xff] %v9783_v23  ;;  %v13434_v22 = vunpack.c.h.bf16 %v9770_v24 }
 0x156   :  { %1495 = vmatpush1.msra.mxu0 %v9385_v51  ;;  %1419 = vmatprep.mubr.f32.mxu1 %v13431_v19  ;;  %v13435_v51 = vunpack.c.l.bf16 %v9770_v24  ;;  %v9797_v19 = vld [vmem:[%s13398_s1 + $0xe0] sm:$0xff] }
 0x157   :  { %1194 = vmatmul.mubr.f32.gmra.mxu0 %v13432_v54  ;;  %1496 = vmatprep.subr.mxu0 %v13498_v8  ;;  %13834 = vst [vmem:[#allocation22_spill] sm:$0xff] %v9797_v19  ;;  %v13438_v54 = vunpack.c.h.bf16 %v9783_v23 }
 0x158   :  { %1420 = vmatmul.mubr.f32.vlgmr.msra.gmra.mxu1 %v13433_v56  ;;  %1497 = vmatpush1.msra.mxu0 %v9370_v44  ;;  %v6860_v44 = vunpack.c.l.bf16 %v9660_v32  ;;  %v13441_v56 = vunpack.c.h.bf16 %v9797_v19  ;;  %v13836_v32 = vld [vmem:[#allocation6_spill] sm:$0xff] }
 0x159   :  { %1498 = vmatprep.subr.mxu0 %v13498_v8  ;;  %8310 = vmatpush3.msra.mxu1 %v6861_v39  ;;  %v13442_v39 = vunpack.c.l.bf16 %v9783_v23 }
 0x15a   :  { %6366 = vmatprep.mubr.msk.f32.mxu0 %vm947_vm1, %v13437_v49  ;;  %1499 = vmatpush1.msra.mxu0 %v9374_v46  ;;  %v9820_v46 = vld [vmem:[%s13398_s1 + $0x78] sm:$0xff] }
 0x15b   :  { %1199 = vmatmul.mubr.f32.gmra.mxu0 %v13436_v15  ;;  %1424 = vmatprep.mubr.f32.mxu1 %v13434_v22  ;;  %13835 = vst [vmem:[#allocation23_spill] sm:$0xff] %v9820_v46  ;;  %v9829_v22 = vld [vmem:[%s13398_s1 + $0xf0] sm:$0xff] }
 0x15c   :  { %1500 = vmatprep.subr.mxu0 %v13498_v8  ;;  %1425 = vmatmul.mubr.f32.gmra.mxu1 %v13435_v51  ;;  %13837 = vst [vmem:[#allocation6_spill] sm:$0xff] %v9829_v22  ;;  %v13443_v51 = vunpack.c.l.bf16 %v9797_v19  ;;  %v7135_v15 = vld [vmem:[%s13399_s2 + $0x30] sm:$0xff]   ;;  %v13444_v27 = vunpack.c.h.bf16 %v9829_v22 }
 0x15d   :  { %1501 = vmatpush1.msra.mxu0 %v13836_v32  ;;  %6367 = vmatprep.mubr.msk.f32.mxu0 %vm947_vm1, %v13438_v54  ;;  %v13838_v49 = vld [vmem:[#allocation7_spill] sm:$0xff]  ;;  %v13446_v32 = vunpack.c.h.bf16 %v9820_v46  ;;  %v13445_v54 = vunpack.c.l.bf16 %v9820_v46  ;;  %v6857_v36 = vunpack.c.h.bf16 %v7135_v15 }
 0x15e   :  { %1502 = vmatprep.subr.mxu0 %v13498_v8  ;;  %8311 = vmatprep.subr.mxu1 %v6860_v44 }
 0x15f   :  { %1503 = vmatpush1.msra.mxu0 %v13838_v49  ;;  %1429 = vmatprep.mubr.f32.mxu1 %v13441_v56  ;;  %v9849_v49 = vld [vmem:[%s13398_s1 + $0x88] sm:$0xff]  ;;  %v13447_v56 = vunpack.c.l.bf16 %v9829_v22 }
 0x160   :  { %1204 = vmatmul.mubr.f32.gmra.mxu0 %v13442_v39  ;;  %1504 = vmatprep.subr.mxu0 %v13498_v8  ;;  %13839 = vst [vmem:[#allocation7_spill] sm:$0xff] %v9849_v49  ;;  %v9858_v39 = vld [vmem:[%s13398_s1 + $0x100] sm:$0xff] }
 0x161   :  { %8312 = vmatpush3.msra.mxu1 %v6860_v44  ;;  %1505 = vmatpush1.msra.mxu0 %v9424_v0  ;;  %13840 = vst [vmem:[#allocation24_spill] sm:$0xff] %v9858_v39  ;;  %v13452_v0 = vunpack.c.h.bf16 %v9849_v49  ;;  %v9872_v44 = vld [vmem:[%s13398_s1 + $0x98] sm:$0xff] }
 0x162   :  { %1430 = vmatmul.mubr.f32.gmra.mxu1 %v13443_v51  ;;  %1506 = vmatprep.subr.mxu0 %v13498_v8  ;;  %13841 = vst [vmem:[#allocation25_spill] sm:$0xff] %v9872_v44  ;;  %v13451_v51 = vunpack.c.l.bf16 %v9849_v49 }
 0x163   :  { %6368 = vmatprep.mubr.msk.f32.mxu0 %vm947_vm1, %v13446_v32  ;;  %1507 = vmatpush1.msra.mxu0 %v9432_v2  ;;  %v13449_v2 = vunpack.c.h.bf16 %v9858_v39  ;;  %v13450_v32 = vunpack.c.h.bf16 %v9872_v44 }
 0x164   :  { %1209 = vmatmul.mubr.f32.gmra.mxu0 %v13445_v54  ;;  %1434 = vmatprep.mubr.f32.mxu1 %v13444_v27  ;;  %v13448_v27 = vunpack.c.l.bf16 %v9858_v39  ;;  %v9884_v54 = vld [vmem:[%s13398_s1 + $0x110] sm:$0xff] }
 0x165   :  { %1508 = vmatprep.subr.mxu0 %v13498_v8  ;;  %8313 = vmatprep.subr.mxu1 %v6857_v36  ;;  %13842 = vst [vmem:[#allocation26_spill] sm:$0xff] %v9884_v54 }
 0x166   :  { %1435 = vmatmul.mubr.f32.gmra.mxu1 %v13447_v56  ;;  %1509 = vmatpush1.msra.mxu0 %v9408_v59  ;;  %v6856_v56 = vunpack.c.l.bf16 %v7135_v15  ;;  %v13453_v59 = vunpack.c.h.bf16 %v9884_v54  ;;  %v9913_v15 = vld [vmem:[%s13398_s1 + $0x120] sm:$0xff] }
 0x167   :  { %1510 = vmatprep.subr.mxu0 %v13498_v8  ;;  %8314 = vmatpush3.msra.mxu1 %v6857_v36  ;;  %v13454_v36 = vunpack.c.l.bf16 %v9872_v44  ;;  %13844 = vst [vmem:[#allocation28_spill] sm:$0xff] %v9913_v15 }
 0x168   :  { %6369 = vmatprep.mubr.msk.f32.mxu0 %vm947_vm1, %v13452_v0  ;;  %1511 = vmatpush1.msra.mxu0 %v9414_v61  ;;  %v9904_v61 = vld [vmem:[%s13398_s1 + $0xa8] sm:$0xff] }
 0x169   :  { %1214 = vmatmul.mubr.f32.gmra.mxu0 %v13451_v51  ;;  %1439 = vmatprep.mubr.f32.mxu1 %v13449_v2  ;;  %13843 = vst [vmem:[#allocation27_spill] sm:$0xff] %v9904_v61  ;;  %v7134_v2 = vld [vmem:[%s13399_s2 + $0x28] sm:$0xff]   ;;  %v13457_v51 = vunpack.c.h.bf16 %v9913_v15 }
 0x16a   :  { %1520 = vmatprep.subr.mxu0 %v13498_v8  ;;  %1440 = vmatmul.mubr.f32.gmra.mxu1 %v13448_v27  ;;  %v13455_v27 = vunpack.c.l.bf16 %v9884_v54  ;;  %v6853_v0 = vunpack.c.h.bf16 %v7134_v2 }
 0x16b   :  { %1521 = vmatpush2.msra.mxu0 %v9525_v52  ;;  %6370 = vmatprep.mubr.msk.f32.mxu0 %vm947_vm1, %v13450_v32  ;;  %v13456_v52 = vunpack.c.h.bf16 %v9904_v61  ;;  %v13458_v32 = vunpack.c.l.bf16 %v9904_v61 }
 0x16c   :  { %1522 = vmatprep.subr.mxu0 %v13498_v8  ;;  %8315 = vmatprep.subr.mxu1 %v6856_v56 }
 0x16d   :  { %1523 = vmatpush2.msra.mxu0 %v9542_v20  ;;  %1444 = vmatprep.mubr.f32.mxu1 %v13453_v59  ;;  %v9933_v20 = vld [vmem:[%s13398_s1 + $0xb8] sm:$0xff]  ;;  %v13459_v59 = vunpack.c.l.bf16 %v9913_v15 }
 0x16e   :  { %1219 = vmatmul.mubr.f32.gmra.mxu0 %v13454_v36  ;;  %1524 = vmatprep.subr.mxu0 %v13498_v8  ;;  %13845 = vst [vmem:[#allocation29_spill] sm:$0xff] %v9933_v20  ;;  %v9942_v36 = vld [vmem:[%s13398_s1 + $0x130] sm:$0xff] }
 0x16f   :  { %8316 = vmatpush3.msra.mxu1 %v6856_v56  ;;  %1525 = vmatpush2.msra.mxu0 %v9494_v62  ;;  %13846 = vst [vmem:[#allocation30_spill] sm:$0xff] %v9942_v36  ;;  %v13466_v62 = vunpack.c.h.bf16 %v9933_v20  ;;  %v13465_v56 = vunpack.c.l.bf16 %v9933_v20 }
 0x170   :  { %1445 = vmatmul.mubr.f32.gmra.mxu1 %v13455_v27  ;;  %1526 = vmatprep.subr.mxu0 %v13498_v8  ;;  %v13460_v27 = vunpack.c.h.bf16 %v9942_v36 }
 0x171   :  { %6371 = vmatprep.mubr.msk.f32.mxu0 %vm947_vm1, %v13456_v52  ;;  %1527 = vmatpush2.msra.mxu0 %v9506_v10  ;;  %v9959_v52 = vld [vmem:[%s13398_s1 + $0x140] sm:$0xff]  ;;  %v13462_v10 = vunpack.c.l.bf16 %v9942_v36 }
 0x172   :  { %1224 = vmatmul.mubr.f32.gmra.mxu0 %v13458_v32  ;;  %1449 = vmatprep.mubr.f32.mxu1 %v13457_v51  ;;  %13847 = vst [vmem:[#allocation31_spill] sm:$0xff] %v9959_v52  ;;  %v6852_v51 = vunpack.c.l.bf16 %v7134_v2  ;;  %v13461_v32 = vunpack.c.h.bf16 %v9959_v52 }
 0x173   :  { %1528 = vmatprep.subr.mxu0 %v13498_v8  ;;  %8317 = vmatprep.subr.mxu1 %v6853_v0 }
 0x174   :  { %1450 = vmatmul.mubr.f32.gmra.mxu1 %v13459_v59  ;;  %1529 = vmatpush2.msra.mxu0 %v9474_v42  ;;  %v9974_v59 = vld [vmem:[%s13398_s1 + $0x150] sm:$0xff]  ;;  %v7133_v42 = vld [vmem:[%s13399_s2 + $0x20] sm:$0xff]  }
 0x175   :  { %1530 = vmatprep.subr.mxu0 %v13498_v8  ;;  %8318 = vmatpush3.msra.mxu1 %v6853_v0  ;;  %13848 = vst [vmem:[#allocation32_spill] sm:$0xff] %v9974_v59  ;;  %v13464_v0 = vunpack.c.h.bf16 %v9974_v59  ;;  %v6849_v2 = vunpack.c.h.bf16 %v7133_v42 }
 0x176   :  { %6372 = vmatprep.mubr.msk.f32.mxu0 %vm947_vm1, %v13466_v62  ;;  %1531 = vmatpush2.msra.mxu0 %v9480_v47  ;;  %v13463_v47 = vunpack.c.l.bf16 %v9959_v52 }
 0x177   :  { %1229 = vmatmul.mubr.f32.gmra.mxu0 %v13465_v56  ;;  %1454 = vmatprep.mubr.f32.mxu1 %v13460_v27  ;;  %v9995_v27 = vld [vmem:[%s13398_s1 + $0xc8] sm:$0xff] }
 0x178   :  { %1532 = vmatprep.subr.mxu0 %v13498_v8  ;;  %1455 = vmatmul.mubr.f32.gmra.mxu1 %v13462_v10  ;;  %13849 = vst [vmem:[#allocation33_spill] sm:$0xff] %v9995_v27  ;;  %v7148_v10 = vld [vmem:[%s13399_s2 + $0xf8] sm:$0xff]   ;;  %v13472_v56 = vunpack.c.l.bf16 %v9995_v27 }
 0x179   :  { %1533 = vmatpush2.msra.mxu0 %v9462_v7  ;;  %8319 = vmatprep.subr.mxu1 %v6852_v51  ;;  %v10001_v7 = vld [vmem:[%s13398_s1 + $0x160] sm:$0xff] }
 0x17a   :  { %1534 = vmatprep.subr.mxu0 %v13498_v8  ;;  %1459 = vmatprep.mubr.f32.mxu1 %v13461_v32  ;;  %13850 = vst [vmem:[#allocation34_spill] sm:$0xff] %v10001_v7  ;;  %v13467_v32 = vunpack.c.l.bf16 %v9974_v59  ;;  %v13471_v62 = vunpack.c.l.bf16 %v10001_v7 }
 0x17b   :  { %1535 = vmatpush2.msra.mxu0 %v9468_v41  ;;  %8320 = vmatpush3.msra.mxu1 %v6852_v51  ;;  %v13469_v41 = vunpack.c.h.bf16 %v9995_v27  ;;  %v13468_v51 = vunpack.c.h.bf16 %v10001_v7  ;;  %v10444_v7 = vpop.permute.xlu1 %899 }
 0x17c   :  { %1536 = vmatprep.subr.mxu0 %v13498_v8  ;;  %1460 = vmatmul.mubr.f32.gmra.mxu1 %v13463_v47  ;;  %v10019_v47 = vld [vmem:[%s13398_s1 + $0xd8] sm:$0xff]  ;;  %13872 = vst [vmem:[#allocation49_spill] sm:$0xff] %v10444_v7 }
 0x17d   :  { %1537 = vmatpush2.msra.mxu0 %v9450_v5  ;;  %1464 = vmatprep.mubr.f32.mxu1 %v13464_v0  ;;  %13851 = vst [vmem:[#allocation35_spill] sm:$0xff] %v10019_v47  ;;  %v6848_v5 = vunpack.c.l.bf16 %v7133_v42  ;;  %v10025_v0 = vld [vmem:[%s13398_s1 + $0x170] sm:$0xff]  ;;  %v13478_v42 = vunpack.c.h.bf16 %v10019_v47 }
 0x17e   :  { %1538 = vmatprep.subr.mxu0 %v13498_v8  ;;  %8321 = vmatprep.subr.mxu1 %v6849_v2  ;;  %13852 = vst [vmem:[#allocation36_spill] sm:$0xff] %v10025_v0 }
 0x17f   :  { %1539 = vmatpush2.msra.mxu0 %v9456_v6  ;;  %8322 = vmatpush3.msra.mxu1 %v6849_v2  ;;  %v6909_v6 = vunpack.c.h.bf16 %v7148_v10  ;;  %v13474_v2 = vunpack.c.h.bf16 %v10025_v0  ;;  %v10450_v27 = vpop.permute.xlu1 %904 }
 0x180   :  { %1540 = vmatprep.subr.mxu0 %v13498_v8  ;;  %1465 = vmatmul.mubr.f32.gmra.mxu1 %v13467_v32  ;;  %v10044_v32 = vld [vmem:[%s13398_s1 + $0xe8] sm:$0xff]  ;;  %13873 = vst [vmem:[#allocation50_spill] sm:$0xff] %v10450_v27 }
 0x181   :  { %1541 = vmatpush2.msra.mxu0 %v9438_v3  ;;  %6397 = vmatprep.mubr.msk.f32.mxu0 %vm947_vm1, %v13469_v41  ;;  %13853 = vst [vmem:[#allocation37_spill] sm:$0xff] %v10044_v32  ;;  %v13476_v3 = vunpack.c.l.bf16 %v10019_v47  ;;  %v62_v41 = vld [vmem:[%s13400_s3 + $0x28] sm:$0xff] }
 0x182   :  { %1542 = vmatprep.subr.mxu0 %v13498_v8  ;;  %1469 = vmatprep.mubr.f32.mxu1 %v13468_v51  ;;  %v13475_v51 = vunpack.c.l.bf16 %v10025_v0  ;;  %v10238_v8 = vld [vmem:[%s13397_s0 + $0x48] sm:$0xff] }
 0x183   :  { %1543 = vmatpush2.msra.mxu0 %v9444_v4  ;;  %8323 = vmatprep.subr.mxu1 %v6848_v5  ;;  %v13477_v4 = vunpack.c.h.bf16 %v10044_v32 }
 0x184   :  { %1545 = vmatmul.mubr.f32.vlgmr.msra.gmra.mxu0 %v13472_v56  ;;  %1470 = vmatmul.mubr.f32.gmra.mxu1 %v13471_v62  ;;  %v6908_v62 = vunpack.c.l.bf16 %v7148_v10  ;;  %v10068_v56 = vld [vmem:[%s13398_s1 + $0xf8] sm:$0xff]  ;;  %v13479_v10 = vunpack.c.l.bf16 %v10044_v32 }
 0x185   :  { %8411 = vmatprep.subr.mxu0 %v6909_v6  ;;  %6398 = vmatprep.mubr.msk.f32.mxu0 %vm947_vm1, %v13478_v42  ;;  %13854 = vst [vmem:[#allocation38_spill] sm:$0xff] %v10068_v56  ;;  %v7139_v42 = vld [vmem:[%s13399_s2 + $0x70] sm:$0xff]  }
 0x186   :  { %8412 = vmatpush3.msra.mxu0 %v6909_v6  ;;  %1474 = vmatprep.mubr.f32.mxu1 %v13474_v2  ;;  %v63_v6 = vld [vmem:[%s13400_s3 + $0x30] sm:$0xff] }
 0x187   :  { %8324 = vmatpush3.msra.mxu1 %v6848_v5  ;;  %914 = vperm.xlu1 %8806, %v62_v41   ;;  %v10081_v2 = vld [vmem:[%s13399_s2 + $0xf0] sm:$0xff]   ;;  %v13481_v41 = vunpack.c.h.bf16 %v10068_v56  ;;  %v10090_v5 = vld [vmem:[%s13397_s0] sm:$0xff] }
 0x188   :  { %1550 = vmatmul.mubr.f32.gmra.mxu0 %v13476_v3  ;;  %1475 = vmatmul.mubr.f32.gmra.mxu1 %v13475_v51  ;;  %v6876_v51 = vunpack.c.l.bf16 %v7140_v25  ;;  %v6905_v3 = vunpack.c.h.bf16 %v10081_v2  ;;  %v10108_v25 = vld [vmem:[%s13397_s0 + $0x8] sm:$0xff] }
 0x189   :  { %6399 = vmatprep.mubr.msk.f32.mxu0 %vm947_vm1, %v13477_v4  ;;  %8413 = vmatprep.subr.mxu0 %v6908_v62  ;;  %v10098_v4 = vld [vmem:[%s13398_s1 + $0x108] sm:$0xff] }
 0x18a   :  { %8325 = vmatprep.mubr.msk.f32.mxu1 %vm85_vm0, %v10090_v5  ;;  %8414 = vmatpush3.msra.mxu0 %v6908_v62  ;;  %13855 = vst [vmem:[#allocation39_spill] sm:$0xff] %v10098_v4  ;;  %v13484_v62 = vunpack.c.l.bf16 %v10068_v56  ;;  %v13487_v17 = vunpack.c.h.bf16 %v10098_v4  ;;  %v13489_v35 = vunpack.c.l.bf16 %v10098_v4 }
 0x18b   :  { %8343 = vmatprep.subr.mxu1 %v6877_v31  ;;  %919 = vperm.xlu0 %8805, %v63_v6   ;;  %v10119_v6 = vld [vmem:[%s13397_s0 + $0x10] sm:$0xff] }
 0x18c   :  { %1555 = vmatmul.mubr.f32.gmra.mxu0 %v13479_v10  ;;  %8326 = vmatmul.mubr.msk.f32.vlgmr.msra.gmra.mxu1 %vm85_vm0, %v10108_v25  ;;  %v64_v10 = vld [vmem:[%s13400_s3 + $0x38] sm:$0xff] }
 0x18d   :  { %8344 = vmatpush3.msra.mxu1 %v6877_v31  ;;  %6400 = vmatprep.mubr.msk.f32.mxu0 %vm947_vm1, %v13481_v41  ;;  %v6873_v31 = vunpack.c.h.bf16 %v7139_v42  ;;  %v10130_v41 = vld [vmem:[%s13398_s1 + $0x118] sm:$0xff] }
 0x18e   :  { %8328 = vmatprep.mubr.msk.f32.mxu1 %vm85_vm0, %v10119_v6  ;;  %8345 = vmatprep.subr.mxu1 %v6876_v51  ;;  %13856 = vst [vmem:[#allocation40_spill] sm:$0xff] %v10130_v41  ;;  %v13490_v33 = vunpack.c.h.bf16 %v10130_v41 }
 0x18f   :  { %8346 = vmatpush3.msra.mxu1 %v6876_v51  ;;  %8415 = vmatprep.subr.mxu0 %v6905_v3  ;;  %v6872_v51 = vunpack.c.l.bf16 %v7139_v42  ;;  %v6904_v42 = vunpack.c.l.bf16 %v10081_v2  ;;  %v6869_v2 = vunpack.c.h.bf16 %v7138_v16  ;;  %v10219_v16 = vld [vmem:[%s13397_s0 + $0x40] sm:$0xff] }
 0x190   :  { %1560 = vmatmul.mubr.f32.gmra.mxu0 %v13484_v62  ;;  %8329 = vmatmul.mubr.msk.f32.gmra.mxu1 %vm85_vm0, %v10137_v29  ;;  %v65_v62 = vld [vmem:[%s13400_s3 + $0x40] sm:$0xff] }
 0x191   :  { %924 = vperm.xlu1 %8806, %v64_v10   ;;  %8416 = vmatpush3.msra.mxu0 %v6905_v3  ;;  %v10155_v3 = vld [vmem:[%s13397_s0 + $0x20] sm:$0xff]  ;;  %v10165_v10 = vld [vmem:[%s13397_s0 + $0x28] sm:$0xff] }
 0x192   :  { %6401 = vmatprep.mubr.msk.f32.mxu0 %vm947_vm1, %v13487_v17  ;;  %8347 = vmatprep.subr.mxu1 %v6873_v31  ;;  %v13494_v17 = vunpack.c.l.bf16 %v10130_v41  ;;  %v13860_v41 = vunpack.c.l.bf16 %v10207_v53 }
 0x193   :  { %8331 = vmatprep.mubr.msk.f32.mxu1 %vm85_vm0, %v10155_v3  ;;  %8348 = vmatpush3.msra.mxu1 %v6873_v31  ;;  %v10181_v31 = vld [vmem:[%s13399_s2 + $0xe8] sm:$0xff]  }
 0x194   :  { %1565 = vmatmul.mubr.f32.gmra.mxu0 %v13489_v35  ;;  %8332 = vmatmul.mubr.msk.f32.gmra.mxu1 %vm85_vm0, %v10165_v10  ;;  %v10186_v35 = vld [vmem:[%s13397_s0 + $0x30] sm:$0xff]  ;;  %v6900_v4 = vunpack.c.l.bf16 %v10181_v31 }
 0x195   :  { %929 = vperm.xlu0 %8805, %v65_v62   ;;  %8349 = vmatprep.subr.mxu1 %v6872_v51  ;;  %v66_v62 = vld [vmem:[%s13400_s3 + $0x48] sm:$0xff] }
 0x196   :  { %6402 = vmatprep.mubr.msk.f32.mxu0 %vm947_vm1, %v13490_v33  ;;  %8350 = vmatpush3.msra.mxu1 %v6872_v51  ;;  %v13497_v51 = vunpack.c.h.bf16 %v10173_v14  ;;  %v10199_v33 = vld [vmem:[%s13397_s0 + $0x38] sm:$0xff] }
 0x197   :  { %8417 = vmatprep.subr.mxu0 %v6904_v42  ;;  %8334 = vmatprep.mubr.msk.f32.mxu1 %vm85_vm0, %v10186_v35 }
 0x198   :  { %1570 = vmatmul.mubr.f32.gmra.mxu0 %v13494_v17  ;;  %8335 = vmatmul.mubr.msk.f32.gmra.mxu1 %vm85_vm0, %v10199_v33  ;;  %v6901_v17 = vunpack.c.h.bf16 %v10181_v31  ;;  %v10271_v31 = vld [vmem:[%s13397_s0 + $0x58] sm:$0xff] }
 0x199   :  { %8418 = vmatpush3.msra.mxu0 %v6904_v42  ;;  %8351 = vmatprep.subr.mxu1 %v6869_v2  ;;  %v67_v42 = vld [vmem:[%s13400_s3 + $0x50] sm:$0xff] }
 0x19a   :  { %934 = vperm.xlu1 %8806, %v66_v62   ;;  %8352 = vmatpush3.msra.mxu1 %v6869_v2  ;;  %v6865_v2 = vunpack.c.h.bf16 %v7137_v38  ;;  %v6864_v62 = vunpack.c.l.bf16 %v7137_v38  ;;  %v10263_v38 = vld [vmem:[%s13397_s0 + $0x50] sm:$0xff] }
 0x19b   :  { %6403 = vmatprep.mubr.msk.f32.mxu0 %vm947_vm1, %v13497_v51  ;;  %8337 = vmatprep.mubr.msk.f32.mxu1 %vm85_vm0, %v10219_v16  ;;  %v10233_v51 = vld [vmem:[%s13398_s1 + $0x148] sm:$0xff] }
 0x19c   :  { %1575 = vmatmul.mubr.f32.gmra.mxu0 %v13500_v48  ;;  %8353 = vmatprep.subr.mxu1 %v6868_v18  ;;  %13859 = vst [vmem:[#allocation43_spill] sm:$0xff] %v10233_v51  ;;  %v68_v48 = vld [vmem:[%s13400_s3 + $0x58] sm:$0xff]  ;;  %v13510_v14 = vunpack.c.h.bf16 %v10233_v51 }
 0x19d   :  { %8338 = vmatmul.mubr.msk.f32.gmra.mxu1 %vm85_vm0, %v10238_v8  ;;  %8419 = vmatprep.subr.mxu0 %v6901_v17 }
 0x19e   :  { %8354 = vmatpush3.msra.mxu1 %v6868_v18  ;;  %939 = vperm.xlu0 %8805, %v67_v42   ;;  %v7144_v18 = vld [vmem:[%s13399_s2 + $0xb8] sm:$0xff]  }
 0x19f   :  { %8420 = vmatpush3.msra.mxu0 %v6901_v17  ;;  %6404 = vmatprep.mubr.msk.f32.mxu0 %vm947_vm1, %v13507_v12  ;;  %v10258_v17 = vld [vmem:[%s13398_s1 + $0x158] sm:$0xff]  ;;  %v6893_v42 = vunpack.c.h.bf16 %v7144_v18  ;;  %v6892_v53 = vunpack.c.l.bf16 %v7144_v18  ;;  %v7143_v12 = vld [vmem:[%s13399_s2 + $0xb0] sm:$0xff]  }
 0x1a0   :  { %8355 = vmatprep.subr.mxu1 %v6865_v2  ;;  %1580 = vmatmul.mubr.f32.gmra.mxu0 %v13860_v41  ;;  %13861 = vst [vmem:[#allocation44_spill] sm:$0xff] %v10258_v17  ;;  %v13511_v41 = vunpack.c.l.bf16 %v10233_v51  ;;  %v10303_v18 = vld [vmem:[%s13398_s1 + $0x178] sm:$0xff]  ;;  %v13865_v51 = vunpack.c.l.bf16 %v10258_v17 }
 0x1a1   :  { %8340 = vmatprep.mubr.msk.f32.mxu1 %vm85_vm0, %v10263_v38  ;;  %8356 = vmatpush3.msra.mxu1 %v6865_v2  ;;  %v7145_v2 = vld [vmem:[%s13399_s2 + $0xe0] sm:$0xff]   ;;  %13864 = vst [vmem:[#allocation46_spill] sm:$0xff] %v10303_v18 }
 0x1a2   :  { %8341 = vmatmul.mubr.msk.f32.gmra.mxu1 %vm85_vm0, %v10271_v31  ;;  %944 = vperm.xlu1 %8806, %v68_v48   ;;  %v6889_v48 = vunpack.c.h.bf16 %v7143_v12 }
 0x1a3   :  { %8357 = vmatprep.subr.mxu1 %v6864_v62  ;;  %6405 = vmatprep.mubr.msk.f32.mxu0 %vm947_vm1, %v13510_v14  ;;  %v10290_v14 = vld [vmem:[%s13398_s1 + $0x168] sm:$0xff] }
 0x1a4   :  { %8358 = vmatpush3.msra.mxu1 %v6864_v62  ;;  %8421 = vmatprep.subr.mxu0 %v6900_v4  ;;  %13862 = vst [vmem:[#allocation45_spill] sm:$0xff] %v10290_v14  ;;  %v6897_v62 = vunpack.c.h.bf16 %v7145_v2  ;;  %v13520_v0 = vunpack.c.l.bf16 %v10290_v14  ;;  %v13866_v56 = vunpack.c.h.bf16 %v10290_v14 }
 0x1a5   :  { %1585 = vmatmul.mubr.f32.gmra.mxu0 %v13511_v41  ;;  %8359 = vmatprep.mubr.msk.f32.mxu1 %vm85_vm0, %v10090_v5  ;;  %v13863_v41 = vunpack.c.h.bf16 %v10258_v17 }
 0x1a6   :  { %8422 = vmatpush3.msra.mxu0 %v6900_v4  ;;  %8360 = vmatmul.mubr.msk.f32.vlgmr.msra.gmra.mxu1 %vm85_vm0, %v10108_v25  ;;  %v7142_v4 = vld [vmem:[%s13399_s2 + $0xa8] sm:$0xff]  }
 0x1a7   :  { %8377 = vmatprep.subr.mxu1 %v6893_v42  ;;  %6406 = vmatprep.mubr.msk.f32.mxu0 %vm947_vm1, %v13863_v41  ;;  %v13519_v41 = vunpack.c.h.bf16 %v10303_v18 }
 0x1a8   :  { %8378 = vmatpush3.msra.mxu1 %v6893_v42  ;;  %8362 = vmatprep.mubr.msk.f32.mxu1 %vm85_vm0, %v10119_v6  ;;  %v6888_v42 = vunpack.c.l.bf16 %v7143_v12  ;;  %v6885_v12 = vunpack.c.h.bf16 %v7142_v4 }
 0x1a9   :  { %1590 = vmatmul.mubr.f32.gmra.mxu0 %v13865_v51  ;;  %8379 = vmatprep.subr.mxu1 %v6892_v53  ;;  %v6896_v51 = vunpack.c.l.bf16 %v7145_v2  ;;  %v6884_v2 = vunpack.c.l.bf16 %v7142_v4 }
 0x1aa   :  { %8363 = vmatmul.mubr.msk.f32.gmra.mxu1 %vm85_vm0, %v10137_v29  ;;  %8423 = vmatprep.subr.mxu0 %v6897_v62 }
 0x1ab   :  { %8380 = vmatpush3.msra.mxu1 %v6892_v53  ;;  %8424 = vmatpush3.msra.mxu0 %v6897_v62  ;;  %v13518_v53 = vunpack.c.l.bf16 %v10303_v18  ;;  %v7152_v62 = vld [vmem:[%s13399_s2 + $0x138] sm:$0xff]  }
 0x1ac   :  { %6407 = vmatprep.mubr.msk.f32.mxu0 %vm947_vm1, %v13866_v56  ;;  %8381 = vmatprep.subr.mxu1 %v6889_v48  ;;  %v7141_v56 = vld [vmem:[%s13399_s2 + $0xa0] sm:$0xff]  }
 0x1ad   :  { %1595 = vmatmul.mubr.f32.gmra.mxu0 %v13520_v0  ;;  %8365 = vmatprep.mubr.msk.f32.mxu1 %vm85_vm0, %v10155_v3  ;;  %v6880_v4 = vunpack.c.l.bf16 %v7141_v56 }
 0x1ae   :  { %8382 = vmatpush3.msra.mxu1 %v6889_v48  ;;  %6408 = vmatprep.mubr.msk.f32.mxu0 %vm947_vm1, %v13519_v41  ;;  %v6881_v48 = vunpack.c.h.bf16 %v7141_v56 }
 0x1af   :  { %8366 = vmatmul.mubr.msk.f32.gmra.mxu1 %vm85_vm0, %v10165_v10  ;;  %8383 = vmatprep.subr.mxu1 %v6888_v42 }
 0x1b0   :  { %8384 = vmatpush3.msra.mxu1 %v6888_v42  ;;  %8425 = vmatprep.subr.mxu0 %v6896_v51  ;;  %v6925_v42 = vunpack.c.h.bf16 %v7152_v62 }
 0x1b1   :  { %1600 = vmatmul.mubr.f32.gmra.mxu0 %v13518_v53  ;;  %8368 = vmatprep.mubr.msk.f32.mxu1 %vm85_vm0, %v10186_v35 }
 0x1b2   :  { %8426 = vmatpush3.msra.mxu0 %v6896_v51  ;;  %8385 = vmatprep.subr.mxu1 %v6885_v12  ;;  %v7151_v51 = vld [vmem:[%s13399_s2 + $0x130] sm:$0xff]  }
 0x1b3   :  { %8369 = vmatmul.mubr.msk.f32.gmra.mxu1 %vm85_vm0, %v10199_v33  ;;  %8427 = vmatprep.mubr.msk.f32.mxu0 %vm85_vm0, %v10090_v5  ;;  %v6921_v56 = vunpack.c.h.bf16 %v7151_v51 }
 0x1b4   :  { %8386 = vmatpush3.msra.mxu1 %v6885_v12  ;;  %8371 = vmatprep.mubr.msk.f32.mxu1 %vm85_vm0, %v10219_v16  ;;  %v6924_v12 = vunpack.c.l.bf16 %v7152_v62 }
 0x1b5   :  { %8387 = vmatprep.subr.mxu1 %v6884_v2  ;;  %8428 = vmatmul.mubr.msk.f32.vlgmr.msra.gmra.mxu0 %vm85_vm0, %v10108_v25 }
 0x1b6   :  { %8388 = vmatpush3.msra.mxu1 %v6884_v2  ;;  %8430 = vmatprep.mubr.msk.f32.mxu0 %vm85_vm0, %v10119_v6  ;;  %v7150_v2 = vld [vmem:[%s13399_s2 + $0x128] sm:$0xff]  }
 0x1b7   :  { %8372 = vmatmul.mubr.msk.f32.gmra.mxu1 %vm85_vm0, %v10238_v8  ;;  %8389 = vmatprep.subr.mxu1 %v6881_v48  ;;  %v6917_v62 = vunpack.c.h.bf16 %v7150_v2 }
 0x1b8   :  { %8374 = vmatprep.mubr.msk.f32.mxu1 %vm85_vm0, %v10263_v38  ;;  %8390 = vmatpush3.msra.mxu1 %v6881_v48  ;;  %v6920_v48 = vunpack.c.l.bf16 %v7151_v51 }
 0x1b9   :  { %8431 = vmatmul.mubr.msk.f32.gmra.mxu0 %vm85_vm0, %v10137_v29  ;;  %8391 = vmatprep.subr.mxu1 %v6880_v4 }
 0x1ba   :  { %8392 = vmatpush3.msra.mxu1 %v6880_v4  ;;  %8433 = vmatprep.mubr.msk.f32.mxu0 %vm85_vm0, %v10155_v3  ;;  %v7149_v4 = vld [vmem:[%s13399_s2 + $0x120] sm:$0xff]  }
 0x1bb   :  { %8375 = vmatmul.mubr.msk.f32.gmra.mxu1 %vm85_vm0, %v10271_v31  ;;  %8445 = vmatprep.subr.mxu1 %v6925_v42  ;;  %v6913_v51 = vunpack.c.h.bf16 %v7149_v4 }
 0x1bc   :  { %8393 = vmatprep.mubr.msk.f32.mxu1 %vm85_vm0, %v10090_v5 }
 0x1bd   :  { %8434 = vmatmul.mubr.msk.f32.gmra.mxu0 %vm85_vm0, %v10165_v10 }
 0x1be   :  { %8436 = vmatprep.mubr.msk.f32.mxu0 %vm85_vm0, %v10186_v35 }
 0x1bf   :  { %8394 = vmatmul.mubr.msk.f32.vlgmr.msra.gmra.mxu1 %vm85_vm0, %v10108_v25 }
 0x1c0   :  { %8446 = vmatpush3.msra.mxu1 %v6925_v42  ;;  %8396 = vmatprep.mubr.msk.f32.mxu1 %vm85_vm0, %v10119_v6  ;;  %v6916_v42 = vunpack.c.l.bf16 %v7150_v2  ;;  %v13868_v2 = vmov 0.0  }
 0x1c1   :  { %8437 = vmatmul.mubr.msk.f32.gmra.mxu0 %vm85_vm0, %v10199_v33  ;;  %8447 = vmatprep.subr.mxu1 %v6924_v12 }
 0x1c2   :  { %8448 = vmatpush3.msra.mxu1 %v6924_v12  ;;  %8439 = vmatprep.mubr.msk.f32.mxu0 %vm85_vm0, %v10219_v16  ;;  %v6912_v12 = vunpack.c.l.bf16 %v7149_v4 }
 0x1c3   :  { %8397 = vmatmul.mubr.msk.f32.gmra.mxu1 %vm85_vm0, %v10137_v29  ;;  %8449 = vmatprep.subr.mxu1 %v6921_v56 }
 0x1c4   :  { %8399 = vmatprep.mubr.msk.f32.mxu1 %vm85_vm0, %v10155_v3  ;;  %8450 = vmatpush3.msra.mxu1 %v6921_v56  ;;  %v13867_v56 = vunpack.c.h.bf16 %v9295_v9 }
 0x1c5   :  { %8440 = vmatmul.mubr.msk.f32.gmra.mxu0 %vm85_vm0, %v10238_v8  ;;  %8451 = vmatprep.subr.mxu1 %v6920_v48 }
 0x1c6   :  { %8442 = vmatprep.mubr.msk.f32.mxu0 %vm85_vm0, %v10263_v38  ;;  %8452 = vmatpush3.msra.mxu1 %v6920_v48 }
 0x1c7   :  { %8400 = vmatmul.mubr.msk.f32.gmra.mxu1 %vm85_vm0, %v10165_v10  ;;  %8453 = vmatprep.subr.mxu1 %v6917_v62 }
 0x1c8   :  { %8402 = vmatprep.mubr.msk.f32.mxu1 %vm85_vm0, %v10186_v35  ;;  %8454 = vmatpush3.msra.mxu1 %v6917_v62 }
 0x1c9   :  { %8443 = vmatmul.mubr.msk.f32.gmra.mxu0 %vm85_vm0, %v10271_v31  ;;  %8455 = vmatprep.subr.mxu1 %v6916_v42 }
 0x1ca   :  { %8456 = vmatpush3.msra.mxu1 %v6916_v42  ;;  %2403 = vmatprep.mubr.f32.mxu0 %v13867_v56  ;;  %v10437_v56 = vpop.permute.xlu0 %889 }
 0x1cb   :  { %8403 = vmatmul.mubr.msk.f32.gmra.mxu1 %vm85_vm0, %v10199_v33  ;;  %8457 = vmatprep.subr.mxu1 %v6913_v51  ;;  %13870 = vst [vmem:[#allocation47_spill] sm:$0xff] %v10437_v56 }
 0x1cc   :  { %8405 = vmatprep.mubr.msk.f32.mxu1 %vm85_vm0, %v10219_v16  ;;  %8458 = vmatpush3.msra.mxu1 %v6913_v51 }
 0x1cd   :  { %8459 = vmatprep.subr.mxu1 %v6912_v12 }
 0x1ce   :  { %8460 = vmatpush3.msra.mxu1 %v6912_v12  ;;  %v10440_v18 = vpop.permute.xlu0 %894 }
 0x1cf   :  { %8406 = vmatmul.mubr.msk.f32.gmra.mxu1 %vm85_vm0, %v10238_v8  ;;  %2464 = vmatprep.subr.mxu1 %v13868_v2  ;;  %13871 = vst [vmem:[#allocation48_spill] sm:$0xff] %v10440_v18 }
 0x1d0   :  { %8408 = vmatprep.mubr.msk.f32.mxu1 %vm85_vm0, %v10263_v38 }
 0x1d3   :  { %8409 = vmatmul.mubr.msk.f32.gmra.mxu1 %vm85_vm0, %v10271_v31 }
 0x1d4   :  { %8461 = vmatprep.mubr.msk.f32.mxu1 %vm85_vm0, %v10090_v5 }
 0x1d7   :  { %8462 = vmatmul.mubr.msk.f32.vlgmr.msra.gmra.mxu1 %vm85_vm0, %v10108_v25 }
 0x1d8   :  { %8464 = vmatprep.mubr.msk.f32.mxu1 %vm85_vm0, %v10119_v6 }
 0x1db   :  { %8465 = vmatmul.mubr.msk.f32.gmra.mxu1 %vm85_vm0, %v10137_v29 }
 0x1dc   :  { %8467 = vmatprep.mubr.msk.f32.mxu1 %vm85_vm0, %v10155_v3  ;;  %v13869_v3 = vunpack.c.h.bf16 %v9303_v11 }
 0x1df   :  { %8468 = vmatmul.mubr.msk.f32.gmra.mxu1 %vm85_vm0, %v10165_v10  ;;  %v7328_v48 = vpop.f32.mrf.mxu1 }
 0x1e0   :  { %8470 = vmatprep.mubr.msk.f32.mxu1 %vm85_vm0, %v10186_v35 }
 0x1e1   :  { %v7329_v5 = vpop.f32.mrf.mxu1 }
 0x1e2   :  { %v7330_v12 = vadd.f32 %v7329_v5, %v7328_v48 }
 0x1e3   :  { %8471 = vmatmul.mubr.msk.f32.gmra.mxu1 %vm85_vm0, %v10199_v33 }
 0x1e4   :  { %8473 = vmatprep.mubr.msk.f32.mxu1 %vm85_vm0, %v10219_v16  ;;  %v7331_v25 = vpop.f32.mrf.mxu1 }
 0x1e6   :  { %v7332_v6 = vpop.f32.mrf.mxu1 }
 0x1e7   :  { %8474 = vmatmul.mubr.msk.f32.gmra.mxu1 %vm85_vm0, %v10238_v8  ;;  %v7333_v41 = vadd.f32 %v7332_v6, %v7331_v25 }
 0x1e8   :  { %8476 = vmatprep.mubr.msk.f32.mxu1 %vm85_vm0, %v10263_v38 }
 0x1e9   :  { %v7334_v29 = vpop.f32.mrf.mxu1  ;;  %v1056_v48 = vadd.f32 %v7333_v41, %v10440_v18 }
 0x1eb   :  { %8477 = vmatmul.mubr.msk.f32.gmra.mxu1 %vm85_vm0, %v10271_v31  ;;  %v7335_v35 = vpop.f32.mrf.mxu1  ;;  %v1051_v31 = vadd.f32 %v7330_v12, %v10437_v56 }
 0x1ec   :  { %6509 = vmatprep.mubr.msk.f32.mxu1 %vm947_vm1, %v13869_v3  ;;  %v7336_v59 = vadd.f32 %v7335_v35, %v7334_v29  ;;  %v10455_v35 = vpop.permute.xlu0 %909 }
 0x1ed   :  { %13874 = vst [vmem:[#allocation51_spill] sm:$0xff] %v10455_v35 }
 0x1ee   :  { %v7337_v33 = vpop.f32.mrf.mxu1  ;;  %v1061_v6 = vadd.f32 %v7336_v59, %v10444_v7 }
 0x1f0   :  { %v7338_v10 = vpop.f32.mrf.mxu1 }
 0x1f1   :  { %v7339_v12 = vadd.f32 %v7338_v10, %v7337_v33 }
 0x1f3   :  { %v7340_v16 = vpop.f32.mrf.mxu1  ;;  %v1066_v41 = vadd.f32 %v7339_v12, %v10450_v27 }
 0x1f5   :  { %v7341_v62 = vpop.f32.mrf.mxu1 }
 0x1f6   :  { %v7342_v54 = vadd.f32 %v7341_v62, %v7340_v16 }
 0x1f8   :  { %v7343_v4 = vpop.f32.mrf.mxu1  ;;  %v1071_v20 = vadd.f32 %v7342_v54, %v10455_v35 }
 0x1fa   :  { %v7344_v42 = vpop.f32.mrf.mxu1 }
 0x1fb   :  { %v7345_v10 = vadd.f32 %v7344_v42, %v7343_v4 }
 0x1fd   :  { %v7346_v51 = vpop.f32.mrf.mxu1 }
 0x1ff   :  { %v7347_v8 = vpop.f32.mrf.mxu1 }
 0x200   :  { %v7348_v61 = vadd.f32 %v7347_v8, %v7346_v51 }
 0x202   :  { %v7349_v38 = vpop.f32.mrf.mxu1  ;;  %v10460_v39 = vpop.permute.xlu1 %914 }
 0x203   :  { %13875 = vst [vmem:[#allocation52_spill] sm:$0xff] %v10460_v39  ;;  %v1076_v12 = vadd.f32 %v7345_v10, %v10460_v39 }
 0x204   :  { %v7350_v53 = vpop.f32.mrf.mxu1 }
 0x205   :  { %v7351_v54 = vadd.f32 %v7350_v53, %v7349_v38 }
 0x206   :  { %v1175_v0 = vpop.f32.mrf.mxu0 }
 0x207   :  { %v10442_v3 = vadd.f32 %v1175_v0, %v1051_v31  ;;  %v7352_v14 = vpop.f32.mrf.mxu1 }
 0x208   :  { %v1177_v17 = vpop.f32.mrf.mxu0 }
 0x209   :  { %v7353_v32 = vpop.f32.mrf.mxu1  ;;  %v1234_v13 = vmax.f32 %v10442_v3, 0.0 }
 0x20a   :  { %v7354_v8 = vadd.f32 %v7353_v32, %v7352_v14 }
 0x20b   :  { %v1180_v5 = vpop.f32.mrf.mxu0 }
 0x20c   :  { %v10447_v47 = vadd.f32 %v1180_v5, %v1056_v48  ;;  %v7355_v52 = vpop.f32.mrf.mxu1  ;;  %v10470_v19 = vpop.permute.xlu1 %924 }
 0x20d   :  { %v1182_v36 = vpop.f32.mrf.mxu0  ;;  %13877 = vst [vmem:[#allocation54_spill] sm:$0xff] %v10470_v19  ;;  %v1086_v51 = vadd.f32 %v7351_v54, %v10470_v19 }
 0x20e   :  { %v7356_v25 = vpop.f32.mrf.mxu1 }
 0x20f   :  { %v1185_v0 = vpop.f32.mrf.mxu0  ;;  %v7357_v46 = vadd.f32 %v7356_v25, %v7355_v52 }
 0x210   :  { %v10452_v31 = vadd.f32 %v1185_v0, %v1061_v6  ;;  %v7358_v17 = vpop.f32.mrf.mxu1 }
 0x211   :  { %v1187_v15 = vpop.f32.mrf.mxu0 }
 0x212   :  { %v7359_v29 = vpop.f32.mrf.mxu1 }
 0x213   :  { %v1190_v48 = vpop.f32.mrf.mxu0  ;;  %v7360_v32 = vadd.f32 %v7359_v29, %v7358_v17 }
 0x214   :  { %v10457_v5 = vadd.f32 %v1190_v48, %v1066_v41  ;;  %v7361_v36 = vpop.f32.mrf.mxu1  ;;  %v10465_v41 = vpop.permute.xlu0 %919 }
 0x215   :  { %v1192_v33 = vpop.f32.mrf.mxu0  ;;  %13876 = vst [vmem:[#allocation53_spill] sm:$0xff] %v10465_v41  ;;  %v1081_v44 = vadd.f32 %v7348_v61, %v10465_v41 }
 0x216   :  { %v7362_v59 = vpop.f32.mrf.mxu1 }
 0x217   :  { %v1195_v6 = vpop.f32.mrf.mxu0  ;;  %v7363_v25 = vadd.f32 %v7362_v59, %v7361_v36 }
 0x218   :  { %v10462_v0 = vadd.f32 %v1195_v6, %v1071_v20  ;;  %v7396_v15 = vpop.f32.mrf.mxu1 }
 0x219   :  { %v1197_v16 = vpop.f32.mrf.mxu0 }
 0x21a   :  { %v7397_v62 = vpop.f32.mrf.mxu1 }
 0x21b   :  { %v1200_v22 = vpop.f32.mrf.mxu0 }
 0x21c   :  { %v10467_v48 = vadd.f32 %v1200_v22, %v1076_v12  ;;  %v7399_v4 = vpop.f32.mrf.mxu1  ;;  %v10475_v22 = vpop.permute.xlu0 %929 }
 0x21d   :  { %v1202_v42 = vpop.f32.mrf.mxu0  ;;  %13878 = vst [vmem:[#allocation55_spill] sm:$0xff] %v10475_v22  ;;  %v1091_v61 = vadd.f32 %v7354_v8, %v10475_v22 }
 0x21e   :  { %v7400_v33 = vpop.f32.mrf.mxu1 }
 0x220   :  { %v1205_v20 = vpop.f32.mrf.mxu0  ;;  %v10485_v1 = vpop.permute.xlu0 %939 }
 0x221   :  { %v10472_v6 = vadd.f32 %v1205_v20, %v1081_v44  ;;  %v10480_v44 = vpop.permute.xlu1 %934  ;;  %13880 = vst [vmem:[#allocation57_spill] sm:$0xff] %v10485_v1  ;;  %v1101_v52 = vadd.f32 %v7360_v32, %v10485_v1  ;;  %v7398_v32 = vadd.f32 %v7397_v62, %v7396_v15 }
 0x222   :  { %v7402_v16 = vpop.f32.mrf.mxu1  ;;  %v1207_v49 = vpop.f32.mrf.mxu0  ;;  %13879 = vst [vmem:[#allocation56_spill] sm:$0xff] %v10480_v44  ;;  %v1096_v23 = vadd.f32 %v7357_v46, %v10480_v44 }
 0x224   :  { %v7403_v10 = vpop.f32.mrf.mxu1  ;;  %v1210_v24 = vpop.f32.mrf.mxu0 }
 0x225   :  { %v10477_v12 = vadd.f32 %v1210_v24, %v1086_v51  ;;  %v7404_v34 = vadd.f32 %v7403_v10, %v7402_v16 }
 0x226   :  { %v7405_v42 = vpop.f32.mrf.mxu1  ;;  %v1212_v53 = vpop.f32.mrf.mxu0 }
 0x228   :  { %v7406_v38 = vpop.f32.mrf.mxu1 }
 0x229   :  { %v1215_v60 = vpop.f32.mrf.mxu0 }
 0x22a   :  { %v10482_v20 = vadd.f32 %v1215_v60, %v1091_v61  ;;  %v7408_v49 = vpop.f32.mrf.mxu1  ;;  %v10490_v60 = vpop.permute.xlu1 %944 }
 0x22b   :  { %v1217_v54 = vpop.f32.mrf.mxu0  ;;  %13881 = vst [vmem:[#allocation58_spill] sm:$0xff] %v10490_v60  ;;  %v1106_v46 = vadd.f32 %v7363_v25, %v10490_v60  ;;  %v1422_v25 = vadd.f32 %v7398_v32, %v10437_v56  ;;  %v1432_v56 = vadd.f32 %v7404_v34, %v10444_v7 }
 0x22c   :  { %v7409_v14 = vpop.f32.mrf.mxu1 }
 0x22e   :  { %v1220_v24 = vpop.f32.mrf.mxu0 }
 0x22f   :  { %v10487_v51 = vadd.f32 %v1220_v24, %v1096_v23 }
 0x230   :  { %v7411_v53 = vpop.f32.mrf.mxu1  ;;  %v1222_v21 = vpop.f32.mrf.mxu0 }
 0x232   :  { %v7412_v8 = vpop.f32.mrf.mxu1  ;;  %v1225_v45 = vpop.f32.mrf.mxu0 }
 0x233   :  { %v10492_v61 = vadd.f32 %v1225_v45, %v1101_v52 }
 0x234   :  { %v7414_v54 = vpop.f32.mrf.mxu1  ;;  %v1227_v17 = vpop.f32.mrf.mxu0 }
 0x235   :  { %v7401_v17 = vadd.f32 %v7400_v33, %v7399_v4 }
 0x236   :  { %v7415_v29 = vpop.f32.mrf.mxu1 }
 0x237   :  { %v1230_v58 = vpop.f32.mrf.mxu0  ;;  %v1427_v15 = vadd.f32 %v7401_v17, %v10440_v18 }
 0x238   :  { %v10495_v28 = vadd.f32 %v1230_v58, %v1106_v46  ;;  %v10497_v23 = vpop.f32.mrf.mxu1 }
 0x239   :  { %v1232_v21 = vpop.f32.mrf.mxu0 }
 0x23a   :  { %v10499_v24 = vpop.f32.mrf.mxu1 }
 0x23c   :  { %v10501_v36 = vpop.f32.mrf.mxu1 }
 0x23e   :  { %v10503_v59 = vpop.f32.mrf.mxu1 }
 0x240   :  { %v10505_v45 = vpop.f32.mrf.mxu1 }
 0x242   :  { %v10507_v52 = vpop.f32.mrf.mxu1 }
 0x244   :  { %v1546_v63 = vpop.f32.mrf.mxu0  ;;  %v10510_v58 = vpop.f32.mrf.mxu1 }
 0x245   :  { %v1547_v46 = vadd.f32 %v1546_v63, %v1422_v25  ;;  %v1235_v63 = vmax.f32 %v10447_v47, 0.0 }
 0x246   :  { %v1548_v30 = vpop.f32.mrf.mxu0  ;;  %v10512_v21 = vpop.f32.mrf.mxu1 }
 0x247   :  { %v1605_v26 = vmax.f32 %v1547_v46, 0.0  ;;  %v7407_v30 = vadd.f32 %v7406_v38, %v7405_v42 }
 0x248   :  { %v1551_v62 = vpop.f32.mrf.mxu0  ;;  %v10516_v37 = vpop.f32.mrf.mxu1 }
 0x249   :  { %v10518_v11 = vmax.f32 %v1234_v13, %v1605_v26  ;;  %v1552_v4 = vadd.f32 %v1551_v62, %v1427_v15  ;;  %v1236_v26 = vmax.f32 %v10452_v31, 0.0  ;;  %v7410_v13 = vadd.f32 %v7409_v14, %v7408_v49 }
 0x24a   :  { %v1553_v33 = vpop.f32.mrf.mxu0  ;;  %v10520_v32 = vpop.f32.mrf.mxu1  ;;  %v1437_v62 = vadd.f32 %v7407_v30, %v10450_v27 }
 0x24b   :  { %13882 = vst [vmem:[#allocation59_spill] sm:$0xff] %v10518_v11  ;;  %v1606_v25 = vmax.f32 %v1552_v4, 0.0 }
 0x24c   :  { %v1556_v3 = vpop.f32.mrf.mxu0  ;;  %v10524_v16 = vpop.f32.mrf.mxu1 }
 0x24d   :  { %v10526_v10 = vmax.f32 %v1235_v63, %v1606_v25  ;;  %v1557_v17 = vadd.f32 %v1556_v3, %v1432_v56  ;;  %v1237_v56 = vmax.f32 %v10457_v5, 0.0  ;;  %v7413_v63 = vadd.f32 %v7412_v8, %v7411_v53 }
 0x24e   :  { %v1558_v46 = vpop.f32.mrf.mxu0  ;;  %v10528_v18 = vpop.f32.mrf.mxu1  ;;  %v1442_v3 = vadd.f32 %v7410_v13, %v10455_v35 }
 0x24f   :  { %13883 = vst [vmem:[#allocation60_spill] sm:$0xff] %v10526_v10  ;;  %v1607_v15 = vmax.f32 %v1557_v17, 0.0 }
 0x250   :  { %v1561_v47 = vpop.f32.mrf.mxu0  ;;  %v10532_v42 = vpop.f32.mrf.mxu1 }
 0x251   :  { %v10534_v38 = vmax.f32 %v1236_v26, %v1607_v15  ;;  %v1562_v34 = vadd.f32 %v1561_v47, %v1437_v62  ;;  %v1238_v26 = vmax.f32 %v10462_v0, 0.0  ;;  %v7416_v15 = vadd.f32 %v7415_v29, %v7414_v54 }
 0x252   :  { %v1563_v4 = vpop.f32.mrf.mxu0  ;;  %v10536_v33 = vpop.f32.mrf.mxu1  ;;  %v1447_v47 = vadd.f32 %v7413_v63, %v10460_v39 }
 0x253   :  { %13884 = vst [vmem:[#allocation61_spill] sm:$0xff] %v10534_v38  ;;  %v1608_v25 = vmax.f32 %v1562_v34, 0.0  ;;  %v1452_v0 = vadd.f32 %v7416_v15, %v10465_v41 }
 0x254   :  { %v1566_v31 = vpop.f32.mrf.mxu0  ;;  %v10540_v49 = vpop.f32.mrf.mxu1 }
 0x255   :  { %v10542_v14 = vmax.f32 %v1237_v56, %v1608_v25  ;;  %v1567_v30 = vadd.f32 %v1566_v31, %v1442_v3  ;;  %v1239_v56 = vmax.f32 %v10467_v48, 0.0  ;;  %v7419_v25 = vadd.f32 %v10499_v24, %v10497_v23 }
 0x256   :  { %v1568_v17 = vpop.f32.mrf.mxu0  ;;  %v10544_v46 = vpop.f32.mrf.mxu1  ;;  %v7422_v23 = vadd.f32 %v10503_v59, %v10501_v36 }
 0x257   :  { %13885 = vst [vmem:[#allocation62_spill] sm:$0xff] %v10542_v14  ;;  %v1609_v62 = vmax.f32 %v1567_v30, 0.0  ;;  %v1240_v17 = vmax.f32 %v10472_v6, 0.0  ;;  %v1457_v48 = vadd.f32 %v7419_v25, %v10470_v19  ;;  %v7425_v6 = vadd.f32 %v10507_v52, %v10505_v45 }
 0x258   :  { %v1571_v5 = vpop.f32.mrf.mxu0  ;;  %v10548_v53 = vpop.f32.mrf.mxu1  ;;  %v1462_v25 = vadd.f32 %v7422_v23, %v10475_v22 }
 0x259   :  { %v10550_v8 = vmax.f32 %v1238_v26, %v1609_v62  ;;  %v1572_v13 = vadd.f32 %v1571_v5, %v1447_v47  ;;  %v1467_v45 = vadd.f32 %v7425_v6, %v10480_v44 }
 0x25a   :  { %v1573_v34 = vpop.f32.mrf.mxu0  ;;  %v10552_v4 = vpop.f32.mrf.mxu1 }
 0x25b   :  { %13886 = vst [vmem:[#allocation63_spill] sm:$0xff] %v10550_v8  ;;  %v1610_v3 = vmax.f32 %v1572_v13, 0.0  ;;  %v1241_v34 = vmax.f32 %v10477_v12, 0.0  ;;  %v7428_v12 = vadd.f32 %v10512_v21, %v10510_v58 }
 0x25c   :  { %v1576_v54 = vpop.f32.mrf.mxu0 }
 0x25d   :  { %v10558_v29 = vmax.f32 %v1239_v56, %v1610_v3  ;;  %v1577_v63 = vadd.f32 %v1576_v54, %v1452_v0  ;;  %v10560_v31 = vpop.f32.mrf.mxu1  ;;  %v1472_v58 = vadd.f32 %v7428_v12, %v10485_v1 }
 0x25e   :  { %v1578_v30 = vpop.f32.mrf.mxu0 }
 0x25f   :  { %13887 = vst [vmem:[#allocation64_spill] sm:$0xff] %v10558_v29  ;;  %v1611_v26 = vmax.f32 %v1577_v63, 0.0  ;;  %v10563_v62 = vpop.f32.mrf.mxu1  ;;  %v1242_v30 = vmax.f32 %v10482_v20, 0.0  ;;  %v7431_v20 = vadd.f32 %v10520_v32, %v10516_v37 }
 0x260   :  { %v1581_v24 = vpop.f32.mrf.mxu0 }
 0x261   :  { %v10568_v47 = vmax.f32 %v1240_v17, %v1611_v26  ;;  %v1582_v15 = vadd.f32 %v1581_v24, %v1457_v48 }
 0x262   :  { %v10570_v5 = vpop.f32.mrf.mxu1  ;;  %v1583_v13 = vpop.f32.mrf.mxu0 }
 0x263   :  { %13888 = vst [vmem:[#allocation65_spill] sm:$0xff] %v10568_v47  ;;  %v1612_v56 = vmax.f32 %v1582_v15, 0.0  ;;  %v1243_v13 = vmax.f32 %v10487_v51, 0.0  ;;  %v1477_v51 = vadd.f32 %v7431_v20, %v10490_v60 }
 0x264   :  { %v10575_v3 = vpop.f32.mrf.mxu1 }
 0x265   :  { %v10578_v0 = vmax.f32 %v1241_v34, %v1612_v56  ;;  %v1586_v36 = vpop.f32.mrf.mxu0 }
 0x266   :  { %v1587_v59 = vadd.f32 %v1586_v36, %v1462_v25  ;;  %v10580_v54 = vpop.f32.mrf.mxu1 }
 0x267   :  { %13889 = vst [vmem:[#allocation66_spill] sm:$0xff] %v10578_v0  ;;  %v1588_v63 = vpop.f32.mrf.mxu0 }
 0x268   :  { %v1613_v17 = vmax.f32 %v1587_v59, 0.0  ;;  %v10585_v26 = vpop.f32.mrf.mxu1  ;;  %v1244_v63 = vmax.f32 %v10492_v61, 0.0 }
 0x269   :  { %v1591_v52 = vpop.f32.mrf.mxu0 }
 0x26a   :  { %v10588_v48 = vmax.f32 %v1242_v30, %v1613_v17  ;;  %v1592_v23 = vadd.f32 %v1591_v52, %v1467_v45  ;;  %v10590_v24 = vpop.f32.mrf.mxu1 }
 0x26b   :  { %v1593_v15 = vpop.f32.mrf.mxu0 }
 0x26c   :  { %13890 = vst [vmem:[#allocation67_spill] sm:$0xff] %v10588_v48  ;;  %v1614_v34 = vmax.f32 %v1592_v23, 0.0  ;;  %v10595_v56 = vpop.f32.mrf.mxu1  ;;  %v1245_v23 = vmax.f32 %v10495_v28, 0.0 }
 0x26d   :  { %v1596_v21 = vpop.f32.mrf.mxu0 }
 0x26e   :  { %v10598_v25 = vmax.f32 %v1243_v13, %v1614_v34  ;;  %v1597_v6 = vadd.f32 %v1596_v21, %v1472_v58 }
 0x26f   :  { %v10600_v36 = vpop.f32.mrf.mxu1  ;;  %v1598_v59 = vpop.f32.mrf.mxu0 }
 0x270   :  { %13891 = vst [vmem:[#allocation68_spill] sm:$0xff] %v10598_v25  ;;  %v1615_v30 = vmax.f32 %v1597_v6, 0.0 }
 0x271   :  { %v10604_v17 = vpop.f32.mrf.mxu1  ;;  %v1601_v37 = vpop.f32.mrf.mxu0 }
 0x272   :  { %v10606_v32 = vmax.f32 %v1244_v63, %v1615_v30  ;;  %v1602_v45 = vadd.f32 %v1601_v37, %v1477_v51 }
 0x273   :  { %v10608_v52 = vpop.f32.mrf.mxu1  ;;  %v1603_v12 = vpop.f32.mrf.mxu0 }
 0x274   :  { %13892 = vst [vmem:[#allocation69_spill] sm:$0xff] %v10606_v32  ;;  %v1616_v15 = vmax.f32 %v1602_v45, 0.0 }
 0x275   :  { %v10611_v13 = vpop.f32.mrf.mxu1  ;;  %v10613_v34 = vpop.f32.mrf.mxu0 }
 0x276   :  { %v10615_v61 = vmax.f32 %v1245_v23, %v1616_v15 }
 0x277   :  { %v10617_v58 = vpop.f32.mrf.mxu1  ;;  %v10619_v20 = vpop.f32.mrf.mxu0 }
 0x278   :  { %13893 = vst [vmem:[#allocation70_spill] sm:$0xff] %v10615_v61 }
 0x279   :  { %v10621_v21 = vpop.f32.mrf.mxu1  ;;  %v10623_v6 = vpop.f32.mrf.mxu0 }
 0x27b   :  { %v10625_v59 = vpop.f32.mrf.mxu1  ;;  %v10627_v63 = vpop.f32.mrf.mxu0 }
 0x27d   :  { %v10629_v28 = vpop.f32.mrf.mxu1  ;;  %v10631_v30 = vpop.f32.mrf.mxu0 }
 0x27f   :  { %v10633_v51 = vpop.f32.mrf.mxu1  ;;  %v10635_v37 = vpop.f32.mrf.mxu0 }
 0x281   :  { %v10637_v45 = vpop.f32.mrf.mxu1  ;;  %v10639_v12 = vpop.f32.mrf.mxu0 }
 0x283   :  { %v10641_v23 = vpop.f32.mrf.mxu1  ;;  %v10643_v15 = vpop.f32.mrf.mxu0 }
 0x285   :  { %v10645_v61 = vpop.f32.mrf.mxu1  ;;  %v10647_v32 = vpop.f32.mrf.mxu0 }
 0x287   :  { %v10649_v25 = vpop.f32.mrf.mxu1  ;;  %v10651_v48 = vpop.f32.mrf.mxu0 }
 0x289   :  { %v10653_v60 = vpop.f32.mrf.mxu1  ;;  %v10655_v1 = vpop.f32.mrf.mxu0 }
 0x28a   :  { %2465 = vmatpush1.msra.mxu1 %v10655_v1 }
 0x28b   :  { %v10658_v0 = vpop.f32.mrf.mxu1  ;;  %v10660_v44 = vpop.f32.mrf.mxu0  ;;  %2466 = vmatprep.subr.mxu1 %v13868_v2 }
 0x28c   :  { %7532 = vmatprep.subr.mxu0 %v10658_v0  ;;  %2467 = vmatpush1.msra.mxu1 %v10660_v44 }
 0x28d   :  { %v10665_v47 = vpop.f32.mrf.mxu1  ;;  %7533 = vmatpush3.msra.mxu0 %v10590_v24  ;;  %2468 = vmatprep.subr.mxu1 %v13868_v2 }
 0x28e   :  { %7534 = vmatprep.subr.mxu0 %v10665_v47  ;;  %2469 = vmatpush1.msra.mxu1 %v10647_v32 }
 0x28f   :  { %v10671_v29 = vpop.f32.mrf.mxu1  ;;  %7535 = vmatpush3.msra.mxu0 %v10595_v56  ;;  %2470 = vmatprep.subr.mxu1 %v13868_v2 }
 0x290   :  { %13894 = vst [vmem:[#allocation71_spill] sm:$0xff] %v10671_v29  ;;  %7536 = vmatprep.subr.mxu0 %v10649_v25  ;;  %2471 = vmatpush1.msra.mxu1 %v10651_v48 }
 0x291   :  { %v10677_v22 = vpop.f32.mrf.mxu1  ;;  %7537 = vmatpush3.msra.mxu0 %v10580_v54  ;;  %2472 = vmatprep.subr.mxu1 %v13868_v2 }
 0x292   :  { %13895 = vst [vmem:[#allocation72_spill] sm:$0xff] %v10677_v22  ;;  %7538 = vmatprep.subr.mxu0 %v10653_v60  ;;  %2473 = vmatpush1.msra.mxu1 %v10639_v12 }
 0x293   :  { %v10683_v19 = vpop.f32.mrf.mxu1  ;;  %7539 = vmatpush3.msra.mxu0 %v10585_v26  ;;  %2474 = vmatprep.subr.mxu1 %v13868_v2 }
 0x294   :  { %13896 = vst [vmem:[#allocation73_spill] sm:$0xff] %v10683_v19  ;;  %7540 = vmatprep.subr.mxu0 %v10641_v23  ;;  %2475 = vmatpush1.msra.mxu1 %v10643_v15 }
 0x295   :  { %v10689_v8 = vpop.f32.mrf.mxu1  ;;  %7541 = vmatpush3.msra.mxu0 %v10570_v5  ;;  %2476 = vmatprep.subr.mxu1 %v13868_v2 }
 0x296   :  { %13897 = vst [vmem:[#allocation74_spill] sm:$0xff] %v10689_v8  ;;  %7542 = vmatprep.subr.mxu0 %v10645_v61  ;;  %2477 = vmatpush1.msra.mxu1 %v10631_v30 }
 0x297   :  { %v10695_v41 = vpop.f32.mrf.mxu1  ;;  %7543 = vmatpush3.msra.mxu0 %v10575_v3  ;;  %2478 = vmatprep.subr.mxu1 %v13868_v2 }
 0x298   :  { %7544 = vmatprep.subr.mxu0 %v10633_v51  ;;  %2479 = vmatpush1.msra.mxu1 %v10635_v37 }
 0x299   :  { %v10701_v14 = vpop.f32.mrf.mxu1  ;;  %7545 = vmatpush3.msra.mxu0 %v10560_v31  ;;  %2480 = vmatprep.subr.mxu1 %v13868_v2 }
 0x29a   :  { %7546 = vmatprep.subr.mxu0 %v10637_v45  ;;  %2481 = vmatpush1.msra.mxu1 %v10623_v6 }
 0x29b   :  { %v10707_v38 = vpop.f32.mrf.mxu1  ;;  %7547 = vmatpush3.msra.mxu0 %v10563_v62  ;;  %2482 = vmatprep.subr.mxu1 %v13868_v2 }
 0x29c   :  { %7548 = vmatprep.subr.mxu0 %v10625_v59  ;;  %2483 = vmatpush1.msra.mxu1 %v10627_v63 }
 0x29d   :  { %v10713_v39 = vpop.f32.mrf.mxu1  ;;  %7549 = vmatpush3.msra.mxu0 %v10548_v53  ;;  %2484 = vmatprep.subr.mxu1 %v13868_v2 }
 0x29e   :  { %7550 = vmatprep.subr.mxu0 %v10629_v28  ;;  %2485 = vmatpush1.msra.mxu1 %v10613_v34 }
 0x29f   :  { %v10719_v35 = vpop.f32.mrf.mxu1  ;;  %7551 = vmatpush3.msra.mxu0 %v10552_v4  ;;  %2486 = vmatprep.subr.mxu1 %v13868_v2 }
 0x2a0   :  { %7552 = vmatprep.subr.mxu0 %v10617_v58  ;;  %2487 = vmatpush1.msra.mxu1 %v10619_v20 }
 0x2a1   :  { %v10725_v10 = vpop.f32.mrf.mxu1  ;;  %7553 = vmatpush3.msra.mxu0 %v10540_v49  ;;  %2488 = vmatprep.subr.mxu1 %v13868_v2 }
 0x2a2   :  { %7554 = vmatprep.subr.mxu0 %v10621_v21  ;;  %2489 = vmatpush1.msra.mxu1 %v10683_v19 }
 0x2a3   :  { %v10731_v27 = vpop.f32.mrf.mxu1  ;;  %7555 = vmatpush3.msra.mxu0 %v10544_v46  ;;  %2490 = vmatprep.subr.mxu1 %v13868_v2 }
 0x2a4   :  { %7556 = vmatprep.subr.mxu0 %v10608_v52  ;;  %2491 = vmatpush1.msra.mxu1 %v10689_v8 }
 0x2a5   :  { %v10737_v11 = vpop.f32.mrf.mxu1  ;;  %7557 = vmatpush3.msra.mxu0 %v10532_v42  ;;  %2492 = vmatprep.subr.mxu1 %v13868_v2 }
 0x2a6   :  { %7558 = vmatprep.subr.mxu0 %v10611_v13  ;;  %2493 = vmatpush1.msra.mxu1 %v10671_v29 }
 0x2a7   :  { %v10743_v7 = vpop.f32.mrf.mxu1  ;;  %7559 = vmatpush3.msra.mxu0 %v10536_v33  ;;  %2494 = vmatprep.subr.mxu1 %v13868_v2 }
 0x2a8   :  { %7560 = vmatprep.subr.mxu0 %v10600_v36  ;;  %2495 = vmatpush1.msra.mxu1 %v10677_v22  ;;  %v13899_v22 = vunpack.c.l.bf16 %v9295_v9  ;;  %v13901_v9 = vunpack.c.l.bf16 %v9490_v57 }
 0x2a9   :  { %v10749_v8 = vpop.f32.mrf.mxu1  ;;  %7561 = vmatpush3.msra.mxu0 %v10524_v16  ;;  %2504 = vmatprep.subr.mxu1 %v13868_v2 }
 0x2aa   :  { %7562 = vmatprep.subr.mxu0 %v10604_v17 }
 0x2ab   :  { %v10754_v19 = vpop.f32.mrf.mxu1  ;;  %7563 = vmatpush3.msra.mxu0 %v10528_v18 }
 0x2ac   :  { %13898 = vst [vmem:[#allocation75_spill] sm:$0xff] %v10754_v19  ;;  %2505 = vmatpush2.msra.mxu1 %v10754_v19  ;;  %7600 = vmatprep.subr.mxu0 %v10658_v0  ;;  %v13900_v19 = vunpack.c.h.bf16 %v9490_v57  ;;  %v13903_v57 = vunpack.c.l.bf16 %v9512_v40 }
 0x2ad   :  { %v10759_v29 = vpop.f32.mrf.mxu1  ;;  %2404 = vmatmul.mubr.f32.vlgmr.msra.gmra.mxu0 %v13899_v22  ;;  %2506 = vmatprep.subr.mxu1 %v13868_v2  ;;  %v13904_v22 = vunpack.c.h.bf16 %v9533_v55 }
 0x2ae   :  { %7601 = vmatpush3.msra.mxu0 %v10590_v24  ;;  %2507 = vmatpush2.msra.mxu1 %v10759_v29  ;;  %v13927_v24 = vld [vmem:[#allocation15_spill] sm:$0xff] }
 0x2af   :  { %7602 = vmatprep.subr.mxu0 %v10665_v47  ;;  %2508 = vmatprep.subr.mxu1 %v13868_v2 }
 0x2b0   :  { %7603 = vmatpush3.msra.mxu0 %v10595_v56  ;;  %2408 = vmatprep.mubr.f32.mxu0 %v13900_v19  ;;  %v13902_v19 = vunpack.c.h.bf16 %v9512_v40  ;;  %v13905_v40 = vunpack.c.l.bf16 %v9533_v55  ;;  %v13907_v55 = vunpack.c.l.bf16 %v9554_v50  ;;  %v13928_v56 = vunpack.c.h.bf16 %v13927_v24 }
 0x2b1   :  { %2509 = vmatpush2.msra.mxu1 %v10743_v7  ;;  %7604 = vmatprep.subr.mxu0 %v10649_v25 }
 0x2b2   :  { %2409 = vmatmul.mubr.f32.gmra.mxu0 %v13901_v9  ;;  %2510 = vmatprep.subr.mxu1 %v13868_v2  ;;  %v13952_v9 = vld [vmem:[#allocation23_spill] sm:$0xff] }
 0x2b3   :  { %7605 = vmatpush3.msra.mxu0 %v10580_v54  ;;  %2511 = vmatpush2.msra.mxu1 %v10749_v8  ;;  %v13924_v54 = vld [vmem:[#allocation10_spill] sm:$0xff] }
 0x2b4   :  { %7606 = vmatprep.subr.mxu0 %v10653_v60  ;;  %2512 = vmatprep.subr.mxu1 %v13868_v2  ;;  %v13906_v60 = vunpack.c.h.bf16 %v9554_v50  ;;  %v13909_v50 = vunpack.c.l.bf16 %v9573_v43 }
 0x2b5   :  { %7607 = vmatpush3.msra.mxu0 %v10585_v26  ;;  %2413 = vmatprep.mubr.f32.mxu0 %v13902_v19  ;;  %v13925_v26 = vunpack.c.h.bf16 %v13924_v54  ;;  %v13953_v19 = vunpack.c.h.bf16 %v13952_v9 }
 0x2b6   :  { %2513 = vmatpush2.msra.mxu1 %v10731_v27  ;;  %7608 = vmatprep.subr.mxu0 %v10641_v23 }
 0x2b7   :  { %2414 = vmatmul.mubr.f32.gmra.mxu0 %v13903_v57  ;;  %2514 = vmatprep.subr.mxu1 %v13868_v2  ;;  %v13955_v57 = vunpack.c.l.bf16 %v13952_v9  ;;  %v14006_v9 = vld [vmem:[#allocation34_spill] sm:$0xff] }
 0x2b8   :  { %7609 = vmatpush3.msra.mxu0 %v10570_v5  ;;  %2515 = vmatpush2.msra.mxu1 %v10737_v11 }
 0x2b9   :  { %7610 = vmatprep.subr.mxu0 %v10645_v61  ;;  %2516 = vmatprep.subr.mxu1 %v13868_v2 }
 0x2ba   :  { %7611 = vmatpush3.msra.mxu0 %v10575_v3  ;;  %2418 = vmatprep.mubr.f32.mxu0 %v13904_v22  ;;  %v13956_v22 = vld [vmem:[#allocation20_spill] sm:$0xff] }
 0x2bb   :  { %2517 = vmatpush2.msra.mxu1 %v10719_v35  ;;  %7612 = vmatprep.subr.mxu0 %v10633_v51 }
 0x2bc   :  { %2419 = vmatmul.mubr.f32.gmra.mxu0 %v13905_v40  ;;  %2518 = vmatprep.subr.mxu1 %v13868_v2  ;;  %v13957_v40 = vunpack.c.h.bf16 %v13956_v22 }
 0x2bd   :  { %7613 = vmatpush3.msra.mxu0 %v10560_v31  ;;  %2519 = vmatpush2.msra.mxu1 %v10725_v10  ;;  %v13908_v31 = vunpack.c.h.bf16 %v9573_v43 }
 0x2be   :  { %7614 = vmatprep.subr.mxu0 %v10637_v45  ;;  %2520 = vmatprep.subr.mxu1 %v13868_v2 }
 0x2bf   :  { %7615 = vmatpush3.msra.mxu0 %v10563_v62  ;;  %2423 = vmatprep.mubr.f32.mxu0 %v13906_v60  ;;  %v13912_v62 = vld [vmem:[#allocation8_spill] sm:$0xff]  ;;  %v13958_v60 = vld [vmem:[#allocation71_spill] sm:$0xff] }
 0x2c0   :  { %2521 = vmatpush2.msra.mxu1 %v10707_v38  ;;  %7616 = vmatprep.subr.mxu0 %v10625_v59  ;;  %v13913_v47 = vunpack.c.h.bf16 %v13912_v62  ;;  %v13914_v43 = vunpack.c.l.bf16 %v13912_v62  ;;  %v13964_v62 = vld [vmem:[#allocation22_spill] sm:$0xff] }
 0x2c1   :  { %2424 = vmatmul.mubr.f32.gmra.mxu0 %v13907_v55  ;;  %2522 = vmatprep.subr.mxu1 %v13868_v2  ;;  %v13959_v55 = vunpack.c.l.bf16 %v13956_v22 }
 0x2c2   :  { %7617 = vmatpush3.msra.mxu0 %v10548_v53  ;;  %2523 = vmatpush2.msra.mxu1 %v10713_v39  ;;  %v13910_v53 = vld [vmem:[#allocation5_spill] sm:$0xff] }
 0x2c3   :  { %7618 = vmatprep.subr.mxu0 %v10629_v28  ;;  %2524 = vmatprep.subr.mxu1 %v13868_v2 }
 0x2c4   :  { %7619 = vmatpush3.msra.mxu0 %v10552_v4  ;;  %2428 = vmatprep.mubr.f32.mxu0 %v13908_v31  ;;  %v13911_v4 = vunpack.c.l.bf16 %v13910_v53  ;;  %v13960_v31 = vld [vmem:[#allocation7_spill] sm:$0xff]  ;;  %v13962_v53 = vld [vmem:[#allocation72_spill] sm:$0xff] }
 0x2c5   :  { %2525 = vmatpush2.msra.mxu1 %v10695_v41  ;;  %7620 = vmatprep.subr.mxu0 %v10617_v58 }
 0x2c6   :  { %2429 = vmatmul.mubr.f32.gmra.mxu0 %v13909_v50  ;;  %2526 = vmatprep.subr.mxu1 %v13868_v2  ;;  %v13961_v50 = vunpack.c.h.bf16 %v13960_v31 }
 0x2c7   :  { %7621 = vmatpush3.msra.mxu0 %v10540_v49  ;;  %2527 = vmatpush2.msra.mxu1 %v10701_v14  ;;  %v13915_v49 = vld [vmem:[#allocation11_spill] sm:$0xff] }
 0x2c8   :  { %7622 = vmatprep.subr.mxu0 %v10621_v21  ;;  %2529 = vmatmul.mubr.f32.vlgmr.msra.gmra.mxu1 %v13911_v4  ;;  %v13916_v5 = vunpack.c.h.bf16 %v13915_v49  ;;  %v13939_v21 = vld [vmem:[#allocation19_spill] sm:$0xff]  ;;  %v13963_v4 = vunpack.c.l.bf16 %v13960_v31 }
 0x2c9   :  { %7623 = vmatpush3.msra.mxu0 %v10544_v46  ;;  %2738 = vmatprep.subr.mxu1 %v13868_v2  ;;  %v13917_v46 = vunpack.c.l.bf16 %v13915_v49  ;;  %v13940_v59 = vunpack.c.h.bf16 %v13939_v21  ;;  %v13941_v28 = vunpack.c.l.bf16 %v13939_v21  ;;  %v13967_v49 = vunpack.c.l.bf16 %v13964_v62 }
 0x2ca   :  { %2433 = vmatprep.mubr.f32.mxu0 %v13913_v47  ;;  %7624 = vmatprep.subr.mxu0 %v10608_v52  ;;  %v13965_v47 = vunpack.c.h.bf16 %v13964_v62 }
 0x2cb   :  { %2739 = vmatpush1.msra.mxu1 %v10655_v1  ;;  %2434 = vmatmul.mubr.f32.gmra.mxu0 %v13914_v43  ;;  %v13918_v1 = vld [vmem:[#allocation9_spill] sm:$0xff]  ;;  %v13966_v43 = vld [vmem:[#allocation75_spill] sm:$0xff] }
 0x2cc   :  { %7625 = vmatpush3.msra.mxu0 %v10532_v42  ;;  %2740 = vmatprep.subr.mxu1 %v13868_v2  ;;  %v13919_v3 = vunpack.c.h.bf16 %v13918_v1  ;;  %v13920_v42 = vunpack.c.l.bf16 %v13918_v1 }
 0x2cd   :  { %6510 = vmatprep.mubr.msk.f32.mxu1 %vm947_vm1, %v13916_v5  ;;  %7626 = vmatprep.subr.mxu0 %v10611_v13  ;;  %v13936_v13 = vld [vmem:[#allocation14_spill] sm:$0xff]  ;;  %v13968_v5 = vld [vmem:[#allocation25_spill] sm:$0xff] }
 0x2ce   :  { %2741 = vmatpush1.msra.mxu1 %v10660_v44  ;;  %7627 = vmatpush3.msra.mxu0 %v10536_v33  ;;  %v13921_v44 = vld [vmem:[#allocation13_spill] sm:$0xff]  ;;  %v13937_v61 = vunpack.c.h.bf16 %v13936_v13  ;;  %v13938_v58 = vunpack.c.l.bf16 %v13936_v13  ;;  %v13970_v1 = vunpack.c.l.bf16 %v13968_v5 }
 0x2cf   :  { %2534 = vmatmul.mubr.f32.gmra.mxu1 %v13917_v46  ;;  %2742 = vmatprep.subr.mxu1 %v13868_v2  ;;  %v13922_v33 = vunpack.c.h.bf16 %v13921_v44  ;;  %v13923_v0 = vunpack.c.l.bf16 %v13921_v44  ;;  %v13969_v46 = vunpack.c.h.bf16 %v13968_v5 }
 0x2d0   :  { %2438 = vmatprep.mubr.f32.mxu0 %v13919_v3  ;;  %7628 = vmatprep.subr.mxu0 %v10600_v36  ;;  %v13971_v3 = vld [vmem:[#allocation6_spill] sm:$0xff] }
 0x2d1   :  { %2743 = vmatpush1.msra.mxu1 %v10647_v32  ;;  %2439 = vmatmul.mubr.f32.gmra.mxu0 %v13920_v42  ;;  %v13972_v42 = vunpack.c.h.bf16 %v13971_v3  ;;  %v13973_v44 = vunpack.c.l.bf16 %v13971_v3 }
 0x2d2   :  { %7629 = vmatpush3.msra.mxu0 %v10524_v16  ;;  %2744 = vmatprep.subr.mxu1 %v13868_v2  ;;  %v13926_v16 = vunpack.c.l.bf16 %v13924_v54  ;;  %v13977_v54 = vld [vmem:[#allocation24_spill] sm:$0xff] }
 0x2d3   :  { %6511 = vmatprep.mubr.msk.f32.mxu1 %vm947_vm1, %v13922_v33  ;;  %7630 = vmatprep.subr.mxu0 %v10604_v17  ;;  %v13933_v17 = vld [vmem:[#allocation17_spill] sm:$0xff]  ;;  %v13974_v33 = vld [vmem:[#allocation27_spill] sm:$0xff] }
 0x2d4   :  { %2745 = vmatpush1.msra.mxu1 %v10651_v48  ;;  %7631 = vmatpush3.msra.mxu0 %v10528_v18  ;;  %v13929_v18 = vunpack.c.l.bf16 %v13927_v24  ;;  %v13930_v48 = vld [vmem:[#allocation12_spill] sm:$0xff]  ;;  %v13934_v32 = vunpack.c.h.bf16 %v13933_v17  ;;  %v13935_v52 = vunpack.c.l.bf16 %v13933_v17 }
 0x2d5   :  { %2539 = vmatmul.mubr.f32.gmra.mxu1 %v13923_v0  ;;  %2746 = vmatprep.subr.mxu1 %v13868_v2  ;;  %v13931_v25 = vunpack.c.h.bf16 %v13930_v48  ;;  %v13932_v36 = vunpack.c.l.bf16 %v13930_v48  ;;  %v13975_v0 = vunpack.c.h.bf16 %v13974_v33  ;;  %v2893_v48 = vld [vmem:[%s13403_s6 + $0x30] sm:$0xff] }
 0x2d6   :  { %2443 = vmatprep.mubr.f32.mxu0 %v13925_v26  ;;  %2747 = vmatpush1.msra.mxu1 %v10639_v12  ;;  %v13948_v12 = vld [vmem:[#allocation18_spill] sm:$0xff]  ;;  %v13978_v26 = vunpack.c.h.bf16 %v13977_v54 }
 0x2d7   :  { %2444 = vmatmul.mubr.f32.gmra.mxu0 %v13926_v16  ;;  %2748 = vmatprep.subr.mxu1 %v13868_v2  ;;  %v13949_v23 = vunpack.c.h.bf16 %v13948_v12  ;;  %v13980_v16 = vld [vmem:[#allocation29_spill] sm:$0xff] }
 0x2d8   :  { %6512 = vmatprep.mubr.msk.f32.mxu1 %vm947_vm1, %v13928_v56  ;;  %2749 = vmatpush1.msra.mxu1 %v10643_v15  ;;  %v13951_v15 = vunpack.c.l.bf16 %v13948_v12  ;;  %v13981_v24 = vunpack.c.h.bf16 %v13980_v16  ;;  %v13983_v56 = vld [vmem:[#allocation26_spill] sm:$0xff] }
 0x2d9   :  { %2544 = vmatmul.mubr.f32.gmra.mxu1 %v13929_v18  ;;  %2750 = vmatprep.subr.mxu1 %v13868_v2  ;;  %v13984_v18 = vunpack.c.h.bf16 %v13983_v56 }
 0x2da   :  { %2448 = vmatprep.mubr.f32.mxu0 %v13931_v25  ;;  %2751 = vmatpush1.msra.mxu1 %v10631_v30  ;;  %v13942_v30 = vld [vmem:[#allocation16_spill] sm:$0xff] }
 0x2db   :  { %2449 = vmatmul.mubr.f32.gmra.mxu0 %v13932_v36  ;;  %2752 = vmatprep.subr.mxu1 %v13868_v2  ;;  %v13943_v51 = vunpack.c.h.bf16 %v13942_v30  ;;  %v13988_v36 = vld [vmem:[#allocation33_spill] sm:$0xff] }
 0x2dc   :  { %6513 = vmatprep.mubr.msk.f32.mxu1 %vm947_vm1, %v13934_v32  ;;  %2753 = vmatpush1.msra.mxu1 %v10635_v37  ;;  %v13945_v37 = vld [vmem:[#allocation21_spill] sm:$0xff]  ;;  %v13989_v17 = vunpack.c.h.bf16 %v13988_v36 }
 0x2dd   :  { %2549 = vmatmul.mubr.f32.gmra.mxu1 %v13935_v52  ;;  %2754 = vmatprep.subr.mxu1 %v13868_v2  ;;  %v13946_v45 = vunpack.c.h.bf16 %v13945_v37  ;;  %v13991_v52 = vld [vmem:[#allocation30_spill] sm:$0xff] }
 0x2de   :  { %2453 = vmatprep.mubr.f32.mxu0 %v13937_v61  ;;  %2755 = vmatpush1.msra.mxu1 %v10623_v6  ;;  %v13944_v6 = vunpack.c.l.bf16 %v13942_v30  ;;  %v13992_v13 = vunpack.c.h.bf16 %v13991_v52  ;;  %v13993_v61 = vunpack.c.l.bf16 %v13991_v52  ;;  %v2888_v30 = vld [vmem:[%s13403_s6 + $0x8] sm:$0xff] }
 0x2df   :  { %2454 = vmatmul.mubr.f32.gmra.mxu0 %v13938_v58  ;;  %2756 = vmatprep.subr.mxu1 %v13868_v2  ;;  %v13994_v58 = vld [vmem:[#allocation31_spill] sm:$0xff] }
 0x2e0   :  { %6514 = vmatprep.mubr.msk.f32.mxu1 %vm947_vm1, %v13940_v59  ;;  %2757 = vmatpush1.msra.mxu1 %v10627_v63  ;;  %v13947_v63 = vunpack.c.l.bf16 %v13945_v37  ;;  %v13995_v21 = vunpack.c.h.bf16 %v13994_v58  ;;  %v13997_v59 = vld [vmem:[#allocation35_spill] sm:$0xff] }
 0x2e1   :  { %2554 = vmatmul.mubr.f32.gmra.mxu1 %v13941_v28  ;;  %2758 = vmatprep.subr.mxu1 %v13868_v2  ;;  %v13998_v28 = vunpack.c.h.bf16 %v13997_v59 }
 0x2e2   :  { %2458 = vmatprep.mubr.f32.mxu0 %v13943_v51  ;;  %2759 = vmatpush1.msra.mxu1 %v10613_v34  ;;  %v13950_v34 = vld [vmem:[#allocation73_spill] sm:$0xff]  ;;  %v13999_v51 = vunpack.c.l.bf16 %v13994_v58 }
 0x2e3   :  { %2459 = vmatmul.mubr.f32.gmra.mxu0 %v13944_v6  ;;  %2760 = vmatprep.subr.mxu1 %v13868_v2  ;;  %v14000_v6 = vld [vmem:[#allocation32_spill] sm:$0xff] }
 0x2e4   :  { %6515 = vmatprep.mubr.msk.f32.mxu1 %vm947_vm1, %v13946_v45  ;;  %2761 = vmatpush1.msra.mxu1 %v10619_v20  ;;  %v13954_v20 = vld [vmem:[#allocation74_spill] sm:$0xff]  ;;  %v14001_v37 = vunpack.c.h.bf16 %v14000_v6  ;;  %v14002_v45 = vunpack.c.l.bf16 %v13997_v59 }
 0x2e5   :  { %2559 = vmatmul.mubr.f32.gmra.mxu1 %v13947_v63  ;;  %2762 = vmatprep.subr.mxu1 %v13868_v2  ;;  %v14003_v63 = vld [vmem:[#allocation37_spill] sm:$0xff] }
 0x2e6   :  { %2677 = vmatprep.mubr.f32.mxu0 %v13949_v23  ;;  %2763 = vmatpush1.msra.mxu1 %v13950_v34  ;;  %v14004_v12 = vunpack.c.h.bf16 %v14003_v63  ;;  %v2890_v23 = vld [vmem:[%s13403_s6 + $0x18] sm:$0xff]  ;;  %v14005_v34 = vunpack.c.l.bf16 %v14000_v6 }
 0x2e7   :  { %2678 = vmatmul.mubr.f32.vlgmr.msra.gmra.mxu0 %v13951_v15  ;;  %2764 = vmatprep.subr.mxu1 %v13868_v2  ;;  %v2891_v15 = vld [vmem:[%s13403_s6 + $0x20] sm:$0xff] }
 0x2e8   :  { %6516 = vmatprep.mubr.msk.f32.mxu1 %vm947_vm1, %v13953_v19  ;;  %2765 = vmatpush1.msra.mxu1 %v13954_v20  ;;  %v14007_v19 = vunpack.c.h.bf16 %v14006_v9  ;;  %v14008_v20 = vunpack.c.l.bf16 %v14003_v63 }
 0x2e9   :  { %2564 = vmatmul.mubr.f32.gmra.mxu1 %v13955_v57  ;;  %2766 = vmatprep.subr.mxu1 %v13868_v2  ;;  %v14009_v57 = vld [vmem:[#allocation38_spill] sm:$0xff] }
 0x2ea   :  { %2682 = vmatprep.mubr.f32.mxu0 %v13957_v40  ;;  %2767 = vmatpush1.msra.mxu1 %v13958_v60  ;;  %v14010_v22 = vunpack.c.h.bf16 %v14009_v57  ;;  %v2892_v40 = vld [vmem:[%s13403_s6 + $0x28] sm:$0xff]  ;;  %v14011_v60 = vunpack.c.l.bf16 %v14006_v9 }
 0x2eb   :  { %2683 = vmatmul.mubr.f32.gmra.mxu0 %v13959_v55  ;;  %2768 = vmatprep.subr.mxu1 %v13868_v2  ;;  %v14012_v55 = vld [vmem:[#allocation36_spill] sm:$0xff] }
 0x2ec   :  { %6517 = vmatprep.mubr.msk.f32.mxu1 %vm947_vm1, %v13961_v50  ;;  %2769 = vmatpush1.msra.mxu1 %v13962_v53  ;;  %v14013_v31 = vunpack.c.h.bf16 %v14012_v55  ;;  %v14014_v50 = vunpack.c.l.bf16 %v14009_v57  ;;  %v14015_v53 = vld [vmem:[#allocation39_spill] sm:$0xff]  ;;  %v14017_v62 = vunpack.c.l.bf16 %v14012_v55 }
 0x2ed   :  { %2569 = vmatmul.mubr.f32.gmra.mxu1 %v13963_v4  ;;  %2778 = vmatprep.subr.mxu1 %v13868_v2  ;;  %v14016_v4 = vunpack.c.h.bf16 %v14015_v53 }
 0x2ee   :  { %2687 = vmatprep.mubr.f32.mxu0 %v13965_v47  ;;  %2779 = vmatpush2.msra.mxu1 %v13966_v43  ;;  %v14018_v47 = vunpack.c.l.bf16 %v14015_v53  ;;  %v14019_v43 = vld [vmem:[#allocation40_spill] sm:$0xff] }
 0x2ef   :  { %2688 = vmatmul.mubr.f32.gmra.mxu0 %v13967_v49  ;;  %2780 = vmatprep.subr.mxu1 %v13868_v2  ;;  %v14020_v49 = vunpack.c.h.bf16 %v14019_v43  ;;  %v14021_v5 = vunpack.c.l.bf16 %v14019_v43 }
 0x2f0   :  { %6518 = vmatprep.mubr.msk.f32.mxu1 %vm947_vm1, %v13969_v46  ;;  %2781 = vmatpush2.msra.mxu1 %v10759_v29  ;;  %v13976_v29 = vunpack.c.l.bf16 %v13974_v33  ;;  %v14022_v46 = vld [vmem:[#allocation41_spill] sm:$0xff] }
 0x2f1   :  { %2574 = vmatmul.mubr.f32.gmra.mxu1 %v13970_v1  ;;  %2782 = vmatprep.subr.mxu1 %v13868_v2  ;;  %v14023_v1 = vunpack.c.h.bf16 %v14022_v46  ;;  %v14024_v3 = vunpack.c.l.bf16 %v14022_v46 }
 0x2f2   :  { %2692 = vmatprep.mubr.f32.mxu0 %v13972_v42  ;;  %2783 = vmatpush2.msra.mxu1 %v10743_v7  ;;  %v13979_v7 = vunpack.c.l.bf16 %v13977_v54  ;;  %v14025_v42 = vld [vmem:[#allocation42_spill] sm:$0xff] }
 0x2f3   :  { %2693 = vmatmul.mubr.f32.gmra.mxu0 %v13973_v44  ;;  %2784 = vmatprep.subr.mxu1 %v13868_v2  ;;  %v14026_v44 = vunpack.c.h.bf16 %v14025_v42  ;;  %v14027_v33 = vunpack.c.l.bf16 %v14025_v42 }
 0x2f4   :  { %6519 = vmatprep.mubr.msk.f32.mxu1 %vm947_vm1, %v13975_v0  ;;  %2785 = vmatpush2.msra.mxu1 %v10749_v8  ;;  %v13982_v8 = vunpack.c.l.bf16 %v13980_v16  ;;  %v14028_v0 = vld [vmem:[#allocation43_spill] sm:$0xff] }
 0x2f5   :  { %2579 = vmatmul.mubr.f32.gmra.mxu1 %v13976_v29  ;;  %2786 = vmatprep.subr.mxu1 %v13868_v2  ;;  %v14029_v29 = vunpack.c.h.bf16 %v14028_v0  ;;  %v14030_v54 = vunpack.c.l.bf16 %v14028_v0 }
 0x2f6   :  { %2697 = vmatprep.mubr.f32.mxu0 %v13978_v26  ;;  %2787 = vmatpush2.msra.mxu1 %v10731_v27  ;;  %v13985_v27 = vunpack.c.l.bf16 %v13983_v56  ;;  %v14031_v26 = vld [vmem:[#allocation44_spill] sm:$0xff] }
 0x2f7   :  { %2698 = vmatmul.mubr.f32.gmra.mxu0 %v13979_v7  ;;  %2788 = vmatprep.subr.mxu1 %v13868_v2  ;;  %v14032_v7 = vunpack.c.h.bf16 %v14031_v26  ;;  %v14033_v16 = vunpack.c.l.bf16 %v14031_v26 }
 0x2f8   :  { %6520 = vmatprep.mubr.msk.f32.mxu1 %vm947_vm1, %v13981_v24  ;;  %2789 = vmatpush2.msra.mxu1 %v10737_v11  ;;  %v13986_v11 = vld [vmem:[#allocation28_spill] sm:$0xff]  ;;  %v14034_v24 = vld [vmem:[#allocation45_spill] sm:$0xff] }
 0x2f9   :  { %2584 = vmatmul.mubr.f32.gmra.mxu1 %v13982_v8  ;;  %2790 = vmatprep.subr.mxu1 %v13868_v2  ;;  %v13987_v25 = vunpack.c.h.bf16 %v13986_v11  ;;  %v13990_v32 = vunpack.c.l.bf16 %v13986_v11  ;;  %v14035_v8 = vunpack.c.h.bf16 %v14034_v24  ;;  %v14036_v56 = vunpack.c.l.bf16 %v14034_v24  ;;  %v2900_v11 = vld [vmem:[%s13402_s5 + $0xc] sm:$0x3] }
 0x2fa   :  { %2702 = vmatprep.mubr.f32.mxu0 %v13984_v18  ;;  %2791 = vmatpush2.msra.mxu1 %v10719_v35  ;;  %v2894_v35 = vld [vmem:[%s13403_s6 + $0x38] sm:$0xff]  ;;  %v14037_v18 = vld [vmem:[#allocation46_spill] sm:$0xff] }
 0x2fb   :  { %2703 = vmatmul.mubr.f32.gmra.mxu0 %v13985_v27  ;;  %2792 = vmatprep.subr.mxu1 %v13868_v2  ;;  %v14038_v27 = vunpack.c.h.bf16 %v14037_v18 }
 0x2fc   :  { %2793 = vmatpush2.msra.mxu1 %v10725_v10  ;;  %2707 = vmatprep.mubr.f32.mxu0 %v13987_v25  ;;  %v2895_v10 = vld [vmem:[%s13403_s6 + $0x40] sm:$0xff]  ;;  %v2904_v25 = vunpack.c.l.bf16 %v2900_v11 }
 0x2fd   :  { %2794 = vmatprep.subr.mxu1 %v13868_v2  ;;  %6521 = vmatprep.mubr.msk.f32.mxu1 %vm947_vm1, %v13989_v17 }
 0x2fe   :  { %2795 = vmatpush2.msra.mxu1 %v10707_v38  ;;  %3711 = vperm.xlu0 %8805, %v2893_v48   ;;  %v2896_v38 = vld [vmem:[%s13403_s6 + $0x48] sm:$0xff]  ;;  %v14039_v48 = vunpack.c.l.bf16 %v14037_v18 }
 0x2ff   :  { %2708 = vmatmul.mubr.f32.gmra.mxu0 %v13990_v32  ;;  %2796 = vmatprep.subr.mxu1 %v13868_v2 }
 0x300   :  { %2797 = vmatpush2.msra.mxu1 %v10713_v39  ;;  %2712 = vmatprep.mubr.f32.mxu0 %v13992_v13  ;;  %v2887_v39 = vld [vmem:[%s13403_s6] sm:$0xff] }
 0x301   :  { %2798 = vmatprep.subr.mxu1 %v13868_v2  ;;  %3716 = vperm.xlu1 %8806, %v2894_v35   ;;  %v6583_v35 = vld [vmem:[%s13402_s5 + $0x6c] sm:$0x3]  ;;  %v6927_v13 = vld [vmem:[%s13402_s5] sm:$0xff]  }
 0x302   :  { %2799 = vmatpush2.msra.mxu1 %v10695_v41  ;;  %3721 = vperm.xlu0 %8805, %v2895_v10   ;;  %v13996_v41 = vunpack.c.l.bf16 %v13988_v36  ;;  %v2899_v36 = vld [vmem:[%s13402_s5 + $0x8] sm:$0xf]  ;;  %v3353_v32 = vunpack.c.l.bf16 %v6583_v35  ;;  %v6928_v58 = vunpack.c.l.bf16 %v6927_v13 }
 0x303   :  { %2713 = vmatmul.mubr.f32.gmra.mxu0 %v13993_v61  ;;  %2800 = vmatprep.subr.mxu1 %v13868_v2  ;;  %v2903_v17 = vunpack.c.l.bf16 %v2899_v36  ;;  %v6582_v10 = vld [vmem:[%s13402_s5 + $0x68] sm:$0xf]  ;;  %v6929_v61 = vunpack.c.h.bf16 %v6927_v13 }
 0x304   :  { %2801 = vmatpush2.msra.mxu1 %v10701_v14  ;;  %2717 = vmatprep.mubr.f32.mxu0 %v13995_v21  ;;  %v2889_v14 = vld [vmem:[%s13403_s6 + $0x10] sm:$0xff]  ;;  %v3352_v52 = vunpack.c.l.bf16 %v6582_v10 }
 0x305   :  { %2803 = vmatmul.mubr.f32.vlgmr.msra.gmra.mxu1 %v13996_v41  ;;  %3726 = vperm.xlu1 %8806, %v2896_v38   ;;  %v7155_v38 = vld [vmem:[%s13402_s5 + $0x60] sm:$0xff]   ;;  %v11136_v41 = vld [vmem:[%s13402_s5 + $0x2c] sm:$0x3] }
 0x306   :  { %6522 = vmatprep.mubr.msk.f32.mxu1 %vm947_vm1, %v13998_v28  ;;  %3681 = vperm.xlu0 %8805, %v2887_v39   ;;  %v6941_v39 = vunpack.c.h.bf16 %v7155_v38  ;;  %v6940_v21 = vunpack.c.l.bf16 %v7155_v38  ;;  %v13619_v59 = vunpack.c.l.bf16 %v11136_v41 }
 0x307   :  { %2718 = vmatmul.mubr.f32.gmra.mxu0 %v13999_v51  ;;  %8479 = vmatprep.subr.msk.mxu0 %vm2942_vm2, %v2904_v25 }
 0x308   :  { %2722 = vmatprep.mubr.f32.mxu0 %v14001_v37  ;;  %8480 = vmatpush3.msk.msra.mxu0 %vm2942_vm2, %v2904_v25 }
 0x309   :  { %2808 = vmatmul.mubr.f32.gmra.mxu1 %v14002_v45  ;;  %3686 = vperm.xlu1 %8806, %v2888_v30  }
 0x30a   :  { %6523 = vmatprep.mubr.msk.f32.mxu1 %vm947_vm1, %v14004_v12  ;;  %3691 = vperm.xlu0 %8805, %v2889_v14  }
 0x30b   :  { %2723 = vmatmul.mubr.f32.gmra.mxu0 %v14005_v34  ;;  %8481 = vmatprep.subr.mxu0 %v2903_v17 }
 0x30c   :  { %2727 = vmatprep.mubr.f32.mxu0 %v14007_v19  ;;  %8482 = vmatpush3.msra.mxu0 %v2903_v17 }
 0x30d   :  { %2813 = vmatmul.mubr.f32.gmra.mxu1 %v14008_v20  ;;  %3696 = vperm.xlu1 %8806, %v2890_v23  }
 0x30e   :  { %6524 = vmatprep.mubr.msk.f32.mxu1 %vm947_vm1, %v14010_v22  ;;  %3701 = vperm.xlu0 %8805, %v2891_v15  }
 0x30f   :  { %2728 = vmatmul.mubr.f32.gmra.mxu0 %v14011_v60  ;;  %8557 = vmatprep.subr.msk.mxu1 %vm2942_vm2, %v3353_v32 }
 0x310   :  { %2732 = vmatprep.mubr.f32.mxu0 %v14013_v31  ;;  %8558 = vmatpush3.msk.msra.mxu1 %vm2942_vm2, %v3353_v32 }
 0x311   :  { %2818 = vmatmul.mubr.f32.gmra.mxu1 %v14014_v50  ;;  %3706 = vperm.xlu1 %8806, %v2892_v40  }
 0x312   :  { %6525 = vmatprep.mubr.msk.f32.mxu1 %vm947_vm1, %v14016_v4  ;;  %8559 = vmatprep.subr.mxu1 %v3352_v52 }
 0x313   :  { %2733 = vmatmul.mubr.f32.gmra.mxu0 %v14017_v62  ;;  %8560 = vmatpush3.msra.mxu1 %v3352_v52 }
 0x314   :  { %8483 = vmatprep.subr.mxu0 %v6929_v61  ;;  %8561 = vmatprep.subr.mxu1 %v6941_v39 }
 0x315   :  { %2823 = vmatmul.mubr.f32.gmra.mxu1 %v14018_v47  ;;  %8484 = vmatpush3.msra.mxu0 %v6929_v61 }
 0x316   :  { %6526 = vmatprep.mubr.msk.f32.mxu1 %vm947_vm1, %v14020_v49  ;;  %8562 = vmatpush3.msra.mxu1 %v6941_v39 }
 0x317   :  { %8485 = vmatprep.subr.mxu0 %v6928_v58  ;;  %8563 = vmatprep.subr.mxu1 %v6940_v21 }
 0x318   :  { %8486 = vmatpush3.msra.mxu0 %v6928_v58  ;;  %8564 = vmatpush3.msra.mxu1 %v6940_v21  ;;  %v14040_v58 = vld [vmem:[#allocation47_spill] sm:$0xff] }
 0x319   :  { %2828 = vmatmul.mubr.f32.gmra.mxu1 %v14021_v5  ;;  %8505 = vmatprep.subr.msk.mxu0 %vm2942_vm2, %v13619_v59 }
 0x31a   :  { %6527 = vmatprep.mubr.msk.f32.mxu1 %vm947_vm1, %v14023_v1 }
 0x31d   :  { %2833 = vmatmul.mubr.f32.gmra.mxu1 %v14024_v3 }
 0x31e   :  { %6528 = vmatprep.mubr.msk.f32.mxu1 %vm947_vm1, %v14026_v44 }
 0x321   :  { %2838 = vmatmul.mubr.f32.gmra.mxu1 %v14027_v33 }
 0x322   :  { %6529 = vmatprep.mubr.msk.f32.mxu1 %vm947_vm1, %v14029_v29 }
 0x325   :  { %2843 = vmatmul.mubr.f32.gmra.mxu1 %v14030_v54 }
 0x326   :  { %6530 = vmatprep.mubr.msk.f32.mxu1 %vm947_vm1, %v14032_v7 }
 0x329   :  { %2848 = vmatmul.mubr.f32.gmra.mxu1 %v14033_v16 }
 0x32a   :  { %6531 = vmatprep.mubr.msk.f32.mxu1 %vm947_vm1, %v14035_v8 }
 0x32d   :  { %2853 = vmatmul.mubr.f32.gmra.mxu1 %v14036_v56 }
 0x32e   :  { %6532 = vmatprep.mubr.msk.f32.mxu1 %vm947_vm1, %v14038_v27 }
 0x331   :  { %2858 = vmatmul.mubr.f32.gmra.mxu1 %v14039_v48 }
 0x36d   :  { %v7564_v28 = vpop.f32.mrf.mxu0 }
 0x36f   :  { %v7565_v30 = vpop.f32.mrf.mxu0 }
 0x370   :  { %v7566_v10 = vadd.f32 %v7565_v30, %v7564_v28 }
 0x372   :  { %v7567_v51 = vpop.f32.mrf.mxu0  ;;  %v2406_v21 = vadd.f32 %v7566_v10, %v14040_v58 }
 0x374   :  { %v7568_v14 = vpop.f32.mrf.mxu0 }
 0x375   :  { %v7569_v39 = vadd.f32 %v7568_v14, %v7567_v51  ;;  %v14042_v14 = vld [vmem:[#allocation49_spill] sm:$0xff] }
 0x377   :  { %v7570_v6 = vpop.f32.mrf.mxu0 }
 0x379   :  { %v7571_v37 = vpop.f32.mrf.mxu0 }
 0x37c   :  { %v11142_v45 = vpop.f32.mrf.mxu0 }
 0x37e   :  { %v7574_v63 = vpop.f32.mrf.mxu0 }
 0x381   :  { %v11144_v12 = vpop.f32.mrf.mxu0 }
 0x383   :  { %v11146_v23 = vpop.f32.mrf.mxu0 }
 0x386   :  { %v11148_v34 = vpop.f32.mrf.mxu0 }
 0x388   :  { %v11150_v15 = vpop.f32.mrf.mxu0  ;;  %v2530_v9 = vpop.f32.mrf.mxu1 }
 0x38a   :  { %v2532_v19 = vpop.f32.mrf.mxu1 }
 0x38b   :  { %v11152_v20 = vpop.f32.mrf.mxu0 }
 0x38d   :  { %v11154_v57 = vpop.f32.mrf.mxu0 }
 0x38f   :  { %v2535_v22 = vpop.f32.mrf.mxu1 }
 0x391   :  { %v11156_v40 = vpop.f32.mrf.mxu0  ;;  %v2537_v60 = vpop.f32.mrf.mxu1 }
 0x393   :  { %v11158_v55 = vpop.f32.mrf.mxu0 }
 0x395   :  { %v11160_v31 = vpop.f32.mrf.mxu1 }
 0x397   :  { %v11162_v50 = vpop.f32.mrf.mxu0  ;;  %v2542_v53 = vpop.f32.mrf.mxu1 }
 0x399   :  { %v11164_v4 = vpop.f32.mrf.mxu0  ;;  %v11166_v62 = vpop.f32.mrf.mxu1 }
 0x39b   :  { %v11168_v47 = vpop.f32.mrf.mxu0  ;;  %v2547_v43 = vpop.f32.mrf.mxu1 }
 0x39c   :  { %v2531_v43 = vadd.f32 %v2530_v9, %v2406_v21 }
 0x39d   :  { %v11170_v49 = vpop.f32.mrf.mxu0  ;;  %v11172_v5 = vpop.f32.mrf.mxu1 }
 0x39f   :  { %v11174_v46 = vpop.f32.mrf.mxu0  ;;  %v2552_v1 = vpop.f32.mrf.mxu1 }
 0x3a0   :  { %v14041_v1 = vld [vmem:[#allocation48_spill] sm:$0xff] }
 0x3a1   :  { %v11176_v3 = vpop.f32.mrf.mxu0  ;;  %v11178_v42 = vpop.f32.mrf.mxu1 }
 0x3a3   :  { %v11180_v44 = vpop.f32.mrf.mxu0  ;;  %v2557_v33 = vpop.f32.mrf.mxu1 }
 0x3a4   :  { %v2411_v33 = vadd.f32 %v7569_v39, %v14041_v1  ;;  %v7578_v39 = vadd.f32 %v11146_v23, %v11144_v12  ;;  %v7581_v12 = vadd.f32 %v11150_v15, %v11148_v34  ;;  %v14045_v23 = vld [vmem:[#allocation60_spill] sm:$0xff] }
 0x3a5   :  { %v11182_v0 = vpop.f32.mrf.mxu0  ;;  %v11184_v29 = vpop.f32.mrf.mxu1 }
 0x3a6   :  { %v2536_v51 = vadd.f32 %v2535_v22, %v2411_v33 }
 0x3a7   :  { %v2562_v54 = vpop.f32.mrf.mxu1  ;;  %v7632_v26 = vpop.f32.mrf.mxu0 }
 0x3a9   :  { %v11186_v7 = vpop.f32.mrf.mxu1  ;;  %v7633_v16 = vpop.f32.mrf.mxu0 }
 0x3aa   :  { %v7634_v28 = vadd.f32 %v7633_v16, %v7632_v26  ;;  %v2590_v26 = vmax.f32 %v2536_v51, 0.0  ;;  %v14044_v16 = vld [vmem:[#allocation50_spill] sm:$0xff] }
 0x3ab   :  { %v2567_v24 = vpop.f32.mrf.mxu1  ;;  %v7635_v8 = vpop.f32.mrf.mxu0 }
 0x3ac   :  { %v7572_v24 = vadd.f32 %v7571_v37, %v7570_v6  ;;  %v14043_v6 = vld [vmem:[#allocation59_spill] sm:$0xff] }
 0x3ad   :  { %v11188_v56 = vpop.f32.mrf.mxu1  ;;  %v7636_v18 = vpop.f32.mrf.mxu0 }
 0x3ae   :  { %v2416_v10 = vadd.f32 %v7572_v24, %v14042_v14 }
 0x3af   :  { %v2572_v27 = vpop.f32.mrf.mxu1  ;;  %v7638_v48 = vpop.f32.mrf.mxu0 }
 0x3b0   :  { %v7575_v27 = vadd.f32 %v7574_v63, %v11142_v45  ;;  %v2541_v63 = vadd.f32 %v11160_v31, %v2416_v10 }
 0x3b1   :  { %v11190_v11 = vpop.f32.mrf.mxu1  ;;  %v7639_v25 = vpop.f32.mrf.mxu0 }
 0x3b2   :  { %v2421_v2 = vadd.f32 %v7575_v27, %v14044_v16  ;;  %v7640_v22 = vadd.f32 %v7639_v25, %v7638_v48  ;;  %v6548_v25 = vld [vmem:[%s13402_s5 + $0x28] sm:$0xf] }
 0x3b3   :  { %v2577_v36 = vpop.f32.mrf.mxu1  ;;  %v7641_v17 = vpop.f32.mrf.mxu0 }
 0x3b4   :  { %v2589_v36 = vmax.f32 %v2531_v43, 0.0  ;;  %v2546_v27 = vadd.f32 %v11166_v62, %v2421_v2  ;;  %v2690_v34 = vadd.f32 %v7640_v22, %v14042_v14 }
 0x3b5   :  { %v11192_v35 = vpop.f32.mrf.mxu1  ;;  %v7642_v32 = vpop.f32.mrf.mxu0 }
 0x3b6   :  { %v2601_v37 = vmax.f32 %v14043_v6, %v2589_v36  ;;  %v14046_v36 = vld [vmem:[#allocation51_spill] sm:$0xff]  ;;  %v7643_v51 = vadd.f32 %v7642_v32, %v7641_v17  ;;  %v7153_v17 = vld [vmem:[%s13402_s5 + $0x20] sm:$0xff]   ;;  %v7584_v32 = vadd.f32 %v11154_v57, %v11152_v20  ;;  %v14050_v57 = vunpack.c.l.bf16 %v11136_v41  ;;  %v11265_v41 = vld [vmem:[%s13402_s5 + $0x4c] sm:$0x3] }
 0x3b7   :  { %v2582_v52 = vpop.f32.mrf.mxu1  ;;  %v7644_v13 = vpop.f32.mrf.mxu0  ;;  %v2426_v31 = vadd.f32 %v7578_v39, %v14046_v36  ;;  %v14048_v39 = vld [vmem:[#allocation52_spill] sm:$0xff] }
 0x3b8   :  { %v7637_v52 = vadd.f32 %v7636_v18, %v7635_v8  ;;  %v2431_v6 = vadd.f32 %v7581_v12, %v14048_v39  ;;  %v2695_v22 = vadd.f32 %v7643_v51, %v14044_v16  ;;  %v14053_v16 = vld [vmem:[#allocation53_spill] sm:$0xff] }
 0x3b9   :  { %v11194_v38 = vpop.f32.mrf.mxu1  ;;  %v7645_v61 = vpop.f32.mrf.mxu0 }
 0x3ba   :  { %v2685_v8 = vadd.f32 %v7637_v52, %v14041_v1  ;;  %v2591_v1 = vmax.f32 %v2541_v63, 0.0 }
 0x3bb   :  { %v11197_v19 = vpop.f32.mrf.mxu0  ;;  %v2587_v60 = vpop.f32.mrf.mxu1 }
 0x3bc   :  { %v2680_v60 = vadd.f32 %v7634_v28, %v14040_v58  ;;  %v2602_v28 = vmax.f32 %v14045_v23, %v2590_v26 }
 0x3bd   :  { %v11199_v53 = vpop.f32.mrf.mxu0 }
 0x3bf   :  { %v11202_v54 = vpop.f32.mrf.mxu0 }
 0x3c1   :  { %v11204_v30 = vpop.f32.mrf.mxu0 }
 0x3c3   :  { %v11209_v59 = vpop.f32.mrf.mxu0 }
 0x3c5   :  { %v2804_v9 = vpop.f32.mrf.mxu1  ;;  %v11217_v18 = vpop.f32.mrf.mxu0 }
 0x3c6   :  { %v2805_v21 = vadd.f32 %v2804_v9, %v2680_v60  ;;  %v3078_v60 = vunpack.c.l.bf16 %v6548_v25  ;;  %v2592_v9 = vmax.f32 %v2546_v27, 0.0 }
 0x3c7   :  { %v2806_v45 = vpop.f32.mrf.mxu1  ;;  %v11234_v15 = vpop.f32.mrf.mxu0 }
 0x3c8   :  { %v2863_v43 = vmax.f32 %v2805_v21, 0.0  ;;  %v2551_v21 = vadd.f32 %v11172_v5, %v2426_v31  ;;  %v7646_v45 = vadd.f32 %v7645_v61, %v7644_v13  ;;  %v6933_v5 = vunpack.c.h.bf16 %v7153_v17 }
 0x3c9   :  { %v2809_v58 = vpop.f32.mrf.mxu1  ;;  %v6932_v61 = vunpack.c.l.bf16 %v7153_v17  ;;  %v2556_v31 = vadd.f32 %v11178_v42, %v2431_v6  ;;  %v3216_v42 = vunpack.c.l.bf16 %v11265_v41  ;;  %v6599_v41 = vld [vmem:[%s13402_s5 + $0x88] sm:$0xf] }
 0x3ca   :  { %v11219_v33 = vmax.f32 %v2601_v37, %v2863_v43  ;;  %v2810_v24 = vadd.f32 %v2809_v58, %v2685_v8  ;;  %v14049_v37 = vld [vmem:[#allocation61_spill] sm:$0xff]  ;;  %v11251_v43 = vpop.f32.mrf.mxu0  ;;  %v7587_v58 = vadd.f32 %v11158_v55, %v11156_v40  ;;  %v2593_v23 = vmax.f32 %v2551_v21, 0.0 }
 0x3cb   :  { %v2811_v48 = vpop.f32.mrf.mxu1  ;;  %v2603_v26 = vmax.f32 %v14049_v37, %v2591_v1  ;;  %v2700_v40 = vadd.f32 %v7646_v45, %v14046_v36  ;;  %v2594_v36 = vmax.f32 %v2556_v31, 0.0  ;;  %v14058_v37 = vld [vmem:[#allocation55_spill] sm:$0xff] }
 0x3cc   :  { %v2864_v10 = vmax.f32 %v2810_v24, 0.0  ;;  %8487 = vmatprep.mubr.msk.f32.mxu0 %vm2905_vm3, %v11219_v33  ;;  %8565 = vmatprep.mubr.msk.f32.mxu1 %vm2905_vm3, %v11219_v33  ;;  %v14052_v24 = vld [vmem:[#allocation62_spill] sm:$0xff]  ;;  %v7649_v48 = vadd.f32 %v11199_v53, %v11197_v19  ;;  %v7659_v55 = vpop.f32.mrf.mxu0  ;;  %v7590_v19 = vadd.f32 %v11164_v4, %v11162_v50  ;;  %v14055_v53 = vld [vmem:[#allocation63_spill] sm:$0xff] }
 0x3cd   :  { %v2814_v2 = vpop.f32.mrf.mxu1  ;;  %v2604_v12 = vmax.f32 %v14052_v24, %v2592_v9 }
 0x3ce   :  { %v11236_v62 = vmax.f32 %v2602_v28, %v2864_v10  ;;  %v2815_v52 = vadd.f32 %v2814_v2, %v2690_v34  ;;  %v2436_v28 = vadd.f32 %v7584_v32, %v14053_v16  ;;  %v2605_v34 = vmax.f32 %v14055_v53, %v2593_v23  ;;  %v7660_v4 = vpop.f32.mrf.mxu0 }
 0x3cf   :  { %v2816_v14 = vpop.f32.mrf.mxu1  ;;  %v7652_v32 = vadd.f32 %v11204_v30, %v11202_v54  ;;  %v2705_v50 = vadd.f32 %v7649_v48, %v14048_v39  ;;  %v7593_v54 = vadd.f32 %v11170_v49, %v11168_v47  ;;  %v14059_v39 = vld [vmem:[#allocation64_spill] sm:$0xff]  ;;  %v7661_v53 = vadd.f32 %v7660_v4, %v7659_v55 }
 0x3d0   :  { %14047 = vst [vmem:[#allocation5_spill] sm:$0xff] %v11236_v62  ;;  %v2865_v63 = vmax.f32 %v2815_v52, 0.0  ;;  %8488 = vmatmul.mubr.msk.f32.vlgmr.msra.gmra.mxu0 %vm2905_vm3, %v11236_v62  ;;  %8566 = vmatmul.mubr.msk.f32.vlgmr.msra.gmra.mxu1 %vm2905_vm3, %v11236_v62  ;;  %v2561_v2 = vadd.f32 %v11184_v29, %v2436_v28  ;;  %v14056_v52 = vld [vmem:[#allocation54_spill] sm:$0xff]  ;;  %v7662_v49 = vpop.f32.mrf.mxu0  ;;  %v7658_v28 = vadd.f32 %v11251_v43, %v11234_v15  ;;  %v14065_v43 = vld [vmem:[#allocation57_spill] sm:$0xff] }
 0x3d1   :  { %v2819_v20 = vpop.f32.mrf.mxu1  ;;  %8506 = vmatpush3.msk.msra.mxu0 %vm2942_vm2, %v14050_v57  ;;  %v2710_v47 = vadd.f32 %v7652_v32, %v14053_v16 }
 0x3d2   :  { %v11256_v8 = vmax.f32 %v2603_v26, %v2865_v63  ;;  %v2820_v13 = vadd.f32 %v2819_v20, %v2695_v22  ;;  %8507 = vmatprep.subr.mxu0 %v3078_v60  ;;  %v2595_v30 = vmax.f32 %v2561_v2, 0.0  ;;  %v2446_v26 = vadd.f32 %v7590_v19, %v14058_v37 }
 0x3d3   :  { %v2821_v27 = vpop.f32.mrf.mxu1  ;;  %8508 = vmatpush3.msra.mxu0 %v3078_v60  ;;  %v2441_v60 = vadd.f32 %v7587_v58, %v14056_v52  ;;  %v2606_v63 = vmax.f32 %v14059_v39, %v2594_v36  ;;  %v7655_v22 = vadd.f32 %v11217_v18, %v11209_v59  ;;  %v14062_v18 = vld [vmem:[#allocation56_spill] sm:$0xff]  ;;  %v2720_v2 = vadd.f32 %v7658_v28, %v14058_v37  ;;  %v14067_v36 = vld [vmem:[#allocation58_spill] sm:$0xff] }
 0x3d4   :  { %14051 = vst [vmem:[#allocation8_spill] sm:$0xff] %v11256_v8  ;;  %v2866_v25 = vmax.f32 %v2820_v13, 0.0  ;;  %8490 = vmatprep.mubr.msk.f32.mxu0 %vm2905_vm3, %v11256_v8  ;;  %8568 = vmatprep.mubr.msk.f32.mxu1 %vm2905_vm3, %v11256_v8  ;;  %v7596_v13 = vadd.f32 %v11176_v3, %v11174_v46  ;;  %v2451_v24 = vadd.f32 %v7593_v54, %v14062_v18  ;;  %v7663_v3 = vpop.f32.mrf.mxu0  ;;  %v14070_v37 = vld [vmem:[#allocation68_spill] sm:$0xff] }
 0x3d5   :  { %v2824_v1 = vpop.f32.mrf.mxu1  ;;  %8509 = vmatprep.subr.mxu0 %v6933_v5  ;;  %v2566_v14 = vadd.f32 %v11186_v7, %v2441_v60  ;;  %v2571_v23 = vadd.f32 %v11188_v56, %v2446_v26  ;;  %v2715_v46 = vadd.f32 %v7655_v22, %v14056_v52  ;;  %v7599_v56 = vadd.f32 %v11182_v0, %v11180_v44 }
 0x3d6   :  { %v11275_v51 = vmax.f32 %v2604_v12, %v2866_v25  ;;  %v2825_v10 = vadd.f32 %v2824_v1, %v2700_v40  ;;  %8510 = vmatpush3.msra.mxu0 %v6933_v5  ;;  %v14064_v25 = vld [vmem:[#allocation66_spill] sm:$0xff]  ;;  %v2576_v15 = vadd.f32 %v11190_v11, %v2451_v24  ;;  %v2456_v1 = vadd.f32 %v7596_v13, %v14065_v43  ;;  %v7665_v52 = vpop.f32.mrf.mxu0 }
 0x3d7   :  { %v2826_v17 = vpop.f32.mrf.mxu1  ;;  %8511 = vmatprep.subr.mxu0 %v6932_v61  ;;  %v2596_v59 = vmax.f32 %v2566_v14, 0.0  ;;  %v2597_v19 = vmax.f32 %v2571_v23, 0.0  ;;  %v2461_v32 = vadd.f32 %v7599_v56, %v14067_v36  ;;  %v7664_v4 = vadd.f32 %v7663_v3, %v7662_v49  ;;  %v7154_v56 = vld [vmem:[%s13402_s5 + $0x40] sm:$0xff]  }
 0x3d8   :  { %14054 = vst [vmem:[#allocation11_spill] sm:$0xff] %v11275_v51  ;;  %v2867_v9 = vmax.f32 %v2825_v10, 0.0  ;;  %8491 = vmatmul.mubr.msk.f32.gmra.mxu0 %vm2905_vm3, %v11275_v51  ;;  %8569 = vmatmul.mubr.msk.f32.gmra.mxu1 %vm2905_vm3, %v11275_v51  ;;  %v2598_v11 = vmax.f32 %v2576_v15, 0.0  ;;  %v2581_v17 = vadd.f32 %v11192_v35, %v2456_v1  ;;  %v7666_v54 = vpop.f32.mrf.mxu0  ;;  %v6600_v15 = vld [vmem:[%s13402_s5 + $0x8c] sm:$0x3] }
 0x3d9   :  { %v2829_v21 = vpop.f32.mrf.mxu1  ;;  %8512 = vmatpush3.msra.mxu0 %v6932_v61  ;;  %v14061_v61 = vld [vmem:[#allocation65_spill] sm:$0xff]  ;;  %v2608_v40 = vmax.f32 %v14064_v25, %v2596_v59  ;;  %v7667_v22 = vadd.f32 %v7666_v54, %v7665_v52  ;;  %v3490_v1 = vunpack.c.l.bf16 %v6600_v15 }
 0x3da   :  { %v11290_v29 = vmax.f32 %v2605_v34, %v2867_v9  ;;  %v2830_v6 = vadd.f32 %v2829_v21, %v2705_v50  ;;  %8531 = vmatprep.subr.msk.mxu0 %vm2942_vm2, %v3216_v42  ;;  %v2607_v58 = vmax.f32 %v14061_v61, %v2595_v30  ;;  %v14068_v9 = vld [vmem:[#allocation67_spill] sm:$0xff]  ;;  %v2610_v26 = vmax.f32 %v14070_v37, %v2598_v11  ;;  %v14072_v61 = vld [vmem:[#allocation69_spill] sm:$0xff] }
 0x3db   :  { %v2831_v45 = vpop.f32.mrf.mxu1  ;;  %v2609_v50 = vmax.f32 %v14068_v9, %v2597_v19  ;;  %v11481_v11 = vld [vmem:[%s13401_s4 + $0x8] sm:$0xff] }
 0x3dc   :  { %14057 = vst [vmem:[#allocation9_spill] sm:$0xff] %v11290_v29  ;;  %v2868_v20 = vmax.f32 %v2830_v6, 0.0  ;;  %8493 = vmatprep.mubr.msk.f32.mxu0 %vm2905_vm3, %v11290_v29  ;;  %8571 = vmatprep.mubr.msk.f32.mxu1 %vm2905_vm3, %v11290_v29  ;;  %v2725_v6 = vadd.f32 %v7661_v53, %v14062_v18  ;;  %v2599_v45 = vmax.f32 %v2581_v17, 0.0  ;;  %14077 = vst [vmem:[#allocation16_spill] sm:$0xff] %v11481_v11  ;;  %v13622_v17 = vunpack.c.h.bf16 %v11481_v11 }
 0x3dd   :  { %v2834_v57 = vpop.f32.mrf.mxu1 }
 0x3de   :  { %v11307_v7 = vmax.f32 %v2606_v63, %v2868_v20  ;;  %v2835_v5 = vadd.f32 %v2834_v57, %v2710_v47  ;;  %v2586_v63 = vadd.f32 %v11194_v38, %v2461_v32  ;;  %v2730_v47 = vadd.f32 %v7664_v4, %v14065_v43 }
 0x3df   :  { %v2836_v12 = vpop.f32.mrf.mxu1  ;;  %v2735_v38 = vadd.f32 %v7667_v22, %v14067_v36  ;;  %v6936_v43 = vunpack.c.l.bf16 %v7154_v56 }
 0x3e0   :  { %14060 = vst [vmem:[#allocation13_spill] sm:$0xff] %v11307_v7  ;;  %v2869_v16 = vmax.f32 %v2835_v5, 0.0  ;;  %8494 = vmatmul.mubr.msk.f32.gmra.mxu0 %vm2905_vm3, %v11307_v7  ;;  %8572 = vmatmul.mubr.msk.f32.gmra.mxu1 %vm2905_vm3, %v11307_v7  ;;  %v2600_v59 = vmax.f32 %v2586_v63, 0.0 }
 0x3e1   :  { %v2839_v27 = vpop.f32.mrf.mxu1 }
 0x3e2   :  { %v11321_v31 = vmax.f32 %v2607_v58, %v2869_v16  ;;  %v2840_v48 = vadd.f32 %v2839_v27, %v2715_v46  ;;  %v2611_v58 = vmax.f32 %v14072_v61, %v2599_v45  ;;  %v14074_v16 = vld [vmem:[#allocation70_spill] sm:$0xff] }
 0x3e3   :  { %v2841_v10 = vpop.f32.mrf.mxu1  ;;  %v2612_v46 = vmax.f32 %v14074_v16, %v2600_v59 }
 0x3e4   :  { %14063 = vst [vmem:[#allocation10_spill] sm:$0xff] %v11321_v31  ;;  %v2870_v34 = vmax.f32 %v2840_v48, 0.0  ;;  %8496 = vmatprep.mubr.msk.f32.mxu0 %vm2905_vm3, %v11321_v31  ;;  %8574 = vmatprep.mubr.msk.f32.mxu1 %vm2905_vm3, %v11321_v31  ;;  %v6565_v48 = vld [vmem:[%s13402_s5 + $0x48] sm:$0xf]  ;;  %v3489_v10 = vunpack.c.l.bf16 %v6599_v41 }
 0x3e5   :  { %v2844_v44 = vpop.f32.mrf.mxu1  ;;  %v3215_v25 = vunpack.c.l.bf16 %v6565_v48 }
 0x3e6   :  { %v11333_v0 = vmax.f32 %v2608_v40, %v2870_v34  ;;  %v2845_v60 = vadd.f32 %v2844_v44, %v2720_v2  ;;  %v6937_v40 = vunpack.c.h.bf16 %v7154_v56  ;;  %v14076_v34 = vmov 0.0   ;;  %v11469_v2 = vld [vmem:[%s13401_s4] sm:$0xff] }
 0x3e7   :  { %v2846_v55 = vpop.f32.mrf.mxu1  ;;  %v13621_v52 = vunpack.c.h.bf16 %v11469_v2 }
 0x3e8   :  { %14066 = vst [vmem:[#allocation15_spill] sm:$0xff] %v11333_v0  ;;  %v2871_v21 = vmax.f32 %v2845_v60, 0.0  ;;  %8497 = vmatmul.mubr.msk.f32.gmra.mxu0 %vm2905_vm3, %v11333_v0  ;;  %8575 = vmatmul.mubr.msk.f32.gmra.mxu1 %vm2905_vm3, %v11333_v0 }
 0x3e9   :  { %v2849_v30 = vpop.f32.mrf.mxu1 }
 0x3ea   :  { %v11343_v14 = vmax.f32 %v2609_v50, %v2871_v21  ;;  %v2850_v35 = vadd.f32 %v2849_v30, %v2725_v6 }
 0x3eb   :  { %v2851_v39 = vpop.f32.mrf.mxu1 }
 0x3ec   :  { %14069 = vst [vmem:[#allocation12_spill] sm:$0xff] %v11343_v14  ;;  %v2872_v20 = vmax.f32 %v2850_v35, 0.0  ;;  %8499 = vmatprep.mubr.msk.f32.mxu0 %vm2905_vm3, %v11343_v14  ;;  %8577 = vmatprep.mubr.msk.f32.mxu1 %vm2905_vm3, %v11343_v14 }
 0x3ed   :  { %v2854_v49 = vpop.f32.mrf.mxu1 }
 0x3ee   :  { %v11352_v57 = vmax.f32 %v2610_v26, %v2872_v20  ;;  %v2855_v5 = vadd.f32 %v2854_v49, %v2730_v47 }
 0x3ef   :  { %v2856_v13 = vpop.f32.mrf.mxu1 }
 0x3f0   :  { %14071 = vst [vmem:[#allocation17_spill] sm:$0xff] %v11352_v57  ;;  %v2873_v18 = vmax.f32 %v2855_v5, 0.0  ;;  %8500 = vmatmul.mubr.msk.f32.gmra.mxu0 %vm2905_vm3, %v11352_v57  ;;  %8578 = vmatmul.mubr.msk.f32.gmra.mxu1 %vm2905_vm3, %v11352_v57 }
 0x3f1   :  { %v2859_v24 = vpop.f32.mrf.mxu1 }
 0x3f2   :  { %v11360_v12 = vmax.f32 %v2611_v58, %v2873_v18  ;;  %v2860_v23 = vadd.f32 %v2859_v24, %v2735_v38 }
 0x3f3   :  { %v2861_v28 = vpop.f32.mrf.mxu1 }
 0x3f4   :  { %14073 = vst [vmem:[#allocation14_spill] sm:$0xff] %v11360_v12  ;;  %v2874_v3 = vmax.f32 %v2860_v23, 0.0  ;;  %8502 = vmatprep.mubr.msk.f32.mxu0 %vm2905_vm3, %v11360_v12  ;;  %8580 = vmatprep.mubr.msk.f32.mxu1 %vm2905_vm3, %v11360_v12 }
 0x3f6   :  { %v11367_v27 = vmax.f32 %v2612_v46, %v2874_v3 }
 0x3f8   :  { %14075 = vst [vmem:[#allocation19_spill] sm:$0xff] %v11367_v27  ;;  %8503 = vmatmul.mubr.msk.f32.gmra.mxu0 %vm2905_vm3, %v11367_v27  ;;  %8581 = vmatmul.mubr.msk.f32.gmra.mxu1 %vm2905_vm3, %v11367_v27 }
 0x3f9   :  { %8513 = vmatprep.mubr.msk.f32.mxu0 %vm2905_vm3, %v11219_v33  ;;  %3823 = vmatprep.mubr.f32.mxu1 %v13621_v52 }
 0x3fc   :  { %8514 = vmatmul.mubr.msk.f32.vlgmr.msra.gmra.mxu0 %vm2905_vm3, %v11236_v62 }
 0x3fd   :  { %8516 = vmatprep.mubr.msk.f32.mxu0 %vm2905_vm3, %v11256_v8  ;;  %8532 = vmatpush3.msk.msra.mxu0 %vm2942_vm2, %v3216_v42  ;;  %v7156_v42 = vld [vmem:[%s13402_s5 + $0x80] sm:$0xff]  }
 0x3fe   :  { %8533 = vmatprep.subr.mxu0 %v3215_v25  ;;  %v6945_v19 = vunpack.c.h.bf16 %v7156_v42  ;;  %v6944_v53 = vunpack.c.l.bf16 %v7156_v42 }
 0x3ff   :  { %8534 = vmatpush3.msra.mxu0 %v3215_v25 }
 0x400   :  { %8517 = vmatmul.mubr.msk.f32.gmra.mxu0 %vm2905_vm3, %v11275_v51  ;;  %8535 = vmatprep.subr.mxu0 %v6937_v40 }
 0x401   :  { %8519 = vmatprep.mubr.msk.f32.mxu0 %vm2905_vm3, %v11290_v29  ;;  %8536 = vmatpush3.msra.mxu0 %v6937_v40 }
 0x402   :  { %8537 = vmatprep.subr.mxu0 %v6936_v43 }
 0x403   :  { %8538 = vmatpush3.msra.mxu0 %v6936_v43 }
 0x404   :  { %8520 = vmatmul.mubr.msk.f32.gmra.mxu0 %vm2905_vm3, %v11307_v7  ;;  %8583 = vmatprep.subr.msk.mxu0 %vm2942_vm2, %v3490_v1 }
 0x405   :  { %8522 = vmatprep.mubr.msk.f32.mxu0 %vm2905_vm3, %v11321_v31 }
 0x408   :  { %8523 = vmatmul.mubr.msk.f32.gmra.mxu0 %vm2905_vm3, %v11333_v0 }
 0x409   :  { %8525 = vmatprep.mubr.msk.f32.mxu0 %vm2905_vm3, %v11343_v14 }
 0x40c   :  { %8526 = vmatmul.mubr.msk.f32.gmra.mxu0 %vm2905_vm3, %v11352_v57 }
 0x40d   :  { %8528 = vmatprep.mubr.msk.f32.mxu0 %vm2905_vm3, %v11360_v12 }
 0x410   :  { %8529 = vmatmul.mubr.msk.f32.gmra.mxu0 %vm2905_vm3, %v11367_v27 }
 0x411   :  { %8539 = vmatprep.mubr.msk.f32.mxu0 %vm2905_vm3, %v11219_v33 }
 0x414   :  { %8540 = vmatmul.mubr.msk.f32.vlgmr.msra.gmra.mxu0 %vm2905_vm3, %v11236_v62 }
 0x415   :  { %8542 = vmatprep.mubr.msk.f32.mxu0 %vm2905_vm3, %v11256_v8  ;;  %8584 = vmatpush3.msk.msra.mxu0 %vm2942_vm2, %v3490_v1 }
 0x416   :  { %8585 = vmatprep.subr.mxu0 %v3489_v10 }
 0x417   :  { %8586 = vmatpush3.msra.mxu0 %v3489_v10 }
 0x418   :  { %8543 = vmatmul.mubr.msk.f32.gmra.mxu0 %vm2905_vm3, %v11275_v51  ;;  %8587 = vmatprep.subr.mxu0 %v6945_v19 }
 0x419   :  { %8545 = vmatprep.mubr.msk.f32.mxu0 %vm2905_vm3, %v11290_v29  ;;  %8588 = vmatpush3.msra.mxu0 %v6945_v19 }
 0x41a   :  { %8589 = vmatprep.subr.mxu0 %v6944_v53 }
 0x41b   :  { %8590 = vmatpush3.msra.mxu0 %v6944_v53 }
 0x41c   :  { %8546 = vmatmul.mubr.msk.f32.gmra.mxu0 %vm2905_vm3, %v11307_v7  ;;  %3874 = vmatprep.subr.mxu0 %v14076_v34 }
 0x41d   :  { %8548 = vmatprep.mubr.msk.f32.mxu0 %vm2905_vm3, %v11321_v31 }
 0x420   :  { %8549 = vmatmul.mubr.msk.f32.gmra.mxu0 %vm2905_vm3, %v11333_v0 }
 0x421   :  { %8551 = vmatprep.mubr.msk.f32.mxu0 %vm2905_vm3, %v11343_v14 }
 0x424   :  { %8552 = vmatmul.mubr.msk.f32.gmra.mxu0 %vm2905_vm3, %v11352_v57 }
 0x425   :  { %8554 = vmatprep.mubr.msk.f32.mxu0 %vm2905_vm3, %v11360_v12 }
 0x428   :  { %8555 = vmatmul.mubr.msk.f32.gmra.mxu0 %vm2905_vm3, %v11367_v27 }
 0x429   :  { %8591 = vmatprep.mubr.msk.f32.mxu0 %vm2905_vm3, %v11219_v33 }
 0x42c   :  { %8592 = vmatmul.mubr.msk.f32.vlgmr.msra.gmra.mxu0 %vm2905_vm3, %v11236_v62 }
 0x42d   :  { %8594 = vmatprep.mubr.msk.f32.mxu0 %vm2905_vm3, %v11256_v8 }
 0x430   :  { %8595 = vmatmul.mubr.msk.f32.gmra.mxu0 %vm2905_vm3, %v11275_v51 }
 0x431   :  { %8597 = vmatprep.mubr.msk.f32.mxu0 %vm2905_vm3, %v11290_v29  ;;  %v13727_v29 = vunpack.c.l.bf16 %v11469_v2 }
 0x434   :  { %8598 = vmatmul.mubr.msk.f32.gmra.mxu0 %vm2905_vm3, %v11307_v7 }
 0x435   :  { %8600 = vmatprep.mubr.msk.f32.mxu0 %vm2905_vm3, %v11321_v31 }
 0x438   :  { %8601 = vmatmul.mubr.msk.f32.gmra.mxu0 %vm2905_vm3, %v11333_v0 }
 0x439   :  { %8603 = vmatprep.mubr.msk.f32.mxu0 %vm2905_vm3, %v11343_v14 }
 0x43c   :  { %8604 = vmatmul.mubr.msk.f32.gmra.mxu0 %vm2905_vm3, %v11352_v57 }
 0x43d   :  { %8606 = vmatprep.mubr.msk.f32.mxu0 %vm2905_vm3, %v11360_v12 }
 0x440   :  { %8607 = vmatmul.mubr.msk.f32.gmra.mxu0 %vm2905_vm3, %v11367_v27 }
 0x441   :  { %6614 = vmatprep.mubr.msk.f32.mxu0 %vm947_vm1, %v13622_v17 }
 0x490   :  { %v11474_v44 = vpop.f32.mrf.mxu0  ;;  %v11476_v60 = vpop.f32.mrf.mxu1 }
 0x492   :  { %v11487_v36 = vpop.f32.mrf.mxu0  ;;  %v11489_v32 = vpop.f32.mrf.mxu1 }
 0x493   :  { %14078 = vst [vmem:[#allocation21_spill] sm:$0xff] %v11489_v32 }
 0x498   :  { %v11491_v55 = vpop.f32.mrf.mxu0  ;;  %v11493_v9 = vpop.f32.mrf.mxu1 }
 0x49a   :  { %v11495_v50 = vpop.f32.mrf.mxu0  ;;  %v11497_v4 = vpop.f32.mrf.mxu1 }
 0x4a0   :  { %v11499_v21 = vpop.f32.mrf.mxu0  ;;  %v11501_v6 = vpop.f32.mrf.mxu1 }
 0x4a2   :  { %v11503_v54 = vpop.f32.mrf.mxu0  ;;  %v11505_v30 = vpop.f32.mrf.mxu1 }
 0x4a8   :  { %v11507_v35 = vpop.f32.mrf.mxu0  ;;  %v11509_v37 = vpop.f32.mrf.mxu1 }
 0x4aa   :  { %v11511_v26 = vpop.f32.mrf.mxu0  ;;  %v11513_v45 = vpop.f32.mrf.mxu1 }
 0x4b0   :  { %v11515_v39 = vpop.f32.mrf.mxu0  ;;  %v11517_v63 = vpop.f32.mrf.mxu1 }
 0x4b2   :  { %v11519_v22 = vpop.f32.mrf.mxu0  ;;  %v11521_v20 = vpop.f32.mrf.mxu1 }
 0x4b8   :  { %v11523_v47 = vpop.f32.mrf.mxu0  ;;  %v11525_v49 = vpop.f32.mrf.mxu1 }
 0x4b9   :  { %3875 = vmatpush1.msra.mxu0 %v11525_v49 }
 0x4ba   :  { %v11528_v5 = vpop.f32.mrf.mxu0  ;;  %v11530_v13 = vpop.f32.mrf.mxu1  ;;  %3876 = vmatprep.subr.mxu0 %v14076_v34 }
 0x4bb   :  { %3877 = vmatpush1.msra.mxu0 %v11530_v13 }
 0x4bc   :  { %v11534_v61 = vpop.f32.mrf.mxu0  ;;  %3878 = vmatprep.subr.mxu0 %v14076_v34 }
 0x4bd   :  { %3879 = vmatpush1.msra.mxu0 %v11517_v63 }
 0x4be   :  { %v11538_v58 = vpop.f32.mrf.mxu0  ;;  %3880 = vmatprep.subr.mxu0 %v14076_v34 }
 0x4bf   :  { %3881 = vmatpush1.msra.mxu0 %v11521_v20 }
 0x4c0   :  { %v11542_v59 = vpop.f32.mrf.mxu0  ;;  %3882 = vmatprep.subr.mxu0 %v14076_v34 }
 0x4c1   :  { %3883 = vmatpush1.msra.mxu0 %v11509_v37 }
 0x4c2   :  { %v11546_v18 = vpop.f32.mrf.mxu0  ;;  %3884 = vmatprep.subr.mxu0 %v14076_v34 }
 0x4c3   :  { %3885 = vmatpush1.msra.mxu0 %v11513_v45 }
 0x4c4   :  { %v11550_v38 = vpop.f32.mrf.mxu0  ;;  %3886 = vmatprep.subr.mxu0 %v14076_v34 }
 0x4c5   :  { %3887 = vmatpush1.msra.mxu0 %v11501_v6 }
 0x4c6   :  { %v11554_v24 = vpop.f32.mrf.mxu0  ;;  %3888 = vmatprep.subr.mxu0 %v14076_v34 }
 0x4c7   :  { %3889 = vmatpush1.msra.mxu0 %v11505_v30 }
 0x4c8   :  { %v11558_v23 = vpop.f32.mrf.mxu0  ;;  %3890 = vmatprep.subr.mxu0 %v14076_v34 }
 0x4c9   :  { %3891 = vmatpush1.msra.mxu0 %v11493_v9 }
 0x4ca   :  { %v11562_v28 = vpop.f32.mrf.mxu0  ;;  %3892 = vmatprep.subr.mxu0 %v14076_v34 }
 0x4cb   :  { %3893 = vmatpush1.msra.mxu0 %v11497_v4 }
 0x4cc   :  { %v11566_v16 = vpop.f32.mrf.mxu0  ;;  %3894 = vmatprep.subr.mxu0 %v14076_v34 }
 0x4cd   :  { %3895 = vmatpush1.msra.mxu0 %v11476_v60 }
 0x4ce   :  { %v11570_v46 = vpop.f32.mrf.mxu0  ;;  %3896 = vmatprep.subr.mxu0 %v14076_v34 }
 0x4cf   :  { %3897 = vmatpush1.msra.mxu0 %v11489_v32  ;;  %v11679_v32 = vld [vmem:[%s13401_s4 + $0x20] sm:$0xff] }
 0x4d0   :  { %v11574_v3 = vpop.f32.mrf.mxu0  ;;  %3898 = vmatprep.subr.mxu0 %v14076_v34 }
 0x4d2   :  { %v11577_v48 = vpop.f32.mrf.mxu0 }
 0x4d4   :  { %v11579_v56 = vpop.f32.mrf.mxu0 }
 0x4d6   :  { %v11581_v25 = vpop.f32.mrf.mxu0 }
 0x4d8   :  { %v11583_v40 = vpop.f32.mrf.mxu0 }
 0x4da   :  { %v11585_v15 = vpop.f32.mrf.mxu0 }
 0x4dc   :  { %v11587_v43 = vpop.f32.mrf.mxu0 }
 0x4de   :  { %v11589_v1 = vpop.f32.mrf.mxu0 }
 0x4e0   :  { %v8550_v41 = vpop.f32.mrf.mxu0 }
 0x4e1   :  { %7748 = vmatprep.subr.mxu1 %v8550_v41 }
 0x4e2   :  { %v11591_v42 = vpop.f32.mrf.mxu0  ;;  %7749 = vmatpush3.msra.mxu1 %v11542_v59 }
 0x4e3   :  { %7750 = vmatprep.subr.mxu1 %v11591_v42 }
 0x4e4   :  { %v11595_v10 = vpop.f32.mrf.mxu0  ;;  %7751 = vmatpush3.msra.mxu1 %v11546_v18 }
 0x4e5   :  { %14079 = vst [vmem:[#allocation18_spill] sm:$0xff] %v11595_v10  ;;  %7752 = vmatprep.subr.mxu1 %v11587_v43 }
 0x4e6   :  { %v11599_v19 = vpop.f32.mrf.mxu0  ;;  %7753 = vmatpush3.msra.mxu1 %v11534_v61 }
 0x4e7   :  { %14080 = vst [vmem:[#allocation73_spill] sm:$0xff] %v11599_v19  ;;  %7754 = vmatprep.subr.mxu1 %v11589_v1 }
 0x4e8   :  { %v11603_v53 = vpop.f32.mrf.mxu0  ;;  %7755 = vmatpush3.msra.mxu1 %v11538_v58 }
 0x4e9   :  { %14081 = vst [vmem:[#allocation23_spill] sm:$0xff] %v11603_v53  ;;  %7756 = vmatprep.subr.mxu1 %v11583_v40  ;;  %3899 = vmatpush1.msra.mxu0 %v11603_v53 }
 0x4ea   :  { %v11608_v52 = vpop.f32.mrf.mxu0  ;;  %7757 = vmatpush3.msra.mxu1 %v11523_v47  ;;  %3900 = vmatprep.subr.mxu0 %v14076_v34 }
 0x4eb   :  { %14082 = vst [vmem:[#allocation74_spill] sm:$0xff] %v11608_v52  ;;  %7758 = vmatprep.subr.mxu1 %v11585_v15  ;;  %3901 = vmatpush1.msra.mxu0 %v11608_v52 }
 0x4ec   :  { %v11614_v17 = vpop.f32.mrf.mxu0  ;;  %7759 = vmatpush3.msra.mxu1 %v11528_v5  ;;  %3902 = vmatprep.subr.mxu0 %v14076_v34 }
 0x4ed   :  { %7760 = vmatprep.subr.mxu1 %v11579_v56  ;;  %3903 = vmatpush1.msra.mxu0 %v11595_v10  ;;  %v11659_v10 = vld [vmem:[%s13401_s4 + $0x10] sm:$0xff] }
 0x4ee   :  { %v11620_v27 = vpop.f32.mrf.mxu0  ;;  %7761 = vmatpush3.msra.mxu1 %v11515_v39  ;;  %3904 = vmatprep.subr.mxu0 %v14076_v34  ;;  %v13726_v53 = vunpack.c.h.bf16 %v11659_v10  ;;  %v13725_v62 = vunpack.c.l.bf16 %v11659_v10 }
 0x4ef   :  { %7762 = vmatprep.subr.mxu1 %v11581_v25  ;;  %3905 = vmatpush1.msra.mxu0 %v11599_v19 }
 0x4f0   :  { %v11626_v12 = vpop.f32.mrf.mxu0  ;;  %7763 = vmatpush3.msra.mxu1 %v11519_v22  ;;  %3914 = vmatprep.subr.mxu0 %v14076_v34 }
 0x4f1   :  { %7764 = vmatprep.subr.mxu1 %v11574_v3 }
 0x4f2   :  { %v11631_v57 = vpop.f32.mrf.mxu0  ;;  %7765 = vmatpush3.msra.mxu1 %v11507_v35 }
 0x4f3   :  { %7766 = vmatprep.subr.mxu1 %v11577_v48 }
 0x4f4   :  { %v11635_v14 = vpop.f32.mrf.mxu0  ;;  %7767 = vmatpush3.msra.mxu1 %v11511_v26 }
 0x4f5   :  { %7768 = vmatprep.subr.mxu1 %v11566_v16 }
 0x4f6   :  { %v11639_v0 = vpop.f32.mrf.mxu0  ;;  %7769 = vmatpush3.msra.mxu1 %v11499_v21 }
 0x4f7   :  { %7770 = vmatprep.subr.mxu1 %v11570_v46 }
 0x4f8   :  { %v11643_v31 = vpop.f32.mrf.mxu0  ;;  %7771 = vmatpush3.msra.mxu1 %v11503_v54 }
 0x4f9   :  { %7772 = vmatprep.subr.mxu1 %v11558_v23 }
 0x4fa   :  { %v11647_v7 = vpop.f32.mrf.mxu0  ;;  %7773 = vmatpush3.msra.mxu1 %v11491_v55 }
 0x4fb   :  { %7774 = vmatprep.subr.mxu1 %v11562_v28 }
 0x4fc   :  { %v11651_v19 = vpop.f32.mrf.mxu0  ;;  %7775 = vmatpush3.msra.mxu1 %v11495_v50 }
 0x4fd   :  { %7776 = vmatprep.subr.mxu1 %v11550_v38 }
 0x4fe   :  { %v11661_v51 = vpop.f32.mrf.mxu0  ;;  %7777 = vmatpush3.msra.mxu1 %v11474_v44 }
 0x4ff   :  { %7778 = vmatprep.subr.mxu1 %v11554_v24 }
 0x500   :  { %v11665_v52 = vpop.f32.mrf.mxu0  ;;  %7779 = vmatpush3.msra.mxu1 %v11487_v36 }
 0x501   :  { %3824 = vmatmul.mubr.f32.vlgmr.msra.gmra.mxu1 %v13727_v29  ;;  %3915 = vmatpush2.msra.mxu0 %v11665_v52 }
 0x502   :  { %7810 = vmatprep.subr.mxu1 %v8550_v41  ;;  %v11672_v8 = vpop.f32.mrf.mxu0  ;;  %3916 = vmatprep.subr.mxu0 %v14076_v34  ;;  %v13724_v41 = vunpack.c.h.bf16 %v11679_v32 }
 0x503   :  { %7811 = vmatpush3.msra.mxu1 %v11542_v59  ;;  %3917 = vmatpush2.msra.mxu0 %v11672_v8  ;;  %v13714_v59 = vunpack.c.l.bf16 %v11679_v32 }
 0x504   :  { %7812 = vmatprep.subr.mxu1 %v11591_v42  ;;  %3828 = vmatprep.mubr.f32.mxu1 %v13726_v53  ;;  %v11698_v42 = vld [vmem:[%s13401_s4 + $0x30] sm:$0xff] }
 0x505   :  { %3918 = vmatprep.subr.mxu0 %v14076_v34  ;;  %7813 = vmatpush3.msra.mxu1 %v11546_v18  ;;  %14083 = vst [vmem:[#allocation20_spill] sm:$0xff] %v11698_v42  ;;  %v13713_v18 = vunpack.c.h.bf16 %v11698_v42 }
 0x506   :  { %3829 = vmatmul.mubr.f32.gmra.mxu1 %v13725_v62  ;;  %3919 = vmatpush2.msra.mxu0 %v11651_v19 }
 0x507   :  { %7814 = vmatprep.subr.mxu1 %v11587_v43  ;;  %3920 = vmatprep.subr.mxu0 %v14076_v34  ;;  %v11717_v43 = vld [vmem:[%s13401_s4 + $0x40] sm:$0xff] }
 0x508   :  { %7815 = vmatpush3.msra.mxu1 %v11534_v61  ;;  %3921 = vmatpush2.msra.mxu0 %v11661_v51  ;;  %v13703_v61 = vunpack.c.l.bf16 %v11698_v42  ;;  %14084 = vst [vmem:[#allocation71_spill] sm:$0xff] %v11717_v43 }
 0x509   :  { %7816 = vmatprep.subr.mxu1 %v11589_v1  ;;  %3833 = vmatprep.mubr.f32.mxu1 %v13724_v41 }
 0x50a   :  { %3922 = vmatprep.subr.mxu0 %v14076_v34  ;;  %7817 = vmatpush3.msra.mxu1 %v11538_v58  ;;  %v13696_v58 = vunpack.c.h.bf16 %v11717_v43 }
 0x50b   :  { %3834 = vmatmul.mubr.f32.gmra.mxu1 %v13714_v59  ;;  %3923 = vmatpush2.msra.mxu0 %v11643_v31 }
 0x50c   :  { %7818 = vmatprep.subr.mxu1 %v11583_v40  ;;  %3924 = vmatprep.subr.mxu0 %v14076_v34  ;;  %v11736_v40 = vld [vmem:[%s13401_s4 + $0x50] sm:$0xff] }
 0x50d   :  { %7819 = vmatpush3.msra.mxu1 %v11523_v47  ;;  %3925 = vmatpush2.msra.mxu0 %v11647_v7  ;;  %v13695_v47 = vunpack.c.l.bf16 %v11717_v43  ;;  %14085 = vst [vmem:[#allocation7_spill] sm:$0xff] %v11736_v40 }
 0x50e   :  { %7820 = vmatprep.subr.mxu1 %v11585_v15  ;;  %3838 = vmatprep.mubr.f32.mxu1 %v13713_v18  ;;  %v11783_v15 = vld [vmem:[%s13401_s4 + $0x70] sm:$0xff]  ;;  %v12301_v18 = vld [vmem:[%s13401_s4 + $0x128] sm:$0xff] }
 0x50f   :  { %3926 = vmatprep.subr.mxu0 %v14076_v34  ;;  %7821 = vmatpush3.msra.mxu1 %v11528_v5  ;;  %v13694_v5 = vunpack.c.h.bf16 %v11736_v40  ;;  %14088 = vst [vmem:[#allocation75_spill] sm:$0xff] %v11783_v15  ;;  %v13653_v1 = vunpack.c.h.bf16 %v11783_v15  ;;  %14133 = vst [vmem:[#allocation50_spill] sm:$0xff] %v12301_v18 }
 0x510   :  { %3839 = vmatmul.mubr.f32.gmra.mxu1 %v13703_v61  ;;  %3927 = vmatpush2.msra.mxu0 %v11635_v14  ;;  %v7160_v61 = vld [vmem:[%s13402_s5 + $0x70] sm:$0xff]  }
 0x511   :  { %7822 = vmatprep.subr.mxu1 %v11579_v56  ;;  %3928 = vmatprep.subr.mxu0 %v14076_v34  ;;  %v11755_v56 = vld [vmem:[%s13401_s4 + $0x60] sm:$0xff] }
 0x512   :  { %7823 = vmatpush3.msra.mxu1 %v11515_v39  ;;  %3929 = vmatpush2.msra.mxu0 %v11639_v0  ;;  %v13691_v39 = vunpack.c.l.bf16 %v11736_v40  ;;  %14086 = vst [vmem:[#allocation72_spill] sm:$0xff] %v11755_v56 }
 0x513   :  { %7824 = vmatprep.subr.mxu1 %v11581_v25  ;;  %3843 = vmatprep.mubr.f32.mxu1 %v13696_v58  ;;  %v14119_v58 = vld [vmem:[#allocation10_spill] sm:$0xff] }
 0x514   :  { %3930 = vmatprep.subr.mxu0 %v14076_v34  ;;  %7825 = vmatpush3.msra.mxu1 %v11519_v22  ;;  %v6657_v22 = vld [vmem:[%s13402_s5 + $0x1c] sm:$0x3] }
 0x515   :  { %3844 = vmatmul.mubr.f32.gmra.mxu1 %v13695_v47  ;;  %3931 = vmatpush2.msra.mxu0 %v11626_v12  ;;  %v4348_v25 = vunpack.c.l.bf16 %v6657_v22  ;;  %v11807_v22 = vld [vmem:[%s13401_s4 + $0x80] sm:$0xff] }
 0x516   :  { %7826 = vmatprep.subr.mxu1 %v11574_v3  ;;  %3932 = vmatprep.subr.mxu0 %v14076_v34  ;;  %v13660_v3 = vunpack.c.h.bf16 %v11755_v56  ;;  %14090 = vst [vmem:[#allocation6_spill] sm:$0xff] %v11807_v22  ;;  %v14118_v47 = vld [vmem:[#allocation13_spill] sm:$0xff] }
 0x517   :  { %7827 = vmatpush3.msra.mxu1 %v11507_v35  ;;  %3933 = vmatpush2.msra.mxu0 %v11631_v57  ;;  %v13650_v35 = vunpack.c.l.bf16 %v11481_v11 }
 0x518   :  { %7828 = vmatprep.subr.mxu1 %v11577_v48  ;;  %3848 = vmatprep.mubr.f32.mxu1 %v13694_v5  ;;  %v11775_v48 = vld [vmem:[%s13401_s4 + $0x18] sm:$0xff] }
 0x519   :  { %3934 = vmatprep.subr.mxu0 %v14076_v34  ;;  %7829 = vmatpush3.msra.mxu1 %v11511_v26  ;;  %14087 = vst [vmem:[#allocation22_spill] sm:$0xff] %v11775_v48  ;;  %v13651_v26 = vunpack.c.l.bf16 %v11755_v56 }
 0x51a   :  { %3849 = vmatmul.mubr.f32.gmra.mxu1 %v13691_v39  ;;  %3935 = vmatpush2.msra.mxu0 %v11614_v17  ;;  %v14115_v39 = vld [vmem:[#allocation18_spill] sm:$0xff] }
 0x51b   :  { %7830 = vmatprep.subr.mxu1 %v11566_v16  ;;  %3936 = vmatprep.subr.mxu0 %v14076_v34  ;;  %v13652_v16 = vunpack.c.h.bf16 %v11775_v48 }
 0x51c   :  { %7831 = vmatpush3.msra.mxu1 %v11499_v21  ;;  %3937 = vmatpush2.msra.mxu0 %v11620_v27  ;;  %v11798_v21 = vld [vmem:[%s13401_s4 + $0x28] sm:$0xff] }
 0x51d   :  { %7832 = vmatprep.subr.mxu1 %v11570_v46  ;;  %3853 = vmatprep.mubr.f32.mxu1 %v13660_v3  ;;  %14089 = vst [vmem:[#allocation25_spill] sm:$0xff] %v11798_v21  ;;  %v13654_v46 = vunpack.c.l.bf16 %v11775_v48 }
 0x51e   :  { %3939 = vmatmul.mubr.f32.vlgmr.msra.gmra.mxu0 %v13650_v35  ;;  %7833 = vmatpush3.msra.mxu1 %v11503_v54  ;;  %v13655_v54 = vunpack.c.l.bf16 %v11783_v15  ;;  %v13656_v35 = vunpack.c.h.bf16 %v11798_v21 }
 0x51f   :  { %8609 = vmatprep.subr.msk.mxu0 %vm2942_vm2, %v4348_v25  ;;  %3854 = vmatmul.mubr.f32.gmra.mxu1 %v13651_v26  ;;  %v6656_v26 = vld [vmem:[%s13402_s5 + $0x18] sm:$0xf] }
 0x520   :  { %7834 = vmatprep.subr.mxu1 %v11558_v23  ;;  %8610 = vmatpush3.msk.msra.mxu0 %vm2942_vm2, %v4348_v25  ;;  %v13657_v23 = vunpack.c.h.bf16 %v11807_v22  ;;  %v13658_v25 = vunpack.c.l.bf16 %v11798_v21 }
 0x521   :  { %7835 = vmatpush3.msra.mxu1 %v11491_v55  ;;  %6615 = vmatprep.mubr.msk.f32.mxu0 %vm947_vm1, %v13652_v16  ;;  %v11827_v55 = vld [vmem:[%s13401_s4 + $0x38] sm:$0xff]  ;;  %v13659_v16 = vunpack.c.l.bf16 %v11807_v22 }
 0x522   :  { %7836 = vmatprep.subr.mxu1 %v11562_v28  ;;  %3858 = vmatprep.mubr.f32.mxu1 %v13653_v1  ;;  %14091 = vst [vmem:[#allocation27_spill] sm:$0xff] %v11827_v55  ;;  %v11836_v28 = vld [vmem:[%s13401_s4 + $0x90] sm:$0xff]  ;;  %v4347_v1 = vunpack.c.l.bf16 %v6656_v26  ;;  %v13663_v26 = vunpack.c.l.bf16 %v11827_v55 }
 0x523   :  { %3944 = vmatmul.mubr.f32.gmra.mxu0 %v13654_v46  ;;  %7837 = vmatpush3.msra.mxu1 %v11495_v50  ;;  %14092 = vst [vmem:[#allocation24_spill] sm:$0xff] %v11836_v28  ;;  %v7157_v46 = vld [vmem:[%s13402_s5 + $0x10] sm:$0xff]   ;;  %v13661_v50 = vunpack.c.h.bf16 %v11827_v55 }
 0x524   :  { %3859 = vmatmul.mubr.f32.gmra.mxu1 %v13655_v54  ;;  %7838 = vmatprep.subr.mxu1 %v11550_v38  ;;  %v11853_v54 = vld [vmem:[%s13401_s4 + $0x48] sm:$0xff]  ;;  %v13662_v38 = vunpack.c.h.bf16 %v11836_v28  ;;  %v6948_v3 = vunpack.c.l.bf16 %v7157_v46 }
 0x525   :  { %7839 = vmatpush3.msra.mxu1 %v11474_v44  ;;  %6616 = vmatprep.mubr.msk.f32.mxu0 %vm947_vm1, %v13656_v35  ;;  %14093 = vst [vmem:[#allocation29_spill] sm:$0xff] %v11853_v54  ;;  %v11862_v44 = vld [vmem:[%s13401_s4 + $0xa0] sm:$0xff]  ;;  %v6949_v35 = vunpack.c.h.bf16 %v7157_v46 }
 0x526   :  { %7840 = vmatprep.subr.mxu1 %v11554_v24  ;;  %3863 = vmatprep.mubr.f32.mxu1 %v13657_v23  ;;  %14094 = vst [vmem:[#allocation26_spill] sm:$0xff] %v11862_v44  ;;  %v13665_v24 = vunpack.c.l.bf16 %v11836_v28  ;;  %v13664_v23 = vunpack.c.h.bf16 %v11853_v54 }
 0x527   :  { %3949 = vmatmul.mubr.f32.gmra.mxu0 %v13658_v25  ;;  %7841 = vmatpush3.msra.mxu1 %v11487_v36  ;;  %v13667_v25 = vunpack.c.h.bf16 %v11862_v44  ;;  %v11879_v36 = vld [vmem:[%s13401_s4 + $0x58] sm:$0xff] }
 0x528   :  { %3864 = vmatmul.mubr.f32.gmra.mxu1 %v13659_v16  ;;  %8611 = vmatprep.subr.mxu0 %v4347_v1  ;;  %14095 = vst [vmem:[#allocation28_spill] sm:$0xff] %v11879_v36  ;;  %v11887_v16 = vld [vmem:[%s13401_s4 + $0xb0] sm:$0xff] }
 0x529   :  { %6617 = vmatprep.mubr.msk.f32.mxu0 %vm947_vm1, %v13661_v50  ;;  %8612 = vmatpush3.msra.mxu0 %v4347_v1  ;;  %14096 = vst [vmem:[#allocation33_spill] sm:$0xff] %v11887_v16  ;;  %v13666_v1 = vunpack.c.l.bf16 %v11853_v54  ;;  %v13668_v50 = vunpack.c.l.bf16 %v11862_v44  ;;  %v13670_v46 = vunpack.c.h.bf16 %v11887_v16 }
 0x52a   :  { %3868 = vmatprep.mubr.f32.mxu1 %v13662_v38  ;;  %4205 = vmatprep.subr.mxu1 %v14076_v34  ;;  %v13669_v38 = vunpack.c.h.bf16 %v11879_v36 }
 0x52b   :  { %3954 = vmatmul.mubr.f32.gmra.mxu0 %v13663_v26  ;;  %8613 = vmatprep.subr.mxu0 %v6949_v35  ;;  %v11905_v26 = vld [vmem:[%s13401_s4 + $0x68] sm:$0xff] }
 0x52c   :  { %3869 = vmatmul.mubr.f32.gmra.mxu1 %v13665_v24  ;;  %6618 = vmatprep.mubr.msk.f32.mxu0 %vm947_vm1, %v13664_v23  ;;  %14097 = vst [vmem:[#allocation30_spill] sm:$0xff] %v11905_v26  ;;  %v13671_v23 = vunpack.c.l.bf16 %v11879_v36  ;;  %v11913_v24 = vld [vmem:[%s13401_s4 + $0xc0] sm:$0xff] }
 0x52d   :  { %4154 = vmatprep.mubr.f32.mxu1 %v13667_v25  ;;  %8614 = vmatpush3.msra.mxu0 %v6949_v35  ;;  %14098 = vst [vmem:[#allocation31_spill] sm:$0xff] %v11913_v24  ;;  %v13690_v35 = vunpack.c.l.bf16 %v11887_v16  ;;  %v13673_v25 = vunpack.c.h.bf16 %v11913_v24 }
 0x52e   :  { %8615 = vmatprep.subr.mxu0 %v6948_v3 }
 0x52f   :  { %3959 = vmatmul.mubr.f32.gmra.mxu0 %v13666_v1  ;;  %v13672_v1 = vunpack.c.h.bf16 %v11905_v26 }
 0x530   :  { %4155 = vmatmul.mubr.f32.vlgmr.msra.gmra.mxu1 %v13668_v50  ;;  %6619 = vmatprep.mubr.msk.f32.mxu0 %vm947_vm1, %v13669_v38  ;;  %v11930_v50 = vld [vmem:[%s13401_s4 + $0x78] sm:$0xff]  ;;  %v11939_v38 = vld [vmem:[%s13401_s4 + $0xd0] sm:$0xff] }
 0x531   :  { %4206 = vmatpush1.msra.mxu1 %v11525_v49  ;;  %4159 = vmatprep.mubr.f32.mxu1 %v13670_v46  ;;  %14099 = vst [vmem:[#allocation35_spill] sm:$0xff] %v11930_v50  ;;  %v13674_v49 = vunpack.c.l.bf16 %v11905_v26  ;;  %14100 = vst [vmem:[#allocation32_spill] sm:$0xff] %v11939_v38  ;;  %v13675_v46 = vunpack.c.l.bf16 %v11913_v24 }
 0x532   :  { %4207 = vmatprep.subr.mxu1 %v14076_v34  ;;  %8616 = vmatpush3.msra.mxu0 %v6948_v3  ;;  %v13677_v3 = vunpack.c.h.bf16 %v11939_v38 }
 0x533   :  { %4208 = vmatpush1.msra.mxu1 %v11530_v13  ;;  %3964 = vmatmul.mubr.f32.gmra.mxu0 %v13671_v23  ;;  %v13676_v13 = vunpack.c.h.bf16 %v11930_v50  ;;  %v11957_v23 = vld [vmem:[%s13401_s4 + $0x88] sm:$0xff] }
 0x534   :  { %4209 = vmatprep.subr.mxu1 %v14076_v34  ;;  %4160 = vmatmul.mubr.f32.gmra.mxu1 %v13690_v35  ;;  %14101 = vst [vmem:[#allocation37_spill] sm:$0xff] %v11957_v23  ;;  %v14113_v35 = vld [vmem:[#allocation11_spill] sm:$0xff] }
 0x535   :  { %4210 = vmatpush1.msra.mxu1 %v11517_v63  ;;  %6620 = vmatprep.mubr.msk.f32.mxu0 %vm947_vm1, %v13672_v1  ;;  %v13678_v63 = vunpack.c.l.bf16 %v11930_v50  ;;  %v11966_v1 = vld [vmem:[%s13401_s4 + $0xe0] sm:$0xff] }
 0x536   :  { %4211 = vmatprep.subr.mxu1 %v14076_v34  ;;  %4164 = vmatprep.mubr.f32.mxu1 %v13673_v25  ;;  %14102 = vst [vmem:[#allocation34_spill] sm:$0xff] %v11966_v1  ;;  %v13689_v25 = vunpack.c.l.bf16 %v11939_v38 }
 0x537   :  { %4212 = vmatpush1.msra.mxu1 %v11521_v20  ;;  %3969 = vmatmul.mubr.f32.gmra.mxu0 %v13674_v49  ;;  %v13679_v20 = vunpack.c.h.bf16 %v11957_v23  ;;  %v13680_v49 = vunpack.c.h.bf16 %v11966_v1 }
 0x538   :  { %4213 = vmatprep.subr.mxu1 %v14076_v34  ;;  %4165 = vmatmul.mubr.f32.gmra.mxu1 %v13675_v46  ;;  %v11984_v46 = vld [vmem:[%s13401_s4 + $0x98] sm:$0xff] }
 0x539   :  { %4214 = vmatpush1.msra.mxu1 %v11509_v37  ;;  %6621 = vmatprep.mubr.msk.f32.mxu0 %vm947_vm1, %v13676_v13  ;;  %14103 = vst [vmem:[#allocation38_spill] sm:$0xff] %v11984_v46  ;;  %v13681_v37 = vunpack.c.l.bf16 %v11957_v23  ;;  %v11993_v13 = vld [vmem:[%s13401_s4 + $0xf0] sm:$0xff] }
 0x53a   :  { %4215 = vmatprep.subr.mxu1 %v14076_v34  ;;  %4169 = vmatprep.mubr.f32.mxu1 %v13677_v3  ;;  %14104 = vst [vmem:[#allocation36_spill] sm:$0xff] %v11993_v13  ;;  %v13687_v3 = vunpack.c.l.bf16 %v11966_v1 }
 0x53b   :  { %4216 = vmatpush1.msra.mxu1 %v11513_v45  ;;  %3974 = vmatmul.mubr.f32.gmra.mxu0 %v13678_v63  ;;  %v13682_v45 = vunpack.c.h.bf16 %v11984_v46  ;;  %v13685_v63 = vunpack.c.h.bf16 %v11993_v13 }
 0x53c   :  { %4217 = vmatprep.subr.mxu1 %v14076_v34  ;;  %4170 = vmatmul.mubr.f32.gmra.mxu1 %v13689_v25  ;;  %v14112_v25 = vld [vmem:[#allocation74_spill] sm:$0xff] }
 0x53d   :  { %4218 = vmatpush1.msra.mxu1 %v11501_v6  ;;  %6622 = vmatprep.mubr.msk.f32.mxu0 %vm947_vm1, %v13679_v20  ;;  %v13683_v6 = vunpack.c.l.bf16 %v11984_v46  ;;  %v12015_v20 = vld [vmem:[%s13401_s4 + $0x100] sm:$0xff] }
 0x53e   :  { %4219 = vmatprep.subr.mxu1 %v14076_v34  ;;  %4174 = vmatprep.mubr.f32.mxu1 %v13680_v49  ;;  %14105 = vst [vmem:[#allocation39_spill] sm:$0xff] %v12015_v20  ;;  %v13684_v49 = vunpack.c.l.bf16 %v11993_v13 }
 0x53f   :  { %4220 = vmatpush1.msra.mxu1 %v11505_v30  ;;  %3979 = vmatmul.mubr.f32.gmra.mxu0 %v13681_v37  ;;  %v6674_v30 = vld [vmem:[%s13402_s5 + $0x3c] sm:$0x3]  ;;  %v13686_v37 = vunpack.c.h.bf16 %v12015_v20 }
 0x540   :  { %4221 = vmatprep.subr.mxu1 %v14076_v34  ;;  %4175 = vmatmul.mubr.f32.gmra.mxu1 %v13687_v3  ;;  %v12069_v3 = vld [vmem:[%s13401_s4 + $0x120] sm:$0xff] }
 0x541   :  { %4222 = vmatpush1.msra.mxu1 %v11493_v9  ;;  %6623 = vmatprep.mubr.msk.f32.mxu0 %vm947_vm1, %v13682_v45  ;;  %v4485_v9 = vunpack.c.l.bf16 %v6674_v30  ;;  %v12041_v45 = vld [vmem:[%s13401_s4 + $0x110] sm:$0xff]  ;;  %v14108_v30 = vld [vmem:[#allocation5_spill] sm:$0xff]  ;;  %14111 = vst [vmem:[#allocation41_spill] sm:$0xff] %v12069_v3 }
 0x542   :  { %4223 = vmatprep.subr.mxu1 %v14076_v34  ;;  %4179 = vmatprep.mubr.f32.mxu1 %v13685_v63  ;;  %14106 = vst [vmem:[#allocation40_spill] sm:$0xff] %v12041_v45  ;;  %v14109_v63 = vld [vmem:[#allocation8_spill] sm:$0xff] }
 0x543   :  { %4224 = vmatpush1.msra.mxu1 %v11497_v4  ;;  %3984 = vmatmul.mubr.f32.gmra.mxu0 %v13683_v6  ;;  %v13688_v4 = vunpack.c.l.bf16 %v12015_v20  ;;  %v14107_v6 = vld [vmem:[#allocation21_spill] sm:$0xff] }
 0x544   :  { %4225 = vmatprep.subr.mxu1 %v14076_v34  ;;  %4180 = vmatmul.mubr.f32.gmra.mxu1 %v13684_v49  ;;  %v13692_v49 = vunpack.c.h.bf16 %v12041_v45 }
 0x545   :  { %4226 = vmatpush1.msra.mxu1 %v11476_v60  ;;  %8617 = vmatprep.mubr.msk.f32.mxu0 %vm2905_vm3, %v11219_v33  ;;  %v6673_v60 = vld [vmem:[%s13402_s5 + $0x38] sm:$0xf] }
 0x546   :  { %4227 = vmatprep.subr.mxu1 %v14076_v34  ;;  %4184 = vmatprep.mubr.f32.mxu1 %v13686_v37  ;;  %v14110_v37 = vld [vmem:[#allocation23_spill] sm:$0xff] }
 0x547   :  { %4228 = vmatpush1.msra.mxu1 %v14107_v6  ;;  %8618 = vmatmul.mubr.msk.f32.vlgmr.msra.gmra.mxu0 %vm2905_vm3, %v14108_v30  ;;  %v13693_v6 = vunpack.c.l.bf16 %v12041_v45 }
 0x548   :  { %4229 = vmatprep.subr.mxu1 %v14076_v34  ;;  %8635 = vmatprep.subr.msk.mxu0 %vm2942_vm2, %v4485_v9 }
 0x549   :  { %4185 = vmatmul.mubr.f32.gmra.mxu1 %v13688_v4  ;;  %8620 = vmatprep.mubr.msk.f32.mxu0 %vm2905_vm3, %v14109_v63  ;;  %v4484_v4 = vunpack.c.l.bf16 %v6673_v60  ;;  %v14116_v60 = vld [vmem:[#allocation9_spill] sm:$0xff] }
 0x54a   :  { %4230 = vmatpush1.msra.mxu1 %v14110_v37  ;;  %8636 = vmatpush3.msk.msra.mxu0 %vm2942_vm2, %v4485_v9  ;;  %v13697_v37 = vunpack.c.h.bf16 %v12069_v3  ;;  %v12084_v9 = vld [vmem:[%s13401_s4 + $0x130] sm:$0xff] }
 0x54b   :  { %4231 = vmatprep.subr.mxu1 %v14076_v34  ;;  %4189 = vmatprep.mubr.f32.mxu1 %v13692_v49  ;;  %14114 = vst [vmem:[#allocation42_spill] sm:$0xff] %v12084_v9  ;;  %v7158_v49 = vld [vmem:[%s13402_s5 + $0x30] sm:$0xff]   ;;  %v13699_v5 = vunpack.c.h.bf16 %v12084_v9 }
 0x54c   :  { %4232 = vmatpush1.msra.mxu1 %v14112_v25  ;;  %8621 = vmatmul.mubr.msk.f32.gmra.mxu0 %vm2905_vm3, %v14113_v35  ;;  %v13698_v25 = vunpack.c.l.bf16 %v12069_v3 }
 0x54d   :  { %4233 = vmatprep.subr.mxu1 %v14076_v34  ;;  %4190 = vmatmul.mubr.f32.gmra.mxu1 %v13693_v6  ;;  %v14117_v6 = vld [vmem:[#allocation73_spill] sm:$0xff] }
 0x54e   :  { %4234 = vmatpush1.msra.mxu1 %v14115_v39  ;;  %8623 = vmatprep.mubr.msk.f32.mxu0 %vm2905_vm3, %v14116_v60  ;;  %v6953_v39 = vunpack.c.h.bf16 %v7158_v49 }
 0x54f   :  { %4235 = vmatprep.subr.mxu1 %v14076_v34  ;;  %8637 = vmatprep.subr.mxu0 %v4484_v4 }
 0x550   :  { %4236 = vmatpush1.msra.mxu1 %v14117_v6  ;;  %8638 = vmatpush3.msra.mxu0 %v4484_v4  ;;  %v13700_v4 = vunpack.c.l.bf16 %v12084_v9  ;;  %v6952_v6 = vunpack.c.l.bf16 %v7158_v49  ;;  %v12126_v49 = vld [vmem:[%s13401_s4 + $0xa8] sm:$0xff] }
 0x551   :  { %4194 = vmatprep.mubr.f32.mxu1 %v13697_v37  ;;  %4245 = vmatprep.subr.mxu1 %v14076_v34  ;;  %v14120_v37 = vld [vmem:[#allocation15_spill] sm:$0xff]  ;;  %14122 = vst [vmem:[#allocation43_spill] sm:$0xff] %v12126_v49 }
 0x552   :  { %8624 = vmatmul.mubr.msk.f32.gmra.mxu0 %vm2905_vm3, %v14118_v47  ;;  %4195 = vmatmul.mubr.f32.gmra.mxu1 %v13698_v25  ;;  %v14121_v25 = vld [vmem:[#allocation12_spill] sm:$0xff] }
 0x553   :  { %4246 = vmatpush2.msra.mxu1 %v11665_v52  ;;  %8626 = vmatprep.mubr.msk.f32.mxu0 %vm2905_vm3, %v14119_v58  ;;  %v6691_v52 = vld [vmem:[%s13402_s5 + $0x5c] sm:$0x3] }
 0x554   :  { %4247 = vmatprep.subr.mxu1 %v14076_v34  ;;  %4199 = vmatprep.mubr.f32.mxu1 %v13699_v5  ;;  %v14123_v5 = vld [vmem:[#allocation17_spill] sm:$0xff] }
 0x555   :  { %4248 = vmatpush2.msra.mxu1 %v11672_v8  ;;  %8639 = vmatprep.subr.mxu0 %v6953_v39  ;;  %v4622_v8 = vunpack.c.l.bf16 %v6691_v52 }
 0x556   :  { %4249 = vmatprep.subr.mxu1 %v14076_v34  ;;  %8627 = vmatmul.mubr.msk.f32.gmra.mxu0 %vm2905_vm3, %v14120_v37 }
 0x557   :  { %4200 = vmatmul.mubr.f32.gmra.mxu1 %v13700_v4  ;;  %8629 = vmatprep.mubr.msk.f32.mxu0 %vm2905_vm3, %v14121_v25  ;;  %v14124_v4 = vld [vmem:[#allocation14_spill] sm:$0xff] }
 0x558   :  { %4250 = vmatpush2.msra.mxu1 %v11651_v19  ;;  %8640 = vmatpush3.msra.mxu0 %v6953_v39  ;;  %v13702_v19 = vunpack.c.h.bf16 %v12126_v49  ;;  %v6690_v39 = vld [vmem:[%s13402_s5 + $0x58] sm:$0xf] }
 0x559   :  { %4251 = vmatprep.subr.mxu1 %v14076_v34  ;;  %8641 = vmatprep.subr.mxu0 %v6952_v6 }
 0x55a   :  { %4252 = vmatpush2.msra.mxu1 %v11661_v51  ;;  %8630 = vmatmul.mubr.msk.f32.gmra.mxu0 %vm2905_vm3, %v14123_v5  ;;  %v14125_v51 = vld [vmem:[#allocation19_spill] sm:$0xff] }
 0x55b   :  { %4253 = vmatprep.subr.mxu1 %v14076_v34  ;;  %8632 = vmatprep.mubr.msk.f32.mxu0 %vm2905_vm3, %v14124_v4 }
 0x55c   :  { %4254 = vmatpush2.msra.mxu1 %v11643_v31  ;;  %8642 = vmatpush3.msra.mxu0 %v6952_v6  ;;  %v7159_v31 = vld [vmem:[%s13402_s5 + $0x50] sm:$0xff]   ;;  %v13701_v6 = vunpack.c.l.bf16 %v12126_v49 }
 0x55d   :  { %4255 = vmatprep.subr.mxu1 %v14076_v34  ;;  %8661 = vmatprep.subr.msk.mxu0 %vm2942_vm2, %v4622_v8 }
 0x55e   :  { %4256 = vmatpush2.msra.mxu1 %v11647_v7  ;;  %8633 = vmatmul.mubr.msk.f32.gmra.mxu0 %vm2905_vm3, %v14125_v51  ;;  %v4621_v7 = vunpack.c.l.bf16 %v6690_v39 }
 0x55f   :  { %4257 = vmatprep.subr.mxu1 %v14076_v34  ;;  %8643 = vmatprep.mubr.msk.f32.mxu0 %vm2905_vm3, %v11219_v33 }
 0x560   :  { %4258 = vmatpush2.msra.mxu1 %v11635_v14  ;;  %6644 = vmatprep.mubr.msk.f32.mxu1 %vm947_vm1, %v13702_v19  ;;  %v6957_v14 = vunpack.c.h.bf16 %v7159_v31 }
 0x561   :  { %4259 = vmatprep.subr.mxu1 %v14076_v34 }
 0x562   :  { %4260 = vmatpush2.msra.mxu1 %v11639_v0  ;;  %8644 = vmatmul.mubr.msk.f32.vlgmr.msra.gmra.mxu0 %vm2905_vm3, %v14108_v30  ;;  %v12167_v0 = vld [vmem:[%s13401_s4 + $0xb8] sm:$0xff] }
 0x563   :  { %4261 = vmatprep.subr.mxu1 %v14076_v34  ;;  %8646 = vmatprep.mubr.msk.f32.mxu0 %vm2905_vm3, %v14109_v63  ;;  %14126 = vst [vmem:[#allocation44_spill] sm:$0xff] %v12167_v0  ;;  %v13708_v52 = vunpack.c.h.bf16 %v12167_v0 }
 0x564   :  { %4262 = vmatpush2.msra.mxu1 %v11626_v12  ;;  %8662 = vmatpush3.msk.msra.mxu0 %vm2942_vm2, %v4622_v8  ;;  %v6708_v12 = vld [vmem:[%s13402_s5 + $0x7c] sm:$0x3]  ;;  %v6956_v8 = vunpack.c.l.bf16 %v7159_v31  ;;  %v13704_v31 = vunpack.c.l.bf16 %v12167_v0 }
 0x565   :  { %4263 = vmatprep.subr.mxu1 %v14076_v34  ;;  %8663 = vmatprep.subr.mxu0 %v4621_v7  ;;  %v4759_v39 = vunpack.c.l.bf16 %v6708_v12  ;;  %v12208_v12 = vld [vmem:[%s13401_s4 + $0xd8] sm:$0xff] }
 0x566   :  { %4264 = vmatpush2.msra.mxu1 %v11631_v57  ;;  %8647 = vmatmul.mubr.msk.f32.gmra.mxu0 %vm2905_vm3, %v14113_v35  ;;  %v12185_v57 = vld [vmem:[%s13401_s4 + $0xc8] sm:$0xff]  ;;  %14128 = vst [vmem:[#allocation46_spill] sm:$0xff] %v12208_v12 }
 0x567   :  { %4265 = vmatprep.subr.mxu1 %v14076_v34  ;;  %8649 = vmatprep.mubr.msk.f32.mxu0 %vm2905_vm3, %v14116_v60  ;;  %14127 = vst [vmem:[#allocation45_spill] sm:$0xff] %v12185_v57 }
 0x568   :  { %4266 = vmatpush2.msra.mxu1 %v11614_v17  ;;  %8664 = vmatpush3.msra.mxu0 %v4621_v7  ;;  %v6725_v17 = vld [vmem:[%s13402_s5 + $0x9c] sm:$0x3]  ;;  %v6707_v7 = vld [vmem:[%s13402_s5 + $0x78] sm:$0xf] }
 0x569   :  { %4267 = vmatprep.subr.mxu1 %v14076_v34  ;;  %8665 = vmatprep.subr.mxu0 %v6957_v14  ;;  %v4758_v19 = vunpack.c.l.bf16 %v6707_v7  ;;  %v6961_v7 = vunpack.c.h.bf16 %v7160_v61 }
 0x56a   :  { %4268 = vmatpush2.msra.mxu1 %v11620_v27  ;;  %8650 = vmatmul.mubr.msk.f32.gmra.mxu0 %vm2905_vm3, %v14118_v47  ;;  %v13705_v27 = vunpack.c.h.bf16 %v12185_v57 }
 0x56b   :  { %4270 = vmatmul.mubr.f32.vlgmr.msra.gmra.mxu1 %v13701_v6  ;;  %8652 = vmatprep.mubr.msk.f32.mxu0 %vm2905_vm3, %v14119_v58  ;;  %v4896_v6 = vunpack.c.l.bf16 %v6725_v17  ;;  %v13706_v17 = vunpack.c.h.bf16 %v12208_v12 }
 0x56c   :  { %6645 = vmatprep.mubr.msk.f32.mxu1 %vm947_vm1, %v13708_v52  ;;  %8666 = vmatpush3.msra.mxu0 %v6957_v14  ;;  %v13707_v14 = vunpack.c.l.bf16 %v12185_v57 }
 0x56d   :  { %8667 = vmatprep.subr.mxu0 %v6956_v8  ;;  %8687 = vmatprep.subr.msk.mxu1 %vm2942_vm2, %v4759_v39 }
 0x56e   :  { %8653 = vmatmul.mubr.msk.f32.gmra.mxu0 %vm2905_vm3, %v14120_v37  ;;  %8688 = vmatpush3.msk.msra.mxu1 %vm2942_vm2, %v4759_v39  ;;  %v12229_v39 = vld [vmem:[%s13401_s4 + $0xe8] sm:$0xff] }
 0x56f   :  { %4275 = vmatmul.mubr.f32.gmra.mxu1 %v13704_v31  ;;  %8655 = vmatprep.mubr.msk.f32.mxu0 %vm2905_vm3, %v14121_v25  ;;  %14129 = vst [vmem:[#allocation47_spill] sm:$0xff] %v12229_v39  ;;  %v6960_v31 = vunpack.c.l.bf16 %v7160_v61  ;;  %v6724_v61 = vld [vmem:[%s13402_s5 + $0x98] sm:$0xf] }
 0x570   :  { %6646 = vmatprep.mubr.msk.f32.mxu1 %vm947_vm1, %v13705_v27  ;;  %8668 = vmatpush3.msra.mxu0 %v6956_v8  ;;  %v13709_v8 = vunpack.c.l.bf16 %v12208_v12  ;;  %v13710_v27 = vunpack.c.h.bf16 %v12229_v39  ;;  %v4895_v52 = vunpack.c.l.bf16 %v6724_v61 }
 0x571   :  { %8713 = vmatprep.subr.msk.mxu0 %vm2942_vm2, %v4896_v6  ;;  %8689 = vmatprep.subr.mxu1 %v4758_v19 }
 0x572   :  { %8656 = vmatmul.mubr.msk.f32.gmra.mxu0 %vm2905_vm3, %v14123_v5  ;;  %8690 = vmatpush3.msra.mxu1 %v4758_v19  ;;  %v12246_v19 = vld [vmem:[%s13401_s4 + $0xf8] sm:$0xff] }
 0x573   :  { %4280 = vmatmul.mubr.f32.gmra.mxu1 %v13707_v14  ;;  %8658 = vmatprep.mubr.msk.f32.mxu0 %vm2905_vm3, %v14124_v4  ;;  %14130 = vst [vmem:[#allocation48_spill] sm:$0xff] %v12246_v19  ;;  %v12265_v14 = vld [vmem:[%s13401_s4 + $0x108] sm:$0xff] }
 0x574   :  { %6647 = vmatprep.mubr.msk.f32.mxu1 %vm947_vm1, %v13706_v17  ;;  %8691 = vmatprep.subr.mxu1 %v6961_v7  ;;  %v13711_v17 = vunpack.c.l.bf16 %v12229_v39  ;;  %14131 = vst [vmem:[#allocation49_spill] sm:$0xff] %v12265_v14  ;;  %v13715_v61 = vunpack.c.h.bf16 %v12265_v14 }
 0x575   :  { %8692 = vmatpush3.msra.mxu1 %v6961_v7  ;;  %v13712_v7 = vunpack.c.h.bf16 %v12246_v19 }
 0x576   :  { %8659 = vmatmul.mubr.msk.f32.gmra.mxu0 %vm2905_vm3, %v14125_v51  ;;  %8693 = vmatprep.subr.mxu1 %v6960_v31 }
 0x577   :  { %4285 = vmatmul.mubr.f32.gmra.mxu1 %v13709_v8  ;;  %8669 = vmatprep.mubr.msk.f32.mxu0 %vm2905_vm3, %v11219_v33  ;;  %v7161_v8 = vld [vmem:[%s13402_s5 + $0x90] sm:$0xff]  }
 0x578   :  { %6648 = vmatprep.mubr.msk.f32.mxu1 %vm947_vm1, %v13710_v27  ;;  %8694 = vmatpush3.msra.mxu1 %v6960_v31  ;;  %v13723_v31 = vunpack.c.l.bf16 %v12246_v19  ;;  %v12285_v27 = vld [vmem:[%s13401_s4 + $0x118] sm:$0xff]  ;;  %v6964_v59 = vunpack.c.l.bf16 %v7161_v8 }
 0x579   :  { %14132 = vst [vmem:[#allocation59_spill] sm:$0xff] %v12285_v27 }
 0x57a   :  { %8670 = vmatmul.mubr.msk.f32.vlgmr.msra.gmra.mxu0 %vm2905_vm3, %v14108_v30 }
 0x57b   :  { %4290 = vmatmul.mubr.f32.gmra.mxu1 %v13711_v17  ;;  %8672 = vmatprep.mubr.msk.f32.mxu0 %vm2905_vm3, %v14109_v63  ;;  %v6965_v17 = vunpack.c.h.bf16 %v7161_v8  ;;  %v12317_v8 = vld [vmem:[%s13401_s4 + $0x138] sm:$0xff]  ;;  %s8975_s4 = smov 124  }
 0x57c   :  { %6649 = vmatprep.mubr.msk.f32.mxu1 %vm947_vm1, %v13712_v7  ;;  %8714 = vmatpush3.msk.msra.mxu0 %vm2942_vm2, %v4896_v6  ;;  %v13722_v7 = vunpack.c.l.bf16 %v12265_v14  ;;  %v13716_v6 = vunpack.c.h.bf16 %v12285_v27  ;;  %14134 = vst [vmem:[#allocation60_spill] sm:$0xff] %v12317_v8 }
 0x57d   :  { %8715 = vmatprep.subr.mxu0 %v4895_v52 }
 0x57e   :  { %8673 = vmatmul.mubr.msk.f32.gmra.mxu0 %vm2905_vm3, %v14113_v35 }
 0x57f   :  { %4295 = vmatmul.mubr.f32.gmra.mxu1 %v13723_v31  ;;  %8675 = vmatprep.mubr.msk.f32.mxu0 %vm2905_vm3, %v14116_v60 }
 0x580   :  { %6650 = vmatprep.mubr.msk.f32.mxu1 %vm947_vm1, %v13715_v61  ;;  %8716 = vmatpush3.msra.mxu0 %v4895_v52  ;;  %v13717_v61 = vunpack.c.l.bf16 %v12285_v27  ;;  %v13721_v52 = vunpack.c.h.bf16 %v12301_v18 }
 0x581   :  { %8717 = vmatprep.subr.mxu0 %v6965_v17 }
 0x582   :  { %8676 = vmatmul.mubr.msk.f32.gmra.mxu0 %vm2905_vm3, %v14118_v47 }
 0x583   :  { %4300 = vmatmul.mubr.f32.gmra.mxu1 %v13722_v7  ;;  %8678 = vmatprep.mubr.msk.f32.mxu0 %vm2905_vm3, %v14119_v58 }
 0x584   :  { %6651 = vmatprep.mubr.msk.f32.mxu1 %vm947_vm1, %v13716_v6  ;;  %8718 = vmatpush3.msra.mxu0 %v6965_v17  ;;  %v13720_v6 = vunpack.c.l.bf16 %v12301_v18  ;;  %v13719_v17 = vunpack.c.h.bf16 %v12317_v8 }
 0x585   :  { %8719 = vmatprep.subr.mxu0 %v6964_v59 }
 0x586   :  { %8679 = vmatmul.mubr.msk.f32.gmra.mxu0 %vm2905_vm3, %v14120_v37 }
 0x587   :  { %4305 = vmatmul.mubr.f32.gmra.mxu1 %v13717_v61  ;;  %8681 = vmatprep.mubr.msk.f32.mxu0 %vm2905_vm3, %v14121_v25  ;;  %v13718_v61 = vunpack.c.l.bf16 %v12317_v8 }
 0x588   :  { %6652 = vmatprep.mubr.msk.f32.mxu1 %vm947_vm1, %v13721_v52  ;;  %8720 = vmatpush3.msra.mxu0 %v6964_v59  ;;  %v14136_v59 = vunpack.c.h.bf16 %v11469_v2 }
 0x589   :  { %5140 = vmatprep.subr.mxu0 %v14076_v34 }
 0x58a   :  { %8682 = vmatmul.mubr.msk.f32.gmra.mxu0 %vm2905_vm3, %v14123_v5 }
 0x58b   :  { %4310 = vmatmul.mubr.f32.gmra.mxu1 %v13720_v6  ;;  %8684 = vmatprep.mubr.msk.f32.mxu0 %vm2905_vm3, %v14124_v4 }
 0x58c   :  { %6653 = vmatprep.mubr.msk.f32.mxu1 %vm947_vm1, %v13719_v17 }
 0x58e   :  { %8685 = vmatmul.mubr.msk.f32.gmra.mxu0 %vm2905_vm3, %v14125_v51 }
 0x58f   :  { %4315 = vmatmul.mubr.f32.gmra.mxu1 %v13718_v61  ;;  %8721 = vmatprep.mubr.msk.f32.mxu0 %vm2905_vm3, %v11219_v33 }
 0x590   :  { %8695 = vmatprep.mubr.msk.f32.mxu1 %vm2905_vm3, %v11219_v33  ;;  %v14135_v33 = vunpack.c.h.bf16 %v11481_v11 }
 0x592   :  { %8722 = vmatmul.mubr.msk.f32.vlgmr.msra.gmra.mxu0 %vm2905_vm3, %v14108_v30 }
 0x593   :  { %8696 = vmatmul.mubr.msk.f32.vlgmr.msra.gmra.mxu1 %vm2905_vm3, %v14108_v30  ;;  %8724 = vmatprep.mubr.msk.f32.mxu0 %vm2905_vm3, %v14109_v63 }
 0x594   :  { %8698 = vmatprep.mubr.msk.f32.mxu1 %vm2905_vm3, %v14109_v63 }
 0x596   :  { %8725 = vmatmul.mubr.msk.f32.gmra.mxu0 %vm2905_vm3, %v14113_v35 }
 0x597   :  { %8699 = vmatmul.mubr.msk.f32.gmra.mxu1 %vm2905_vm3, %v14113_v35  ;;  %8727 = vmatprep.mubr.msk.f32.mxu0 %vm2905_vm3, %v14116_v60 }
 0x598   :  { %8701 = vmatprep.mubr.msk.f32.mxu1 %vm2905_vm3, %v14116_v60 }
 0x59a   :  { %8728 = vmatmul.mubr.msk.f32.gmra.mxu0 %vm2905_vm3, %v14118_v47 }
 0x59b   :  { %8702 = vmatmul.mubr.msk.f32.gmra.mxu1 %vm2905_vm3, %v14118_v47  ;;  %8730 = vmatprep.mubr.msk.f32.mxu0 %vm2905_vm3, %v14119_v58 }
 0x59c   :  { %8704 = vmatprep.mubr.msk.f32.mxu1 %vm2905_vm3, %v14119_v58 }
 0x59e   :  { %8731 = vmatmul.mubr.msk.f32.gmra.mxu0 %vm2905_vm3, %v14120_v37 }
 0x59f   :  { %8705 = vmatmul.mubr.msk.f32.gmra.mxu1 %vm2905_vm3, %v14120_v37  ;;  %8733 = vmatprep.mubr.msk.f32.mxu0 %vm2905_vm3, %v14121_v25  ;;  %v12398_v37 = vpop.permute.xlu0 %3711 }
 0x5a0   :  { %8707 = vmatprep.mubr.msk.f32.mxu1 %vm2905_vm3, %v14121_v25 }
 0x5a2   :  { %8734 = vmatmul.mubr.msk.f32.gmra.mxu0 %vm2905_vm3, %v14123_v5 }
 0x5a3   :  { %8708 = vmatmul.mubr.msk.f32.gmra.mxu1 %vm2905_vm3, %v14123_v5  ;;  %8736 = vmatprep.mubr.msk.f32.mxu0 %vm2905_vm3, %v14124_v4  ;;  %v12402_v61 = vpop.permute.xlu0 %3721 }
 0x5a4   :  { %8710 = vmatprep.mubr.msk.f32.mxu1 %vm2905_vm3, %v14124_v4  ;;  %v12400_v4 = vpop.permute.xlu1 %3716  ;;  %14137 = vst [vmem:[#allocation51_spill] sm:$0xff] %v12402_v61 }
 0x5a6   :  { %8737 = vmatmul.mubr.msk.f32.gmra.mxu0 %vm2905_vm3, %v14125_v51 }
 0x5a7   :  { %8711 = vmatmul.mubr.msk.f32.gmra.mxu1 %vm2905_vm3, %v14125_v51  ;;  %6739 = vmatprep.mubr.msk.f32.mxu0 %vm947_vm1, %v14135_v33 }
 0x5a8   :  { %5089 = vmatprep.mubr.f32.mxu1 %v14136_v59  ;;  %v12404_v52 = vpop.permute.xlu1 %3726  ;;  %v12406_v59 = vpop.permute.xlu0 %3681 }
 0x5a9   :  { %14138 = vst [vmem:[#allocation52_spill] sm:$0xff] %v12404_v52  ;;  %14139 = vst [vmem:[#allocation61_spill] sm:$0xff] %v12406_v59 }
 0x5ac   :  { %v12411_v18 = vpop.permute.xlu1 %3686  ;;  %v12416_v12 = vpop.permute.xlu0 %3691 }
 0x5ad   :  { %14140 = vst [vmem:[#allocation62_spill] sm:$0xff] %v12411_v18  ;;  %14141 = vst [vmem:[#allocation53_spill] sm:$0xff] %v12416_v12 }
 0x5b0   :  { %v12421_v0 = vpop.permute.xlu1 %3696 }
 0x5b1   :  { %14142 = vst [vmem:[#allocation63_spill] sm:$0xff] %v12421_v0 }
 0x5c1   :  { %v7780_v58 = vpop.f32.mrf.mxu1 }
 0x5c3   :  { %v7781_v47 = vpop.f32.mrf.mxu1 }
 0x5c4   :  { %v7782_v33 = vadd.f32 %v7781_v47, %v7780_v58 }
 0x5c6   :  { %v7783_v5 = vpop.f32.mrf.mxu1  ;;  %v3826_v31 = vadd.f32 %v7782_v33, %v12406_v59 }
 0x5c8   :  { %v7784_v35 = vpop.f32.mrf.mxu1 }
 0x5c9   :  { %v7785_v41 = vadd.f32 %v7784_v35, %v7783_v5 }
 0x5cb   :  { %v7786_v63 = vpop.f32.mrf.mxu1  ;;  %v3831_v58 = vadd.f32 %v7785_v41, %v12411_v18 }
 0x5cd   :  { %v7787_v30 = vpop.f32.mrf.mxu1 }
 0x5ce   :  { %v7788_v14 = vadd.f32 %v7787_v30, %v7786_v63 }
 0x5d0   :  { %v7789_v60 = vpop.f32.mrf.mxu1 }
 0x5d2   :  { %v7790_v25 = vpop.f32.mrf.mxu1 }
 0x5d3   :  { %v7791_v33 = vadd.f32 %v7790_v25, %v7789_v60 }
 0x5d5   :  { %v7792_v51 = vpop.f32.mrf.mxu1 }
 0x5d7   :  { %v7793_v17 = vpop.f32.mrf.mxu1 }
 0x5d8   :  { %v7794_v30 = vadd.f32 %v7793_v17, %v7792_v51  ;;  %v12433_v17 = vpop.permute.xlu1 %3706 }
 0x5d9   :  { %14144 = vst [vmem:[#allocation55_spill] sm:$0xff] %v12433_v17 }
 0x5da   :  { %v7795_v6 = vpop.f32.mrf.mxu1 }
 0x5dc   :  { %v7796_v7 = vpop.f32.mrf.mxu1 }
 0x5dd   :  { %v7797_v25 = vadd.f32 %v7796_v7, %v7795_v6 }
 0x5de   :  { %v3940_v62 = vpop.f32.mrf.mxu0 }
 0x5df   :  { %v12409_v53 = vadd.f32 %v3940_v62, %v3826_v31  ;;  %v7798_v29 = vpop.f32.mrf.mxu1  ;;  %v3836_v62 = vadd.f32 %v7788_v14, %v12416_v12 }
 0x5e0   :  { %v3942_v8 = vpop.f32.mrf.mxu0 }
 0x5e1   :  { %v7799_v27 = vpop.f32.mrf.mxu1  ;;  %v3989_v22 = vmax.f32 %v12409_v53, 0.0 }
 0x5e3   :  { %v3945_v47 = vpop.f32.mrf.mxu0 }
 0x5e4   :  { %v12414_v19 = vadd.f32 %v3945_v47, %v3831_v58  ;;  %v7801_v39 = vpop.f32.mrf.mxu1  ;;  %v3841_v58 = vadd.f32 %v7791_v33, %v12421_v0  ;;  %v7800_v33 = vadd.f32 %v7799_v27, %v7798_v29 }
 0x5e5   :  { %v3947_v57 = vpop.f32.mrf.mxu0 }
 0x5e6   :  { %v7802_v5 = vpop.f32.mrf.mxu1  ;;  %v12426_v57 = vpop.permute.xlu0 %3701 }
 0x5e7   :  { %v3950_v31 = vpop.f32.mrf.mxu0  ;;  %14143 = vst [vmem:[#allocation54_spill] sm:$0xff] %v12426_v57 }
 0x5e8   :  { %v12419_v35 = vadd.f32 %v3950_v31, %v3836_v62  ;;  %v7804_v8 = vpop.f32.mrf.mxu1  ;;  %v3846_v62 = vadd.f32 %v7794_v30, %v12426_v57 }
 0x5e9   :  { %v3952_v63 = vpop.f32.mrf.mxu0 }
 0x5ea   :  { %v7805_v41 = vpop.f32.mrf.mxu1 }
 0x5eb   :  { %v3955_v47 = vpop.f32.mrf.mxu0  ;;  %v7806_v27 = vadd.f32 %v7805_v41, %v7804_v8 }
 0x5ec   :  { %v12424_v46 = vadd.f32 %v3955_v47, %v3841_v58  ;;  %v7807_v23 = vpop.f32.mrf.mxu1  ;;  %v3851_v58 = vadd.f32 %v7797_v25, %v12433_v17 }
 0x5ed   :  { %v3957_v60 = vpop.f32.mrf.mxu0 }
 0x5ee   :  { %v7808_v14 = vpop.f32.mrf.mxu1  ;;  %v7803_v60 = vadd.f32 %v7802_v5, %v7801_v39 }
 0x5ef   :  { %v3960_v31 = vpop.f32.mrf.mxu0 }
 0x5f0   :  { %v12429_v50 = vadd.f32 %v3960_v31, %v3846_v62  ;;  %v12431_v49 = vpop.f32.mrf.mxu1  ;;  %v3856_v62 = vadd.f32 %v7800_v33, %v12398_v37  ;;  %v3861_v25 = vadd.f32 %v7803_v60, %v12400_v4 }
 0x5f1   :  { %v3962_v51 = vpop.f32.mrf.mxu0 }
 0x5f2   :  { %v12435_v63 = vpop.f32.mrf.mxu1 }
 0x5f3   :  { %v3965_v47 = vpop.f32.mrf.mxu0 }
 0x5f4   :  { %v12438_v26 = vadd.f32 %v3965_v47, %v3851_v58  ;;  %v7845_v7 = vpop.f32.mrf.mxu1 }
 0x5f5   :  { %v3967_v6 = vpop.f32.mrf.mxu0 }
 0x5f6   :  { %v7846_v30 = vpop.f32.mrf.mxu1  ;;  %v7809_v6 = vadd.f32 %v7808_v14, %v7807_v23 }
 0x5f7   :  { %v12441_v31 = vadd.f32 %v7846_v30, %v7845_v7  ;;  %v3970_v9 = vpop.f32.mrf.mxu0  ;;  %v3866_v7 = vadd.f32 %v7806_v27, %v12402_v61 }
 0x5f8   :  { %v12443_v36 = vadd.f32 %v3970_v9, %v3856_v62  ;;  %v7848_v51 = vpop.f32.mrf.mxu1 }
 0x5f9   :  { %v3972_v29 = vpop.f32.mrf.mxu0  ;;  %v4162_v56 = vadd.f32 %v12441_v31, %v12411_v18 }
 0x5fa   :  { %v7849_v3 = vpop.f32.mrf.mxu1 }
 0x5fb   :  { %v12446_v54 = vadd.f32 %v7849_v3, %v7848_v51  ;;  %v3975_v58 = vpop.f32.mrf.mxu0  ;;  %v3871_v3 = vadd.f32 %v7809_v6, %v12404_v52 }
 0x5fc   :  { %v12448_v47 = vadd.f32 %v3975_v58, %v3861_v25  ;;  %v7851_v39 = vpop.f32.mrf.mxu1 }
 0x5fd   :  { %v3977_v5 = vpop.f32.mrf.mxu0 }
 0x5fe   :  { %v7852_v33 = vpop.f32.mrf.mxu1 }
 0x5ff   :  { %v12451_v30 = vadd.f32 %v7852_v33, %v7851_v39  ;;  %v3980_v9 = vpop.f32.mrf.mxu0 }
 0x600   :  { %v12453_v62 = vadd.f32 %v3980_v9, %v3866_v7  ;;  %v7854_v8 = vpop.f32.mrf.mxu1 }
 0x601   :  { %v3982_v41 = vpop.f32.mrf.mxu0 }
 0x602   :  { %v7855_v29 = vpop.f32.mrf.mxu1 }
 0x603   :  { %v12456_v60 = vadd.f32 %v7855_v29, %v7854_v8  ;;  %v3985_v51 = vpop.f32.mrf.mxu0 }
 0x604   :  { %v12458_v25 = vadd.f32 %v3985_v51, %v3871_v3  ;;  %v7857_v58 = vpop.f32.mrf.mxu1 }
 0x605   :  { %v3987_v23 = vpop.f32.mrf.mxu0 }
 0x606   :  { %v7858_v14 = vpop.f32.mrf.mxu1 }
 0x607   :  { %v12460_v5 = vadd.f32 %v7858_v14, %v7857_v58  ;;  %v12462_v27 = vpop.f32.mrf.mxu0 }
 0x609   :  { %v7860_v39 = vpop.f32.mrf.mxu1  ;;  %v12464_v33 = vpop.f32.mrf.mxu0 }
 0x60b   :  { %v7861_v7 = vpop.f32.mrf.mxu1 }
 0x60c   :  { %v12466_v9 = vadd.f32 %v7861_v7, %v7860_v39  ;;  %v12468_v41 = vpop.f32.mrf.mxu0 }
 0x60d   :  { %v7863_v6 = vpop.f32.mrf.mxu1 }
 0x60e   :  { %v12470_v8 = vpop.f32.mrf.mxu0 }
 0x60f   :  { %v7864_v29 = vpop.f32.mrf.mxu1 }
 0x610   :  { %v12472_v3 = vadd.f32 %v7864_v29, %v7863_v6 }
 0x612   :  { %v12474_v51 = vpop.f32.mrf.mxu0  ;;  %v7866_v58 = vpop.f32.mrf.mxu1 }
 0x614   :  { %v12476_v23 = vpop.f32.mrf.mxu0  ;;  %v7867_v14 = vpop.f32.mrf.mxu1 }
 0x615   :  { %v12478_v45 = vadd.f32 %v7867_v14, %v7866_v58  ;;  %v7844_v14 = vadd.f32 %v12435_v63, %v12431_v49 }
 0x616   :  { %v12480_v55 = vpop.f32.mrf.mxu0 }
 0x617   :  { %v7869_v39 = vpop.f32.mrf.mxu1 }
 0x618   :  { %v12482_v7 = vpop.f32.mrf.mxu0 }
 0x619   :  { %v7870_v20 = vpop.f32.mrf.mxu1 }
 0x61a   :  { %v12484_v21 = vadd.f32 %v7870_v20, %v7869_v39  ;;  %v12486_v13 = vpop.f32.mrf.mxu0  ;;  %v4157_v20 = vadd.f32 %v7844_v14, %v12406_v59 }
 0x61c   :  { %v12488_v6 = vpop.f32.mrf.mxu0 }
 0x61e   :  { %v12490_v29 = vpop.f32.mrf.mxu0 }
 0x620   :  { %v12492_v48 = vpop.f32.mrf.mxu0 }
 0x622   :  { %v12494_v1 = vpop.f32.mrf.mxu0 }
 0x624   :  { %v12496_v58 = vpop.f32.mrf.mxu0 }
 0x626   :  { %v12500_v11 = vpop.f32.mrf.mxu0 }
 0x628   :  { %v12502_v38 = vpop.f32.mrf.mxu0 }
 0x62a   :  { %v12505_v39 = vpop.f32.mrf.mxu0 }
 0x62b   :  { %v4271_v24 = vpop.f32.mrf.mxu1 }
 0x62c   :  { %v4272_v16 = vadd.f32 %v4271_v24, %v4157_v20  ;;  %v12507_v44 = vpop.f32.mrf.mxu0  ;;  %v3990_v24 = vmax.f32 %v12414_v19, 0.0 }
 0x62d   :  { %v4273_v28 = vpop.f32.mrf.mxu1 }
 0x62e   :  { %v4320_v15 = vmax.f32 %v4272_v16, 0.0  ;;  %v12512_v49 = vpop.f32.mrf.mxu0  ;;  %v4167_v28 = vadd.f32 %v12446_v54, %v12416_v12 }
 0x62f   :  { %v4276_v63 = vpop.f32.mrf.mxu1 }
 0x630   :  { %v12514_v40 = vmax.f32 %v3989_v22, %v4320_v15  ;;  %v4277_v43 = vadd.f32 %v4276_v63, %v4162_v56  ;;  %v12516_v14 = vpop.f32.mrf.mxu0  ;;  %v3991_v56 = vmax.f32 %v12419_v35, 0.0 }
 0x631   :  { %v4278_v59 = vpop.f32.mrf.mxu1 }
 0x632   :  { %v4321_v20 = vmax.f32 %v4277_v43, 0.0  ;;  %v12521_v53 = vpop.f32.mrf.mxu0  ;;  %v4172_v59 = vadd.f32 %v12451_v30, %v12421_v0 }
 0x633   :  { %v4281_v16 = vpop.f32.mrf.mxu1 }
 0x634   :  { %v12523_v42 = vmax.f32 %v3990_v24, %v4321_v20  ;;  %v4282_v31 = vadd.f32 %v4281_v16, %v4167_v28  ;;  %v12525_v18 = vpop.f32.mrf.mxu0  ;;  %v3992_v20 = vmax.f32 %v12424_v46, 0.0  ;;  %v4177_v16 = vadd.f32 %v12456_v60, %v12426_v57 }
 0x635   :  { %v4283_v15 = vpop.f32.mrf.mxu1 }
 0x636   :  { %v4322_v22 = vmax.f32 %v4282_v31, 0.0  ;;  %v12530_v19 = vpop.f32.mrf.mxu0 }
 0x637   :  { %v4286_v43 = vpop.f32.mrf.mxu1 }
 0x638   :  { %v12532_v63 = vmax.f32 %v3991_v56, %v4322_v22  ;;  %v4287_v54 = vadd.f32 %v4286_v43, %v4172_v59  ;;  %v12534_v12 = vpop.f32.mrf.mxu0  ;;  %v3993_v22 = vmax.f32 %v12429_v50, 0.0  ;;  %v4182_v43 = vadd.f32 %v12460_v5, %v12433_v17 }
 0x639   :  { %v4288_v24 = vpop.f32.mrf.mxu1 }
 0x63a   :  { %v4323_v28 = vmax.f32 %v4287_v54, 0.0  ;;  %v12539_v35 = vpop.f32.mrf.mxu0 }
 0x63b   :  { %v4291_v31 = vpop.f32.mrf.mxu1 }
 0x63c   :  { %v12541_v15 = vmax.f32 %v3992_v20, %v4323_v28  ;;  %v4292_v30 = vadd.f32 %v4291_v31, %v4177_v16  ;;  %v12543_v0 = vpop.f32.mrf.mxu0  ;;  %v3994_v28 = vmax.f32 %v12438_v26, 0.0  ;;  %v4187_v31 = vadd.f32 %v12466_v9, %v12398_v37 }
 0x63d   :  { %v4293_v56 = vpop.f32.mrf.mxu1 }
 0x63e   :  { %v4324_v59 = vmax.f32 %v4292_v30, 0.0  ;;  %v12548_v46 = vpop.f32.mrf.mxu0 }
 0x63f   :  { %v4296_v54 = vpop.f32.mrf.mxu1 }
 0x640   :  { %v12550_v24 = vmax.f32 %v3993_v22, %v4324_v59  ;;  %v4297_v60 = vadd.f32 %v4296_v54, %v4182_v43  ;;  %v12552_v57 = vpop.f32.mrf.mxu0  ;;  %v3995_v59 = vmax.f32 %v12443_v36, 0.0  ;;  %v4192_v54 = vadd.f32 %v12472_v3, %v12400_v4 }
 0x641   :  { %v4298_v20 = vpop.f32.mrf.mxu1  ;;  %v3996_v36 = vmax.f32 %v12448_v47, 0.0  ;;  %v4197_v3 = vadd.f32 %v12478_v45, %v12402_v61 }
 0x642   :  { %v4325_v16 = vmax.f32 %v4297_v60, 0.0  ;;  %v12557_v50 = vpop.f32.mrf.mxu0 }
 0x643   :  { %v4301_v30 = vpop.f32.mrf.mxu1 }
 0x644   :  { %v12559_v56 = vmax.f32 %v3994_v28, %v4325_v16  ;;  %v4302_v5 = vadd.f32 %v4301_v30, %v4187_v31  ;;  %v12561_v17 = vpop.f32.mrf.mxu0 }
 0x645   :  { %v4303_v22 = vpop.f32.mrf.mxu1 }
 0x646   :  { %v4326_v43 = vmax.f32 %v4302_v5, 0.0  ;;  %v12566_v26 = vpop.f32.mrf.mxu0 }
 0x647   :  { %v4306_v60 = vpop.f32.mrf.mxu1  ;;  %7952 = vmatprep.subr.mxu1 %v12566_v26 }
 0x648   :  { %v12569_v9 = vmax.f32 %v3995_v59, %v4326_v43  ;;  %v4307_v20 = vadd.f32 %v4306_v60, %v4192_v54  ;;  %v12571_v28 = vpop.f32.mrf.mxu0  ;;  %7953 = vmatpush3.msra.mxu1 %v12500_v11  ;;  %v3997_v43 = vmax.f32 %v12453_v62, 0.0  ;;  %v4202_v54 = vadd.f32 %v12484_v21, %v12404_v52 }
 0x649   :  { %v4308_v16 = vpop.f32.mrf.mxu1  ;;  %7954 = vmatprep.subr.mxu1 %v12571_v28  ;;  %v14149_v52 = vunpack.c.l.bf16 %v11469_v2 }
 0x64a   :  { %14145 = vst [vmem:[#allocation64_spill] sm:$0xff] %v12569_v9  ;;  %v4327_v31 = vmax.f32 %v4307_v20, 0.0  ;;  %7955 = vmatpush3.msra.mxu1 %v12502_v38  ;;  %v12598_v21 = vpop.f32.mrf.mxu0  ;;  %v14150_v9 = vunpack.c.h.bf16 %v11659_v10 }
 0x64b   :  { %v4311_v30 = vpop.f32.mrf.mxu1  ;;  %7956 = vmatprep.subr.mxu1 %v12557_v50 }
 0x64c   :  { %v12580_v5 = vmax.f32 %v3996_v36, %v4327_v31  ;;  %v4312_v22 = vadd.f32 %v4311_v30, %v4197_v3  ;;  %7957 = vmatpush3.msra.mxu1 %v12494_v1  ;;  %v3998_v36 = vmax.f32 %v12458_v25, 0.0 }
 0x64d   :  { %v4313_v59 = vpop.f32.mrf.mxu1  ;;  %7958 = vmatprep.subr.mxu1 %v12561_v17 }
 0x64e   :  { %14146 = vst [vmem:[#allocation65_spill] sm:$0xff] %v12580_v5  ;;  %v4328_v47 = vmax.f32 %v4312_v22, 0.0  ;;  %7959 = vmatpush3.msra.mxu1 %v12496_v58  ;;  %v12610_v22 = vpop.f32.mrf.mxu0 }
 0x64f   :  { %v4316_v45 = vpop.f32.mrf.mxu1  ;;  %7960 = vmatprep.subr.mxu1 %v12548_v46 }
 0x650   :  { %v12589_v60 = vmax.f32 %v3997_v43, %v4328_v47  ;;  %v4317_v20 = vadd.f32 %v4316_v45, %v4202_v54  ;;  %7961 = vmatpush3.msra.mxu1 %v12490_v29  ;;  %v12620_v47 = vpop.f32.mrf.mxu0 }
 0x651   :  { %v4318_v16 = vpop.f32.mrf.mxu1  ;;  %7962 = vmatprep.subr.mxu1 %v12552_v57 }
 0x652   :  { %14147 = vst [vmem:[#allocation56_spill] sm:$0xff] %v12589_v60  ;;  %v4329_v62 = vmax.f32 %v4317_v20, 0.0  ;;  %7963 = vmatpush3.msra.mxu1 %v12492_v48  ;;  %v12630_v20 = vpop.f32.mrf.mxu0 }
 0x653   :  { %v12595_v31 = vpop.f32.mrf.mxu1  ;;  %7964 = vmatprep.subr.mxu1 %v12539_v35 }
 0x654   :  { %v12600_v3 = vmax.f32 %v3998_v36, %v4329_v62  ;;  %7965 = vmatpush3.msra.mxu1 %v12486_v13  ;;  %v12640_v62 = vpop.f32.mrf.mxu0 }
 0x655   :  { %v12603_v30 = vpop.f32.mrf.mxu1  ;;  %7966 = vmatprep.subr.mxu1 %v12543_v0 }
 0x656   :  { %14148 = vst [vmem:[#allocation66_spill] sm:$0xff] %v12600_v3  ;;  %7967 = vmatpush3.msra.mxu1 %v12488_v6  ;;  %v12652_v5 = vpop.f32.mrf.mxu0 }
 0x657   :  { %v12607_v25 = vpop.f32.mrf.mxu1  ;;  %7968 = vmatprep.subr.mxu1 %v12530_v19 }
 0x658   :  { %7969 = vmatpush3.msra.mxu1 %v12480_v55  ;;  %v12665_v2 = vpop.f32.mrf.mxu0 }
 0x659   :  { %v12613_v59 = vpop.f32.mrf.mxu1  ;;  %7970 = vmatprep.subr.mxu1 %v12534_v12 }
 0x65a   :  { %7971 = vmatpush3.msra.mxu1 %v12482_v7 }
 0x65b   :  { %v12617_v43 = vpop.f32.mrf.mxu1  ;;  %7972 = vmatprep.subr.mxu1 %v12521_v53 }
 0x65c   :  { %7973 = vmatpush3.msra.mxu1 %v12474_v51 }
 0x65d   :  { %v12623_v54 = vpop.f32.mrf.mxu1  ;;  %7974 = vmatprep.subr.mxu1 %v12525_v18 }
 0x65e   :  { %7975 = vmatpush3.msra.mxu1 %v12476_v23 }
 0x65f   :  { %v12627_v45 = vpop.f32.mrf.mxu1  ;;  %7976 = vmatprep.subr.mxu1 %v12512_v49 }
 0x660   :  { %7977 = vmatpush3.msra.mxu1 %v12468_v41 }
 0x661   :  { %v12633_v16 = vpop.f32.mrf.mxu1  ;;  %7978 = vmatprep.subr.mxu1 %v12516_v14 }
 0x662   :  { %7979 = vmatpush3.msra.mxu1 %v12470_v8 }
 0x663   :  { %v12637_v36 = vpop.f32.mrf.mxu1  ;;  %7980 = vmatprep.subr.mxu1 %v12505_v39 }
 0x664   :  { %7981 = vmatpush3.msra.mxu1 %v12462_v27 }
 0x665   :  { %v12643_v3 = vpop.f32.mrf.mxu1  ;;  %7982 = vmatprep.subr.mxu1 %v12507_v44 }
 0x666   :  { %7983 = vmatpush3.msra.mxu1 %v12464_v33 }
 0x667   :  { %v12647_v60 = vpop.f32.mrf.mxu1  ;;  %5090 = vmatmul.mubr.f32.vlgmr.msra.gmra.mxu1 %v14149_v52  ;;  %8014 = vmatprep.subr.mxu1 %v12566_v26  ;;  %v14151_v52 = vunpack.c.l.bf16 %v11659_v10  ;;  %v14153_v10 = vunpack.c.l.bf16 %v11679_v32 }
 0x668   :  { %5141 = vmatpush1.msra.mxu0 %v12647_v60  ;;  %8015 = vmatpush3.msra.mxu1 %v12500_v11  ;;  %v14152_v11 = vunpack.c.h.bf16 %v11679_v32 }
 0x669   :  { %v12656_v61 = vpop.f32.mrf.mxu1  ;;  %5142 = vmatprep.subr.mxu0 %v14076_v34  ;;  %8016 = vmatprep.subr.mxu1 %v12571_v28 }
 0x66a   :  { %5143 = vmatpush1.msra.mxu0 %v12656_v61  ;;  %5094 = vmatprep.mubr.f32.mxu1 %v14150_v9 }
 0x66b   :  { %5144 = vmatprep.subr.mxu0 %v14076_v34  ;;  %8017 = vmatpush3.msra.mxu1 %v12502_v38  ;;  %v12677_v38 = vpop.f32.mrf.mxu0 }
 0x66c   :  { %5095 = vmatmul.mubr.f32.gmra.mxu1 %v14151_v52  ;;  %5145 = vmatpush1.msra.mxu0 %v12637_v36  ;;  %v14178_v52 = vld [vmem:[#allocation33_spill] sm:$0xff] }
 0x66d   :  { %8018 = vmatprep.subr.mxu1 %v12557_v50  ;;  %5146 = vmatprep.subr.mxu0 %v14076_v34 }
 0x66e   :  { %8019 = vmatpush3.msra.mxu1 %v12494_v1  ;;  %5147 = vmatpush1.msra.mxu0 %v12643_v3  ;;  %v12688_v1 = vpop.f32.mrf.mxu0 }
 0x66f   :  { %8020 = vmatprep.subr.mxu1 %v12561_v17  ;;  %5099 = vmatprep.mubr.f32.mxu1 %v14152_v11  ;;  %v14154_v17 = vld [vmem:[#allocation20_spill] sm:$0xff]  ;;  %v14179_v11 = vunpack.c.h.bf16 %v14178_v52 }
 0x670   :  { %5148 = vmatprep.subr.mxu0 %v14076_v34  ;;  %8021 = vmatpush3.msra.mxu1 %v12496_v58  ;;  %v14155_v50 = vunpack.c.h.bf16 %v14154_v17  ;;  %v14156_v32 = vunpack.c.l.bf16 %v14154_v17 }
 0x671   :  { %5100 = vmatmul.mubr.f32.gmra.mxu1 %v14153_v10  ;;  %5149 = vmatpush1.msra.mxu0 %v12627_v45  ;;  %v14180_v10 = vunpack.c.l.bf16 %v14178_v52 }
 0x672   :  { %8022 = vmatprep.subr.mxu1 %v12548_v46  ;;  %5150 = vmatprep.subr.mxu0 %v14076_v34 }
 0x673   :  { %8023 = vmatpush3.msra.mxu1 %v12490_v29  ;;  %5151 = vmatpush1.msra.mxu0 %v12633_v16  ;;  %v12700_v29 = vpop.f32.mrf.mxu0 }
 0x674   :  { %8024 = vmatprep.subr.mxu1 %v12552_v57  ;;  %5104 = vmatprep.mubr.f32.mxu1 %v14155_v50  ;;  %v14157_v57 = vld [vmem:[#allocation71_spill] sm:$0xff] }
 0x675   :  { %5152 = vmatprep.subr.mxu0 %v14076_v34  ;;  %8025 = vmatpush3.msra.mxu1 %v12492_v48  ;;  %v14158_v58 = vunpack.c.h.bf16 %v14157_v57  ;;  %v14159_v48 = vunpack.c.l.bf16 %v14157_v57 }
 0x676   :  { %5105 = vmatmul.mubr.f32.gmra.mxu1 %v14156_v32  ;;  %5153 = vmatpush1.msra.mxu0 %v12617_v43  ;;  %v14189_v32 = vld [vmem:[#allocation34_spill] sm:$0xff] }
 0x677   :  { %8026 = vmatprep.subr.mxu1 %v12539_v35  ;;  %5154 = vmatprep.subr.mxu0 %v14076_v34  ;;  %v12712_v35 = vpop.f32.mrf.mxu0  ;;  %v14190_v57 = vunpack.c.h.bf16 %v14189_v32 }
 0x678   :  { %8027 = vmatpush3.msra.mxu1 %v12486_v13  ;;  %5155 = vmatpush1.msra.mxu0 %v12623_v54  ;;  %v14160_v13 = vld [vmem:[#allocation7_spill] sm:$0xff] }
 0x679   :  { %8028 = vmatprep.subr.mxu1 %v12543_v0  ;;  %5109 = vmatprep.mubr.f32.mxu1 %v14158_v58  ;;  %v14161_v0 = vunpack.c.h.bf16 %v14160_v13  ;;  %v14162_v46 = vunpack.c.l.bf16 %v14160_v13  ;;  %v14191_v58 = vunpack.c.l.bf16 %v14189_v32  ;;  %v14194_v13 = vld [vmem:[#allocation36_spill] sm:$0xff] }
 0x67a   :  { %5156 = vmatprep.subr.mxu0 %v14076_v34  ;;  %8029 = vmatpush3.msra.mxu1 %v12488_v6  ;;  %v12723_v6 = vpop.f32.mrf.mxu0 }
 0x67b   :  { %5110 = vmatmul.mubr.f32.gmra.mxu1 %v14159_v48  ;;  %5157 = vmatpush1.msra.mxu0 %v12607_v25 }
 0x67c   :  { %8030 = vmatprep.subr.mxu1 %v12530_v19  ;;  %5158 = vmatprep.subr.mxu0 %v14076_v34 }
 0x67d   :  { %8031 = vmatpush3.msra.mxu1 %v12480_v55  ;;  %5159 = vmatpush1.msra.mxu0 %v12613_v59  ;;  %v14163_v55 = vld [vmem:[#allocation72_spill] sm:$0xff] }
 0x67e   :  { %8032 = vmatprep.subr.mxu1 %v12534_v12  ;;  %5114 = vmatprep.mubr.f32.mxu1 %v14161_v0  ;;  %v14164_v12 = vunpack.c.h.bf16 %v14163_v55  ;;  %v14165_v19 = vunpack.c.l.bf16 %v14163_v55  ;;  %v14195_v0 = vunpack.c.h.bf16 %v14194_v13 }
 0x67f   :  { %5160 = vmatprep.subr.mxu0 %v14076_v34  ;;  %8033 = vmatpush3.msra.mxu1 %v12482_v7  ;;  %v12735_v7 = vpop.f32.mrf.mxu0 }
 0x680   :  { %5115 = vmatmul.mubr.f32.gmra.mxu1 %v14162_v46  ;;  %5161 = vmatpush1.msra.mxu0 %v12595_v31  ;;  %v14197_v46 = vld [vmem:[#allocation25_spill] sm:$0xff] }
 0x681   :  { %8034 = vmatprep.subr.mxu1 %v12521_v53  ;;  %5162 = vmatprep.subr.mxu0 %v14076_v34  ;;  %v14198_v55 = vunpack.c.h.bf16 %v14197_v46 }
 0x682   :  { %8035 = vmatpush3.msra.mxu1 %v12474_v51  ;;  %5163 = vmatpush1.msra.mxu0 %v12603_v30  ;;  %v14166_v51 = vld [vmem:[#allocation75_spill] sm:$0xff] }
 0x683   :  { %8036 = vmatprep.subr.mxu1 %v12525_v18  ;;  %5119 = vmatprep.mubr.f32.mxu1 %v14164_v12  ;;  %v12746_v18 = vpop.f32.mrf.mxu0  ;;  %v14167_v53 = vunpack.c.h.bf16 %v14166_v51  ;;  %v14199_v12 = vunpack.c.l.bf16 %v14194_v13  ;;  %v14249_v13 = vld [vmem:[#allocation48_spill] sm:$0xff] }
 0x684   :  { %5164 = vmatprep.subr.mxu0 %v14076_v34  ;;  %8037 = vmatpush3.msra.mxu1 %v12476_v23  ;;  %v14168_v23 = vunpack.c.l.bf16 %v14166_v51  ;;  %v14202_v51 = vunpack.c.l.bf16 %v14197_v46  ;;  %v14252_v46 = vld [vmem:[#allocation49_spill] sm:$0xff] }
 0x685   :  { %5120 = vmatmul.mubr.f32.gmra.mxu1 %v14165_v19  ;;  %5165 = vmatpush1.msra.mxu0 %v12620_v47 }
 0x686   :  { %8038 = vmatprep.subr.mxu1 %v12512_v49  ;;  %5166 = vmatprep.subr.mxu0 %v14076_v34  ;;  %v14169_v49 = vld [vmem:[#allocation6_spill] sm:$0xff] }
 0x687   :  { %8039 = vmatpush3.msra.mxu1 %v12468_v41  ;;  %5167 = vmatpush1.msra.mxu0 %v12630_v20  ;;  %v12758_v41 = vpop.f32.mrf.mxu0 }
 0x688   :  { %8040 = vmatprep.subr.mxu1 %v12516_v14  ;;  %5124 = vmatprep.mubr.f32.mxu1 %v14167_v53  ;;  %v14170_v14 = vunpack.c.h.bf16 %v14169_v49 }
 0x689   :  { %5168 = vmatprep.subr.mxu0 %v14076_v34  ;;  %8041 = vmatpush3.msra.mxu1 %v12470_v8  ;;  %v14171_v8 = vunpack.c.l.bf16 %v14169_v49 }
 0x68a   :  { %5125 = vmatmul.mubr.f32.gmra.mxu1 %v14168_v23  ;;  %5169 = vmatpush1.msra.mxu0 %v12598_v21 }
 0x68b   :  { %8042 = vmatprep.subr.mxu1 %v12505_v39  ;;  %5170 = vmatprep.subr.mxu0 %v14076_v34  ;;  %v12770_v39 = vpop.f32.mrf.mxu0 }
 0x68c   :  { %8043 = vmatpush3.msra.mxu1 %v12462_v27  ;;  %5171 = vmatpush1.msra.mxu0 %v12610_v22  ;;  %v14172_v27 = vld [vmem:[#allocation24_spill] sm:$0xff] }
 0x68d   :  { %8044 = vmatprep.subr.mxu1 %v12507_v44  ;;  %5129 = vmatprep.mubr.f32.mxu1 %v14170_v14  ;;  %v14173_v26 = vunpack.c.h.bf16 %v14172_v27  ;;  %v14174_v44 = vunpack.c.l.bf16 %v14172_v27 }
 0x68e   :  { %5180 = vmatprep.subr.mxu0 %v14076_v34  ;;  %8045 = vmatpush3.msra.mxu1 %v12464_v33  ;;  %v14175_v33 = vld [vmem:[#allocation26_spill] sm:$0xff] }
 0x68f   :  { %5130 = vmatmul.mubr.f32.gmra.mxu1 %v14171_v8  ;;  %5181 = vmatpush2.msra.mxu0 %v12758_v41  ;;  %v14176_v9 = vunpack.c.h.bf16 %v14175_v33  ;;  %v14177_v28 = vunpack.c.l.bf16 %v14175_v33 }
 0x690   :  { %5182 = vmatprep.subr.mxu0 %v14076_v34  ;;  %5134 = vmatprep.mubr.f32.mxu1 %v14173_v26 }
 0x691   :  { %5183 = vmatpush2.msra.mxu0 %v12770_v39  ;;  %5390 = vmatprep.subr.mxu1 %v14076_v34 }
 0x692   :  { %5184 = vmatprep.subr.mxu0 %v14076_v34 }
 0x693   :  { %5135 = vmatmul.mubr.f32.gmra.mxu1 %v14174_v44  ;;  %5185 = vmatpush2.msra.mxu0 %v12735_v7 }
 0x694   :  { %5186 = vmatprep.subr.mxu0 %v14076_v34  ;;  %5339 = vmatprep.mubr.f32.mxu1 %v14176_v9 }
 0x695   :  { %5187 = vmatpush2.msra.mxu0 %v12746_v18 }
 0x696   :  { %5188 = vmatprep.subr.mxu0 %v14076_v34 }
 0x697   :  { %5189 = vmatpush2.msra.mxu0 %v12712_v35  ;;  %5340 = vmatmul.mubr.f32.vlgmr.msra.gmra.mxu1 %v14177_v28 }
 0x698   :  { %5391 = vmatpush1.msra.mxu1 %v12647_v60  ;;  %5190 = vmatprep.subr.mxu0 %v14076_v34 }
 0x699   :  { %5392 = vmatprep.subr.mxu1 %v14076_v34  ;;  %5191 = vmatpush2.msra.mxu0 %v12723_v6 }
 0x69a   :  { %5393 = vmatpush1.msra.mxu1 %v12656_v61  ;;  %5192 = vmatprep.subr.mxu0 %v14076_v34  ;;  %v14181_v61 = vld [vmem:[#allocation31_spill] sm:$0xff] }
 0x69b   :  { %5344 = vmatprep.mubr.f32.mxu1 %v14179_v11  ;;  %5394 = vmatprep.subr.mxu1 %v14076_v34  ;;  %v14182_v60 = vunpack.c.h.bf16 %v14181_v61  ;;  %v14183_v17 = vunpack.c.l.bf16 %v14181_v61 }
 0x69c   :  { %5193 = vmatpush2.msra.mxu0 %v12688_v1  ;;  %5345 = vmatmul.mubr.f32.gmra.mxu1 %v14180_v10 }
 0x69d   :  { %5395 = vmatpush1.msra.mxu1 %v12637_v36  ;;  %5194 = vmatprep.subr.mxu0 %v14076_v34 }
 0x69e   :  { %5396 = vmatprep.subr.mxu1 %v14076_v34  ;;  %5195 = vmatpush2.msra.mxu0 %v12700_v29 }
 0x69f   :  { %5397 = vmatpush1.msra.mxu1 %v12643_v3  ;;  %5196 = vmatprep.subr.mxu0 %v14076_v34  ;;  %v14184_v3 = vld [vmem:[#allocation32_spill] sm:$0xff] }
 0x6a0   :  { %5349 = vmatprep.mubr.f32.mxu1 %v14182_v60  ;;  %5398 = vmatprep.subr.mxu1 %v14076_v34  ;;  %v14185_v36 = vunpack.c.h.bf16 %v14184_v3  ;;  %v14186_v50 = vunpack.c.l.bf16 %v14184_v3  ;;  %v14230_v3 = vld [vmem:[#allocation37_spill] sm:$0xff] }
 0x6a1   :  { %5197 = vmatpush2.msra.mxu0 %v12665_v2  ;;  %5350 = vmatmul.mubr.f32.gmra.mxu1 %v14183_v17 }
 0x6a2   :  { %5399 = vmatpush1.msra.mxu1 %v12627_v45  ;;  %5198 = vmatprep.subr.mxu0 %v14076_v34  ;;  %v14187_v45 = vld [vmem:[#allocation16_spill] sm:$0xff] }
 0x6a3   :  { %5400 = vmatprep.subr.mxu1 %v14076_v34  ;;  %5199 = vmatpush2.msra.mxu0 %v12677_v38 }
 0x6a4   :  { %5401 = vmatpush1.msra.mxu1 %v12633_v16  ;;  %5200 = vmatprep.subr.mxu0 %v14076_v34  ;;  %v14188_v16 = vunpack.c.l.bf16 %v14187_v45 }
 0x6a5   :  { %5354 = vmatprep.mubr.f32.mxu1 %v14185_v36  ;;  %5402 = vmatprep.subr.mxu1 %v14076_v34  ;;  %v14231_v36 = vunpack.c.h.bf16 %v14230_v3 }
 0x6a6   :  { %5201 = vmatpush2.msra.mxu0 %v12640_v62  ;;  %5355 = vmatmul.mubr.f32.gmra.mxu1 %v14186_v50 }
 0x6a7   :  { %5403 = vmatpush1.msra.mxu1 %v12617_v43  ;;  %5202 = vmatprep.subr.mxu0 %v14076_v34  ;;  %v14192_v43 = vld [vmem:[#allocation22_spill] sm:$0xff] }
 0x6a8   :  { %5404 = vmatprep.subr.mxu1 %v14076_v34  ;;  %5203 = vmatpush2.msra.mxu0 %v12652_v5  ;;  %v14193_v48 = vunpack.c.h.bf16 %v14192_v43 }
 0x6a9   :  { %5405 = vmatpush1.msra.mxu1 %v12623_v54  ;;  %5205 = vmatmul.mubr.f32.vlgmr.msra.gmra.mxu0 %v14188_v16  ;;  %v14196_v54 = vunpack.c.l.bf16 %v14192_v43 }
 0x6aa   :  { %5359 = vmatprep.mubr.f32.mxu1 %v14190_v57  ;;  %5406 = vmatprep.subr.mxu1 %v14076_v34 }
 0x6ab   :  { %5360 = vmatmul.mubr.f32.gmra.mxu1 %v14191_v58  ;;  %6740 = vmatprep.mubr.msk.f32.mxu0 %vm947_vm1, %v14193_v48  ;;  %v14246_v58 = vld [vmem:[#allocation47_spill] sm:$0xff] }
 0x6ac   :  { %5407 = vmatpush1.msra.mxu1 %v12607_v25  ;;  %5364 = vmatprep.mubr.f32.mxu1 %v14195_v0  ;;  %v14200_v25 = vld [vmem:[#allocation39_spill] sm:$0xff]  ;;  %v14247_v43 = vunpack.c.h.bf16 %v14246_v58  ;;  %v14248_v48 = vunpack.c.l.bf16 %v14246_v58  ;;  %v14250_v0 = vunpack.c.h.bf16 %v14249_v13 }
 0x6ad   :  { %5408 = vmatprep.subr.mxu1 %v14076_v34  ;;  %5210 = vmatmul.mubr.f32.gmra.mxu0 %v14196_v54  ;;  %v14201_v19 = vunpack.c.h.bf16 %v14200_v25  ;;  %v14205_v23 = vunpack.c.l.bf16 %v14200_v25  ;;  %v14251_v54 = vunpack.c.l.bf16 %v14249_v13  ;;  %v14255_v25 = vld [vmem:[#allocation59_spill] sm:$0xff] }
 0x6ae   :  { %5409 = vmatpush1.msra.mxu1 %v12613_v59  ;;  %6741 = vmatprep.mubr.msk.f32.mxu0 %vm947_vm1, %v14198_v55  ;;  %v14203_v59 = vld [vmem:[#allocation27_spill] sm:$0xff]  ;;  %v14253_v55 = vunpack.c.h.bf16 %v14252_v46 }
 0x6af   :  { %5410 = vmatprep.subr.mxu1 %v14076_v34  ;;  %5365 = vmatmul.mubr.f32.gmra.mxu1 %v14199_v12  ;;  %v14204_v53 = vunpack.c.h.bf16 %v14203_v59  ;;  %v14208_v14 = vunpack.c.l.bf16 %v14203_v59  ;;  %v14254_v12 = vunpack.c.l.bf16 %v14252_v46  ;;  %v14258_v59 = vld [vmem:[#allocation50_spill] sm:$0xff] }
 0x6b0   :  { %5411 = vmatpush1.msra.mxu1 %v12595_v31  ;;  %5369 = vmatprep.mubr.f32.mxu1 %v14201_v19  ;;  %v14206_v31 = vld [vmem:[#allocation40_spill] sm:$0xff]  ;;  %v14256_v19 = vunpack.c.h.bf16 %v14255_v25 }
 0x6b1   :  { %5412 = vmatprep.subr.mxu1 %v14076_v34  ;;  %5215 = vmatmul.mubr.f32.gmra.mxu0 %v14202_v51  ;;  %v14207_v49 = vunpack.c.h.bf16 %v14206_v31  ;;  %v14211_v27 = vunpack.c.l.bf16 %v14206_v31  ;;  %v14257_v51 = vunpack.c.l.bf16 %v14255_v25  ;;  %v14261_v31 = vld [vmem:[#allocation60_spill] sm:$0xff] }
 0x6b2   :  { %5413 = vmatpush1.msra.mxu1 %v12603_v30  ;;  %6742 = vmatprep.mubr.msk.f32.mxu0 %vm947_vm1, %v14204_v53  ;;  %v14209_v30 = vld [vmem:[#allocation29_spill] sm:$0xff]  ;;  %v14259_v53 = vunpack.c.h.bf16 %v14258_v59 }
 0x6b3   :  { %5414 = vmatprep.subr.mxu1 %v14076_v34  ;;  %5370 = vmatmul.mubr.f32.gmra.mxu1 %v14205_v23  ;;  %v14210_v8 = vunpack.c.h.bf16 %v14209_v30  ;;  %v14214_v44 = vunpack.c.l.bf16 %v14209_v30  ;;  %v14260_v23 = vunpack.c.l.bf16 %v14258_v59 }
 0x6b4   :  { %5415 = vmatpush1.msra.mxu1 %v12620_v47  ;;  %5374 = vmatprep.mubr.f32.mxu1 %v14207_v49  ;;  %v14212_v47 = vld [vmem:[#allocation41_spill] sm:$0xff]  ;;  %v14262_v49 = vunpack.c.h.bf16 %v14261_v31 }
 0x6b5   :  { %5416 = vmatprep.subr.mxu1 %v14076_v34  ;;  %5220 = vmatmul.mubr.f32.gmra.mxu0 %v14208_v14  ;;  %v14213_v26 = vunpack.c.h.bf16 %v14212_v47  ;;  %v14217_v9 = vunpack.c.l.bf16 %v14212_v47  ;;  %v14263_v14 = vunpack.c.l.bf16 %v14261_v31 }
 0x6b6   :  { %5417 = vmatpush1.msra.mxu1 %v12630_v20  ;;  %6743 = vmatprep.mubr.msk.f32.mxu0 %vm947_vm1, %v14210_v8  ;;  %v14215_v20 = vld [vmem:[#allocation28_spill] sm:$0xff] }
 0x6b7   :  { %5418 = vmatprep.subr.mxu1 %v14076_v34  ;;  %5375 = vmatmul.mubr.f32.gmra.mxu1 %v14211_v27  ;;  %v14216_v33 = vunpack.c.h.bf16 %v14215_v20  ;;  %v14220_v52 = vunpack.c.l.bf16 %v14215_v20 }
 0x6b8   :  { %5419 = vmatpush1.msra.mxu1 %v12598_v21  ;;  %5379 = vmatprep.mubr.f32.mxu1 %v14213_v26  ;;  %v14218_v21 = vld [vmem:[#allocation42_spill] sm:$0xff] }
 0x6b9   :  { %5420 = vmatprep.subr.mxu1 %v14076_v34  ;;  %5225 = vmatmul.mubr.f32.gmra.mxu0 %v14214_v44  ;;  %v14219_v28 = vunpack.c.h.bf16 %v14218_v21  ;;  %v14223_v10 = vunpack.c.l.bf16 %v14218_v21 }
 0x6ba   :  { %5421 = vmatpush1.msra.mxu1 %v12610_v22  ;;  %6744 = vmatprep.mubr.msk.f32.mxu0 %vm947_vm1, %v14216_v33  ;;  %v14221_v22 = vld [vmem:[#allocation30_spill] sm:$0xff] }
 0x6bb   :  { %5430 = vmatprep.subr.mxu1 %v14076_v34  ;;  %5380 = vmatmul.mubr.f32.gmra.mxu1 %v14217_v9  ;;  %v14222_v11 = vunpack.c.h.bf16 %v14221_v22  ;;  %v14226_v60 = vunpack.c.l.bf16 %v14221_v22 }
 0x6bc   :  { %5431 = vmatpush2.msra.mxu1 %v12758_v41  ;;  %5384 = vmatprep.mubr.f32.mxu1 %v14219_v28  ;;  %v14224_v41 = vld [vmem:[#allocation43_spill] sm:$0xff] }
 0x6bd   :  { %5432 = vmatprep.subr.mxu1 %v14076_v34  ;;  %5230 = vmatmul.mubr.f32.gmra.mxu0 %v14220_v52  ;;  %v14225_v61 = vunpack.c.h.bf16 %v14224_v41 }
 0x6be   :  { %5433 = vmatpush2.msra.mxu1 %v12770_v39  ;;  %6745 = vmatprep.mubr.msk.f32.mxu0 %vm947_vm1, %v14222_v11  ;;  %v14227_v39 = vld [vmem:[#allocation35_spill] sm:$0xff] }
 0x6bf   :  { %5434 = vmatprep.subr.mxu1 %v14076_v34  ;;  %5385 = vmatmul.mubr.f32.gmra.mxu1 %v14223_v10  ;;  %v14228_v17 = vunpack.c.h.bf16 %v14227_v39 }
 0x6c0   :  { %5435 = vmatpush2.msra.mxu1 %v12735_v7  ;;  %6749 = vmatprep.mubr.msk.f32.mxu1 %vm947_vm1, %v14225_v61  ;;  %v14229_v7 = vunpack.c.l.bf16 %v14227_v39 }
 0x6c1   :  { %5436 = vmatprep.subr.mxu1 %v14076_v34  ;;  %5235 = vmatmul.mubr.f32.gmra.mxu0 %v14226_v60 }
 0x6c2   :  { %5437 = vmatpush2.msra.mxu1 %v12746_v18  ;;  %6746 = vmatprep.mubr.msk.f32.mxu0 %vm947_vm1, %v14228_v17  ;;  %v14232_v18 = vunpack.c.l.bf16 %v14230_v3 }
 0x6c3   :  { %5438 = vmatprep.subr.mxu1 %v14076_v34 }
 0x6c4   :  { %5439 = vmatpush2.msra.mxu1 %v12712_v35  ;;  %v14233_v35 = vld [vmem:[#allocation38_spill] sm:$0xff] }
 0x6c5   :  { %5440 = vmatprep.subr.mxu1 %v14076_v34  ;;  %5240 = vmatmul.mubr.f32.gmra.mxu0 %v14229_v7  ;;  %v14234_v50 = vunpack.c.h.bf16 %v14233_v35 }
 0x6c6   :  { %5441 = vmatpush2.msra.mxu1 %v12723_v6  ;;  %6747 = vmatprep.mubr.msk.f32.mxu0 %vm947_vm1, %v14231_v36  ;;  %v14235_v6 = vunpack.c.l.bf16 %v14233_v35 }
 0x6c7   :  { %5442 = vmatprep.subr.mxu1 %v14076_v34 }
 0x6c8   :  { %5443 = vmatpush2.msra.mxu1 %v12688_v1  ;;  %v14236_v1 = vunpack.c.l.bf16 %v14224_v41 }
 0x6c9   :  { %5444 = vmatprep.subr.mxu1 %v14076_v34  ;;  %5245 = vmatmul.mubr.f32.gmra.mxu0 %v14232_v18 }
 0x6ca   :  { %5445 = vmatpush2.msra.mxu1 %v12700_v29  ;;  %6748 = vmatprep.mubr.msk.f32.mxu0 %vm947_vm1, %v14234_v50 }
 0x6cb   :  { %5446 = vmatprep.subr.mxu1 %v14076_v34 }
 0x6cc   :  { %5447 = vmatpush2.msra.mxu1 %v12665_v2  ;;  %v14237_v2 = vld [vmem:[#allocation44_spill] sm:$0xff] }
 0x6cd   :  { %5448 = vmatprep.subr.mxu1 %v14076_v34  ;;  %5250 = vmatmul.mubr.f32.gmra.mxu0 %v14235_v6  ;;  %v14238_v29 = vunpack.c.h.bf16 %v14237_v2  ;;  %v14239_v45 = vunpack.c.l.bf16 %v14237_v2 }
 0x6ce   :  { %5449 = vmatpush2.msra.mxu1 %v12677_v38  ;;  %v14240_v38 = vld [vmem:[#allocation45_spill] sm:$0xff] }
 0x6cf   :  { %5450 = vmatprep.subr.mxu1 %v14076_v34  ;;  %v14241_v16 = vunpack.c.h.bf16 %v14240_v38 }
 0x6d0   :  { %5451 = vmatpush2.msra.mxu1 %v12640_v62  ;;  %v14242_v62 = vunpack.c.l.bf16 %v14240_v38 }
 0x6d1   :  { %5452 = vmatprep.subr.mxu1 %v14076_v34 }
 0x6d2   :  { %5453 = vmatpush2.msra.mxu1 %v12652_v5  ;;  %v14243_v5 = vld [vmem:[#allocation46_spill] sm:$0xff] }
 0x6d3   :  { %5455 = vmatmul.mubr.f32.vlgmr.msra.gmra.mxu1 %v14236_v1  ;;  %8739 = vmatprep.subr.mxu1 %v14076_v34  ;;  %v14244_v32 = vunpack.c.h.bf16 %v14243_v5  ;;  %v14245_v57 = vunpack.c.l.bf16 %v14243_v5 }
 0x6d4   :  { %6750 = vmatprep.mubr.msk.f32.mxu1 %vm947_vm1, %v14238_v29 }
 0x6d7   :  { %5460 = vmatmul.mubr.f32.gmra.mxu1 %v14239_v45 }
 0x6d8   :  { %6751 = vmatprep.mubr.msk.f32.mxu1 %vm947_vm1, %v14241_v16 }
 0x6db   :  { %5465 = vmatmul.mubr.f32.gmra.mxu1 %v14242_v62 }
 0x6dc   :  { %6752 = vmatprep.mubr.msk.f32.mxu1 %vm947_vm1, %v14244_v32 }
 0x6df   :  { %5470 = vmatmul.mubr.f32.gmra.mxu1 %v14245_v57 }
 0x6e0   :  { %6753 = vmatprep.mubr.msk.f32.mxu1 %vm947_vm1, %v14247_v43  ;;  %v14264_v43 = vld [vmem:[#allocation61_spill] sm:$0xff] }
 0x6e3   :  { %5475 = vmatmul.mubr.f32.gmra.mxu1 %v14248_v48 }
 0x6e4   :  { %6754 = vmatprep.mubr.msk.f32.mxu1 %vm947_vm1, %v14250_v0 }
 0x6e7   :  { %5480 = vmatmul.mubr.f32.gmra.mxu1 %v14251_v54 }
 0x6e8   :  { %6755 = vmatprep.mubr.msk.f32.mxu1 %vm947_vm1, %v14253_v55 }
 0x6eb   :  { %5485 = vmatmul.mubr.f32.gmra.mxu1 %v14254_v12  ;;  %v14265_v12 = vld [vmem:[#allocation62_spill] sm:$0xff] }
 0x6ec   :  { %6756 = vmatprep.mubr.msk.f32.mxu1 %vm947_vm1, %v14256_v19 }
 0x6ef   :  { %5490 = vmatmul.mubr.f32.gmra.mxu1 %v14257_v51 }
 0x6f0   :  { %6757 = vmatprep.mubr.msk.f32.mxu1 %vm947_vm1, %v14259_v53 }
 0x6f3   :  { %5495 = vmatmul.mubr.f32.gmra.mxu1 %v14260_v23 }
 0x6f4   :  { %6758 = vmatprep.mubr.msk.f32.mxu1 %vm947_vm1, %v14262_v49 }
 0x6f7   :  { %5500 = vmatmul.mubr.f32.gmra.mxu1 %v14263_v14  ;;  %v14266_v14 = vld [vmem:[#allocation53_spill] sm:$0xff] }
 0x6f8   :  { %8769 = vmatprep.mubr.msk.f32.mxu1 %vm8979_vm5, %v14076_v34 }
 0x727   :  { %v7984_v30 = vpop.f32.mrf.mxu1 }
 0x729   :  { %v7985_v8 = vpop.f32.mrf.mxu1 }
 0x72a   :  { %v7986_v27 = vadd.f32 %v7985_v8, %v7984_v30 }
 0x72c   :  { %v7987_v47 = vpop.f32.mrf.mxu1  ;;  %v5092_v48 = vadd.f32 %v7986_v27, %v14264_v43 }
 0x72e   :  { %v7988_v26 = vpop.f32.mrf.mxu1 }
 0x72f   :  { %v7989_v44 = vadd.f32 %v7988_v26, %v7987_v47 }
 0x731   :  { %v7990_v20 = vpop.f32.mrf.mxu1  ;;  %v5097_v25 = vadd.f32 %v7989_v44, %v14265_v12 }
 0x733   :  { %v7991_v33 = vpop.f32.mrf.mxu1 }
 0x734   :  { %v7992_v9 = vadd.f32 %v7991_v33, %v7990_v20  ;;  %v14267_v33 = vld [vmem:[#allocation63_spill] sm:$0xff] }
 0x736   :  { %v7993_v21 = vpop.f32.mrf.mxu1  ;;  %v5102_v30 = vadd.f32 %v7992_v9, %v14266_v14 }
 0x738   :  { %v7994_v28 = vpop.f32.mrf.mxu1 }
 0x739   :  { %v7995_v52 = vadd.f32 %v7994_v28, %v7993_v21 }
 0x73b   :  { %v7996_v22 = vpop.f32.mrf.mxu1  ;;  %v5107_v21 = vadd.f32 %v7995_v52, %v14267_v33 }
 0x73d   :  { %v7997_v11 = vpop.f32.mrf.mxu1 }
 0x73e   :  { %v7998_v10 = vadd.f32 %v7997_v11, %v7996_v22 }
 0x740   :  { %v7999_v41 = vpop.f32.mrf.mxu1 }
 0x742   :  { %v8000_v61 = vpop.f32.mrf.mxu1 }
 0x743   :  { %v8001_v60 = vadd.f32 %v8000_v61, %v7999_v41  ;;  %v14268_v61 = vld [vmem:[#allocation54_spill] sm:$0xff] }
 0x745   :  { %v8002_v39 = vpop.f32.mrf.mxu1 }
 0x747   :  { %v8003_v17 = vpop.f32.mrf.mxu1 }
 0x748   :  { %v8004_v7 = vadd.f32 %v8003_v17, %v8002_v39  ;;  %v5112_v39 = vadd.f32 %v7998_v10, %v14268_v61 }
 0x74a   :  { %v8005_v3 = vpop.f32.mrf.mxu1 }
 0x74c   :  { %v8006_v36 = vpop.f32.mrf.mxu1 }
 0x74d   :  { %v12992_v18 = vadd.f32 %v8006_v36, %v8005_v3 }
 0x74f   :  { %v8008_v35 = vpop.f32.mrf.mxu1 }
 0x751   :  { %v8009_v50 = vpop.f32.mrf.mxu1 }
 0x752   :  { %v12994_v6 = vadd.f32 %v8009_v50, %v8008_v35  ;;  %v14269_v50 = vld [vmem:[#allocation55_spill] sm:$0xff] }
 0x753   :  { %v8011_v1 = vpop.f32.mrf.mxu1 }
 0x755   :  { %v8012_v2 = vpop.f32.mrf.mxu1 }
 0x756   :  { %v12996_v29 = vadd.f32 %v8012_v2, %v8011_v1  ;;  %v5117_v1 = vadd.f32 %v8001_v60, %v14269_v50 }
 0x757   :  { %v12998_v45 = vpop.f32.mrf.mxu1 }
 0x759   :  { %v13000_v38 = vpop.f32.mrf.mxu1 }
 0x75c   :  { %v13002_v16 = vpop.f32.mrf.mxu1 }
 0x75e   :  { %v13004_v62 = vpop.f32.mrf.mxu1 }
 0x761   :  { %v13006_v5 = vpop.f32.mrf.mxu1 }
 0x763   :  { %v13008_v32 = vpop.f32.mrf.mxu1 }
 0x766   :  { %v13010_v57 = vpop.f32.mrf.mxu1 }
 0x768   :  { %v13012_v58 = vpop.f32.mrf.mxu1 }
 0x769   :  { %v5206_v13 = vpop.f32.mrf.mxu0 }
 0x76a   :  { %v5207_v0 = vadd.f32 %v5206_v13, %v5092_v48 }
 0x76b   :  { %v13015_v54 = vpop.f32.mrf.mxu1  ;;  %v5208_v46 = vpop.f32.mrf.mxu0 }
 0x76c   :  { %v5255_v55 = vmax.f32 %v5207_v0, 0.0  ;;  %v5122_v46 = vadd.f32 %v8004_v7, %v12398_v37 }
 0x76d   :  { %v13018_v19 = vpop.f32.mrf.mxu1  ;;  %v5211_v51 = vpop.f32.mrf.mxu0 }
 0x76e   :  { %v13021_v59 = vmax.f32 %v12514_v40, %v5255_v55  ;;  %v5212_v53 = vadd.f32 %v5211_v51, %v5097_v25 }
 0x76f   :  { %v13023_v23 = vpop.f32.mrf.mxu1  ;;  %v5213_v31 = vpop.f32.mrf.mxu0 }
 0x770   :  { %v5256_v49 = vmax.f32 %v5212_v53, 0.0  ;;  %v5127_v31 = vadd.f32 %v12992_v18, %v12400_v4 }
 0x771   :  { %v13026_v8 = vpop.f32.mrf.mxu1  ;;  %v5216_v27 = vpop.f32.mrf.mxu0 }
 0x772   :  { %v13029_v47 = vmax.f32 %v12523_v42, %v5256_v49  ;;  %v5217_v26 = vadd.f32 %v5216_v27, %v5102_v30  ;;  %v14270_v30 = vld [vmem:[#allocation64_spill] sm:$0xff] }
 0x773   :  { %v5218_v44 = vpop.f32.mrf.mxu0  ;;  %v13032_v40 = vpop.f32.mrf.mxu1 }
 0x774   :  { %v5257_v20 = vmax.f32 %v5217_v26, 0.0 }
 0x775   :  { %v5221_v28 = vpop.f32.mrf.mxu0  ;;  %v13038_v17 = vpop.f32.mrf.mxu1 }
 0x776   :  { %v13035_v22 = vmax.f32 %v12532_v63, %v5257_v20  ;;  %v5222_v11 = vadd.f32 %v5221_v28, %v5107_v21  ;;  %v14271_v20 = vld [vmem:[#allocation51_spill] sm:$0xff] }
 0x777   :  { %v5223_v41 = vpop.f32.mrf.mxu0  ;;  %v13044_v2 = vpop.f32.mrf.mxu1  ;;  %v5132_v21 = vadd.f32 %v12994_v6, %v14271_v20 }
 0x778   :  { %v5258_v9 = vmax.f32 %v5222_v11, 0.0  ;;  %v14272_v11 = vld [vmem:[#allocation65_spill] sm:$0xff] }
 0x779   :  { %v5226_v42 = vpop.f32.mrf.mxu0  ;;  %v13050_v55 = vpop.f32.mrf.mxu1 }
 0x77a   :  { %v13041_v3 = vmax.f32 %v12541_v15, %v5258_v9  ;;  %v5227_v36 = vadd.f32 %v5226_v42, %v5112_v39  ;;  %v14273_v42 = vld [vmem:[#allocation52_spill] sm:$0xff] }
 0x77b   :  { %v5228_v35 = vpop.f32.mrf.mxu0  ;;  %v13057_v49 = vpop.f32.mrf.mxu1 }
 0x77c   :  { %v5259_v52 = vmax.f32 %v5227_v36, 0.0  ;;  %v5137_v36 = vadd.f32 %v12996_v29, %v14273_v42 }
 0x77d   :  { %v5231_v63 = vpop.f32.mrf.mxu0 }
 0x77e   :  { %v13047_v48 = vmax.f32 %v12550_v24, %v5259_v52  ;;  %v5232_v13 = vadd.f32 %v5231_v63, %v5117_v1  ;;  %v8048_v1 = vadd.f32 %v13000_v38, %v12998_v45  ;;  %v14274_v63 = vld [vmem:[#allocation56_spill] sm:$0xff]  ;;  %v8054_v45 = vadd.f32 %v13008_v32, %v13006_v5 }
 0x77f   :  { %v5233_v0 = vpop.f32.mrf.mxu0 }
 0x780   :  { %v5260_v10 = vmax.f32 %v5232_v13, 0.0  ;;  %v5342_v29 = vadd.f32 %v8048_v1, %v14264_v43 }
 0x781   :  { %v5236_v15 = vpop.f32.mrf.mxu0 }
 0x782   :  { %v13053_v25 = vmax.f32 %v12559_v56, %v5260_v10  ;;  %v5237_v51 = vadd.f32 %v5236_v15, %v5122_v46  ;;  %v13064_v56 = vpop.f32.mrf.mxu1  ;;  %v8051_v15 = vadd.f32 %v13004_v62, %v13002_v16  ;;  %v8057_v16 = vadd.f32 %v13012_v58, %v13010_v57 }
 0x783   :  { %v5238_v53 = vpop.f32.mrf.mxu0 }
 0x784   :  { %v5261_v60 = vmax.f32 %v5237_v51, 0.0  ;;  %v13071_v35 = vpop.f32.mrf.mxu1  ;;  %v14275_v51 = vld [vmem:[#allocation66_spill] sm:$0xff]  ;;  %v5347_v38 = vadd.f32 %v8051_v15, %v14265_v12  ;;  %v8060_v12 = vadd.f32 %v13018_v19, %v13015_v54 }
 0x785   :  { %v5241_v24 = vpop.f32.mrf.mxu0 }
 0x786   :  { %v13060_v27 = vmax.f32 %v14270_v30, %v5261_v60  ;;  %v5242_v26 = vadd.f32 %v5241_v24, %v5127_v31  ;;  %v13078_v46 = vpop.f32.mrf.mxu1 }
 0x787   :  { %v5243_v7 = vpop.f32.mrf.mxu0 }
 0x788   :  { %v5262_v44 = vmax.f32 %v5242_v26, 0.0 }
 0x789   :  { %v5246_v28 = vpop.f32.mrf.mxu0 }
 0x78a   :  { %v13067_v41 = vmax.f32 %v14272_v11, %v5262_v44  ;;  %v5247_v9 = vadd.f32 %v5246_v28, %v5132_v21  ;;  %v5352_v21 = vadd.f32 %v8054_v45, %v14266_v14  ;;  %v8075_v45 = vadd.f32 %v13078_v46, %v13071_v35 }
 0x78b   :  { %v5248_v18 = vpop.f32.mrf.mxu0 }
 0x78c   :  { %v5263_v39 = vmax.f32 %v5247_v9, 0.0  ;;  %v5357_v9 = vadd.f32 %v8057_v16, %v14267_v33  ;;  %v5387_v16 = vadd.f32 %v8075_v45, %v14273_v42 }
 0x78d   :  { %v5251_v52 = vpop.f32.mrf.mxu0 }
 0x78e   :  { %v13076_v6 = vmax.f32 %v14274_v63, %v5263_v39  ;;  %v5252_v13 = vadd.f32 %v5251_v52, %v5137_v36  ;;  %v5362_v36 = vadd.f32 %v8060_v12, %v14268_v61  ;;  %v8066_v63 = vadd.f32 %v13038_v17, %v13032_v40  ;;  %v7167_v12 = vld [vmem:[%s13404_s7 + $0x30] sm:$0xff]  }
 0x78f   :  { %v5253_v0 = vpop.f32.mrf.mxu0 }
 0x790   :  { %v5264_v10 = vmax.f32 %v5252_v13, 0.0  ;;  %v8069_v0 = vadd.f32 %v13050_v55, %v13044_v2  ;;  %v5372_v15 = vadd.f32 %v8066_v63, %v12398_v37 }
 0x792   :  { %v13083_v53 = vmax.f32 %v14275_v51, %v5264_v10 }
 0x793   :  { %v5456_v60 = vpop.f32.mrf.mxu1 }
 0x794   :  { %v5457_v31 = vadd.f32 %v5456_v60, %v5342_v29  ;;  %v5377_v60 = vadd.f32 %v8069_v0, %v12400_v4 }
 0x795   :  { %v5458_v24 = vpop.f32.mrf.mxu1 }
 0x796   :  { %v5505_v26 = vmax.f32 %v5457_v31, 0.0 }
 0x797   :  { %v5461_v30 = vpop.f32.mrf.mxu1 }
 0x798   :  { %v5462_v7 = vadd.f32 %v5461_v30, %v5347_v38  ;;  %v13093_v43 = vmax.f32 %v13021_v59, %v5505_v26  ;;  %v8072_v26 = vadd.f32 %v13064_v56, %v13057_v49 }
 0x799   :  { %v5463_v44 = vpop.f32.mrf.mxu1 }
 0x79a   :  { %v5506_v62 = vmax.f32 %v5462_v7, 0.0  ;;  %v5382_v35 = vadd.f32 %v8072_v26, %v14271_v20 }
 0x79b   :  { %v5466_v28 = vpop.f32.mrf.mxu1 }
 0x79c   :  { %v13096_v11 = vmax.f32 %v13029_v47, %v5506_v62  ;;  %v5467_v5 = vadd.f32 %v5466_v28, %v5352_v21  ;;  %v8063_v47 = vadd.f32 %v13026_v8, %v13023_v23  ;;  %v7175_v21 = vld [vmem:[%s13404_s7 + $0x70] sm:$0xff]  }
 0x79d   :  { %v5468_v32 = vpop.f32.mrf.mxu1 }
 0x79e   :  { %v8807_v57 = vpack.i.bf16 %v13096_v11, %v13093_v43  ;;  %v5507_v18 = vmax.f32 %v5467_v5, 0.0  ;;  %v5367_v23 = vadd.f32 %v8063_v47, %v14269_v50  ;;  %v6992_v47 = vunpack.c.l.bf16 %v7167_v12 }
 0x79f   :  { %v5471_v58 = vpop.f32.mrf.mxu1 }
 0x7a0   :  { %v5472_v14 = vadd.f32 %v5471_v58, %v5357_v9  ;;  %8808 = vrot.lane.b32.xlu0 %v8807_v57, %s8975_s4  ;;  %v13108_v54 = vmax.f32 %v13035_v22, %v5507_v18  ;;  %v6993_v58 = vunpack.c.h.bf16 %v7167_v12  ;;  %v7174_v18 = vld [vmem:[%s13404_s7 + $0x68] sm:$0xff]  }
 0x7a1   :  { %v5473_v59 = vpop.f32.mrf.mxu1 }
 0x7a2   :  { %v5508_v39 = vmax.f32 %v5472_v14, 0.0  ;;  %v7024_v14 = vunpack.c.l.bf16 %v7175_v21  ;;  %v7166_v59 = vld [vmem:[%s13404_s7 + $0x28] sm:$0xff]  }
 0x7a3   :  { %v5476_v52 = vpop.f32.mrf.mxu1  ;;  %v6988_v63 = vunpack.c.l.bf16 %v7166_v59 }
 0x7a4   :  { %v13111_v19 = vmax.f32 %v13041_v3, %v5508_v39  ;;  %v5477_v33 = vadd.f32 %v5476_v52, %v5362_v36  ;;  %8813 = vrot.lane.b32.xlu0 %v8807_v57, %s8976_s17  ;;  %v7021_v39 = vunpack.c.h.bf16 %v7174_v18  ;;  %v6989_v36 = vunpack.c.h.bf16 %v7166_v59  ;;  %v7173_v52 = vld [vmem:[%s13404_s7 + $0x60] sm:$0xff]  }
 0x7a5   :  { %v5478_v1 = vpop.f32.mrf.mxu1 }
 0x7a6   :  { %v8817_v8 = vpack.i.bf16 %v13111_v19, %v13108_v54  ;;  %v5509_v13 = vmax.f32 %v5477_v33, 0.0  ;;  %v7020_v33 = vunpack.c.l.bf16 %v7174_v18  ;;  %v7165_v1 = vld [vmem:[%s13404_s7 + $0x20] sm:$0xff]  }
 0x7a7   :  { %v5481_v61 = vpop.f32.mrf.mxu1 }
 0x7a8   :  { %v5482_v22 = vadd.f32 %v5481_v61, %v5367_v23  ;;  %8818 = vrot.lane.b32.xlu1 %v8817_v8, %s8975_s4  ;;  %v13124_v40 = vmax.f32 %v13047_v48, %v5509_v13  ;;  %v7017_v23 = vunpack.c.h.bf16 %v7173_v52  ;;  %v7172_v61 = vld [vmem:[%s13404_s7 + $0x58] sm:$0xff]   ;;  %v7016_v13 = vunpack.c.l.bf16 %v7173_v52 }
 0x7a9   :  { %v5483_v3 = vpop.f32.mrf.mxu1  ;;  %v7013_v0 = vunpack.c.h.bf16 %v7172_v61 }
 0x7aa   :  { %v5510_v10 = vmax.f32 %v5482_v22, 0.0  ;;  %v7164_v22 = vld [vmem:[%s13404_s7 + $0x18] sm:$0xff]   ;;  %v6984_v3 = vunpack.c.l.bf16 %v7165_v1 }
 0x7ab   :  { %v5486_v51 = vpop.f32.mrf.mxu1 }
 0x7ac   :  { %v13127_v17 = vmax.f32 %v13053_v25, %v5510_v10  ;;  %v5487_v50 = vadd.f32 %v5486_v51, %v5372_v15  ;;  %8838 = vrot.lane.b32.xlu1 %v8807_v57, %s8977_s18  ;;  %v6981_v10 = vunpack.c.h.bf16 %v7164_v22  ;;  %v7171_v15 = vld [vmem:[%s13404_s7 + $0x50] sm:$0xff]   ;;  %v7012_v51 = vunpack.c.l.bf16 %v7172_v61 }
 0x7ad   :  { %v5488_v29 = vpop.f32.mrf.mxu1 }
 0x7ae   :  { %v8822_v2 = vpack.i.bf16 %v13127_v17, %v13124_v40  ;;  %v5511_v31 = vmax.f32 %v5487_v50, 0.0  ;;  %v7163_v50 = vld [vmem:[%s13404_s7 + $0x10] sm:$0xff]   ;;  %v6980_v29 = vunpack.c.l.bf16 %v7164_v22 }
 0x7af   :  { %v5491_v55 = vpop.f32.mrf.mxu1 }
 0x7b0   :  { %v5492_v37 = vadd.f32 %v5491_v55, %v5377_v60  ;;  %8848 = vrot.lane.b32.xlu1 %v8817_v8, %s8977_s18  ;;  %8823 = vrot.lane.b32.xlu0 %v8822_v2, %s8975_s4  ;;  %v13138_v38 = vmax.f32 %v13060_v27, %v5511_v31  ;;  %v6977_v55 = vunpack.c.h.bf16 %v7163_v50  ;;  %v7170_v31 = vld [vmem:[%s13404_s7 + $0x48] sm:$0xff]  }
 0x7b1   :  { %v5493_v48 = vpop.f32.mrf.mxu1 }
 0x7b2   :  { %v5512_v25 = vmax.f32 %v5492_v37, 0.0  ;;  %v7008_v48 = vunpack.c.l.bf16 %v7171_v15 }
 0x7b3   :  { %v5496_v24 = vpop.f32.mrf.mxu1 }
 0x7b4   :  { %v13141_v4 = vmax.f32 %v13067_v41, %v5512_v25  ;;  %8858 = vrot.lane.b32.xlu1 %v8807_v57, %s8978_s19  ;;  %v5497_v46 = vadd.f32 %v5496_v24, %v5382_v35  ;;  %v7025_v57 = vunpack.c.h.bf16 %v7175_v21  ;;  %v7162_v25 = vld [vmem:[%s13404_s7 + $0x8] sm:$0xff]   ;;  %v6976_v24 = vunpack.c.l.bf16 %v7163_v50 }
 0x7b5   :  { %v5498_v30 = vpop.f32.mrf.mxu1  ;;  %v6973_v26 = vunpack.c.h.bf16 %v7162_v25 }
 0x7b6   :  { %v8827_v7 = vpack.i.bf16 %v13141_v4, %v13138_v38  ;;  %v5513_v49 = vmax.f32 %v5497_v46, 0.0  ;;  %v7005_v30 = vunpack.c.h.bf16 %v7170_v31 }
 0x7b7   :  { %v5501_v44 = vpop.f32.mrf.mxu1 }
 0x7b8   :  { %8868 = vrot.lane.b32.xlu1 %v8822_v2, %s8978_s19  ;;  %8828 = vrot.lane.b32.xlu0 %v8827_v7, %s8976_s17  ;;  %v5502_v41 = vadd.f32 %v5501_v44, %v5387_v16  ;;  %v13158_v42 = vmax.f32 %v13076_v6, %v5513_v49  ;;  %v7176_v6 = vld [vmem:[%s13404_s7 + $0x78] sm:$0xff]   ;;  %v7004_v44 = vunpack.c.l.bf16 %v7170_v31  ;;  %v6967_v16 = vld [vmem:[%s13404_s7] sm:$0xff]  }
 0x7b9   :  { %v5503_v27 = vpop.f32.mrf.mxu1  ;;  %v7029_v28 = vunpack.c.h.bf16 %v7176_v6  ;;  %v7028_v32 = vunpack.c.l.bf16 %v7176_v6 }
 0x7ba   :  { %v5514_v62 = vmax.f32 %v5502_v41, 0.0  ;;  %v6972_v27 = vunpack.c.l.bf16 %v7162_v25 }
 0x7bb   :  { %8076 = vmatprep.subr.mxu0 %v7029_v28 }
 0x7bc   :  { %8873 = vrot.lane.b32.xlu1 %v8827_v7, %s8975_s4  ;;  %8833 = vrot.lane.b32.xlu0 %v8817_v8, %s8976_s17  ;;  %v13155_v56 = vmax.f32 %v13083_v53, %v5514_v62  ;;  %v7168_v53 = vld [vmem:[%s13404_s7 + $0x38] sm:$0xff]   ;;  %v6969_v62 = vunpack.c.h.bf16 %v6967_v16 }
 0x7bd   :  { %v6997_v5 = vunpack.c.h.bf16 %v7168_v53  ;;  %v6996_v9 = vunpack.c.l.bf16 %v7168_v53 }
 0x7be   :  { %v8887_v20 = vpack.i.bf16 %v13155_v56, %v13158_v42 }
 0x7bf   :  { %8077 = vmatpush3.msra.mxu0 %v6997_v5 }
 0x7c0   :  { %8878 = vrot.lane.b32.xlu1 %v8827_v7, %s8977_s18  ;;  %8843 = vrot.lane.b32.xlu0 %v8822_v2, %s8976_s17 }
 0x7c1   :  { %8078 = vmatprep.subr.mxu0 %v7028_v32 }
 0x7c2   :  { %8079 = vmatpush3.msra.mxu0 %v6996_v9 }
 0x7c3   :  { %8080 = vmatprep.subr.mxu0 %v7025_v57 }
 0x7c4   :  { %8883 = vrot.lane.b32.xlu1 %v8827_v7, %s8978_s19  ;;  %8853 = vrot.lane.b32.xlu0 %v8822_v2, %s8977_s18  ;;  %v7009_v2 = vunpack.c.h.bf16 %v7171_v15  ;;  %v7169_v7 = vld [vmem:[%s13404_s7 + $0x40] sm:$0xff]  }
 0x7c5   :  { %8081 = vmatpush3.msra.mxu0 %v6993_v58  ;;  %v7001_v46 = vunpack.c.h.bf16 %v7169_v7  ;;  %v7000_v18 = vunpack.c.l.bf16 %v7169_v7 }
 0x7c6   :  { %8082 = vmatprep.subr.mxu0 %v7024_v14  ;;  %v6968_v14 = vunpack.c.l.bf16 %v6967_v16 }
 0x7c7   :  { %8083 = vmatpush3.msra.mxu0 %v6992_v47 }
 0x7c8   :  { %8888 = vrot.lane.b32.xlu1 %v8887_v20, %s8976_s17  ;;  %8863 = vrot.lane.b32.xlu0 %v8817_v8, %s8978_s19  ;;  %v6985_v8 = vunpack.c.h.bf16 %v7165_v1 }
 0x7c9   :  { %8084 = vmatprep.subr.mxu0 %v7021_v39 }
 0x7ca   :  { %8085 = vmatpush3.msra.mxu0 %v6989_v36 }
 0x7cb   :  { %8086 = vmatprep.subr.mxu0 %v7020_v33 }
 0x7cc   :  { %8893 = vrot.lane.b32.xlu1 %v8887_v20, %s8975_s4  ;;  %5641 = vrot.lane.b32.xlu0 %v13158_v42, %s8978_s19 }
 0x7cd   :  { %8087 = vmatpush3.msra.mxu0 %v6988_v63 }
 0x7ce   :  { %8088 = vmatprep.subr.mxu0 %v7017_v23 }
 0x7cf   :  { %8089 = vmatpush3.msra.mxu0 %v6985_v8 }
 0x7d0   :  { %8898 = vrot.lane.b32.xlu0 %v8887_v20, %s8977_s18  ;;  %8090 = vmatprep.subr.mxu0 %v7016_v13 }
 0x7d1   :  { %8091 = vmatpush3.msra.mxu0 %v6984_v3 }
 0x7d2   :  { %8092 = vmatprep.subr.mxu0 %v7013_v0 }
 0x7d3   :  { %8093 = vmatpush3.msra.mxu0 %v6981_v10 }
 0x7d4   :  { %5643 = vrot.lane.b32.xlu0 %v13155_v56, %s8978_s19  ;;  %8094 = vmatprep.subr.mxu0 %v7012_v51 }
 0x7d5   :  { %8095 = vmatpush3.msra.mxu0 %v6980_v29 }
 0x7d6   :  { %8096 = vmatprep.subr.mxu0 %v7009_v2 }
 0x7d7   :  { %8097 = vmatpush3.msra.mxu0 %v6977_v55 }
 0x7d8   :  { %8098 = vmatprep.subr.mxu0 %v7008_v48 }
 0x7d9   :  { %8099 = vmatpush3.msra.mxu0 %v6976_v24 }
 0x7da   :  { %8100 = vmatprep.subr.mxu0 %v7005_v30 }
 0x7db   :  { %8101 = vmatpush3.msra.mxu0 %v6973_v26 }
 0x7dc   :  { %8102 = vmatprep.subr.mxu0 %v7004_v44 }
 0x7dd   :  { %8103 = vmatpush3.msra.mxu0 %v6972_v27 }
 0x7de   :  { %8104 = vmatprep.subr.mxu0 %v7001_v46 }
 0x7df   :  { %8105 = vmatpush3.msra.mxu0 %v6969_v62 }
 0x7e0   :  { %8106 = vmatprep.subr.mxu0 %v7000_v18 }
 0x7e1   :  { %8107 = vmatpush3.msra.mxu0 %v6968_v14 }
 0x7e2   :  { %5964 = vmatprep.subr.mxu0 %v14076_v34 }
 0x812   :  { %v13209_v37 = vpop.permute.xlu0 %8808 }
 0x813   :  { %v8810_v1 = vunpack.i.l.bf16 %v13209_v37  ;;  %v8811_v8 = vunpack.i.h.bf16 %v13209_v37 }
 0x815   :  { %v8910_v61 = vpack.i.bf16 %v13124_v40, %v8810_v1  ;;  %v8912_v22 = vpack.i.bf16 %v13127_v17, %v8811_v8 }
 0x816   :  { %v13222_v35 = vpop.permute.xlu0 %8813 }
 0x817   :  { %v8815_v55 = vunpack.i.l.bf16 %v13222_v35  ;;  %v8816_v25 = vunpack.i.h.bf16 %v13222_v35 }
 0x81a   :  { %v13204_v60 = vpop.permute.xlu1 %8818 }
 0x81b   :  { %v8821_v0 = vunpack.i.h.bf16 %v13204_v60 }
 0x81d   :  { %v8916_v15 = vpack.i.bf16 %v13141_v4, %v8821_v0 }
 0x81e   :  { %v13214_v45 = vpop.permute.xlu1 %8838 }
 0x81f   :  { %v8840_v46 = vunpack.i.l.bf16 %v13214_v45 }
 0x822   :  { %v8849_v41 = vpop.permute.xlu1 %8848  ;;  %v8824_v49 = vpop.permute.xlu0 %8823 }
 0x823   :  { %v8850_v3 = vunpack.i.l.bf16 %v8849_v41  ;;  %v8851_v10 = vunpack.i.h.bf16 %v8849_v41  ;;  %v8825_v40 = vunpack.i.l.bf16 %v8824_v49  ;;  %v8826_v50 = vunpack.i.h.bf16 %v8824_v49 }
 0x825   :  { %v8918_v17 = vpack.i.bf16 %v13158_v42, %v8825_v40  ;;  %v8920_v2 = vpack.i.bf16 %v13155_v56, %v8826_v50 }
 0x826   :  { %v13224_v20 = vpop.permute.xlu1 %8858 }
 0x827   :  { %v8860_v27 = vunpack.i.l.bf16 %v13224_v20  ;;  %v8861_v62 = vunpack.i.h.bf16 %v13224_v20 }
 0x82a   :  { %v13226_v6 = vpop.permute.xlu1 %8868  ;;  %v8829_v53 = vpop.permute.xlu0 %8828 }
 0x82b   :  { %v8830_v21 = vunpack.i.l.bf16 %v8829_v53  ;;  %v8831_v28 = vunpack.i.h.bf16 %v8829_v53  ;;  %v8871_v20 = vunpack.i.h.bf16 %v13226_v6 }
 0x82d   :  { %v8902_v5 = vpack.i.bf16 %v13093_v43, %v8830_v21  ;;  %v8904_v9 = vpack.i.bf16 %v13096_v11, %v8831_v28  ;;  %v8841_v21 = vunpack.i.h.bf16 %v13214_v45 }
 0x82e   :  { %v13229_v32 = vpop.permute.xlu1 %8873  ;;  %v13231_v12 = vpop.permute.xlu0 %8833 }
 0x82f   :  { %8903 = vxpose.xlu1.b32.start [1/16] (narrow) %v8902_v5, 8  ;;  %v8876_v4 = vunpack.i.h.bf16 %v13229_v32  ;;  %v8835_v56 = vunpack.i.l.bf16 %v13231_v12  ;;  %v8836_v16 = vunpack.i.h.bf16 %v13231_v12  ;;  %v8870_v12 = vunpack.i.l.bf16 %v13226_v6 }
 0x831   :  { %v8924_v42 = vpack.i.bf16 %v8816_v25, %v8876_v4  ;;  %v7190_v4 = vld [vmem:[%s13406_s9 + $0x28] sm:$0xff]   ;;  %v7189_v25 = vld [vmem:[%s13406_s9 + $0x20] sm:$0xff]  }
 0x832   :  { %v8879_v57 = vpop.permute.xlu1 %8878  ;;  %v13234_v58 = vpop.permute.xlu0 %8843 }
 0x833   :  { %8905 = vxpose.xlu1.b32.cont [2/16] (narrow) %v8904_v9, 8  ;;  %v8881_v37 = vunpack.i.h.bf16 %v8879_v57  ;;  %v8845_v35 = vunpack.i.l.bf16 %v13234_v58  ;;  %v8846_v49 = vunpack.i.h.bf16 %v13234_v58 }
 0x835   :  { %v8930_v53 = vpack.i.bf16 %v8845_v35, %v8840_v46  ;;  %v8932_v28 = vpack.i.bf16 %v8846_v49, %v8841_v21  ;;  %v6157_v21 = vld [vmem:[%s13408_s11 + $0x28] sm:$0x3] }
 0x836   :  { %v13236_v59 = vpop.permute.xlu1 %8883  ;;  %v8854_v47 = vpop.permute.xlu0 %8853 }
 0x837   :  { %v8855_v51 = vunpack.i.l.bf16 %v8854_v47  ;;  %v8856_v29 = vunpack.i.h.bf16 %v8854_v47  ;;  %v8885_v9 = vunpack.i.l.bf16 %v13236_v59  ;;  %v8886_v45 = vunpack.i.h.bf16 %v13236_v59  ;;  %v7182_v59 = vld [vmem:[%s13404_s7 + $0xa8] sm:$0xff]  }
 0x83a   :  { %v8889_v43 = vpop.permute.xlu1 %8888  ;;  %v13239_v39 = vpop.permute.xlu0 %8863 }
 0x83b   :  { %v8890_v36 = vunpack.i.l.bf16 %v8889_v43  ;;  %v8891_v52 = vunpack.i.h.bf16 %v8889_v43  ;;  %v8865_v5 = vunpack.i.l.bf16 %v13239_v39  ;;  %v7183_v43 = vld [vmem:[%s13404_s7 + $0xb0] sm:$0xff]  }
 0x83d   :  { %v8906_v11 = vpack.i.bf16 %v13108_v54, %v8890_v36  ;;  %v8908_v63 = vpack.i.bf16 %v13111_v19, %v8891_v52  ;;  %v8820_v54 = vunpack.i.l.bf16 %v13204_v60  ;;  %v8875_v60 = vunpack.i.l.bf16 %v13229_v32 }
 0x83e   :  { %v5642_v33 = vpop.permute.xlu0 %5641  ;;  %v8894_v48 = vpop.permute.xlu1 %8893  ;;  %v8866_v32 = vunpack.i.h.bf16 %v13239_v39  ;;  %v7057_v39 = vunpack.c.h.bf16 %v7183_v43  ;;  %v7056_v36 = vunpack.c.l.bf16 %v7183_v43  ;;  %v7053_v52 = vunpack.c.h.bf16 %v7182_v59 }
 0x83f   :  { %5858 = vxpose.xlu0.b32.start [1/2] (short) (narrow) %v5642_v33, 8  ;;  %8907 = vxpose.xlu1.b32.cont [3/16] (narrow) %v8906_v11, 8  ;;  %v8914_v19 = vpack.i.bf16 %v13138_v38, %v8820_v54  ;;  %v8880_v38 = vunpack.i.l.bf16 %v8879_v57  ;;  %v8922_v31 = vpack.i.bf16 %v8815_v55, %v8875_v60  ;;  %v8895_v24 = vunpack.i.l.bf16 %v8894_v48  ;;  %v7184_v57 = vld [vmem:[%s13404_s7 + $0xb8] sm:$0xff]   ;;  %v7181_v11 = vld [vmem:[%s13404_s7 + $0xa0] sm:$0xff]   ;;  %v7191_v55 = vld [vmem:[%s13406_s9 + $0x30] sm:$0xff]  }
 0x840   :  { %v8896_v26 = vunpack.i.h.bf16 %v8894_v48  ;;  %v7061_v18 = vunpack.c.h.bf16 %v7184_v57  ;;  %v7060_v6 = vunpack.c.l.bf16 %v7184_v57  ;;  %v7052_v33 = vunpack.c.l.bf16 %v7182_v59  ;;  %v6049_v60 = vld [vmem:[%s13406_s9 + $0x38] sm:$0xf]  ;;  %v6759_v59 = vld [vmem:[%s13405_s8] ss:$0 sm:$0xff] }
 0x841   :  { %v8926_v7 = vpack.i.bf16 %v8835_v56, %v8895_v24  ;;  %v7048_v8 = vunpack.c.l.bf16 %v7181_v11  ;;  %v7089_v48 = vunpack.c.h.bf16 %v7190_v4  ;;  %v7085_v24 = vunpack.c.h.bf16 %v7189_v25 }
 0x842   :  { %v8899_v23 = vpop.permute.xlu0 %8898  ;;  %v8928_v41 = vpack.i.bf16 %v8836_v16, %v8896_v26  ;;  %v7084_v56 = vunpack.c.l.bf16 %v7189_v25 }
 0x843   :  { %8909 = vxpose.xlu1.b32.cont [4/16] (narrow) %v8908_v63, 8  ;;  %v8900_v30 = vunpack.i.l.bf16 %v8899_v23  ;;  %v8901_v44 = vunpack.i.h.bf16 %v8899_v23  ;;  %v7049_v63 = vunpack.c.h.bf16 %v7181_v11  ;;  %v7180_v23 = vld [vmem:[%s13404_s7 + $0x98] sm:$0xff]  }
 0x846   :  { %v5644_v13 = vpop.permute.xlu0 %5643 }
 0x847   :  { %5859 = vxpose.xlu0.b32.end [2/2] (short) (narrow) %v5644_v13, 8  ;;  %8911 = vxpose.xlu1.b32.cont [5/16] (narrow) %v8910_v61, 8  ;;  %v7045_v61 = vunpack.c.h.bf16 %v7180_v23  ;;  %v7179_v13 = vld [vmem:[%s13404_s7 + $0x90] sm:$0xff]  }
 0x848   :  { %v7041_v54 = vunpack.c.h.bf16 %v7179_v13  ;;  %v7040_v0 = vunpack.c.l.bf16 %v7179_v13  ;;  %v6761_v13 = vld [vmem:[%s13407_s10] ss:$0 sm:$0xff] }
 0x84b   :  { %5826 = vxpose.xlu0.b32.start [1/16] (narrow) %v8850_v3, 8  ;;  %8913 = vxpose.xlu1.b32.cont [6/16] (narrow) %v8912_v22, 8  ;;  %v7044_v22 = vunpack.c.l.bf16 %v7180_v23  ;;  %v7178_v3 = vld [vmem:[%s13404_s7 + $0x88] sm:$0xff]   ;;  %v7095_v23 = vld [vmem:[%s13408_s11] sm:$0xff]  }
 0x84f   :  { %5827 = vxpose.xlu0.b32.cont [2/16] (narrow) %v8851_v10, 8  ;;  %8915 = vxpose.xlu1.b32.cont [7/16] (narrow) %v8914_v19, 8  ;;  %v7037_v19 = vunpack.c.h.bf16 %v7178_v3  ;;  %v7177_v10 = vld [vmem:[%s13404_s7 + $0x80] sm:$0xff]  }
 0x850   :  { %v7033_v40 = vunpack.c.h.bf16 %v7177_v10  ;;  %v7032_v50 = vunpack.c.l.bf16 %v7177_v10 }
 0x853   :  { %5828 = vxpose.xlu0.b32.cont [3/16] (narrow) %v8855_v51, 8  ;;  %8917 = vxpose.xlu1.b32.cont [8/16] (narrow) %v8916_v15, 8  ;;  %v7036_v15 = vunpack.c.l.bf16 %v7178_v3  ;;  %v7185_v51 = vld [vmem:[%s13404_s7 + $0xc0] sm:$0xff]  }
 0x857   :  { %5829 = vxpose.xlu0.b32.cont [4/16] (narrow) %v8856_v29, 8  ;;  %8919 = vxpose.xlu1.b32.cont [9/16] (narrow) %v8918_v17, 8  ;;  %v7065_v17 = vunpack.c.h.bf16 %v7185_v51  ;;  %v7064_v29 = vunpack.c.l.bf16 %v7185_v51 }
 0x85b   :  { %5830 = vxpose.xlu0.b32.cont [5/16] (narrow) %v8880_v38, 8  ;;  %8921 = vxpose.xlu1.b32.cont [10/16] (narrow) %v8920_v2, 8  ;;  %v6064_v38 = vunpack.c.l.bf16 %v6049_v60 }
 0x85d   :  { %8740 = vmatpush3.msra.mxu1 %v6064_v38 }
 0x85e   :  { %8741 = vmatprep.subr.mxu1 %v14076_v34 }
 0x85f   :  { %5831 = vxpose.xlu0.b32.cont [6/16] (narrow) %v8881_v37, 8  ;;  %8923 = vxpose.xlu1.b32.cont [11/16] (narrow) %v8922_v31, 8  ;;  %v7093_v31 = vunpack.c.h.bf16 %v7191_v55  ;;  %v7092_v37 = vunpack.c.l.bf16 %v7191_v55 }
 0x861   :  { %8742 = vmatpush3.msra.mxu1 %v7093_v31 }
 0x862   :  { %8743 = vmatprep.subr.mxu1 %v14076_v34 }
 0x863   :  { %5832 = vxpose.xlu0.b32.cont [7/16] (narrow) %v8900_v30, 8  ;;  %8925 = vxpose.xlu1.b32.cont [12/16] (narrow) %v8924_v42, 8  ;;  %v7088_v42 = vunpack.c.l.bf16 %v7190_v4  ;;  %v7188_v30 = vld [vmem:[%s13406_s9 + $0x18] sm:$0xff]  }
 0x864   :  { %8744 = vmatpush3.msra.mxu1 %v7092_v37  ;;  %v7081_v26 = vunpack.c.h.bf16 %v7188_v30 }
 0x865   :  { %8745 = vmatprep.subr.mxu1 %v14076_v34 }
 0x866   :  { %8746 = vmatpush3.msra.mxu1 %v7089_v48 }
 0x867   :  { %5833 = vxpose.xlu0.b32.cont [8/16] (narrow) %v8901_v44, 8  ;;  %8927 = vxpose.xlu1.b32.cont [13/16] (narrow) %v8926_v7, 8  ;;  %v7187_v7 = vld [vmem:[%s13406_s9 + $0x10] sm:$0xff]   ;;  %v7080_v44 = vunpack.c.l.bf16 %v7188_v30 }
 0x868   :  { %8747 = vmatprep.subr.mxu1 %v14076_v34  ;;  %v7077_v16 = vunpack.c.h.bf16 %v7187_v7  ;;  %v7076_v35 = vunpack.c.l.bf16 %v7187_v7 }
 0x869   :  { %8748 = vmatpush3.msra.mxu1 %v7088_v42 }
 0x86a   :  { %8749 = vmatprep.subr.mxu1 %v14076_v34 }
 0x86b   :  { %5834 = vxpose.xlu0.b32.cont [9/16] (narrow) %v8860_v27, 8  ;;  %8929 = vxpose.xlu1.b32.cont [14/16] (narrow) %v8928_v41, 8  ;;  %v7186_v27 = vld [vmem:[%s13406_s9 + $0x8] sm:$0xff]  }
 0x86c   :  { %8750 = vmatpush3.msra.mxu1 %v7085_v24  ;;  %v7073_v41 = vunpack.c.h.bf16 %v7186_v27  ;;  %v7072_v46 = vunpack.c.l.bf16 %v7186_v27 }
 0x86d   :  { %8751 = vmatprep.subr.mxu1 %v14076_v34 }
 0x86e   :  { %8752 = vmatpush3.msra.mxu1 %v7084_v56 }
 0x86f   :  { %5835 = vxpose.xlu0.b32.cont [10/16] (narrow) %v8861_v62, 8  ;;  %8931 = vxpose.xlu1.b32.cont [15/16] (narrow) %v8930_v53, 8  ;;  %v7067_v62 = vld [vmem:[%s13406_s9] sm:$0xff]  }
 0x870   :  { %8753 = vmatprep.subr.mxu1 %v14076_v34  ;;  %v7069_v49 = vunpack.c.h.bf16 %v7067_v62  ;;  %v7068_v53 = vunpack.c.l.bf16 %v7067_v62 }
 0x871   :  { %8754 = vmatpush3.msra.mxu1 %v7081_v26 }
 0x872   :  { %8755 = vmatprep.subr.mxu1 %v14076_v34 }
 0x873   :  { %5836 = vxpose.xlu0.b32.cont [11/16] (narrow) %v8865_v5, 8  ;;  %8933 = vxpose.xlu1.b32.end [16/16] (narrow) %v8932_v28, 8  ;;  %v7195_v28 = vld [vmem:[%s13408_s11 + $0x20] sm:$0xff]   ;;  %v6168_v5 = vunpack.c.l.bf16 %v6157_v21 }
 0x874   :  { %8756 = vmatpush3.msra.mxu1 %v7080_v44 }
 0x875   :  { %8757 = vmatprep.subr.mxu1 %v14076_v34 }
 0x876   :  { %8758 = vmatpush3.msra.mxu1 %v7077_v16 }
 0x877   :  { %5837 = vxpose.xlu0.b32.cont [12/16] (narrow) %v8866_v32, 8  ;;  %8759 = vmatprep.subr.mxu1 %v14076_v34  ;;  %v7113_v32 = vunpack.c.h.bf16 %v7195_v28 }
 0x878   :  { %8760 = vmatpush3.msra.mxu1 %v7076_v35 }
 0x879   :  { %8761 = vmatprep.subr.mxu1 %v14076_v34 }
 0x87a   :  { %8762 = vmatpush3.msra.mxu1 %v7073_v41 }
 0x87b   :  { %5838 = vxpose.xlu0.b32.cont [13/16] (narrow) %v8870_v12, 8  ;;  %8763 = vmatprep.subr.mxu1 %v14076_v34  ;;  %v7194_v12 = vld [vmem:[%s13408_s11 + $0x18] sm:$0xff]  }
 0x87c   :  { %8764 = vmatpush3.msra.mxu1 %v7072_v46  ;;  %v7108_v57 = vunpack.c.l.bf16 %v7194_v12 }
 0x87d   :  { %8765 = vmatprep.subr.mxu1 %v14076_v34 }
 0x87e   :  { %8766 = vmatpush3.msra.mxu1 %v7069_v49 }
 0x87f   :  { %5839 = vxpose.xlu0.b32.cont [14/16] (narrow) %v8871_v20, 8  ;;  %8767 = vmatprep.subr.mxu1 %v14076_v34  ;;  %v7112_v20 = vunpack.c.l.bf16 %v7195_v28 }
 0x880   :  { %8768 = vmatpush3.msra.mxu1 %v7068_v53 }
 0x883   :  { %5840 = vxpose.xlu0.b32.cont [15/16] (narrow) %v8885_v9, 8  ;;  %v7109_v9 = vunpack.c.h.bf16 %v7194_v12 }
 0x887   :  { %5841 = vxpose.xlu0.b32.end [16/16] (narrow) %v8886_v45, 8  ;;  %v7193_v45 = vld [vmem:[%s13408_s11 + $0x10] sm:$0xff]  }
 0x8b3   :  { %v8934_v58 = vpop.trf.xlu1 }
 0x8b4   :  { %v8938_v14 = vunpack.i.h.bf16 %v8934_v58  ;;  %v8935_v47 = vunpack.i.l.bf16 %v8934_v58  ;;  %v7105_v58 = vunpack.c.h.bf16 %v7193_v45 }
 0x8b6   :  { %5958 = vmatprep.mubr.f32.mxu0 %v8935_v47 }
 0x8b7   :  { %5959 = vmatmul.mubr.f32.vlgmr.msra.gmra.mxu0 %v8938_v14  ;;  %v7104_v14 = vunpack.c.l.bf16 %v7193_v45 }
 0x8b8   :  { %5965 = vmatpush1.msra.mxu0 %v7061_v18  ;;  %v7192_v18 = vld [vmem:[%s13408_s11 + $0x8] sm:$0xff]  }
 0x8b9   :  { %5966 = vmatprep.subr.mxu0 %v14076_v34  ;;  %v7101_v47 = vunpack.c.h.bf16 %v7192_v18 }
 0x8ba   :  { %5967 = vmatpush1.msra.mxu0 %v7060_v6 }
 0x8bb   :  { %5968 = vmatprep.subr.mxu0 %v14076_v34 }
 0x8bc   :  { %5969 = vmatpush1.msra.mxu0 %v7057_v39 }
 0x8bd   :  { %5970 = vmatprep.subr.mxu0 %v14076_v34 }
 0x8be   :  { %5971 = vmatpush1.msra.mxu0 %v7056_v36 }
 0x8bf   :  { %5972 = vmatprep.subr.mxu0 %v14076_v34  ;;  %v5874_v1 = vpop.trf.xlu0 }
 0x8c0   :  { %5973 = vmatpush1.msra.mxu0 %v7053_v52  ;;  %6760 = vmatprep.mubr.msk.f32.mxu0 %vm5890_vm4, %v5874_v1 }
 0x8c1   :  { %5974 = vmatprep.subr.mxu0 %v14076_v34 }
 0x8c2   :  { %5975 = vmatpush1.msra.mxu0 %v7052_v33 }
 0x8c3   :  { %5976 = vmatprep.subr.mxu0 %v14076_v34 }
 0x8c4   :  { %5977 = vmatpush1.msra.mxu0 %v7049_v63  ;;  %v7100_v63 = vunpack.c.l.bf16 %v7192_v18 }
 0x8c5   :  { %5978 = vmatprep.subr.mxu0 %v14076_v34 }
 0x8c6   :  { %5979 = vmatpush1.msra.mxu0 %v7048_v8  ;;  %v7097_v8 = vunpack.c.h.bf16 %v7095_v23 }
 0x8c7   :  { %5980 = vmatprep.subr.mxu0 %v14076_v34  ;;  %v5842_v2 = vpop.trf.xlu0 }
 0x8c8   :  { %5981 = vmatpush1.msra.mxu0 %v7045_v61  ;;  %v7096_v61 = vunpack.c.l.bf16 %v7095_v23 }
 0x8c9   :  { %5982 = vmatprep.subr.mxu0 %v14076_v34 }
 0x8ca   :  { %5983 = vmatpush1.msra.mxu0 %v7044_v22 }
 0x8cb   :  { %5984 = vmatprep.subr.mxu0 %v14076_v34 }
 0x8cc   :  { %5985 = vmatpush1.msra.mxu0 %v7041_v54 }
 0x8cd   :  { %5986 = vmatprep.subr.mxu0 %v14076_v34 }
 0x8ce   :  { %5987 = vmatpush1.msra.mxu0 %v7040_v0 }
 0x8cf   :  { %5988 = vmatprep.subr.mxu0 %v14076_v34 }
 0x8d0   :  { %5989 = vmatpush1.msra.mxu0 %v7037_v19  ;;  %v6763_v19 = vld [vmem:[%s13409_s12] ss:$0 sm:$0xff] }
 0x8d1   :  { %5990 = vmatprep.subr.mxu0 %v14076_v34 }
 0x8d2   :  { %5991 = vmatpush1.msra.mxu0 %v7036_v15 }
 0x8d3   :  { %5992 = vmatprep.subr.mxu0 %v14076_v34 }
 0x8d4   :  { %5993 = vmatpush1.msra.mxu0 %v7033_v40 }
 0x8d5   :  { %5994 = vmatprep.subr.mxu0 %v14076_v34 }
 0x8d6   :  { %5995 = vmatpush1.msra.mxu0 %v7032_v50 }
 0x8d7   :  { %6024 = vmatprep.subr.mxu0 %v14076_v34 }
 0x8d8   :  { %6025 = vmatpush2.msra.mxu0 %v7065_v17 }
 0x8d9   :  { %6026 = vmatprep.subr.mxu0 %v14076_v34 }
 0x8da   :  { %6027 = vmatpush2.msra.mxu0 %v7064_v29 }
 0x8db   :  { %6029 = vmatmul.mubr.f32.vlgmr.msra.gmra.mxu0 %v5842_v2  ;;  %8772 = vmatprep.subr.mxu0 %v14076_v34 }
 0x8dc   :  { %8794 = vmatprep.mubr.msk.f32.mxu0 %vm8979_vm5, %v14076_v34  ;;  %8773 = vmatpush3.msk.msra.mxu0 %vm2942_vm2, %v6168_v5 }
 0x8dd   :  { %8774 = vmatprep.subr.mxu0 %v14076_v34 }
 0x8de   :  { %8775 = vmatpush3.msra.mxu0 %v7113_v32 }
 0x8df   :  { %8776 = vmatprep.subr.mxu0 %v14076_v34 }
 0x8e0   :  { %8777 = vmatpush3.msra.mxu0 %v7112_v20 }
 0x8e1   :  { %8778 = vmatprep.subr.mxu0 %v14076_v34 }
 0x8e2   :  { %8779 = vmatpush3.msra.mxu0 %v7109_v9 }
 0x8e3   :  { %8780 = vmatprep.subr.mxu0 %v14076_v34 }
 0x8e4   :  { %8781 = vmatpush3.msra.mxu0 %v7108_v57 }
 0x8e5   :  { %8782 = vmatprep.subr.mxu0 %v14076_v34 }
 0x8e6   :  { %8783 = vmatpush3.msra.mxu0 %v7105_v58 }
 0x8e7   :  { %8784 = vmatprep.subr.mxu0 %v14076_v34 }
 0x8e8   :  { %8785 = vmatpush3.msra.mxu0 %v7104_v14 }
 0x8e9   :  { %8786 = vmatprep.subr.mxu0 %v14076_v34 }
 0x8ea   :  { %8787 = vmatpush3.msra.mxu0 %v7101_v47 }
 0x8eb   :  { %8788 = vmatprep.subr.mxu0 %v14076_v34 }
 0x8ec   :  { %8789 = vmatpush3.msra.mxu0 %v7100_v63 }
 0x8ed   :  { %8790 = vmatprep.subr.mxu0 %v14076_v34 }
 0x8ee   :  { %8791 = vmatpush3.msra.mxu0 %v7097_v8 }
 0x8ef   :  { %8792 = vmatprep.subr.mxu0 %v14076_v34 }
 0x8f0   :  { %8793 = vmatpush3.msra.mxu0 %v7096_v61 }
 0x977   :  { %v8108_v43 = vpop.f32.mrf.mxu0 }
 0x979   :  { %v8109_v6 = vpop.f32.mrf.mxu0 }
 0x97a   :  { %v8110_v39 = vadd.f32 %v8109_v6, %v8108_v43 }
 0x97c   :  { %v5961_v36 = vadd.f32 %v8110_v39, %v6759_v59 }
 0x99b   :  { %v6030_v52 = vpop.f32.mrf.mxu0 }
 0x99c   :  { %v6031_v11 = vadd.f32 %v6030_v52, %v5961_v36 }
 0x99d   :  { %v6032_v33 = vpop.f32.mrf.mxu0 }
 0x99e   :  { %v6034_v1 = vmax.f32 %v6031_v11, 0.0 }
 0x9a0   :  { %8770 = vmatmul.mubr.msk.f32.vlgmr.msra.gmra.mxu1 %vm6072_vm6, %v6034_v1 }
 0xa60   :  { %v6142_v22 = vpop.f32.mrf.mxu1 }
 0xa61   :  { %v6143_v54 = vadd.f32 %v6761_v13, %v6142_v22 }
 0xa62   :  { %v8771_v3 = vpop.f32.mrf.mxu1 }
 0xa63   :  { %v6146_v0 = vmax.f32 %v6143_v54, 0.0 }
 0xa65   :  { %8795 = vmatmul.mubr.msk.f32.vlgmr.msra.gmra.mxu0 %vm6176_vm7, %v6146_v0 }
 0xb25   :  { %v6249_v10 = vpop.f32.mrf.mxu0 }
 0xb26   :  { %v6250_v34 = vadd.f32 %v6763_v19, %v6249_v10 }
 0xb27   :  { %v8796_v15 = vpop.f32.mrf.mxu0 }
 0xb28   :  { %6254 = vst.msk [vmem:[#allocation2] sm:$0x3] %vm6253_vm8, %v6250_v34 }
 0xb29   :  { %8962 = shalt.err (!%p8959_p4)
}
 0xb2a   :  { %6264 = dma.vmem_to_hbm [thread:$0]  %s6262_s27, 32, %s13410_s13, [#allocation3]  }
 0xb2b   :  { %8971 = dma.done.wait [#allocation3], 32  }
 0xb2c   :  { %8972 = vsyncadd [#allocation3], 4294967264 }
 0xb2d   :  { %6268 = vsyncpa [#allocation3], 1 }

</bundles_post_ra>
